<compile_context>
chip_gen: v6e
topology: v6e:2x2x1
jax: 0.10.0
libtpu: 0.0.40
codegen_flags: <defaults>
</compile_context>

<pallas_src>
import functools

import jax
import jax.numpy as jnp
import numpy as np
from jax import lax
from jax.experimental import pallas as pl
from jax.experimental.pallas import tpu as pltpu


def _residual_block_kernel(xp_ref, idn_ref, w1_ref, b1_ref, w2_ref, b2_ref,
                           o_ref, s_ref, mid_ref, *, Nb, D, H, WC, res_scale):
    """Nb batch elements per grid step.

    xp_ref : (Nb, D+2, H+2, W*C) bf16  conv input, zero-padded in D and H
    idn_ref: (Nb, D*H, W*C)      f32   residual identity (lane-dense, unpadded)
    w1_ref : (9*W*C, W*C)        bf16  conv1 weights (kw folded into a band)
    b1_ref : (1, W*C)            f32   conv1 bias, tiled over w
    w2_ref : (9*W*C, W*C)        bf16  conv2 weights
    b2_ref : (1, W*C)            f32   conv2 bias
    o_ref  : (Nb, D*H, W*C)      f32   output
    s_ref  : (Nb*D*H, 9*W*C)     bf16  im2col slab scratch (reused by both convs)
    mid_ref: (Nb, D+2, H+2, W*C) bf16  padded intermediate scratch
    """
    DH = D * H
    M = Nb * DH

    # Re-zero ONLY the halo border of the persistent intermediate scratch.
    # Kept unconditional (not @pl.when(pid==0)) for multi-TensorCore safety;
    # the interior is fully overwritten below every step.
    mid_ref[:, 0:1, :, :] = jnp.zeros((Nb, 1, H + 2, WC), jnp.bfloat16)
    mid_ref[:, D + 1:D + 2, :, :] = jnp.zeros((Nb, 1, H + 2, WC), jnp.bfloat16)
    mid_ref[:, 1:D + 1, 0:1, :] = jnp.zeros((Nb, D, 1, WC), jnp.bfloat16)
    mid_ref[:, 1:D + 1, H + 1:H + 2, :] = jnp.zeros((Nb, D, 1, WC), jnp.bfloat16)

    xp = xp_ref[...]                                    # (Nb, D+2, H+2, WC) bf16

    # ---- conv1: build im2col slab over the 9 (kd, kh) taps — pure bf16 copies
    # (input pre-cast in the wrapper) — then one big MXU matmul.
    for j in range(9):
        kd, kh = j // 3, j % 3
        s_ref[:, j * WC:(j + 1) * WC] = (
            xp[:, kd:kd + D, kh:kh + H, :].reshape(M, WC))

    h1 = jnp.maximum(
        jnp.dot(s_ref[...], w1_ref[...], preferred_element_type=jnp.float32)
        + b1_ref[...], 0.0)                             # (M, WC) f32, bias+ReLU fused

    # Single f32->bf16 cast of the intermediate, stored into the padded scratch.
    mid_ref[:, 1:D + 1, 1:H + 1, :] = (
        h1.reshape(Nb, D, H, WC).astype(jnp.bfloat16))

    # ---- conv2: same folded-tap single matmul; slab build is pure bf16 copies.
    for j in range(9):
        kd, kh = j // 3, j % 3
        s_ref[:, j * WC:(j + 1) * WC] = (
            mid_ref[:, kd:kd + D, kh:kh + H, :].reshape(M, WC))

    conv2 = (jnp.dot(s_ref[...], w2_ref[...], preferred_element_type=jnp.float32)
             + b2_ref[...])                             # (M, WC) f32

    # ---- residual: identity + res_scale * conv2 (f32, lane-dense unmasked store)
    o_ref[...] = (idn_ref[...]
                  + res_scale * conv2.reshape(Nb, DH, WC)).astype(o_ref.dtype)


def _fold_conv_weight(w, W):
    """torch (Cout, Cin, 3, 3, 3) -> (9*W*Cin, W*Cout) block-banded matrix.

    Row index = ((kd*3 + kh)*W + w_in)*Cin + ci   (matches the im2col slab columns)
    Col index = w_out*Cout + co                   (matches the (w, c) lane packing)
    Entry     = w[co, ci, kd, kh, w_in - w_out + 1] when |w_in - w_out| <= 1 else 0;
    the missing bands at w = 0 / W-1 implement the zero padding along W.
    """
    wt = jnp.transpose(w, (2, 3, 4, 1, 0))               # (kd, kh, kw, Cin, Cout)
    Cin, Cout = wt.shape[3], wt.shape[4]
    w_in = jnp.arange(W)[:, None]
    w_out = jnp.arange(W)[None, :]
    band = ((w_in[None, :, :] - w_out[None, :, :]) ==
            (jnp.arange(3) - 1)[:, None, None]).astype(w.dtype)   # (kw, w_in, w_out)
    Bm = jnp.einsum('dhkio,kab->dhaibo', wt, band)       # (3, 3, W, Cin, W, Cout)
    return Bm.reshape(9 * W * Cin, W * Cout)


def residual_block_no_bn(x_ncdhw, w1, b1, w2, b2, res_scale=1.0, batch_block=4):
    """x_ncdhw: (N, C, D, H, W) f32; w*: torch (Cout, Cin, 3, 3, 3); b*: (Cout,)."""
    N, C, D, H, W = x_ncdhw.shape
    WC = W * C
    DH = D * H

    Nb = max(1, min(batch_block, N))
    Np = pl.cdiv(N, Nb) * Nb                             # pad batch to multiple of Nb

    # glue: NCDHW -> (N, D, H, W*C) with (w, c) packed into lanes
    x = jnp.transpose(x_ncdhw, (0, 2, 3, 4, 1)).reshape(N, D, H, WC)
    if Np != N:
        x = jnp.pad(x, ((0, Np - N), (0, 0), (0, 0), (0, 0)))
    # bf16 conv input, zero-padded in D and H (halves its per-step DMA)
    xp = jnp.pad(x, ((0, 0), (1, 1), (1, 1), (0, 0))).astype(jnp.bfloat16)
    # f32 lane-dense residual identity (separate block, no sublane-offset slice)
    idn = x.reshape(Np, DH, WC)

    # glue: fold kw into block-banded bf16 weights, tile biases over w
    w1f = _fold_conv_weight(w1, W).astype(jnp.bfloat16)
    w2f = _fold_conv_weight(w2, W).astype(jnp.bfloat16)
    b1r = jnp.tile(b1, W).reshape(1, WC).astype(jnp.float32)
    b2r = jnp.tile(b2, W).reshape(1, WC).astype(jnp.float32)

    kernel = functools.partial(_residual_block_kernel, Nb=Nb, D=D, H=H, WC=WC,
                               res_scale=float(res_scale))

    out = pl.pallas_call(
        kernel,
        out_shape=jax.ShapeDtypeStruct((Np, DH, WC), x_ncdhw.dtype),
        grid_spec=pltpu.PrefetchScalarGridSpec(
            num_scalar_prefetch=0,
            grid=(Np // Nb,),
            in_specs=[
                pl.BlockSpec((Nb, D + 2, H + 2, WC), lambda n: (n, 0, 0, 0)),
                pl.BlockSpec((Nb, DH, WC), lambda n: (n, 0, 0)),
                pl.BlockSpec((9 * WC, WC), lambda n: (0, 0)),
                pl.BlockSpec((1, WC), lambda n: (0, 0)),
                pl.BlockSpec((9 * WC, WC), lambda n: (0, 0)),
                pl.BlockSpec((1, WC), lambda n: (0, 0)),
            ],
            out_specs=pl.BlockSpec((Nb, DH, WC), lambda n: (n, 0, 0)),
            scratch_shapes=[
                pltpu.VMEM((Nb * DH, 9 * WC), jnp.bfloat16),       # im2col slab
                pltpu.VMEM((Nb, D + 2, H + 2, WC), jnp.bfloat16),  # padded mid
            ],
        ),
        compiler_params=pltpu.CompilerParams(
            dimension_semantics=("parallel",)),
    )(xp, idn, w1f, b1r, w2f, b2r)

    # glue: drop batch padding, back to NCDHW
    out = out[:N]
    return jnp.transpose(out.reshape(N, D, H, W, C), (0, 4, 1, 2, 3))


def _reference(x_ncdhw, w1, b1, w2, b2, res_scale=1.0):
    """Pure-JAX f32 reference (NCDHW, like torch)."""
    dn = ("NCDHW", "OIDHW", "NCDHW")

    def conv(x, w, b):
        y = lax.conv_general_dilated(x, w, window_strides=(1, 1, 1),
                                     padding=((1, 1), (1, 1), (1, 1)),
                                     dimension_numbers=dn,
                                     precision=lax.Precision.HIGHEST)
        return y + b.reshape(1, -1, 1, 1, 1)

    out = conv(jnp.maximum(conv(x_ncdhw, w1, b1), 0.0), w2, b2)
    return x_ncdhw + out * res_scale


if __name__ == "__main__":
    # ResidualBlockNoBN(spatial_dims=3, num_feat=C, res_scale=1.0) — small demo.
    # W*C = 128 fills the 128-lane vreg width; Nb=4 elements/step -> M = 192.
    N, C, D, H, W = 8, 8, 6, 8, 16
    res_scale = 1.0

    key = jax.random.PRNGKey(0)
    kx, k1, k2, kb1, kb2 = jax.random.split(key, 5)

    x = jax.random.normal(kx, (N, C, D, H, W), dtype=jnp.float32)

    # default_init_weights style: kaiming-normal conv weights scaled by 0.1
    fan_in = C * 3 * 3 * 3
    std = np.sqrt(2.0 / fan_in) * 0.1
    w1 = jax.random.normal(k1, (C, C, 3, 3, 3), dtype=jnp.float32) * std
    w2 = jax.random.normal(k2, (C, C, 3, 3, 3), dtype=jnp.float32) * std
    # small nonzero biases to exercise the bias path (Conv3d has bias=True)
    b1 = jax.random.normal(kb1, (C,), dtype=jnp.float32) * 0.01
    b2 = jax.random.normal(kb2, (C,), dtype=jnp.float32) * 0.01

    out = residual_block_no_bn(x, w1, b1, w2, b2, res_scale, batch_block=4)
    out = jax.block_until_ready(out)

    ref = jax.block_until_ready(_reference(x, w1, b1, w2, b2, res_scale))
    np.testing.assert_allclose(np.asarray(out), np.asarray(ref),
                               rtol=2e-3, atol=2e-3)

    print("KERNEL_OK")
</pallas_src>

<mosaic_0001>
module attributes {stable_mosaic.version = 11 : i64} {
  func.func @_residual_block_kernel(%arg0: i32, %arg1: memref<4x8x10x128xbf16, #tpu.memory_space<vmem>>, %arg2: memref<4x48x128xf32, #tpu.memory_space<vmem>>, %arg3: memref<1152x128xbf16, #tpu.memory_space<vmem>>, %arg4: memref<1x128xf32, #tpu.memory_space<vmem>>, %arg5: memref<1152x128xbf16, #tpu.memory_space<vmem>>, %arg6: memref<1x128xf32, #tpu.memory_space<vmem>>, %arg7: memref<4x48x128xf32, #tpu.memory_space<vmem>>, %arg8: memref<192x1152xbf16, #tpu.memory_space<vmem>>, %arg9: memref<4x8x10x128xbf16, #tpu.memory_space<vmem>>) attributes {dimension_semantics = [#tpu.dimension_semantics<parallel>], iteration_bounds = array<i64: 2>, scalar_prefetch = 0 : i64, scratch_operands = 2 : i64, tpu.core_type = #tpu.core_type<tc>, window_params = [{transform_indices = @transform_0, window_bounds = array<i64: 4, 8, 10, 128>}, {transform_indices = @transform_1, window_bounds = array<i64: 4, 48, 128>}, {pipeline_mode = #tpu.pipeline_mode<synchronous>, transform_indices = @transform_2, window_bounds = array<i64: 1152, 128>}, {pipeline_mode = #tpu.pipeline_mode<synchronous>, transform_indices = @transform_3, window_bounds = array<i64: 1, 128>}, {pipeline_mode = #tpu.pipeline_mode<synchronous>, transform_indices = @transform_4, window_bounds = array<i64: 1152, 128>}, {pipeline_mode = #tpu.pipeline_mode<synchronous>, transform_indices = @transform_5, window_bounds = array<i64: 1, 128>}, {transform_indices = @transform_6, window_bounds = array<i64: 4, 48, 128>}]} {
    %cst = arith.constant 0.000000e+00 : bf16
    %0 = vector.broadcast %cst : bf16 to vector<4x1x10x128xbf16>
    %c0 = arith.constant 0 : index
    %c0_0 = arith.constant 0 : index
    %c0_1 = arith.constant 0 : index
    %c0_2 = arith.constant 0 : index
    %1 = vector.load %arg9[%c0, %c0_0, %c0_1, %c0_2] : memref<4x8x10x128xbf16, #tpu.memory_space<vmem>>, vector<4x1x10x128xbf16>
    tpu.vector_store %arg9[%c0, %c0_0, %c0_1, %c0_2], %0 {strides = array<i32>} : memref<4x8x10x128xbf16, #tpu.memory_space<vmem>>, vector<4x1x10x128xbf16>,
    %cst_3 = arith.constant 0.000000e+00 : bf16
    %2 = vector.broadcast %cst_3 : bf16 to vector<4x1x10x128xbf16>
    %c0_4 = arith.constant 0 : index
    %c7 = arith.constant 7 : index
    %c0_5 = arith.constant 0 : index
    %c0_6 = arith.constant 0 : index
    %3 = vector.load %arg9[%c0_4, %c7, %c0_5, %c0_6] : memref<4x8x10x128xbf16, #tpu.memory_space<vmem>>, vector<4x1x10x128xbf16>
    tpu.vector_store %arg9[%c0_4, %c7, %c0_5, %c0_6], %2 {strides = array<i32>} : memref<4x8x10x128xbf16, #tpu.memory_space<vmem>>, vector<4x1x10x128xbf16>,
    %cst_7 = arith.constant 0.000000e+00 : bf16
    %4 = vector.broadcast %cst_7 : bf16 to vector<4x6x1x128xbf16>
    %c0_8 = arith.constant 0 : index
    %c1 = arith.constant 1 : index
    %c0_9 = arith.constant 0 : index
    %c0_10 = arith.constant 0 : index
    %5 = vector.load %arg9[%c0_8, %c1, %c0_9, %c0_10] : memref<4x8x10x128xbf16, #tpu.memory_space<vmem>>, vector<4x6x1x128xbf16>
    tpu.vector_store %arg9[%c0_8, %c1, %c0_9, %c0_10], %4 {strides = array<i32>} : memref<4x8x10x128xbf16, #tpu.memory_space<vmem>>, vector<4x6x1x128xbf16>,
    %cst_11 = arith.constant 0.000000e+00 : bf16
    %6 = vector.broadcast %cst_11 : bf16 to vector<4x6x1x128xbf16>
    %c0_12 = arith.constant 0 : index
    %c1_13 = arith.constant 1 : index
    %c9 = arith.constant 9 : index
    %c0_14 = arith.constant 0 : index
    %7 = vector.load %arg9[%c0_12, %c1_13, %c9, %c0_14] : memref<4x8x10x128xbf16, #tpu.memory_space<vmem>>, vector<4x6x1x128xbf16>
    tpu.vector_store %arg9[%c0_12, %c1_13, %c9, %c0_14], %6 {strides = array<i32>} : memref<4x8x10x128xbf16, #tpu.memory_space<vmem>>, vector<4x6x1x128xbf16>,
    %c0_15 = arith.constant 0 : index
    %c0_16 = arith.constant 0 : index
    %c0_17 = arith.constant 0 : index
    %c0_18 = arith.constant 0 : index
    %8 = vector.load %arg1[%c0_15, %c0_16, %c0_17, %c0_18] : memref<4x8x10x128xbf16, #tpu.memory_space<vmem>>, vector<4x8x10x128xbf16>
    %9 = vector.extract_strided_slice %8 {offsets = [0, 0, 0, 0], sizes = [4, 6, 8, 128], strides = [1, 1, 1, 1]} : vector<4x8x10x128xbf16> to vector<4x6x8x128xbf16>
    %10 = vector.shape_cast %9 : vector<4x6x8x128xbf16> to vector<192x128xbf16>
    %c0_19 = arith.constant 0 : index
    %c0_20 = arith.constant 0 : index
    %11 = vector.load %arg8[%c0_19, %c0_20] : memref<192x1152xbf16, #tpu.memory_space<vmem>>, vector<192x128xbf16>
    tpu.vector_store %arg8[%c0_19, %c0_20], %10 {strides = array<i32>} : memref<192x1152xbf16, #tpu.memory_space<vmem>>, vector<192x128xbf16>,
    %12 = vector.extract_strided_slice %8 {offsets = [0, 0, 1, 0], sizes = [4, 6, 8, 128], strides = [1, 1, 1, 1]} : vector<4x8x10x128xbf16> to vector<4x6x8x128xbf16>
    %13 = vector.shape_cast %12 : vector<4x6x8x128xbf16> to vector<192x128xbf16>
    %c0_21 = arith.constant 0 : index
    %c128 = arith.constant 128 : index
    %14 = vector.load %arg8[%c0_21, %c128] : memref<192x1152xbf16, #tpu.memory_space<vmem>>, vector<192x128xbf16>
    tpu.vector_store %arg8[%c0_21, %c128], %13 {strides = array<i32>} : memref<192x1152xbf16, #tpu.memory_space<vmem>>, vector<192x128xbf16>,
    %15 = vector.extract_strided_slice %8 {offsets = [0, 0, 2, 0], sizes = [4, 6, 8, 128], strides = [1, 1, 1, 1]} : vector<4x8x10x128xbf16> to vector<4x6x8x128xbf16>
    %16 = vector.shape_cast %15 : vector<4x6x8x128xbf16> to vector<192x128xbf16>
    %c0_22 = arith.constant 0 : index
    %c256 = arith.constant 256 : index
    %17 = vector.load %arg8[%c0_22, %c256] : memref<192x1152xbf16, #tpu.memory_space<vmem>>, vector<192x128xbf16>
    tpu.vector_store %arg8[%c0_22, %c256], %16 {strides = array<i32>} : memref<192x1152xbf16, #tpu.memory_space<vmem>>, vector<192x128xbf16>,
    %18 = vector.extract_strided_slice %8 {offsets = [0, 1, 0, 0], sizes = [4, 6, 8, 128], strides = [1, 1, 1, 1]} : vector<4x8x10x128xbf16> to vector<4x6x8x128xbf16>
    %19 = vector.shape_cast %18 : vector<4x6x8x128xbf16> to vector<192x128xbf16>
    %c0_23 = arith.constant 0 : index
    %c384 = arith.constant 384 : index
    %20 = vector.load %arg8[%c0_23, %c384] : memref<192x1152xbf16, #tpu.memory_space<vmem>>, vector<192x128xbf16>
    tpu.vector_store %arg8[%c0_23, %c384], %19 {strides = array<i32>} : memref<192x1152xbf16, #tpu.memory_space<vmem>>, vector<192x128xbf16>,
    %21 = vector.extract_strided_slice %8 {offsets = [0, 1, 1, 0], sizes = [4, 6, 8, 128], strides = [1, 1, 1, 1]} : vector<4x8x10x128xbf16> to vector<4x6x8x128xbf16>
    %22 = vector.shape_cast %21 : vector<4x6x8x128xbf16> to vector<192x128xbf16>
    %c0_24 = arith.constant 0 : index
    %c512 = arith.constant 512 : index
    %23 = vector.load %arg8[%c0_24, %c512] : memref<192x1152xbf16, #tpu.memory_space<vmem>>, vector<192x128xbf16>
    tpu.vector_store %arg8[%c0_24, %c512], %22 {strides = array<i32>} : memref<192x1152xbf16, #tpu.memory_space<vmem>>, vector<192x128xbf16>,
    %24 = vector.extract_strided_slice %8 {offsets = [0, 1, 2, 0], sizes = [4, 6, 8, 128], strides = [1, 1, 1, 1]} : vector<4x8x10x128xbf16> to vector<4x6x8x128xbf16>
    %25 = vector.shape_cast %24 : vector<4x6x8x128xbf16> to vector<192x128xbf16>
    %c0_25 = arith.constant 0 : index
    %c640 = arith.constant 640 : index
    %26 = vector.load %arg8[%c0_25, %c640] : memref<192x1152xbf16, #tpu.memory_space<vmem>>, vector<192x128xbf16>
    tpu.vector_store %arg8[%c0_25, %c640], %25 {strides = array<i32>} : memref<192x1152xbf16, #tpu.memory_space<vmem>>, vector<192x128xbf16>,
    %27 = vector.extract_strided_slice %8 {offsets = [0, 2, 0, 0], sizes = [4, 6, 8, 128], strides = [1, 1, 1, 1]} : vector<4x8x10x128xbf16> to vector<4x6x8x128xbf16>
    %28 = vector.shape_cast %27 : vector<4x6x8x128xbf16> to vector<192x128xbf16>
    %c0_26 = arith.constant 0 : index
    %c768 = arith.constant 768 : index
    %29 = vector.load %arg8[%c0_26, %c768] : memref<192x1152xbf16, #tpu.memory_space<vmem>>, vector<192x128xbf16>
    tpu.vector_store %arg8[%c0_26, %c768], %28 {strides = array<i32>} : memref<192x1152xbf16, #tpu.memory_space<vmem>>, vector<192x128xbf16>,
    %30 = vector.extract_strided_slice %8 {offsets = [0, 2, 1, 0], sizes = [4, 6, 8, 128], strides = [1, 1, 1, 1]} : vector<4x8x10x128xbf16> to vector<4x6x8x128xbf16>
    %31 = vector.shape_cast %30 : vector<4x6x8x128xbf16> to vector<192x128xbf16>
    %c0_27 = arith.constant 0 : index
    %c896 = arith.constant 896 : index
    %32 = vector.load %arg8[%c0_27, %c896] : memref<192x1152xbf16, #tpu.memory_space<vmem>>, vector<192x128xbf16>
    tpu.vector_store %arg8[%c0_27, %c896], %31 {strides = array<i32>} : memref<192x1152xbf16, #tpu.memory_space<vmem>>, vector<192x128xbf16>,
    %33 = vector.extract_strided_slice %8 {offsets = [0, 2, 2, 0], sizes = [4, 6, 8, 128], strides = [1, 1, 1, 1]} : vector<4x8x10x128xbf16> to vector<4x6x8x128xbf16>
    %34 = vector.shape_cast %33 : vector<4x6x8x128xbf16> to vector<192x128xbf16>
    %c0_28 = arith.constant 0 : index
    %c1024 = arith.constant 1024 : index
    %35 = vector.load %arg8[%c0_28, %c1024] : memref<192x1152xbf16, #tpu.memory_space<vmem>>, vector<192x128xbf16>
    tpu.vector_store %arg8[%c0_28, %c1024], %34 {strides = array<i32>} : memref<192x1152xbf16, #tpu.memory_space<vmem>>, vector<192x128xbf16>,
    %c0_29 = arith.constant 0 : index
    %c0_30 = arith.constant 0 : index
    %36 = vector.load %arg8[%c0_29, %c0_30] : memref<192x1152xbf16, #tpu.memory_space<vmem>>, vector<192x1152xbf16>
    %c0_31 = arith.constant 0 : index
    %c0_32 = arith.constant 0 : index
    %37 = vector.load %arg3[%c0_31, %c0_32] : memref<1152x128xbf16, #tpu.memory_space<vmem>>, vector<1152x128xbf16>
    %cst_33 = arith.constant dense<0.000000e+00> : vector<192x128xf32>
    %38 = tpu.matmul %36, %37, %cst_33 {dimension_numbers = #tpu.dot_dimension_numbers<[1], [0], [0], [1], [0, 0, 1, 1], [], []>} : vector<192x1152xbf16>, vector<1152x128xbf16>, vector<192x128xf32> -> vector<192x128xf32>
    %c0_34 = arith.constant 0 : index
    %c0_35 = arith.constant 0 : index
    %39 = vector.load %arg4[%c0_34, %c0_35] : memref<1x128xf32, #tpu.memory_space<vmem>>, vector<1x128xf32>
    %40 = vector.broadcast %39 : vector<1x128xf32> to vector<192x128xf32>
    %41 = arith.addf %38, %40 : vector<192x128xf32>
    %cst_36 = arith.constant 0.000000e+00 : f32
    %42 = vector.broadcast %cst_36 : f32 to vector<192x128xf32>
    %43 = arith.maximumf %41, %42 : vector<192x128xf32>
    %44 = vector.shape_cast %43 : vector<192x128xf32> to vector<4x6x8x128xf32>
    %45 = arith.truncf %44 : vector<4x6x8x128xf32> to vector<4x6x8x128xbf16>
    %c0_37 = arith.constant 0 : index
    %c1_38 = arith.constant 1 : index
    %c1_39 = arith.constant 1 : index
    %c0_40 = arith.constant 0 : index
    %46 = vector.load %arg9[%c0_37, %c1_38, %c1_39, %c0_40] : memref<4x8x10x128xbf16, #tpu.memory_space<vmem>>, vector<4x6x8x128xbf16>
    tpu.vector_store %arg9[%c0_37, %c1_38, %c1_39, %c0_40], %45 {strides = array<i32>} : memref<4x8x10x128xbf16, #tpu.memory_space<vmem>>, vector<4x6x8x128xbf16>,
    %c0_41 = arith.constant 0 : index
    %c0_42 = arith.constant 0 : index
    %c0_43 = arith.constant 0 : index
    %c0_44 = arith.constant 0 : index
    %47 = vector.load %arg9[%c0_41, %c0_42, %c0_43, %c0_44] : memref<4x8x10x128xbf16, #tpu.memory_space<vmem>>, vector<4x6x8x128xbf16>
    %48 = vector.shape_cast %47 : vector<4x6x8x128xbf16> to vector<192x128xbf16>
    %c0_45 = arith.constant 0 : index
    %c0_46 = arith.constant 0 : index
    %49 = vector.load %arg8[%c0_45, %c0_46] : memref<192x1152xbf16, #tpu.memory_space<vmem>>, vector<192x128xbf16>
    tpu.vector_store %arg8[%c0_45, %c0_46], %48 {strides = array<i32>} : memref<192x1152xbf16, #tpu.memory_space<vmem>>, vector<192x128xbf16>,
    %c0_47 = arith.constant 0 : index
    %c0_48 = arith.constant 0 : index
    %c1_49 = arith.constant 1 : index
    %c0_50 = arith.constant 0 : index
    %50 = vector.load %arg9[%c0_47, %c0_48, %c1_49, %c0_50] : memref<4x8x10x128xbf16, #tpu.memory_space<vmem>>, vector<4x6x8x128xbf16>
    %51 = vector.shape_cast %50 : vector<4x6x8x128xbf16> to vector<192x128xbf16>
    %c0_51 = arith.constant 0 : index
    %c128_52 = arith.constant 128 : index
    %52 = vector.load %arg8[%c0_51, %c128_52] : memref<192x1152xbf16, #tpu.memory_space<vmem>>, vector<192x128xbf16>
    tpu.vector_store %arg8[%c0_51, %c128_52], %51 {strides = array<i32>} : memref<192x1152xbf16, #tpu.memory_space<vmem>>, vector<192x128xbf16>,
    %c0_53 = arith.constant 0 : index
    %c0_54 = arith.constant 0 : index
    %c2 = arith.constant 2 : index
    %c0_55 = arith.constant 0 : index
    %53 = vector.load %arg9[%c0_53, %c0_54, %c2, %c0_55] : memref<4x8x10x128xbf16, #tpu.memory_space<vmem>>, vector<4x6x8x128xbf16>
    %54 = vector.shape_cast %53 : vector<4x6x8x128xbf16> to vector<192x128xbf16>
    %c0_56 = arith.constant 0 : index
    %c256_57 = arith.constant 256 : index
    %55 = vector.load %arg8[%c0_56, %c256_57] : memref<192x1152xbf16, #tpu.memory_space<vmem>>, vector<192x128xbf16>
    tpu.vector_store %arg8[%c0_56, %c256_57], %54 {strides = array<i32>} : memref<192x1152xbf16, #tpu.memory_space<vmem>>, vector<192x128xbf16>,
    %c0_58 = arith.constant 0 : index
    %c1_59 = arith.constant 1 : index
    %c0_60 = arith.constant 0 : index
    %c0_61 = arith.constant 0 : index
    %56 = vector.load %arg9[%c0_58, %c1_59, %c0_60, %c0_61] : memref<4x8x10x128xbf16, #tpu.memory_space<vmem>>, vector<4x6x8x128xbf16>
    %57 = vector.shape_cast %56 : vector<4x6x8x128xbf16> to vector<192x128xbf16>
    %c0_62 = arith.constant 0 : index
    %c384_63 = arith.constant 384 : index
    %58 = vector.load %arg8[%c0_62, %c384_63] : memref<192x1152xbf16, #tpu.memory_space<vmem>>, vector<192x128xbf16>
    tpu.vector_store %arg8[%c0_62, %c384_63], %57 {strides = array<i32>} : memref<192x1152xbf16, #tpu.memory_space<vmem>>, vector<192x128xbf16>,
    %c0_64 = arith.constant 0 : index
    %c1_65 = arith.constant 1 : index
    %c1_66 = arith.constant 1 : index
    %c0_67 = arith.constant 0 : index
    %59 = vector.load %arg9[%c0_64, %c1_65, %c1_66, %c0_67] : memref<4x8x10x128xbf16, #tpu.memory_space<vmem>>, vector<4x6x8x128xbf16>
    %60 = vector.shape_cast %59 : vector<4x6x8x128xbf16> to vector<192x128xbf16>
    %c0_68 = arith.constant 0 : index
    %c512_69 = arith.constant 512 : index
    %61 = vector.load %arg8[%c0_68, %c512_69] : memref<192x1152xbf16, #tpu.memory_space<vmem>>, vector<192x128xbf16>
    tpu.vector_store %arg8[%c0_68, %c512_69], %60 {strides = array<i32>} : memref<192x1152xbf16, #tpu.memory_space<vmem>>, vector<192x128xbf16>,
    %c0_70 = arith.constant 0 : index
    %c1_71 = arith.constant 1 : index
    %c2_72 = arith.constant 2 : index
    %c0_73 = arith.constant 0 : index
    %62 = vector.load %arg9[%c0_70, %c1_71, %c2_72, %c0_73] : memref<4x8x10x128xbf16, #tpu.memory_space<vmem>>, vector<4x6x8x128xbf16>
    %63 = vector.shape_cast %62 : vector<4x6x8x128xbf16> to vector<192x128xbf16>
    %c0_74 = arith.constant 0 : index
    %c640_75 = arith.constant 640 : index
    %64 = vector.load %arg8[%c0_74, %c640_75] : memref<192x1152xbf16, #tpu.memory_space<vmem>>, vector<192x128xbf16>
    tpu.vector_store %arg8[%c0_74, %c640_75], %63 {strides = array<i32>} : memref<192x1152xbf16, #tpu.memory_space<vmem>>, vector<192x128xbf16>,
    %c0_76 = arith.constant 0 : index
    %c2_77 = arith.constant 2 : index
    %c0_78 = arith.constant 0 : index
    %c0_79 = arith.constant 0 : index
    %65 = vector.load %arg9[%c0_76, %c2_77, %c0_78, %c0_79] : memref<4x8x10x128xbf16, #tpu.memory_space<vmem>>, vector<4x6x8x128xbf16>
    %66 = vector.shape_cast %65 : vector<4x6x8x128xbf16> to vector<192x128xbf16>
    %c0_80 = arith.constant 0 : index
    %c768_81 = arith.constant 768 : index
    %67 = vector.load %arg8[%c0_80, %c768_81] : memref<192x1152xbf16, #tpu.memory_space<vmem>>, vector<192x128xbf16>
    tpu.vector_store %arg8[%c0_80, %c768_81], %66 {strides = array<i32>} : memref<192x1152xbf16, #tpu.memory_space<vmem>>, vector<192x128xbf16>,
    %c0_82 = arith.constant 0 : index
    %c2_83 = arith.constant 2 : index
    %c1_84 = arith.constant 1 : index
    %c0_85 = arith.constant 0 : index
    %68 = vector.load %arg9[%c0_82, %c2_83, %c1_84, %c0_85] : memref<4x8x10x128xbf16, #tpu.memory_space<vmem>>, vector<4x6x8x128xbf16>
    %69 = vector.shape_cast %68 : vector<4x6x8x128xbf16> to vector<192x128xbf16>
    %c0_86 = arith.constant 0 : index
    %c896_87 = arith.constant 896 : index
    %70 = vector.load %arg8[%c0_86, %c896_87] : memref<192x1152xbf16, #tpu.memory_space<vmem>>, vector<192x128xbf16>
    tpu.vector_store %arg8[%c0_86, %c896_87], %69 {strides = array<i32>} : memref<192x1152xbf16, #tpu.memory_space<vmem>>, vector<192x128xbf16>,
    %c0_88 = arith.constant 0 : index
    %c2_89 = arith.constant 2 : index
    %c2_90 = arith.constant 2 : index
    %c0_91 = arith.constant 0 : index
    %71 = vector.load %arg9[%c0_88, %c2_89, %c2_90, %c0_91] : memref<4x8x10x128xbf16, #tpu.memory_space<vmem>>, vector<4x6x8x128xbf16>
    %72 = vector.shape_cast %71 : vector<4x6x8x128xbf16> to vector<192x128xbf16>
    %c0_92 = arith.constant 0 : index
    %c1024_93 = arith.constant 1024 : index
    %73 = vector.load %arg8[%c0_92, %c1024_93] : memref<192x1152xbf16, #tpu.memory_space<vmem>>, vector<192x128xbf16>
    tpu.vector_store %arg8[%c0_92, %c1024_93], %72 {strides = array<i32>} : memref<192x1152xbf16, #tpu.memory_space<vmem>>, vector<192x128xbf16>,
    %c0_94 = arith.constant 0 : index
    %c0_95 = arith.constant 0 : index
    %74 = vector.load %arg8[%c0_94, %c0_95] : memref<192x1152xbf16, #tpu.memory_space<vmem>>, vector<192x1152xbf16>
    %c0_96 = arith.constant 0 : index
    %c0_97 = arith.constant 0 : index
    %75 = vector.load %arg5[%c0_96, %c0_97] : memref<1152x128xbf16, #tpu.memory_space<vmem>>, vector<1152x128xbf16>
    %cst_98 = arith.constant dense<0.000000e+00> : vector<192x128xf32>
    %76 = tpu.matmul %74, %75, %cst_98 {dimension_numbers = #tpu.dot_dimension_numbers<[1], [0], [0], [1], [0, 0, 1, 1], [], []>} : vector<192x1152xbf16>, vector<1152x128xbf16>, vector<192x128xf32> -> vector<192x128xf32>
    %c0_99 = arith.constant 0 : index
    %c0_100 = arith.constant 0 : index
    %77 = vector.load %arg6[%c0_99, %c0_100] : memref<1x128xf32, #tpu.memory_space<vmem>>, vector<1x128xf32>
    %78 = vector.broadcast %77 : vector<1x128xf32> to vector<192x128xf32>
    %79 = arith.addf %76, %78 : vector<192x128xf32>
    %c0_101 = arith.constant 0 : index
    %c0_102 = arith.constant 0 : index
    %c0_103 = arith.constant 0 : index
    %80 = vector.load %arg2[%c0_101, %c0_102, %c0_103] : memref<4x48x128xf32, #tpu.memory_space<vmem>>, vector<4x48x128xf32>
    %81 = vector.shape_cast %79 : vector<192x128xf32> to vector<4x48x128xf32>
    %cst_104 = arith.constant 1.000000e+00 : f32
    %82 = vector.broadcast %cst_104 : f32 to vector<4x48x128xf32>
    %83 = arith.mulf %82, %81 : vector<4x48x128xf32>
    %84 = arith.addf %80, %83 : vector<4x48x128xf32>
    %c0_105 = arith.constant 0 : index
    %c0_106 = arith.constant 0 : index
    %c0_107 = arith.constant 0 : index
    %85 = vector.load %arg7[%c0_105, %c0_106, %c0_107] : memref<4x48x128xf32, #tpu.memory_space<vmem>>, vector<4x48x128xf32>
    tpu.vector_store %arg7[%c0_105, %c0_106, %c0_107], %84 {strides = array<i32>} : memref<4x48x128xf32, #tpu.memory_space<vmem>>, vector<4x48x128xf32>,
    return
  }
  func.func @transform_0(%arg0: i32) -> (i32, i32, i32, i32) {
    %c0_i32 = arith.constant 0 : i32
    %c0_i32_0 = arith.constant 0 : i32
    %c0_i32_1 = arith.constant 0 : i32
    %c0_i32_2 = arith.constant 0 : i32
    return %arg0, %c0_i32, %c0_i32_0, %c0_i32_1 : i32, i32, i32, i32
  }
  func.func @transform_1(%arg0: i32) -> (i32, i32, i32) {
    %c0_i32 = arith.constant 0 : i32
    %c0_i32_0 = arith.constant 0 : i32
    %c0_i32_1 = arith.constant 0 : i32
    return %arg0, %c0_i32, %c0_i32_0 : i32, i32, i32
  }
  func.func @transform_2(%arg0: i32) -> (i32, i32) {
    %c0_i32 = arith.constant 0 : i32
    %c0_i32_0 = arith.constant 0 : i32
    %c0_i32_1 = arith.constant 0 : i32
    return %c0_i32, %c0_i32_0 : i32, i32
  }
  func.func @transform_3(%arg0: i32) -> (i32, i32) {
    %c0_i32 = arith.constant 0 : i32
    %c0_i32_0 = arith.constant 0 : i32
    %c0_i32_1 = arith.constant 0 : i32
    return %c0_i32, %c0_i32_0 : i32, i32
  }
  func.func @transform_4(%arg0: i32) -> (i32, i32) {
    %c0_i32 = arith.constant 0 : i32
    %c0_i32_0 = arith.constant 0 : i32
    %c0_i32_1 = arith.constant 0 : i32
    return %c0_i32, %c0_i32_0 : i32, i32
  }
  func.func @transform_5(%arg0: i32) -> (i32, i32) {
    %c0_i32 = arith.constant 0 : i32
    %c0_i32_0 = arith.constant 0 : i32
    %c0_i32_1 = arith.constant 0 : i32
    return %c0_i32, %c0_i32_0 : i32, i32
  }
  func.func @transform_6(%arg0: i32) -> (i32, i32, i32) {
    %c0_i32 = arith.constant 0 : i32
    %c0_i32_0 = arith.constant 0 : i32
    %c0_i32_1 = arith.constant 0 : i32
    return %arg0, %c0_i32, %c0_i32_0 : i32, i32, i32
  }
}

</mosaic_0001>

<bundles_post_ra>
// kernel: tpu_custom_call.1
= control target key start
LH: loop header
LB: loop body
LE: loop exit
PB: predicated region body
PF: predicated region fallthrough
CT: control target
= control target key end

     0   :  { %11 = vsyncpa [#allocation5], 0  ;;  %s12346_s0 = inlined_call_operand.vmem [shape: bf16[8,8,10,128], index: 0, kind: input, shape index: {}]   ;;  %s12347_s1 = inlined_call_operand.hbm [shape: f32[8,48,128], index: 1, kind: input, shape index: {}]   ;;  %s12348_s2 = inlined_call_operand.vmem [shape: bf16[1152,128], index: 2, kind: input, shape index: {}]   ;;  %s12349_s3 = inlined_call_operand.vmem [shape: f32[1,128], index: 3, kind: input, shape index: {}]   ;;  %s12350_s4 = inlined_call_operand.hbm [shape: bf16[1152,128], index: 4, kind: input, shape index: {}]   ;;  %s12351_s5 = inlined_call_operand.vmem [shape: f32[1,128], index: 5, kind: input, shape index: {}]   ;;  %s12352_s6 = inlined_call_operand.hbm [shape: f32[8,48,128], index: 6, kind: output, shape index: {}]  }
   0x1   :  { %13 = vsyncpa [#allocation5 + $0x1], 0 }
   0x2   :  { %14 = vsyncpa [#allocation8], 0 }
   0x3   :  { %15 = vsyncpa [#allocation6], 0 }
   0x4   :  { %17 = vsyncpa [#allocation6 + $0x1], 0  ;;  %s10157_s21 = smov 0   ;;  %s10159_s22 = smov 0  }
   0x5   :  { %s10161_s23 = smov 0   ;;  %s10163_s24 = smov 0  }
   0x6 LB: > { %s10178_s25 = sadd.s32 4294967295, %s10110_s24   ;;  %s8120_s26 = sadd.s32 4294967294, %s10110_s24   ;;  %s10110_s24 = sphi %s10163_s24, %s12468_s24   ;;  %s10106_s23 = sphi %s10161_s23, %s12467_s23   ;;  %s10102_s22 = sphi %s10159_s22, %s12466_s22   ;;  %s10098_s21 = sphi %s10157_s21, %s12465_s21  }
   0x7   : > { %p69_p0 = scmp.ne.s32.totalorder %s10102_s22, %s10098_s21  ;;  %p12353_p1 = scmp.eq.s32.totalorder %s10178_s25, 0 }
   0x8   : > { %p183_p3 = scmp.eq.s32.totalorder %s8120_s26, 1  ;;  %p8121_p5 = scmp.ge.s32.totalorder %s10110_s24, 1 }
   0x9   : > { %p10187_p4 = por %p12353_p1, %p69_p0  ;;  %p190_p7 = scmp.lt.s32.totalorder %s10110_s24, 3 }
   0xa   : > { %p10192_p6 = por %p183_p3, %p69_p0  ;;  %s10112_s30 = smov [#allocation7]  }
   0xb   : > { %s12363_s27 = scalar_select %p10187_p4, 1, 0 }
   0xc   : > { %s12364_s28 = scalar_select %p10192_p6, 1, 0 }
   0xd   : > { %p10197_p8 = pnand %p8121_p5, %p190_p7  ;;  %s208_s7 = sshll.u32 %s10112_s30, 4  ;;  %s209_s7 = int_to_ptr.vmem [resolvable:$true] %s208_s7 }
   0xe   : > { %s10211_s9 = sadd.s32 1, %s10110_s24   ;;  %s56_s10 = sadd.s32 1, %s10106_s23 }
   0xf   : > { %s12365_s29 = scalar_select %p10197_p8, 1, 0 }
  0x10   : > { %p9488_p9 = pneg %p10197_p8  ;;  %s53_s11 = ssub.s32 %s10110_s24, %s10211_s9 }
  0x11   : > { %s9999_s12 = scalar_lea.vmem %s209_s7, 9216  ;;  %p10007_p5 = scmp.lt.s32.totalorder %s209_s7, %s209_s7 }
  0x12   : > { %p10206_p11 = pnand %p9488_p9, %p12353_p1  ;;  %p10000_p13 = scmp.ne.s32.totalorder %s209_s7, %s9999_s12 }
  0x13   : > { %p10008_p7 = scmp.lt.s32.totalorder %s9999_s12, %s9999_s12 }
  0x14   : > { %p9990_p12 = pneg %p10206_p11 }
  0x15   : > { %p10009_p10 = por %p10008_p7, %p10007_p5 }
  0x16   : > { %p10002_p0 = pnand %p10000_p13, %p9990_p12 }
  0x18   : > { %p10003_p3 = pneg %p10002_p0 }
  0x1a   : > { %p10010_p2 = pnand %p10009_p10, %p10003_p3 }
  0x1c   : > { %10013 = shalt.err (!%p10010_p2)
}
  0x1d   : > { %s10113_s13 = smov 64   ;;  %s10114_s14 = smov 4  }
  0x1e   : > { %9491 = dma.hbm_to_vmem [thread:$0]  (!%p10206_p11), %s12350_s4, 9216, %s209_s7, [#allocation8], %s10113_s13, %s10113_s13, %s10114_s14  }
  0x1f   : > { %p54_p9 = scmp.eq.s32.totalorder %s53_s11, 0  ;;  %p63_p12 = scmp.ne.s32.totalorder %s10106_s23, %s10102_s22 }
  0x20   : > { %p64_p10 = scmp.eq.s32.totalorder %s10110_s24, 0  ;;  %p9501_p2 = scmp.lt.s32.totalorder %s10110_s24, 2 }
  0x21   : > { %s10228_s17 = scalar_select %p54_p9, %s10106_s23, %s56_s10  }
  0x22   : > { %p65_p13 = por %p64_p10, %p63_p12  ;;  %p12367_p0 = scmp.eq.s32.totalorder %s10178_s25, 1 }
  0x23   : > { %s235_s19 = sand.u32 1, %s10106_s23   ;;  %s9477_s20 = smul.u32 3072, %s10110_s24 }
  0x24   : > { %p10232_p3 = por %p12367_p0, %p63_p12  ;;  %s9476_s26 = smul.u32 192, %s235_s19 }
  0x25   : > { %s10241_s12 = scalar_lea.hbm %s12347_s1, %s9477_s20  ;;  %p10243_p11 = pnand %p9501_p2, %p65_p13 }
  0x26   : > { %s12368_s18 = scalar_select %p10232_p3, 1, 0 }
  0x27   : > { %s239_s10 = scalar_lea.vmem [#allocation4], %s9476_s26  ;;  %s10249_s13 = scalar_lea.sflag [#allocation5], %s235_s19 }
  0x28   : > { %s247_s11 = sshll.u32 %s239_s10, 4  ;;  %s10014_s14 = scalar_lea.hbm %s10241_s12, 3072  ;;  %s10247_s11 = int_to_ptr.vmem [resolvable:$true] %s247_s11 }
  0x29   : > { %p10015_p5 = scmp.ne.s32.totalorder %s10241_s12, %s10014_s14  ;;  %p10016_p7 = pneg %p10243_p11 }
  0x2a   : > { %s10019_s20 = scalar_lea.hbm %s12347_s1, 6144  ;;  %p10020_p10 = scmp.lt.s32.totalorder %s10241_s12, %s12347_s1 }
  0x2b   : > { %p10017_p9 = pnand %p10016_p7, %p10015_p5  ;;  %p10021_p2 = scmp.lt.s32.totalorder %s10019_s20, %s10014_s14 }
  0x2d   : > { %p10018_p12 = pneg %p10017_p9  ;;  %p10022_p13 = por %p10021_p2, %p10020_p10 }
  0x2f   : > { %p10023_p0 = pnand %p10022_p13, %p10018_p12 }
  0x31   : > { %10026 = shalt.err (!%p10023_p0)
}
  0x32   : > { %s10027_s19 = scalar_lea.vmem %s10247_s11, 3072  ;;  %s10115_s26 = smov [#allocation4]  }
  0x33   : > { %p10028_p1 = scmp.ne.s32.totalorder %s10247_s11, %s10027_s19  ;;  %s10032_s10 = sshll.u32 %s10115_s26, 4  ;;  %s10033_s10 = int_to_ptr.vmem [resolvable:$false] %s10032_s10 }
  0x34   : > { %s10034_s15 = scalar_lea.vmem %s10033_s10, 6144  ;;  %p10035_p9 = scmp.lt.s32.totalorder %s10247_s11, %s10033_s10 }
  0x35   : > { %p10030_p6 = pnand %p10028_p1, %p10016_p7  ;;  %p10036_p3 = scmp.lt.s32.totalorder %s10034_s15, %s10027_s19 }
  0x37   : > { %p10031_p5 = pneg %p10030_p6  ;;  %p10037_p4 = por %p10036_p3, %p10035_p9 }
  0x39   : > { %p10038_p8 = pnand %p10037_p4, %p10031_p5 }
  0x3b   : > { %10041 = shalt.err (!%p10038_p8)
}
  0x3c   : > { %s10116_s14 = smov 128   ;;  %s10117_s16 = smov 8  }
  0x3d   : > { %9495 = dma.hbm_to_vmem [thread:$0]  (!%p10243_p11), %s10241_s12, 3072, %s10247_s11, %s10249_s13, %s10116_s14, %s10116_s14, %s10117_s16  }
  0x3e   : > { %p12370_p1 = scmp.ne.s32.totalorder %s12365_s29, 0 }
  0x40   : > { %259 = sbr.rel (%p12370_p1) target bundleno = 1184 (0x4a0), region = 44 }
  0x45   : > { %s10273_s20 = sand.u32 1, %s10102_s22   ;;  %p12371_p4 = scmp.ne.s32.totalorder %s12363_s27, 0 }
  0x46   : > { %s9478_s30 = smul.u32 192, %s10273_s20  ;;  %s262_s8 = scalar_lea.sflag [#allocation5], %s10273_s20 }
  0x48   : > { %s10279_s19 = scalar_lea.vmem [#allocation4], %s9478_s30 }
  0x49   : > { %10085 = dma.done.wait (%p12371_p4), %s262_s8, 3072  }
  0x4a   : > { %10087 = vsyncadd (%p12371_p4), %s262_s8, 4294964224  ;;  %p12372_p6 = scmp.eq.s32.totalorder %s10178_s25, 0 }
  0x4c   : > { %10089 = dma.done.wait (%p12372_p6), [#allocation8], 9216   ;;  %p12373_p8 = pmov %p12372_p6 }
  0x4d   : > { %v10118_v0 = vmov 0   ;;  %v9544_v1 = vld [vmem:[%s12348_s2 + $0x78] sm:$0xff]   ;;  %v9548_v5 = vld [vmem:[%s12348_s2 + $0x70] sm:$0xff]   ;;  %v9552_v9 = vld [vmem:[%s12348_s2 + $0x68] sm:$0xff]   ;;  %s8129_s26 = sshll.u32 %s10178_s25, 2  ;;  %vm1004_vm2 = vcmask 1042432  }
  0x4e   : > { %10091 = vsyncadd (%p12373_p8), [#allocation8], 4294958080  ;;  %314 = vst [vmem:[#allocation3] sm:$0xf] %v10118_v0  ;;  %v9545_v2 = vld [vmem:[%s12348_s2 + $0x38] sm:$0xff]   ;;  %8652 = vmatprep.subr.bf16.mxu0 %v9544_v1  ;;  %v9549_v6 = vld [vmem:[%s12348_s2 + $0x30] sm:$0xff]  }
  0x4f   : > { %315 = vst [vmem:[#allocation3 + $0x4] sm:$0x1] %v10118_v0  ;;  %316 = vst [vmem:[#allocation3 + $0x40] sm:$0xf] %v10118_v0  ;;  %v9546_v3 = vld [vmem:[%s12348_s2 + $0xf8] sm:$0xff]   ;;  %8653 = vmatpush3.bf16.msra.mxu0 %v9545_v2  ;;  %v9550_v7 = vld [vmem:[%s12348_s2 + $0xf0] sm:$0xff]  }
  0x50   : > { %317 = vst [vmem:[#allocation3 + $0x44] sm:$0x1] %v10118_v0  ;;  %318 = vst [vmem:[#allocation3 + $0x80] sm:$0xf] %v10118_v0  ;;  %v9547_v4 = vld [vmem:[%s12348_s2 + $0xb8] sm:$0xff]   ;;  %8740 = vmatprep.subr.bf16.mxu1 %v9546_v3  ;;  %8654 = vmatprep.subr.bf16.mxu0 %v9548_v5  ;;  %v9551_v8 = vld [vmem:[%s12348_s2 + $0xb0] sm:$0xff]  }
  0x51   : > { %319 = vst [vmem:[#allocation3 + $0x84] sm:$0x1] %v10118_v0  ;;  %320 = vst [vmem:[#allocation3 + $0xc0] sm:$0xf] %v10118_v0  ;;  %8741 = vmatpush3.bf16.msra.mxu1 %v9547_v4  ;;  %v9553_v10 = vld [vmem:[%s12348_s2 + $0x28] sm:$0xff]   ;;  %v9556_v13 = vld [vmem:[%s12348_s2 + $0x60] sm:$0xff]  }
  0x52   : > { %321 = vst [vmem:[#allocation3 + $0xc4] sm:$0x1] %v10118_v0  ;;  %323 = vst [vmem:[#allocation3 + $0x38] sm:$0xf] %v10118_v0  ;;  %8742 = vmatprep.subr.bf16.mxu1 %v9550_v7  ;;  %v9554_v11 = vld [vmem:[%s12348_s2 + $0xe8] sm:$0xff]   ;;  %v9557_v14 = vld [vmem:[%s12348_s2 + $0x20] sm:$0xff]  }
  0x53   : > { %324 = vst [vmem:[#allocation3 + $0x3c] sm:$0x1] %v10118_v0  ;;  %325 = vst [vmem:[#allocation3 + $0x78] sm:$0xf] %v10118_v0  ;;  %8655 = vmatpush3.bf16.msra.mxu0 %v9549_v6  ;;  %v9555_v12 = vld [vmem:[%s12348_s2 + $0xa8] sm:$0xff]   ;;  %v9558_v15 = vld [vmem:[%s12348_s2 + $0xe0] sm:$0xff]  }
  0x54   : > { %326 = vst [vmem:[#allocation3 + $0x7c] sm:$0x1] %v10118_v0  ;;  %327 = vst [vmem:[#allocation3 + $0xb8] sm:$0xf] %v10118_v0  ;;  %8656 = vmatprep.subr.bf16.mxu0 %v9552_v9  ;;  %v9559_v16 = vld [vmem:[%s12348_s2 + $0xa0] sm:$0xff]   ;;  %v9560_v17 = vld [vmem:[%s12348_s2 + $0x58] sm:$0xff]  }
  0x55   : > { %328 = vst [vmem:[#allocation3 + $0xbc] sm:$0x1] %v10118_v0  ;;  %329 = vst [vmem:[#allocation3 + $0xf8] sm:$0xf] %v10118_v0  ;;  %8743 = vmatpush3.bf16.msra.mxu1 %v9551_v8  ;;  %v9561_v18 = vld [vmem:[%s12348_s2 + $0x18] sm:$0xff]   ;;  %p305_p3 = scmp.lt.s32.totalorder %s8129_s26, 7 }
  0x56   : > { %330 = vst [vmem:[#allocation3 + $0xfc] sm:$0x1] %v10118_v0  ;;  %8744 = vmatprep.subr.bf16.mxu1 %v9554_v11  ;;  %v9562_v19 = vld [vmem:[%s12348_s2 + $0xd8] sm:$0xff]   ;;  %v9564_v21 = vld [vmem:[%s12348_s2 + $0x50] sm:$0xff]   ;;  %v9568_v25 = vld [vmem:[%s12348_s2 + $0x48] sm:$0xff]   ;;  %vm1005_vm3 = vcmask 1046532  }
  0x57   : > { %8657 = vmatpush3.bf16.msra.mxu0 %v9553_v10  ;;  %v9563_v20 = vld [vmem:[%s12348_s2 + $0x98] sm:$0xff]   ;;  %v9565_v22 = vld [vmem:[%s12348_s2 + $0x10] sm:$0xff]   ;;  %s12470_s26 = smov (!%p305_p3, %s8129_s26), 7  ;;  %vm569_vm0 = vsmask.f32 3328  ;;  %v9569_v26 = vld [vmem:[%s12348_s2 + $0x8] sm:$0xff]  }
  0x58   : > { %8658 = vmatprep.subr.bf16.mxu0 %v9556_v13  ;;  %v9566_v23 = vld [vmem:[%s12348_s2 + $0xd0] sm:$0xff]   ;;  %vm570_vm1 = vsmask.f32 7440  ;;  %s8627_s10 = sshll.u32 %s12470_s26, 6  ;;  %v9570_v27 = vld [vmem:[%s12348_s2 + $0xc8] sm:$0xff]   ;;  %v9572_v29 = vld [vmem:[%s12348_s2 + $0x40] sm:$0xff]  }
  0x59   : > { %8745 = vmatpush3.bf16.msra.mxu1 %v9555_v12  ;;  %v9567_v24 = vld [vmem:[%s12348_s2 + $0x90] sm:$0xff]   ;;  %v9571_v28 = vld [vmem:[%s12348_s2 + $0x88] sm:$0xff]   ;;  %s10380_s11 = scalar_lea.vmem %s12346_s0, %s8627_s10  ;;  %v9573_v30 = vld [vmem:[%s12348_s2] sm:$0xff]   ;;  %v12374_v48 = vmov 0  ;;  %v12377_v60 = vmov 0  ;;  %vm332_vm6 = vcmask 1040384  }
  0x5a   : > { %8746 = vmatprep.subr.bf16.mxu1 %v9558_v15  ;;  %v9574_v31 = vld [vmem:[%s12348_s2 + $0xc0] sm:$0xff]   ;;  %v483_v34 = vld [vmem:[%s10380_s11 + $0x8] sm:$0xf]  ;;  %v484_v35 = vld [vmem:[%s10380_s11 + $0xc] sm:$0x1]  ;;  %vm3731_vm11 = vcmask 1043456  }
  0x5b   : > { %8659 = vmatpush3.bf16.msra.mxu0 %v9557_v14  ;;  %v481_v32 = vld [vmem:[%s10380_s11] sm:$0xf]  ;;  %v482_v33 = vld [vmem:[%s10380_s11 + $0x4] sm:$0x1]  ;;  %546 = vst [vmem:[#allocation2 + $0x24] sm:$0xf] %v483_v34  ;;  %vm10394_vm4 = vmor %vm569_vm0, %vm570_vm1 }
  0x5c   : > { %8660 = vmatprep.subr.bf16.mxu0 %v9560_v17  ;;  %545 = vst [vmem:[#allocation2] sm:$0xf] %v481_v32  ;;  %v573_v36 = vshrl.u32 %v481_v32, 16  ;;  %v576_v37 = vshll.u32 %v481_v32, 16  ;;  %v582_v38 = vshll.u32 %v482_v33, 16  ;;  %v587_v39 = vshrl.u32 %v483_v34, 16  ;;  %vm10406_vm5 = vmor %vm1004_vm2, %vm1005_vm3 }
  0x5d   : > { %8747 = vmatpush3.bf16.msra.mxu1 %v9559_v16  ;;  %1151 = vst [vmem:[#allocation2 + $0xc] sm:$0xf] %v483_v34  ;;  %v590_v40 = vshll.u32 %v483_v34, 16  ;;  %v596_v41 = vshll.u32 %v484_v35, 16  ;;  %v3925_v42 = vld [vmem:[#allocation3] sm:$0xf] }
  0x5e   : > { %8748 = vmatprep.subr.bf16.mxu1 %v9562_v19  ;;  %v575_v43 = vrot.slane %v573_v36, 4  ;;  %v578_v44 = vrot.slane %v576_v37, 5  ;;  %v584_v45 = vrot.slane %v582_v38, 5  ;;  %v589_v46 = vrot.slane %v587_v39, 4  ;;  %v3926_v47 = vld [vmem:[#allocation3 + $0x4] sm:$0x1] }
  0x5f   : > { %8661 = vmatpush3.bf16.msra.mxu0 %v9561_v18  ;;  %v12375_v48 = vsel %vm10394_vm4, 4294967295, %v12374_v48  ;;  %v592_v49 = vrot.slane %v590_v40, 5  ;;  %v598_v50 = vrot.slane %v596_v41, 5  ;;  %v3974_v51 = vshrl.u32 %v3925_v42, 16  ;;  %v9577_v55 = vld [vmem:[%s12348_s2 + $0x80] sm:$0xff]   ;;  %v9578_v59 = vld [vmem:[%s12348_s2 + $0x178] sm:$0xff]  }
  0x60   : > { %8662 = vmatprep.subr.bf16.mxu0 %v9564_v21  ;;  %12376 = vst [vmem:[#allocation13_spill] sm:$0xff] %v12375_v48  ;;  %v3977_v52 = vshll.u32 %v3925_v42, 16  ;;  %v579_v53 = vor.u32 %v578_v44, %v575_v43  ;;  %v3983_v54 = vshll.u32 %v3926_v47, 16  ;;  %v12378_v60 = vsel %vm10406_vm5, 4294967295, %v12377_v60  ;;  %v485_v63 = vld [vmem:[%s10380_s11 + $0x10] sm:$0xf] }
  0x61   : > { %8749 = vmatpush3.bf16.msra.mxu1 %v9563_v20  ;;  %v593_v56 = vor.u32 %v592_v49, %v589_v46  ;;  %v3976_v57 = vrot.slane %v3974_v51, 4  ;;  %12379 = vst [vmem:[#allocation14_spill] sm:$0xff] %v12378_v60  ;;  %v8132_v61 = vrot.slane %v481_v32, 9  ;;  %v1009_v0 = vrot.slane %v482_v33, 5  ;;  %1152 = vst [vmem:[#allocation2 + $0x30] sm:$0xf] %v485_v63 }
  0x62   : > { %8750 = vmatprep.subr.bf16.mxu1 %v9566_v23  ;;  %v3979_v58 = vrot.slane %v3977_v52, 5  ;;  %v580_v62 = vrot.slane %v579_v53, 4  ;;  %v8133_v1 = vrot.slane %v483_v34, 9  ;;  %v1013_v4 = vrot.slane %v484_v35, 5  ;;  %v4357_v5 = vld [vmem:[#allocation3] sm:$0xe] }
  0x63   : > { %8663 = vmatpush3.bf16.msra.mxu0 %v9565_v22  ;;  %v594_v2 = vrot.slane %v593_v56, 4  ;;  %v4358_v6 = vld [vmem:[#allocation3 + $0x4] sm:$0x1]  ;;  %547 = vst [vmem:[#allocation2 + $0x48] sm:$0xf] %v485_v63  ;;  %v1010_v8 = vsel %vm10406_vm5, %v8132_v61, %v1009_v0  ;;  %v10417_v10 = vrot.slane %v3983_v54, 5 }
  0x64   : > { %8664 = vmatprep.subr.bf16.mxu0 %v9568_v25  ;;  %v3980_v3 = vor.u32 %v3979_v58, %v3976_v57  ;;  %1311 = vst [vmem:[#allocation2 + $0x18] sm:$0xf] %v485_v63  ;;  %v585_v7 = vsel %vm10394_vm4, %v580_v62, %v584_v45  ;;  %v1014_v11 = vsel %vm10406_vm5, %v8133_v1, %v1013_v4  ;;  %1127 = vst [vmem:[#allocation2 + $0x8] sm:$0xf] %v1010_v8  ;;  %v486_v13 = vld [vmem:[%s10380_s11 + $0x14] sm:$0x1] }
  0x65   : > { %8751 = vmatpush3.bf16.msra.mxu1 %v9567_v24  ;;  %v599_v9 = vsel %vm10394_vm4, %v594_v2, %v598_v50  ;;  %932 = vst [vmem:[#allocation2 + $0x4] sm:$0xf] %v585_v7  ;;  %v8369_v12 = vrot.slane %v4357_v5, 9  ;;  %v487_v14 = vld [vmem:[%s10380_s11 + $0x18] sm:$0xf]  ;;  %v4455_v15 = vrot.slane %v4358_v6, 5 }
  0x66   : > { %8752 = vmatprep.subr.bf16.mxu1 %v9570_v27  ;;  %933 = vst [vmem:[#allocation2 + $0x28] sm:$0xf] %v599_v9  ;;  %1235 = vst [vmem:[#allocation2 + $0x10] sm:$0xf] %v599_v9  ;;  %v488_v16 = vld [vmem:[%s10380_s11 + $0x1c] sm:$0x1] }
  0x67   : > { %8665 = vmatpush3.bf16.msra.mxu0 %v9569_v26  ;;  %1128 = vst [vmem:[#allocation2 + $0x2c] sm:$0xf] %v1014_v11  ;;  %1287 = vst [vmem:[#allocation2 + $0x14] sm:$0xf] %v1014_v11  ;;  %v601_v17 = vshrl.u32 %v485_v63, 16  ;;  %v604_v18 = vshll.u32 %v485_v63, 16  ;;  %v4456_v38 = vsel %vm10406_vm5, %v8369_v12, %v4455_v15 }
  0x68   : > { %8666 = vmatprep.subr.bf16.mxu0 %v9572_v29  ;;  %548 = vst [vmem:[#allocation2 + $0x6c] sm:$0xf] %v487_v14  ;;  %v610_v19 = vshll.u32 %v486_v13, 16  ;;  %1153 = vst [vmem:[#allocation2 + $0x54] sm:$0xf] %v487_v14  ;;  %v3981_v20 = vrot.slane %v3980_v3, 4 }
  0x69   : > { %8753 = vmatpush3.bf16.msra.mxu1 %v9571_v28  ;;  %1312 = vst [vmem:[#allocation2 + $0x3c] sm:$0xf] %v487_v14  ;;  %v615_v21 = vshrl.u32 %v487_v14, 16  ;;  %v618_v22 = vshll.u32 %v487_v14, 16  ;;  %v624_v23 = vshll.u32 %v488_v16, 16  ;;  %v603_v25 = vrot.slane %v601_v17, 4 }
  0x6a   : > { %8754 = vmatprep.subr.bf16.mxu1 %v9574_v31  ;;  %v10425_v24 = vld [vmem:[%s10380_s11 + $0x20] sm:$0xf]  ;;  %v606_v26 = vrot.slane %v604_v18, 5  ;;  %v612_v27 = vrot.slane %v610_v19, 5  ;;  %v8134_v28 = vrot.slane %v485_v63, 9  ;;  %v1017_v33 = vrot.slane %v486_v13, 5 }
  0x6b   : > { %8667 = vmatpush3.bf16.msra.mxu0 %v9573_v30  ;;  %1154 = vst [vmem:[#allocation2 + $0x78] sm:$0xf] %v10425_v24  ;;  %549 = vst [vmem:[#allocation2 + $0x90] sm:$0xf] %v10425_v24  ;;  %v3877_v29 = vld [vmem:[#allocation3] sm:$0xf]  ;;  %v3986_v37 = vsel %vm10394_vm4, %v3981_v20, %v10417_v10 }
  0x6c   : > { %8828 = vmatprep.subr.bf16.mxu0 %v9578_v59  ;;  %1313 = vst [vmem:[#allocation2 + $0x60] sm:$0xf] %v10425_v24  ;;  %v617_v30 = vrot.slane %v615_v21, 4  ;;  %v620_v31 = vrot.slane %v618_v22, 5  ;;  %v626_v32 = vrot.slane %v624_v23, 5  ;;  %v607_v34 = vor.u32 %v606_v26, %v603_v25  ;;  %v1471_v44 = vld [vmem:[#allocation2] sm:$0xff] }
  0x6d   : > { %8755 = vmatpush3.bf16.msra.mxu1 %v9577_v55  ;;  %v8135_v35 = vrot.slane %v487_v14, 9  ;;  %v1021_v36 = vrot.slane %v488_v16, 5  ;;  %v1018_v40 = vsel %vm10406_vm5, %v8134_v28, %v1017_v33  ;;  %v10438_v41 = vld [vmem:[%s10380_s11 + $0x24] sm:$0x1]  ;;  %v10441_v42 = vld [vmem:[%s10380_s11 + $0x28] sm:$0xf] }
  0x6e   : > { %v621_v39 = vor.u32 %v620_v31, %v617_v30  ;;  %v10444_v43 = vld [vmem:[%s10380_s11 + $0x2c] sm:$0x1]  ;;  %v9581_v46 = vld [vmem:[%s12348_s2 + $0x138] sm:$0xff]   ;;  %v608_v47 = vrot.slane %v607_v34, 4  ;;  %1129 = vst [vmem:[#allocation2 + $0x50] sm:$0xf] %v1018_v40 }
  0x6f   : > { %v1472_v45 = vld [vmem:[#allocation2 + $0x8] sm:$0xff]  ;;  %v1022_v49 = vsel %vm10406_vm5, %v8135_v35, %v1021_v36  ;;  %1288 = vst [vmem:[#allocation2 + $0x38] sm:$0xf] %v1018_v40  ;;  %1447 = vst [vmem:[#allocation2 + $0x20] sm:$0xf] %v1018_v40  ;;  %v629_v50 = vshrl.u32 %v10425_v24, 16 }
  0x70   : > { %550 = vst [vmem:[#allocation2 + $0xb4] sm:$0xf] %v10441_v42  ;;  %v632_v51 = vshll.u32 %v10425_v24, 16  ;;  %1155 = vst [vmem:[#allocation2 + $0x9c] sm:$0xf] %v10441_v42  ;;  %v1476_v52 = vld [vmem:[#allocation2 + $0x24] sm:$0xff]  ;;  %v613_v61 = vsel %vm10394_vm4, %v608_v47, %v612_v27 }
  0x71   : > { %1314 = vst [vmem:[#allocation2 + $0x84] sm:$0xf] %v10441_v42  ;;  %v9575_v53 = vld [vmem:[#allocation2 + $0x4] ss:$36 sps:$4 sm:$0xff]   ;;  %v1477_v54 = vld [vmem:[#allocation2 + $0x2c] sm:$0xff]  ;;  %v622_v55 = vrot.slane %v621_v39, 4  ;;  %v8165_v57 = vcombine.low %v1471_v44, %v1476_v52 }
  0x72   : > { %1130 = vst [vmem:[#allocation2 + $0x74] sm:$0xf] %v1022_v49  ;;  %1289 = vst [vmem:[#allocation2 + $0x5c] sm:$0xf] %v1022_v49  ;;  %v638_v56 = vshll.u32 %v10438_v41, 16  ;;  %v8167_v59 = vcombine.low %v1472_v45, %v1477_v54  ;;  %v9588_v62 = vld [vmem:[%s12348_s2 + $0x170] sm:$0xff]   ;;  %2758 = vmatprep.mubr.bf16.mxu0 %v9575_v53 }
  0x73   : > { %1448 = vst [vmem:[#allocation2 + $0x44] sm:$0xf] %v1022_v49  ;;  %3901 = vst [vmem:[#allocation2] sm:$0xf] %v3877_v29  ;;  %v9579_v58 = vld [vmem:[#allocation2 + $0xc] ss:$36 sps:$4 sm:$0xff]   ;;  %v627_v1 = vsel %vm10394_vm4, %v622_v55, %v626_v32  ;;  %2759 = vmatmul.mubr.bf16.vlgmr.msra.gmra.mxu0 %v8165_v57 }
  0x74   : > { %4333 = vst [vmem:[#allocation2 + $0x4] sm:$0xf] %v3986_v37  ;;  %v631_v63 = vrot.slane %v629_v50, 4  ;;  %v10463_v0 = vld [vmem:[%s10380_s11 + $0x30] sm:$0xf]  ;;  %v634_v2 = vrot.slane %v632_v51, 5  ;;  %2887 = vmatprep.mubr.bf16.mxu1 %v9579_v58  ;;  %8829 = vmatpush3.bf16.msra.mxu0 %v9581_v46 }
  0x75   : > { %4573 = vst [vmem:[#allocation2 + $0x8] sm:$0xf] %v4456_v38  ;;  %934 = vst [vmem:[#allocation2 + $0x4c] sm:$0xf] %v613_v61  ;;  %v640_v3 = vrot.slane %v638_v56, 5  ;;  %v643_v4 = vshrl.u32 %v10441_v42, 16  ;;  %2888 = vmatmul.mubr.bf16.vlgmr.msra.gmra.mxu1 %v8167_v59  ;;  %8830 = vmatprep.subr.bf16.mxu0 %v9588_v62 }
  0x76   : > { %1236 = vst [vmem:[#allocation2 + $0x34] sm:$0xf] %v613_v61  ;;  %1395 = vst [vmem:[#allocation2 + $0x1c] sm:$0xf] %v613_v61  ;;  %v10471_v5 = vld [vmem:[%s10380_s11 + $0x40] sm:$0xf]  ;;  %v635_v12 = vor.u32 %v634_v2, %v631_v63 }
  0x77   : > { %1156 = vst [vmem:[#allocation2 + $0xc0] sm:$0xf] %v10463_v0  ;;  %1315 = vst [vmem:[#allocation2 + $0xa8] sm:$0xf] %v10463_v0  ;;  %v646_v6 = vshll.u32 %v10441_v42, 16  ;;  %v652_v7 = vshll.u32 %v10444_v43, 16 }
  0x78   : > { %935 = vst [vmem:[#allocation2 + $0x70] sm:$0xf] %v627_v1  ;;  %1237 = vst [vmem:[#allocation2 + $0x58] sm:$0xf] %v627_v1  ;;  %v8136_v8 = vrot.slane %v10425_v24, 9  ;;  %v1025_v9 = vrot.slane %v10438_v41, 5 }
  0x79   : > { %1396 = vst [vmem:[#allocation2 + $0x40] sm:$0xf] %v627_v1  ;;  %v10478_v10 = vld [vmem:[%s10380_s11 + $0x44] sm:$0x1]  ;;  %551 = vst [vmem:[#allocation2 + $0xd8] sm:$0xf] %v10471_v5 }
  0x7a   : > { %v9589_v11 = vld [vmem:[%s12348_s2 + $0x130] sm:$0xff]   ;;  %v645_v13 = vrot.slane %v643_v4, 4  ;;  %v8137_v14 = vrot.slane %v10441_v42, 9  ;;  %v1029_v15 = vrot.slane %v10444_v43, 5  ;;  %v10487_v16 = vld [vmem:[%s10380_s11 + $0x48] sm:$0xf]  ;;  %v1026_v19 = vsel %vm10406_vm5, %v8136_v8, %v1025_v9 }
  0x7b   : > { %v648_v17 = vrot.slane %v646_v6, 5  ;;  %v654_v18 = vrot.slane %v652_v7, 5  ;;  %552 = vst [vmem:[#allocation2 + $0xfc] sm:$0xf] %v10487_v16  ;;  %v657_v20 = vshrl.u32 %v10471_v5, 16  ;;  %v9598_v21 = vld [vmem:[%s12348_s2 + $0x168] sm:$0xff]   ;;  %8831 = vmatpush3.bf16.msra.mxu0 %v9589_v11 }
  0x7c   : > { %1157 = vst [vmem:[#allocation2 + $0xe4] sm:$0xf] %v10487_v16  ;;  %v636_v22 = vrot.slane %v635_v12, 4  ;;  %v1030_v23 = vsel %vm10406_vm5, %v8137_v14, %v1029_v15  ;;  %1131 = vst [vmem:[#allocation2 + $0x98] sm:$0xf] %v1026_v19  ;;  %v660_v25 = vshll.u32 %v10471_v5, 16  ;;  %8832 = vmatprep.subr.bf16.mxu0 %v9598_v21 }
  0x7d   : > { %1449 = vst [vmem:[#allocation2 + $0x68] sm:$0xf] %v1026_v19  ;;  %1290 = vst [vmem:[#allocation2 + $0x80] sm:$0xf] %v1026_v19  ;;  %v10500_v24 = vld [vmem:[%s10380_s11 + $0x4c] sm:$0x1]  ;;  %v649_v29 = vor.u32 %v648_v17, %v645_v13 }
  0x7e   : > { %v666_v26 = vshll.u32 %v10478_v10, 16  ;;  %v9585_v27 = vld [vmem:[#allocation2 + $0x54] ss:$36 sps:$4 sm:$0xff]   ;;  %1132 = vst [vmem:[#allocation2 + $0xbc] sm:$0xf] %v1030_v23  ;;  %v659_v30 = vrot.slane %v657_v20, 4  ;;  %v641_v31 = vsel %vm10394_vm4, %v636_v22, %v640_v3 }
  0x7f   : > { %v9587_v28 = vld [vmem:[#allocation2 + $0x50] ss:$36 sps:$4 sm:$0xff]   ;;  %1450 = vst [vmem:[#allocation2 + $0x8c] sm:$0xf] %v1030_v23  ;;  %1291 = vst [vmem:[#allocation2 + $0xa4] sm:$0xf] %v1030_v23  ;;  %2895 = vmatprep.mubr.bf16.mxu1 %v9585_v27 }
  0x80   : > { %v662_v32 = vrot.slane %v660_v25, 5  ;;  %v668_v33 = vrot.slane %v666_v26, 5  ;;  %v671_v34 = vshrl.u32 %v10487_v16, 16  ;;  %v3937_v35 = vld [vmem:[#allocation3 + $0x40] sm:$0xf]  ;;  %v9601_v36 = vld [vmem:[%s12348_s2 + $0x128] sm:$0xff]   ;;  %2896 = vmatmul.mubr.bf16.gmra.mxu1 %v9587_v28 }
  0x81   : > { %v650_v37 = vrot.slane %v649_v29, 4  ;;  %936 = vst [vmem:[#allocation2 + $0x94] sm:$0xf] %v641_v31  ;;  %1238 = vst [vmem:[#allocation2 + $0x7c] sm:$0xf] %v641_v31  ;;  %v674_v38 = vshll.u32 %v10487_v16, 16  ;;  %8833 = vmatpush3.bf16.msra.mxu0 %v9601_v36 }
  0x82   : > { %1397 = vst [vmem:[#allocation2 + $0x64] sm:$0xf] %v641_v31  ;;  %v680_v39 = vshll.u32 %v10500_v24, 16  ;;  %v3938_v40 = vld [vmem:[#allocation3 + $0x44] sm:$0x1]  ;;  %v663_v43 = vor.u32 %v662_v32, %v659_v30  ;;  %v673_v44 = vrot.slane %v671_v34, 4 }
  0x83   : > { %v9582_v41 = vld [vmem:[#allocation2 + $0x4c] ss:$36 sps:$4 sm:$0xff]   ;;  %v655_v45 = vsel %vm10394_vm4, %v650_v37, %v654_v18  ;;  %v676_v46 = vrot.slane %v674_v38, 5  ;;  %v4058_v49 = vshrl.u32 %v3937_v35, 16  ;;  %v9608_v50 = vld [vmem:[%s12348_s2 + $0x160] sm:$0xff]   ;;  %v4061_v52 = vshll.u32 %v3937_v35, 16 }
  0x84   : > { %v9584_v42 = vld [vmem:[#allocation2 + $0x48] ss:$36 sps:$4 sm:$0xff]   ;;  %v682_v47 = vrot.slane %v680_v39, 5  ;;  %2766 = vmatprep.mubr.bf16.mxu0 %v9582_v41  ;;  %937 = vst [vmem:[#allocation2 + $0xb8] sm:$0xf] %v655_v45  ;;  %v664_v51 = vrot.slane %v663_v43, 4  ;;  %8834 = vmatprep.subr.bf16.mxu0 %v9608_v50 }
  0x85   : > { %1239 = vst [vmem:[#allocation2 + $0xa0] sm:$0xf] %v655_v45  ;;  %1398 = vst [vmem:[#allocation2 + $0x88] sm:$0xf] %v655_v45  ;;  %v4067_v53 = vshll.u32 %v3938_v40, 16  ;;  %v8138_v54 = vrot.slane %v10471_v5, 9  ;;  %2767 = vmatmul.mubr.bf16.gmra.mxu0 %v9584_v42  ;;  %v677_v56 = vor.u32 %v676_v46, %v673_v44 }
  0x86   : > { %v9609_v55 = vld [vmem:[%s12348_s2 + $0x120] sm:$0xff]   ;;  %v4060_v57 = vrot.slane %v4058_v49, 4  ;;  %v10522_v58 = vld [vmem:[%s10380_s11 + $0x50] sm:$0xf]  ;;  %v1033_v59 = vrot.slane %v10478_v10, 5  ;;  %v8139_v61 = vrot.slane %v10487_v16, 9  ;;  %v669_v1 = vsel %vm10394_vm4, %v664_v51, %v668_v33 }
  0x87   : > { %v9593_v62 = vld [vmem:[#allocation2 + $0x9c] ss:$36 sps:$4 sm:$0xff]   ;;  %v4063_v2 = vrot.slane %v4061_v52, 5  ;;  %1158 = vst [vmem:[#allocation2 + $0x108] sm:$0xf] %v10522_v58  ;;  %v678_v3 = vrot.slane %v677_v56, 4  ;;  %8835 = vmatpush3.bf16.msra.mxu0 %v9609_v55 }
  0x88   : > { %v9595_v63 = vld [vmem:[#allocation2 + $0x98] ss:$36 sps:$4 sm:$0xff]   ;;  %553 = vst [vmem:[#allocation2 + $0x120] sm:$0xf] %v10522_v58  ;;  %1317 = vst [vmem:[#allocation2 + $0xf0] sm:$0xf] %v10522_v58  ;;  %v1034_v5 = vsel %vm10406_vm5, %v8138_v54, %v1033_v59  ;;  %2903 = vmatprep.mubr.bf16.mxu1 %v9593_v62 }
  0x89   : > { %938 = vst [vmem:[#allocation2 + $0xdc] sm:$0xf] %v669_v1  ;;  %v10531_v4 = vrot.slane %v4067_v53, 5  ;;  %v1037_v6 = vrot.slane %v10500_v24, 5  ;;  %v10536_v7 = vld [vmem:[#allocation3 + $0x40] sm:$0xe]  ;;  %v4064_v9 = vor.u32 %v4063_v2, %v4060_v57  ;;  %v683_v12 = vsel %vm10394_vm4, %v678_v3, %v682_v47  ;;  %2904 = vmatmul.mubr.bf16.gmra.mxu1 %v9595_v63 }
  0x8a   : > { %v9618_v8 = vld [vmem:[%s12348_s2 + $0x158] sm:$0xff]   ;;  %1133 = vst [vmem:[#allocation2 + $0xe0] sm:$0xf] %v1034_v5  ;;  %v4370_v10 = vld [vmem:[#allocation3 + $0x44] sm:$0x1]  ;;  %v8375_v11 = vrot.slane %v10536_v7, 9 }
  0x8b   : > { %v1038_v13 = vsel %vm10406_vm5, %v8139_v61, %v1037_v6  ;;  %v4479_v14 = vrot.slane %v4370_v10, 5  ;;  %v502_v15 = vld [vmem:[%s10380_s11 + $0x54] sm:$0x1]  ;;  %v685_v16 = vshrl.u32 %v10522_v58, 16  ;;  %v9621_v17 = vld [vmem:[%s12348_s2 + $0x118] sm:$0xff]   ;;  %v4065_v18 = vrot.slane %v4064_v9, 4  ;;  %8836 = vmatprep.subr.bf16.mxu0 %v9618_v8 }
  0x8c   : > { %939 = vst [vmem:[#allocation2 + $0x100] sm:$0xf] %v683_v12  ;;  %1241 = vst [vmem:[#allocation2 + $0xe8] sm:$0xf] %v683_v12  ;;  %v503_v19 = vld [vmem:[%s10380_s11 + $0x58] sm:$0xf]  ;;  %8837 = vmatpush3.bf16.msra.mxu0 %v9621_v17 }
  0x8d   : > { %1134 = vst [vmem:[#allocation2 + $0x104] sm:$0xf] %v1038_v13  ;;  %1293 = vst [vmem:[#allocation2 + $0xec] sm:$0xf] %v1038_v13  ;;  %v504_v20 = vld [vmem:[%s10380_s11 + $0x5c] sm:$0x1]  ;;  %v4070_v26 = vsel %vm10394_vm4, %v4065_v18, %v10531_v4  ;;  %v4480_v49 = vsel %vm10406_vm5, %v8375_v11, %v4479_v14 }
  0x8e   : > { %v688_v21 = vshll.u32 %v10522_v58, 16  ;;  %v9628_v22 = vld [vmem:[%s12348_s2 + $0x150] sm:$0xff]   ;;  %554 = vst [vmem:[#allocation2 + $0x144] sm:$0xf] %v503_v19  ;;  %v687_v25 = vrot.slane %v685_v16, 4  ;;  %v694_v28 = vshll.u32 %v502_v15, 16 }
  0x8f   : > { %v9590_v23 = vld [vmem:[#allocation2 + $0x94] ss:$36 sps:$4 sm:$0xff]   ;;  %1159 = vst [vmem:[#allocation2 + $0x12c] sm:$0xf] %v503_v19  ;;  %1318 = vst [vmem:[#allocation2 + $0x114] sm:$0xf] %v503_v19  ;;  %8838 = vmatprep.subr.bf16.mxu0 %v9628_v22 }
  0x90   : > { %v9592_v24 = vld [vmem:[#allocation2 + $0x90] ss:$36 sps:$4 sm:$0xff]   ;;  %v690_v27 = vrot.slane %v688_v21, 5  ;;  %v699_v29 = vshrl.u32 %v503_v19, 16  ;;  %v10561_v30 = vld [vmem:[%s10380_s11 + $0x60] sm:$0xf]  ;;  %2774 = vmatprep.mubr.bf16.mxu0 %v9590_v23 }
  0x91   : > { %v9636_v31 = vld [vmem:[%s12348_s2 + $0x1f8] sm:$0xff]   ;;  %v3883_v32 = vld [vmem:[#allocation3 + $0x40] sm:$0xf]  ;;  %v702_v33 = vshll.u32 %v503_v19, 16  ;;  %v708_v34 = vshll.u32 %v504_v20, 16  ;;  %v8140_v35 = vrot.slane %v10522_v58, 9  ;;  %2775 = vmatmul.mubr.bf16.gmra.mxu0 %v9592_v24 }
  0x92   : > { %v1041_v36 = vrot.slane %v502_v15, 5  ;;  %1160 = vst [vmem:[#allocation2 + $0x150] sm:$0xf] %v10561_v30  ;;  %555 = vst [vmem:[#allocation2 + $0x168] sm:$0xf] %v10561_v30  ;;  %v9629_v37 = vld [vmem:[%s12348_s2 + $0x110] sm:$0xff]   ;;  %v691_v39 = vor.u32 %v690_v27, %v687_v25  ;;  %8916 = vmatprep.subr.bf16.mxu1 %v9636_v31 }
  0x93   : > { %1319 = vst [vmem:[#allocation2 + $0x138] sm:$0xf] %v10561_v30  ;;  %v10573_v38 = vld [vmem:[#allocation2 + $0xd8] sm:$0xff]  ;;  %v696_v40 = vrot.slane %v694_v28, 5  ;;  %v701_v41 = vrot.slane %v699_v29, 4  ;;  %v8141_v42 = vrot.slane %v503_v19, 9  ;;  %8839 = vmatpush3.bf16.msra.mxu0 %v9629_v37 }
  0x94   : > { %v1502_v43 = vld [vmem:[#allocation2 + $0xe0] sm:$0xff]  ;;  %v704_v44 = vrot.slane %v702_v33, 5  ;;  %v710_v45 = vrot.slane %v708_v34, 5  ;;  %v1042_v46 = vsel %vm10406_vm5, %v8140_v35, %v1041_v36  ;;  %v1045_v47 = vrot.slane %v504_v20, 5  ;;  %3907 = vst [vmem:[#allocation2 + $0xd8] sm:$0xf] %v3883_v32 }
  0x95   : > { %v692_v50 = vrot.slane %v691_v39, 4  ;;  %1135 = vst [vmem:[#allocation2 + $0x128] sm:$0xf] %v1042_v46  ;;  %1294 = vst [vmem:[#allocation2 + $0x110] sm:$0xf] %v1042_v46  ;;  %v713_v52 = vshrl.u32 %v10561_v30, 16 }
  0x96   : > { %1453 = vst [vmem:[#allocation2 + $0xf8] sm:$0xf] %v1042_v46  ;;  %v10580_v51 = vld [vmem:[%s10380_s11 + $0x64] sm:$0x1]  ;;  %v1506_v53 = vld [vmem:[#allocation2 + $0xfc] sm:$0xff]  ;;  %v705_v56 = vor.u32 %v704_v44, %v701_v41  ;;  %v1046_v57 = vsel %vm10406_vm5, %v8141_v42, %v1045_v47  ;;  %v716_v58 = vshll.u32 %v10561_v30, 16 }
  0x97   : > { %v9596_v54 = vld [vmem:[#allocation2 + $0xdc] ss:$36 sps:$4 sm:$0xff]   ;;  %v1507_v55 = vld [vmem:[#allocation2 + $0x104] sm:$0xff]  ;;  %v722_v59 = vshll.u32 %v10580_v51, 16  ;;  %v8192_v61 = vcombine.low %v10573_v38, %v1506_v53  ;;  %v697_v1 = vsel %vm10394_vm4, %v692_v50, %v696_v40  ;;  %1136 = vst [vmem:[#allocation2 + $0x14c] sm:$0xf] %v1046_v57 }
  0x98   : > { %4339 = vst [vmem:[#allocation2 + $0xdc] sm:$0xf] %v4070_v26  ;;  %v9599_v62 = vld [vmem:[#allocation2 + $0xe4] ss:$36 sps:$4 sm:$0xff]   ;;  %v8194_v63 = vcombine.low %v1502_v43, %v1507_v55  ;;  %1295 = vst [vmem:[#allocation2 + $0x134] sm:$0xf] %v1046_v57  ;;  %2782 = vmatprep.mubr.bf16.mxu0 %v9596_v54 }
  0x99   : > { %1454 = vst [vmem:[#allocation2 + $0x11c] sm:$0xf] %v1046_v57  ;;  %v507_v2 = vld [vmem:[%s10380_s11 + $0x68] sm:$0xf]  ;;  %v508_v3 = vld [vmem:[%s10380_s11 + $0x6c] sm:$0x1]  ;;  %2911 = vmatprep.mubr.bf16.mxu1 %v9599_v62  ;;  %2783 = vmatmul.mubr.bf16.gmra.mxu0 %v8192_v61 }
  0x9a   : > { %4579 = vst [vmem:[#allocation2 + $0xe0] sm:$0xf] %v4480_v49  ;;  %v706_v4 = vrot.slane %v705_v56, 4  ;;  %940 = vst [vmem:[#allocation2 + $0x124] sm:$0xf] %v697_v1  ;;  %v715_v5 = vrot.slane %v713_v52, 4  ;;  %2912 = vmatmul.mubr.bf16.gmra.mxu1 %v8194_v63 }
  0x9b   : > { %1242 = vst [vmem:[#allocation2 + $0x10c] sm:$0xf] %v697_v1  ;;  %1401 = vst [vmem:[#allocation2 + $0xf4] sm:$0xf] %v697_v1  ;;  %v718_v6 = vrot.slane %v716_v58, 5  ;;  %v724_v7 = vrot.slane %v722_v59, 5 }
  0x9c   : > { %556 = vst [vmem:[#allocation2 + $0x18c] sm:$0xf] %v507_v2  ;;  %1161 = vst [vmem:[#allocation2 + $0x174] sm:$0xf] %v507_v2  ;;  %v10593_v8 = vld [vmem:[%s10380_s11 + $0x70] sm:$0xf]  ;;  %v711_v14 = vsel %vm10394_vm4, %v706_v4, %v710_v45 }
  0x9d   : > { %1320 = vst [vmem:[#allocation2 + $0x15c] sm:$0xf] %v507_v2  ;;  %v727_v9 = vshrl.u32 %v507_v2, 16  ;;  %v730_v10 = vshll.u32 %v507_v2, 16  ;;  %v736_v11 = vshll.u32 %v508_v3, 16  ;;  %v8142_v12 = vrot.slane %v10561_v30, 9 }
  0x9e   : > { %1162 = vst [vmem:[#allocation2 + $0x198] sm:$0xf] %v10593_v8  ;;  %1321 = vst [vmem:[#allocation2 + $0x180] sm:$0xf] %v10593_v8  ;;  %v10599_v13 = vld [vmem:[%s10380_s11 + $0x80] sm:$0xf]  ;;  %v719_v15 = vor.u32 %v718_v6, %v715_v5 }
  0x9f   : > { %v1049_v16 = vrot.slane %v10580_v51, 5  ;;  %v8143_v17 = vrot.slane %v507_v2, 9  ;;  %v10605_v18 = vld [vmem:[%s10380_s11 + $0x84] sm:$0x1]  ;;  %v10608_v19 = vld [vmem:[%s10380_s11 + $0x88] sm:$0xf] }
  0xa0   : > { %557 = vst [vmem:[#allocation2 + $0x1b0] sm:$0xf] %v10599_v13  ;;  %941 = vst [vmem:[#allocation2 + $0x148] sm:$0xf] %v711_v14  ;;  %v729_v20 = vrot.slane %v727_v9, 4  ;;  %v732_v21 = vrot.slane %v730_v10, 5 }
  0xa1   : > { %1243 = vst [vmem:[#allocation2 + $0x130] sm:$0xf] %v711_v14  ;;  %1402 = vst [vmem:[#allocation2 + $0x118] sm:$0xf] %v711_v14  ;;  %v738_v22 = vrot.slane %v736_v11, 5  ;;  %v1053_v23 = vrot.slane %v508_v3, 5  ;;  %v1050_v25 = vsel %vm10406_vm5, %v8142_v12, %v1049_v16 }
  0xa2   : > { %558 = vst [vmem:[#allocation2 + $0x1d4] sm:$0xf] %v10608_v19  ;;  %1163 = vst [vmem:[#allocation2 + $0x1bc] sm:$0xf] %v10608_v19  ;;  %v720_v24 = vrot.slane %v719_v15, 4  ;;  %v741_v27 = vshrl.u32 %v10599_v13, 16  ;;  %v733_v29 = vor.u32 %v732_v21, %v729_v20 }
  0xa3   : > { %v10616_v26 = vld [vmem:[%s10380_s11 + $0x8c] sm:$0x1]  ;;  %v744_v28 = vshll.u32 %v10599_v13, 16  ;;  %v1054_v30 = vsel %vm10406_vm5, %v8143_v17, %v1053_v23  ;;  %1137 = vst [vmem:[#allocation2 + $0x170] sm:$0xf] %v1050_v25  ;;  %v750_v31 = vshll.u32 %v10605_v18, 16 }
  0xa4   : > { %1296 = vst [vmem:[#allocation2 + $0x158] sm:$0xf] %v1050_v25  ;;  %1455 = vst [vmem:[#allocation2 + $0x140] sm:$0xf] %v1050_v25  ;;  %v755_v32 = vshrl.u32 %v10608_v19, 16  ;;  %v725_v37 = vsel %vm10394_vm4, %v720_v24, %v724_v7  ;;  %v743_v38 = vrot.slane %v741_v27, 4 }
  0xa5   : > { %v3949_v33 = vld [vmem:[#allocation3 + $0x80] sm:$0xf]  ;;  %v3950_v34 = vld [vmem:[#allocation3 + $0x84] sm:$0x1]  ;;  %v9605_v35 = vld [vmem:[#allocation2 + $0x12c] ss:$36 sps:$4 sm:$0xff]  }
  0xa6   : > { %v9607_v36 = vld [vmem:[#allocation2 + $0x128] ss:$36 sps:$4 sm:$0xff]   ;;  %1138 = vst [vmem:[#allocation2 + $0x194] sm:$0xf] %v1054_v30  ;;  %1297 = vst [vmem:[#allocation2 + $0x17c] sm:$0xf] %v1054_v30  ;;  %2919 = vmatprep.mubr.bf16.mxu1 %v9605_v35 }
  0xa7   : > { %1456 = vst [vmem:[#allocation2 + $0x164] sm:$0xf] %v1054_v30  ;;  %v734_v39 = vrot.slane %v733_v29, 4  ;;  %942 = vst [vmem:[#allocation2 + $0x16c] sm:$0xf] %v725_v37  ;;  %v746_v40 = vrot.slane %v744_v28, 5  ;;  %2920 = vmatmul.mubr.bf16.gmra.mxu1 %v9607_v36 }
  0xa8   : > { %1244 = vst [vmem:[#allocation2 + $0x154] sm:$0xf] %v725_v37  ;;  %1403 = vst [vmem:[#allocation2 + $0x13c] sm:$0xf] %v725_v37  ;;  %v752_v41 = vrot.slane %v750_v31, 5  ;;  %v757_v42 = vrot.slane %v755_v32, 4 }
  0xa9   : > { %v9637_v43 = vld [vmem:[%s12348_s2 + $0x1b8] sm:$0xff]   ;;  %v758_v44 = vshll.u32 %v10608_v19, 16  ;;  %v764_v45 = vshll.u32 %v10616_v26, 16  ;;  %v4142_v46 = vshrl.u32 %v3949_v33, 16  ;;  %v4145_v47 = vshll.u32 %v3949_v33, 16  ;;  %s12164_s13 = scalar_lea.vmem [#allocation9], %s9478_s30 }
  0xaa   : > { %v739_v49 = vsel %vm10394_vm4, %v734_v39, %v738_v22  ;;  %v747_v50 = vor.u32 %v746_v40, %v743_v38  ;;  %v4151_v51 = vshll.u32 %v3950_v34, 16  ;;  %v10634_v52 = vld [vmem:[%s10380_s11 + $0x90] sm:$0xf]  ;;  %v8144_v53 = vrot.slane %v10599_v13, 9  ;;  %8917 = vmatpush3.bf16.msra.mxu1 %v9637_v43  ;;  %v9602_v54 = vld [vmem:[#allocation2 + $0x124] ss:$36 sps:$4 sm:$0xff]  }
  0xab   : > { %v9604_v55 = vld [vmem:[#allocation2 + $0x120] ss:$36 sps:$4 sm:$0xff]   ;;  %943 = vst [vmem:[#allocation2 + $0x190] sm:$0xf] %v739_v49  ;;  %1245 = vst [vmem:[#allocation2 + $0x178] sm:$0xf] %v739_v49  ;;  %2790 = vmatprep.mubr.bf16.mxu0 %v9602_v54 }
  0xac   : > { %1404 = vst [vmem:[#allocation2 + $0x160] sm:$0xf] %v739_v49  ;;  %v760_v56 = vrot.slane %v758_v44, 5  ;;  %1164 = vst [vmem:[#allocation2 + $0x1e0] sm:$0xf] %v10634_v52  ;;  %v748_v57 = vrot.slane %v747_v50, 4  ;;  %2791 = vmatmul.mubr.bf16.gmra.mxu0 %v9604_v55 }
  0xad   : > { %559 = vst [vmem:[#allocation2 + $0x1f8] sm:$0xf] %v10634_v52  ;;  %1323 = vst [vmem:[#allocation2 + $0x1c8] sm:$0xf] %v10634_v52  ;;  %v766_v58 = vrot.slane %v764_v45, 5  ;;  %v4144_v59 = vrot.slane %v4142_v46, 4 }
  0xae   : > { %v4147_v61 = vrot.slane %v4145_v47, 5  ;;  %v10640_v62 = vld [vmem:[#allocation3 + $0x80] sm:$0xe]  ;;  %v761_v63 = vor.u32 %v760_v56, %v757_v42  ;;  %v10642_v1 = vrot.slane %v4151_v51, 5  ;;  %v1057_v2 = vrot.slane %v10605_v18, 5  ;;  %s9479_s30 = smul.u32 3072, %s10178_s25 }
  0xaf   : > { %v8145_v3 = vrot.slane %v10608_v19, 9  ;;  %v4382_v4 = vld [vmem:[#allocation3 + $0x84] sm:$0x1]  ;;  %v9613_v5 = vld [vmem:[#allocation2 + $0x174] ss:$36 sps:$4 sm:$0xff]   ;;  %v753_v7 = vsel %vm10394_vm4, %v748_v57, %v752_v41  ;;  %v1061_v10 = vrot.slane %v10616_v26, 5 }
  0xb0   : > { %v9615_v6 = vld [vmem:[#allocation2 + $0x170] ss:$36 sps:$4 sm:$0xff]   ;;  %v4148_v9 = vor.u32 %v4147_v61, %v4144_v59  ;;  %v762_v11 = vrot.slane %v761_v63, 4  ;;  %944 = vst [vmem:[#allocation2 + $0x1b4] sm:$0xf] %v753_v7  ;;  %v1058_v12 = vsel %vm10406_vm5, %v8144_v53, %v1057_v2  ;;  %v8381_v13 = vrot.slane %v10640_v62, 9  ;;  %2927 = vmatprep.mubr.bf16.mxu1 %v9613_v5  ;;  %s12299_s16 = scalar_lea.hbm %s12352_s6, %s9479_s30 }
  0xb1   : > { %v4503_v14 = vrot.slane %v4382_v4, 5  ;;  %v1062_v16 = vsel %vm10406_vm5, %v8145_v3, %v1061_v10  ;;  %1139 = vst [vmem:[#allocation2 + $0x1b8] sm:$0xf] %v1058_v12  ;;  %v518_v17 = vld [vmem:[%s10380_s11 + $0x94] sm:$0x1]  ;;  %v769_v18 = vshrl.u32 %v10634_v52, 16  ;;  %2928 = vmatmul.mubr.bf16.gmra.mxu1 %v9615_v6 }
  0xb2   : > { %v10652_v15 = vrot.slane %v4148_v9, 4  ;;  %v767_v19 = vsel %vm10394_vm4, %v762_v11, %v766_v58  ;;  %1140 = vst [vmem:[#allocation2 + $0x1dc] sm:$0xf] %v1062_v16  ;;  %1299 = vst [vmem:[#allocation2 + $0x1c4] sm:$0xf] %v1062_v16  ;;  %v772_v22 = vshll.u32 %v10634_v52, 16 }
  0xb3   : > { %v519_v20 = vld [vmem:[%s10380_s11 + $0x98] sm:$0xf]  ;;  %v520_v21 = vld [vmem:[%s10380_s11 + $0x9c] sm:$0x1]  ;;  %v778_v23 = vshll.u32 %v518_v17, 16  ;;  %v771_v26 = vrot.slane %v769_v18, 4  ;;  %v4504_v43 = vsel %vm10406_vm5, %v8381_v13, %v4503_v14 }
  0xb4   : > { %v9610_v24 = vld [vmem:[#allocation2 + $0x16c] ss:$36 sps:$4 sm:$0xff]   ;;  %945 = vst [vmem:[#allocation2 + $0x1d8] sm:$0xf] %v767_v19  ;;  %1247 = vst [vmem:[#allocation2 + $0x1c0] sm:$0xf] %v767_v19  ;;  %v4154_v46 = vsel %vm10394_vm4, %v10652_v15, %v10642_v1 }
  0xb5   : > { %v9612_v25 = vld [vmem:[#allocation2 + $0x168] ss:$36 sps:$4 sm:$0xff]   ;;  %560 = vst [vmem:[#allocation2 + $0x21c] sm:$0xf] %v519_v20  ;;  %1165 = vst [vmem:[#allocation2 + $0x204] sm:$0xf] %v519_v20  ;;  %2798 = vmatprep.mubr.bf16.mxu0 %v9610_v24 }
  0xb6   : > { %1324 = vst [vmem:[#allocation2 + $0x1ec] sm:$0xf] %v519_v20  ;;  %v774_v27 = vrot.slane %v772_v22, 5  ;;  %v780_v28 = vrot.slane %v778_v23, 5  ;;  %v783_v29 = vshrl.u32 %v519_v20, 16  ;;  %v786_v30 = vshll.u32 %v519_v20, 16  ;;  %2799 = vmatmul.mubr.bf16.gmra.mxu0 %v9612_v25 }
  0xb7   : > { %v10664_v31 = vld [vmem:[%s10380_s11 + $0xa0] sm:$0xf]  ;;  %v792_v32 = vshll.u32 %v520_v21, 16  ;;  %v8146_v33 = vrot.slane %v10634_v52, 9  ;;  %v1065_v34 = vrot.slane %v518_v17, 5  ;;  %v8147_v35 = vrot.slane %v519_v20, 9 }
  0xb8   : > { %1166 = vst [vmem:[#allocation2 + $0x228] sm:$0xf] %v10664_v31  ;;  %561 = vst [vmem:[#allocation2 + $0x240] sm:$0xf] %v10664_v31  ;;  %v3889_v36 = vld [vmem:[#allocation3 + $0x80] sm:$0xf]  ;;  %v775_v37 = vor.u32 %v774_v27, %v771_v26 }
  0xb9   : > { %1325 = vst [vmem:[#allocation2 + $0x210] sm:$0xf] %v10664_v31  ;;  %v785_v38 = vrot.slane %v783_v29, 4  ;;  %v788_v39 = vrot.slane %v786_v30, 5  ;;  %v1069_v40 = vrot.slane %v520_v21, 5  ;;  %v9638_v41 = vld [vmem:[%s12348_s2 + $0x1f0] sm:$0xff]   ;;  %v1066_v45 = vsel %vm10406_vm5, %v8146_v33, %v1065_v34 }
  0xba   : > { %v10673_v42 = vld [vmem:[#allocation2 + $0x1b0] sm:$0xff]  ;;  %v794_v44 = vrot.slane %v792_v32, 5  ;;  %v1532_v47 = vld [vmem:[#allocation2 + $0x1b8] sm:$0xff]  ;;  %v776_v49 = vrot.slane %v775_v37, 4  ;;  %1141 = vst [vmem:[#allocation2 + $0x200] sm:$0xf] %v1066_v45  ;;  %8918 = vmatprep.subr.bf16.mxu1 %v9638_v41 }
  0xbb   : > { %v789_v50 = vor.u32 %v788_v39, %v785_v38  ;;  %v1070_v51 = vsel %vm10406_vm5, %v8147_v35, %v1069_v40  ;;  %1300 = vst [vmem:[#allocation2 + $0x1e8] sm:$0xf] %v1066_v45  ;;  %1459 = vst [vmem:[#allocation2 + $0x1d0] sm:$0xf] %v1066_v45  ;;  %v522_v52 = vld [vmem:[%s10380_s11 + $0xa4] sm:$0x1] }
  0xbc   : > { %v10687_v53 = vld [vmem:[%s10380_s11 + $0xa8] sm:$0xf]  ;;  %v1537_v54 = vld [vmem:[#allocation2 + $0x1dc] sm:$0xff]  ;;  %1142 = vst [vmem:[#allocation2 + $0x224] sm:$0xf] %v1070_v51  ;;  %v797_v57 = vshrl.u32 %v10664_v31, 16  ;;  %v781_v62 = vsel %vm10394_vm4, %v776_v49, %v780_v28 }
  0xbd   : > { %v9619_v55 = vld [vmem:[#allocation2 + $0x1bc] ss:$36 sps:$4 sm:$0xff]   ;;  %1301 = vst [vmem:[#allocation2 + $0x20c] sm:$0xf] %v1070_v51  ;;  %1460 = vst [vmem:[#allocation2 + $0x1f4] sm:$0xf] %v1070_v51  ;;  %v8221_v61 = vcombine.low %v1532_v47, %v1537_v54 }
  0xbe   : > { %v524_v56 = vld [vmem:[%s10380_s11 + $0xac] sm:$0x1]  ;;  %562 = vst [vmem:[#allocation2 + $0x264] sm:$0xf] %v10687_v53  ;;  %1167 = vst [vmem:[#allocation2 + $0x24c] sm:$0xf] %v10687_v53  ;;  %2935 = vmatprep.mubr.bf16.mxu1 %v9619_v55 }
  0xbf   : > { %1326 = vst [vmem:[#allocation2 + $0x234] sm:$0xf] %v10687_v53  ;;  %v1536_v58 = vld [vmem:[#allocation2 + $0x1d4] sm:$0xff]  ;;  %4585 = vst [vmem:[#allocation2 + $0x1b8] sm:$0xf] %v4504_v43  ;;  %v790_v63 = vrot.slane %v789_v50, 4  ;;  %2936 = vmatmul.mubr.bf16.gmra.mxu1 %v8221_v61 }
  0xc0   : > { %v9616_v59 = vld [vmem:[#allocation2 + $0x1b4] ss:$36 sps:$4 sm:$0xff]   ;;  %v800_v1 = vshll.u32 %v10664_v31, 16  ;;  %3913 = vst [vmem:[#allocation2 + $0x1b0] sm:$0xf] %v3889_v36  ;;  %v8219_v3 = vcombine.low %v10673_v42, %v1536_v58  ;;  %v799_v4 = vrot.slane %v797_v57, 4 }
  0xc1   : > { %v9641_v2 = vld [vmem:[%s12348_s2 + $0x1b0] sm:$0xff]   ;;  %4345 = vst [vmem:[#allocation2 + $0x1b4] sm:$0xf] %v4154_v46  ;;  %946 = vst [vmem:[#allocation2 + $0x1fc] sm:$0xf] %v781_v62  ;;  %v806_v5 = vshll.u32 %v522_v52, 16  ;;  %2806 = vmatprep.mubr.bf16.mxu0 %v9616_v59  ;;  %v795_v10 = vsel %vm10394_vm4, %v790_v63, %v794_v44 }
  0xc2   : > { %1248 = vst [vmem:[#allocation2 + $0x1e4] sm:$0xf] %v781_v62  ;;  %1407 = vst [vmem:[#allocation2 + $0x1cc] sm:$0xf] %v781_v62  ;;  %v811_v6 = vshrl.u32 %v10687_v53, 16  ;;  %v9642_v9 = vld [vmem:[%s12348_s2 + $0x148] sm:$0xff]   ;;  %8919 = vmatpush3.bf16.msra.mxu1 %v9641_v2  ;;  %2807 = vmatmul.mubr.bf16.gmra.mxu0 %v8219_v3 }
  0xc3   : > { %v10703_v7 = vld [vmem:[%s10380_s11 + $0xb0] sm:$0xf]  ;;  %v802_v11 = vrot.slane %v800_v1, 5  ;;  %v814_v12 = vshll.u32 %v10687_v53, 16  ;;  %v820_v13 = vshll.u32 %v524_v56, 16  ;;  %v9645_v14 = vld [vmem:[%s12348_s2 + $0x108] sm:$0xff]   ;;  %8840 = vmatprep.subr.bf16.mxu0 %v9642_v9 }
  0xc4   : > { %1168 = vst [vmem:[#allocation2 + $0x270] sm:$0xf] %v10703_v7  ;;  %1327 = vst [vmem:[#allocation2 + $0x258] sm:$0xf] %v10703_v7  ;;  %v808_v15 = vrot.slane %v806_v5, 5  ;;  %v813_v16 = vrot.slane %v811_v6, 4  ;;  %8841 = vmatpush3.bf16.msra.mxu0 %v9645_v14 }
  0xc5   : > { %947 = vst [vmem:[#allocation2 + $0x220] sm:$0xf] %v795_v10  ;;  %1249 = vst [vmem:[#allocation2 + $0x208] sm:$0xf] %v795_v10  ;;  %v8148_v17 = vrot.slane %v10664_v31, 9  ;;  %v1073_v18 = vrot.slane %v522_v52, 5  ;;  %v803_v19 = vor.u32 %v802_v11, %v799_v4 }
  0xc6   : > { %1408 = vst [vmem:[#allocation2 + $0x1f0] sm:$0xf] %v795_v10  ;;  %v816_v20 = vrot.slane %v814_v12, 5  ;;  %v822_v21 = vrot.slane %v820_v13, 5  ;;  %v8149_v22 = vrot.slane %v10687_v53, 9  ;;  %v9646_v23 = vld [vmem:[%s12348_s2 + $0x1e8] sm:$0xff]  }
  0xc7   : > { %v1074_v24 = vsel %vm10406_vm5, %v8148_v17, %v1073_v18  ;;  %v1077_v25 = vrot.slane %v524_v56, 5  ;;  %v9625_v26 = vld [vmem:[#allocation2 + $0x204] ss:$36 sps:$4 sm:$0xff]   ;;  %v804_v28 = vrot.slane %v803_v19, 4  ;;  %8920 = vmatprep.subr.bf16.mxu1 %v9646_v23  ;;  %v10726_v31 = vld [vmem:[%s10380_s11 + $0xc0] sm:$0xf] }
  0xc8   : > { %v9627_v27 = vld [vmem:[#allocation2 + $0x200] ss:$36 sps:$4 sm:$0xff]   ;;  %v817_v29 = vor.u32 %v816_v20, %v813_v16  ;;  %1143 = vst [vmem:[#allocation2 + $0x248] sm:$0xf] %v1074_v24  ;;  %1302 = vst [vmem:[#allocation2 + $0x230] sm:$0xf] %v1074_v24  ;;  %2943 = vmatprep.mubr.bf16.mxu1 %v9625_v26 }
  0xc9   : > { %1461 = vst [vmem:[#allocation2 + $0x218] sm:$0xf] %v1074_v24  ;;  %v1078_v30 = vsel %vm10406_vm5, %v8149_v22, %v1077_v25  ;;  %v10729_v32 = vld [vmem:[%s10380_s11 + $0xc4] sm:$0x1]  ;;  %v809_v33 = vsel %vm10394_vm4, %v804_v28, %v808_v15  ;;  %v10734_v35 = vld [vmem:[%s10380_s11 + $0xc8] sm:$0xf]  ;;  %2944 = vmatmul.mubr.bf16.gmra.mxu1 %v9627_v27 }
  0xca   : > { %v818_v34 = vrot.slane %v817_v29, 4  ;;  %1144 = vst [vmem:[#allocation2 + $0x26c] sm:$0xf] %v1078_v30  ;;  %1303 = vst [vmem:[#allocation2 + $0x254] sm:$0xf] %v1078_v30  ;;  %v825_v37 = vshrl.u32 %v10726_v31, 16 }
  0xcb   : > { %1462 = vst [vmem:[#allocation2 + $0x23c] sm:$0xf] %v1078_v30  ;;  %563 = vst [vmem:[#allocation2 + $0x288] sm:$0xf] %v10726_v31  ;;  %v10738_v36 = vld [vmem:[%s10380_s11 + $0xcc] sm:$0x1] }
  0xcc   : > { %948 = vst [vmem:[#allocation2 + $0x244] sm:$0xf] %v809_v33  ;;  %1250 = vst [vmem:[#allocation2 + $0x22c] sm:$0xf] %v809_v33  ;;  %v828_v38 = vshll.u32 %v10726_v31, 16  ;;  %v834_v39 = vshll.u32 %v10729_v32, 16  ;;  %v823_v43 = vsel %vm10394_vm4, %v818_v34, %v822_v21 }
  0xcd   : > { %1409 = vst [vmem:[#allocation2 + $0x214] sm:$0xf] %v809_v33  ;;  %564 = vst [vmem:[#allocation2 + $0x2ac] sm:$0xf] %v10734_v35  ;;  %v839_v40 = vshrl.u32 %v10734_v35, 16  ;;  %v842_v44 = vshll.u32 %v10734_v35, 16 }
  0xce   : > { %1169 = vst [vmem:[#allocation2 + $0x294] sm:$0xf] %v10734_v35  ;;  %v9622_v41 = vld [vmem:[#allocation2 + $0x1fc] ss:$36 sps:$4 sm:$0xff]   ;;  %949 = vst [vmem:[#allocation2 + $0x268] sm:$0xf] %v823_v43 }
  0xcf   : > { %v9624_v42 = vld [vmem:[#allocation2 + $0x1f8] ss:$36 sps:$4 sm:$0xff]   ;;  %1251 = vst [vmem:[#allocation2 + $0x250] sm:$0xf] %v823_v43  ;;  %1410 = vst [vmem:[#allocation2 + $0x238] sm:$0xf] %v823_v43  ;;  %2814 = vmatprep.mubr.bf16.mxu0 %v9622_v41 }
  0xd0   : > { %v827_v45 = vrot.slane %v825_v37, 4  ;;  %v830_v46 = vrot.slane %v828_v38, 5  ;;  %v836_v47 = vrot.slane %v834_v39, 5  ;;  %v841_v49 = vrot.slane %v839_v40, 4  ;;  %v3961_v50 = vld [vmem:[#allocation3 + $0xc0] sm:$0xf]  ;;  %2815 = vmatmul.mubr.bf16.gmra.mxu0 %v9624_v42 }
  0xd1   : > { %v844_v51 = vrot.slane %v842_v44, 5  ;;  %v848_v52 = vshll.u32 %v10738_v36, 16  ;;  %v3962_v53 = vld [vmem:[#allocation3 + $0xc4] sm:$0x1]  ;;  %v4226_v54 = vshrl.u32 %v3961_v50, 16  ;;  %v4229_v55 = vshll.u32 %v3961_v50, 16 }
  0xd2   : > { %v831_v56 = vor.u32 %v830_v46, %v827_v45  ;;  %v4235_v57 = vshll.u32 %v3962_v53, 16  ;;  %v9647_v63 = vld [vmem:[%s12348_s2 + $0x1a8] sm:$0xff]   ;;  %v8150_v9 = vrot.slane %v10726_v31, 9  ;;  %v10757_v11 = vld [vmem:[%s10380_s11 + $0xd0] sm:$0xf]  ;;  %v1081_v12 = vrot.slane %v10729_v32, 5 }
  0xd3   : > { %v845_v58 = vor.u32 %v844_v51, %v841_v49  ;;  %v850_v59 = vrot.slane %v848_v52, 5  ;;  %v4228_v61 = vrot.slane %v4226_v54, 4  ;;  %v4231_v62 = vrot.slane %v4229_v55, 5  ;;  %v9633_v1 = vld [vmem:[#allocation2 + $0x24c] ss:$36 sps:$4 sm:$0xff]   ;;  %8921 = vmatpush3.bf16.msra.mxu1 %v9647_v63  ;;  %v9648_v15 = vld [vmem:[%s12348_s2 + $0x1e0] sm:$0xff]  }
  0xd4   : > { %v9635_v2 = vld [vmem:[#allocation2 + $0x248] ss:$36 sps:$4 sm:$0xff]   ;;  %v832_v3 = vrot.slane %v831_v56, 4  ;;  %v4237_v6 = vrot.slane %v4235_v57, 5  ;;  %2951 = vmatprep.mubr.bf16.mxu1 %v9633_v1  ;;  %v8151_v13 = vrot.slane %v10734_v35, 9  ;;  %v1085_v14 = vrot.slane %v10738_v36, 5  ;;  %8922 = vmatprep.subr.bf16.mxu1 %v9648_v15 }
  0xd5   : > { %v846_v4 = vrot.slane %v845_v58, 4  ;;  %v4232_v5 = vor.u32 %v4231_v62, %v4228_v61  ;;  %v9630_v16 = vld [vmem:[#allocation2 + $0x244] ss:$36 sps:$4 sm:$0xff]   ;;  %2952 = vmatmul.mubr.bf16.gmra.mxu1 %v9635_v2  ;;  %1170 = vst [vmem:[#allocation2 + $0x2b8] sm:$0xf] %v10757_v11  ;;  %v1082_v20 = vsel %vm10406_vm5, %v8150_v9, %v1081_v12  ;;  %v853_v31 = vshrl.u32 %v10757_v11, 16 }
  0xd6   : > { %v837_v10 = vsel %vm10394_vm4, %v832_v3, %v836_v47  ;;  %v9632_v17 = vld [vmem:[#allocation2 + $0x240] ss:$36 sps:$4 sm:$0xff]   ;;  %565 = vst [vmem:[#allocation2 + $0x2d0] sm:$0xf] %v10757_v11  ;;  %1329 = vst [vmem:[#allocation2 + $0x2a0] sm:$0xf] %v10757_v11  ;;  %v1086_v21 = vsel %vm10406_vm5, %v8151_v13, %v1085_v14  ;;  %2822 = vmatprep.mubr.bf16.mxu0 %v9630_v16 }
  0xd7   : > { %v851_v18 = vsel %vm10394_vm4, %v846_v4, %v850_v59  ;;  %950 = vst [vmem:[#allocation2 + $0x28c] sm:$0xf] %v837_v10  ;;  %v4233_v19 = vrot.slane %v4232_v5, 4  ;;  %v4393_v22 = vld [vmem:[#allocation3 + $0xc0] sm:$0xe]  ;;  %v856_v32 = vshll.u32 %v10757_v11, 16 }
  0xd8   : > { %951 = vst [vmem:[#allocation2 + $0x2b0] sm:$0xf] %v851_v18  ;;  %1253 = vst [vmem:[#allocation2 + $0x298] sm:$0xf] %v851_v18  ;;  %v4394_v23 = vld [vmem:[#allocation3 + $0xc4] sm:$0x1]  ;;  %2823 = vmatmul.mubr.bf16.gmra.mxu0 %v9632_v17 }
  0xd9   : > { %1145 = vst [vmem:[#allocation2 + $0x290] sm:$0xf] %v1082_v20  ;;  %1146 = vst [vmem:[#allocation2 + $0x2b4] sm:$0xf] %v1086_v21  ;;  %v8387_v24 = vrot.slane %v4393_v22, 9  ;;  %v4527_v25 = vrot.slane %v4394_v23, 5  ;;  %v4238_v28 = vsel %vm10394_vm4, %v4233_v19, %v4237_v6 }
  0xda   : > { %1305 = vst [vmem:[#allocation2 + $0x29c] sm:$0xf] %v1086_v21  ;;  %v3895_v26 = vld [vmem:[#allocation3 + $0xc0] sm:$0xf]  ;;  %v534_v27 = vld [vmem:[%s10380_s11 + $0xd4] sm:$0x1] }
  0xdb   : > { %v535_v29 = vld [vmem:[%s10380_s11 + $0xd8] sm:$0xf]  ;;  %v536_v30 = vld [vmem:[%s10380_s11 + $0xdc] sm:$0x1]  ;;  %v862_v33 = vshll.u32 %v534_v27, 16  ;;  %v4528_v38 = vsel %vm10406_vm5, %v8387_v24, %v4527_v25  ;;  %v855_v39 = vrot.slane %v853_v31, 4 }
  0xdc   : > { %566 = vst [vmem:[#allocation2 + $0x2f4] sm:$0xf] %v535_v29  ;;  %v867_v34 = vshrl.u32 %v535_v29, 16  ;;  %v870_v35 = vshll.u32 %v535_v29, 16  ;;  %v876_v36 = vshll.u32 %v536_v30, 16  ;;  %v858_v40 = vrot.slane %v856_v32, 5 }
  0xdd   : > { %1171 = vst [vmem:[#allocation2 + $0x2dc] sm:$0xf] %v535_v29  ;;  %1330 = vst [vmem:[#allocation2 + $0x2c4] sm:$0xf] %v535_v29  ;;  %v9651_v41 = vld [vmem:[%s12348_s2 + $0x1a0] sm:$0xff]   ;;  %v864_v44 = vrot.slane %v862_v33, 5 }
  0xde   : > { %v1561_v37 = vld [vmem:[#allocation2 + $0x288] sm:$0xff]  ;;  %v869_v45 = vrot.slane %v867_v34, 4  ;;  %v872_v46 = vrot.slane %v870_v35, 5  ;;  %v9643_v51 = vld [vmem:[#allocation2 + $0x294] ss:$36 sps:$4 sm:$0xff]   ;;  %v859_v52 = vor.u32 %v858_v40, %v855_v39  ;;  %v878_v53 = vrot.slane %v876_v36, 5  ;;  %8923 = vmatpush3.bf16.msra.mxu1 %v9651_v41 }
  0xdf   : > { %v1566_v42 = vld [vmem:[#allocation2 + $0x2ac] sm:$0xff]  ;;  %3919 = vst [vmem:[#allocation2 + $0x288] sm:$0xf] %v3895_v26  ;;  %v8152_v54 = vrot.slane %v10757_v11, 9  ;;  %v10788_v57 = vld [vmem:[%s10380_s11 + $0xe0] sm:$0xf]  ;;  %2959 = vmatprep.mubr.bf16.mxu1 %v9643_v51 }
  0xe0   : > { %v9639_v43 = vld [vmem:[#allocation2 + $0x28c] ss:$36 sps:$4 sm:$0xff]   ;;  %v8246_v47 = vcombine.low %v1561_v37, %v1566_v42  ;;  %v1567_v50 = vld [vmem:[#allocation2 + $0x2b4] sm:$0xff]  ;;  %v873_v56 = vor.u32 %v872_v46, %v869_v45  ;;  %v1089_v58 = vrot.slane %v534_v27, 5  ;;  %v8153_v59 = vrot.slane %v535_v29, 9  ;;  %v9658_v4 = vld [vmem:[%s12348_s2 + $0x140] sm:$0xff]  }
  0xe1   : > { %4351 = vst [vmem:[#allocation2 + $0x28c] sm:$0xf] %v4238_v28  ;;  %v1562_v49 = vld [vmem:[#allocation2 + $0x290] sm:$0xff]  ;;  %2830 = vmatprep.mubr.bf16.mxu0 %v9639_v43  ;;  %v860_v61 = vrot.slane %v859_v52, 4  ;;  %v1093_v62 = vrot.slane %v536_v30, 5  ;;  %v9656_v63 = vld [vmem:[%s12348_s2 + $0x1d8] sm:$0xff]   ;;  %8842 = vmatprep.subr.bf16.mxu0 %v9658_v4 }
  0xe2   : > { %4591 = vst [vmem:[#allocation2 + $0x290] sm:$0xf] %v4528_v38  ;;  %v8248_v55 = vcombine.low %v1562_v49, %v1567_v50  ;;  %2831 = vmatmul.mubr.bf16.gmra.mxu0 %v8246_v47  ;;  %1172 = vst [vmem:[#allocation2 + $0x300] sm:$0xf] %v10788_v57  ;;  %v9657_v1 = vld [vmem:[%s12348_s2 + $0x198] sm:$0xff]   ;;  %v874_v2 = vrot.slane %v873_v56, 4  ;;  %v1090_v3 = vsel %vm10406_vm5, %v8152_v54, %v1089_v58  ;;  %8924 = vmatprep.subr.bf16.mxu1 %v9656_v63 }
  0xe3   : > { %567 = vst [vmem:[#allocation2 + $0x318] sm:$0xf] %v10788_v57  ;;  %1331 = vst [vmem:[#allocation2 + $0x2e8] sm:$0xf] %v10788_v57  ;;  %v865_v5 = vsel %vm10394_vm4, %v860_v61, %v864_v44  ;;  %v1094_v6 = vsel %vm10406_vm5, %v8153_v59, %v1093_v62  ;;  %8925 = vmatpush3.bf16.msra.mxu1 %v9657_v1  ;;  %v9659_v10 = vld [vmem:[%s12348_s2 + $0x100] sm:$0xff]   ;;  %v881_v11 = vshrl.u32 %v10788_v57, 16 }
  0xe4   : > { %2960 = vmatmul.mubr.bf16.gmra.mxu1 %v8248_v55  ;;  %1147 = vst [vmem:[#allocation2 + $0x2d8] sm:$0xf] %v1090_v3  ;;  %1306 = vst [vmem:[#allocation2 + $0x2c0] sm:$0xf] %v1090_v3  ;;  %v879_v9 = vsel %vm10394_vm4, %v874_v2, %v878_v53  ;;  %v9660_v12 = vld [vmem:[%s12348_s2 + $0x1d0] sm:$0xff]   ;;  %v884_v14 = vshll.u32 %v10788_v57, 16  ;;  %8843 = vmatpush3.bf16.msra.mxu0 %v9659_v10 }
  0xe5   : > { %1465 = vst [vmem:[#allocation2 + $0x2a8] sm:$0xf] %v1090_v3  ;;  %952 = vst [vmem:[#allocation2 + $0x2d4] sm:$0xf] %v865_v5  ;;  %v538_v13 = vld [vmem:[%s10380_s11 + $0xe4] sm:$0x1]  ;;  %8926 = vmatprep.subr.bf16.mxu1 %v9660_v12 }
  0xe6   : > { %1254 = vst [vmem:[#allocation2 + $0x2bc] sm:$0xf] %v865_v5  ;;  %1413 = vst [vmem:[#allocation2 + $0x2a4] sm:$0xf] %v865_v5  ;;  %v539_v15 = vld [vmem:[%s10380_s11 + $0xe8] sm:$0xf] }
  0xe7   : > { %1148 = vst [vmem:[#allocation2 + $0x2fc] sm:$0xf] %v1094_v6  ;;  %1307 = vst [vmem:[#allocation2 + $0x2e4] sm:$0xf] %v1094_v6  ;;  %v540_v16 = vld [vmem:[%s10380_s11 + $0xec] sm:$0x1] }
  0xe8   : > { %1466 = vst [vmem:[#allocation2 + $0x2cc] sm:$0xf] %v1094_v6  ;;  %953 = vst [vmem:[#allocation2 + $0x2f8] sm:$0xf] %v879_v9  ;;  %v883_v17 = vrot.slane %v881_v11, 4  ;;  %v890_v18 = vshll.u32 %v538_v13, 16 }
  0xe9   : > { %1255 = vst [vmem:[#allocation2 + $0x2e0] sm:$0xf] %v879_v9  ;;  %1414 = vst [vmem:[#allocation2 + $0x2c8] sm:$0xf] %v879_v9  ;;  %v886_v19 = vrot.slane %v884_v14, 5  ;;  %v895_v20 = vshrl.u32 %v539_v15, 16 }
  0xea   : > { %568 = vst [vmem:[#allocation2 + $0x33c] sm:$0xf] %v539_v15  ;;  %v898_v21 = vshll.u32 %v539_v15, 16  ;;  %v904_v22 = vshll.u32 %v540_v16, 16  ;;  %1173 = vst [vmem:[#allocation2 + $0x324] sm:$0xf] %v539_v15 }
  0xeb   : > { %1332 = vst [vmem:[#allocation2 + $0x30c] sm:$0xf] %v539_v15  ;;  %v892_v23 = vrot.slane %v890_v18, 5  ;;  %v9663_v24 = vld [vmem:[%s12348_s2 + $0x190] sm:$0xff]   ;;  %v887_v26 = vor.u32 %v886_v19, %v883_v17  ;;  %v897_v27 = vrot.slane %v895_v20, 4  ;;  %v9668_v30 = vld [vmem:[%s12348_s2 + $0x1c8] sm:$0xff]  }
  0xec   : > { %v10825_v25 = vld [vmem:[%s10380_s11 + $0xf0] sm:$0xf]  ;;  %v900_v28 = vrot.slane %v898_v21, 5  ;;  %v906_v29 = vrot.slane %v904_v22, 5  ;;  %8927 = vmatpush3.bf16.msra.mxu1 %v9663_v24  ;;  %v8154_v31 = vrot.slane %v10788_v57, 9  ;;  %v1097_v32 = vrot.slane %v538_v13, 5 }
  0xed   : > { %1174 = vst [vmem:[#allocation2 + $0x348] sm:$0xf] %v10825_v25  ;;  %1333 = vst [vmem:[#allocation2 + $0x330] sm:$0xf] %v10825_v25  ;;  %v8155_v33 = vrot.slane %v539_v15, 9  ;;  %v1101_v34 = vrot.slane %v540_v16, 5  ;;  %8928 = vmatprep.subr.bf16.mxu1 %v9668_v30 }
  0xee   : > { %v9669_v35 = vld [vmem:[%s12348_s2 + $0x188] sm:$0xff]   ;;  %v9653_v36 = vld [vmem:[#allocation2 + $0x2dc] ss:$36 sps:$4 sm:$0xff]   ;;  %v888_v37 = vrot.slane %v887_v26, 4  ;;  %v901_v38 = vor.u32 %v900_v28, %v897_v27  ;;  %v1176_v39 = vshrl.u32 %v10463_v0, 16  ;;  %v1098_v42 = vsel %vm10406_vm5, %v8154_v31, %v1097_v32  ;;  %s8025_s15 = sshll.u32 %s12164_s13, 4  ;;  %s12302_s15 = int_to_ptr.vmem [resolvable:$true] %s8025_s15 }
  0xef   : > { %v9649_v40 = vld [vmem:[#allocation2 + $0x2d4] ss:$36 sps:$4 sm:$0xff]   ;;  %v1102_v43 = vsel %vm10406_vm5, %v8155_v33, %v1101_v34  ;;  %v1179_v44 = vshll.u32 %v10463_v0, 16  ;;  %2967 = vmatprep.mubr.bf16.mxu1 %v9653_v36  ;;  %1149 = vst [vmem:[#allocation2 + $0x320] sm:$0xf] %v1098_v42  ;;  %v9670_v49 = vld [vmem:[%s12348_s2 + $0x1c0] sm:$0xff]  }
  0xf0   : > { %v9652_v41 = vld [vmem:[#allocation2 + $0x2d0] ss:$36 sps:$4 sm:$0xff]   ;;  %v9655_v45 = vld [vmem:[#allocation2 + $0x2d8] ss:$36 sps:$4 sm:$0xff]   ;;  %v893_v46 = vsel %vm10394_vm4, %v888_v37, %v892_v23  ;;  %v902_v47 = vrot.slane %v901_v38, 4  ;;  %2838 = vmatprep.mubr.bf16.mxu0 %v9649_v40  ;;  %8929 = vmatpush3.bf16.msra.mxu1 %v9669_v35  ;;  %v9673_v51 = vld [vmem:[%s12348_s2 + $0x180] sm:$0xff]  }
  0xf1   : > { %1150 = vst [vmem:[#allocation2 + $0x344] sm:$0xf] %v1102_v43  ;;  %1308 = vst [vmem:[#allocation2 + $0x308] sm:$0xf] %v1098_v42  ;;  %2839 = vmatmul.mubr.bf16.gmra.mxu0 %v9652_v41  ;;  %2968 = vmatmul.mubr.bf16.gmra.mxu1 %v9655_v45  ;;  %v9675_v52 = vld [vmem:[%s12348_s2 + $0x238] sm:$0xff]   ;;  %v1178_v53 = vrot.slane %v1176_v39, 4 }
  0xf2   : > { %1309 = vst [vmem:[#allocation2 + $0x32c] sm:$0xf] %v1102_v43  ;;  %1467 = vst [vmem:[#allocation2 + $0x2f0] sm:$0xf] %v1098_v42  ;;  %v907_v50 = vsel %vm10394_vm4, %v902_v47, %v906_v29  ;;  %8930 = vmatprep.subr.bf16.mxu1 %v9670_v49  ;;  %v1181_v54 = vrot.slane %v1179_v44, 5  ;;  %9396 = vmatprep.subr.bf16.mxu0 %v9675_v52  ;;  %v1190_v61 = vshrl.u32 %v10593_v8, 16 }
  0xf3   : > { %1468 = vst [vmem:[#allocation2 + $0x314] sm:$0xf] %v1102_v43  ;;  %954 = vst [vmem:[#allocation2 + $0x31c] sm:$0xf] %v893_v46  ;;  %v9676_v55 = vld [vmem:[#allocation2 + $0x1c] ss:$36 sps:$4 sm:$0xff]  }
  0xf4   : > { %1256 = vst [vmem:[#allocation2 + $0x304] sm:$0xf] %v893_v46  ;;  %1415 = vst [vmem:[#allocation2 + $0x2ec] sm:$0xf] %v893_v46  ;;  %8931 = vmatpush3.bf16.msra.mxu1 %v9673_v51  ;;  %v9665_v56 = vld [vmem:[#allocation2 + $0x324] ss:$36 sps:$4 sm:$0xff]   ;;  %v1182_v59 = vor.u32 %v1181_v54, %v1178_v53 }
  0xf5   : > { %955 = vst [vmem:[#allocation2 + $0x340] sm:$0xf] %v907_v50  ;;  %1257 = vst [vmem:[#allocation2 + $0x328] sm:$0xf] %v907_v50  ;;  %2975 = vmatprep.mubr.bf16.mxu1 %v9665_v56  ;;  %v9671_v58 = vld [vmem:[#allocation2 + $0x14] ss:$36 sps:$4 sm:$0xff]  }
  0xf6   : > { %1416 = vst [vmem:[#allocation2 + $0x310] sm:$0xf] %v907_v50  ;;  %v1193_v62 = vshll.u32 %v10593_v8, 16  ;;  %v9664_v1 = vld [vmem:[#allocation2 + $0x318] ss:$36 sps:$4 sm:$0xff]   ;;  %v8156_v2 = vrot.slane %v10463_v0, 9 }
  0xf7   : > { %v9678_v3 = vld [vmem:[#allocation2 + $0x18] ss:$36 sps:$4 sm:$0xff]   ;;  %v494_v4 = vld [vmem:[%s10380_s11 + $0x34] sm:$0x1]  ;;  %v1183_v5 = vrot.slane %v1182_v59, 4  ;;  %v1192_v6 = vrot.slane %v1190_v61, 4 }
  0xf8   : > { %v9667_v57 = vld [vmem:[#allocation2 + $0x320] ss:$36 sps:$4 sm:$0xff]   ;;  %v1195_v9 = vrot.slane %v1193_v62, 5  ;;  %v1185_v10 = vshll.u32 %v494_v4, 16  ;;  %v1269_v11 = vrot.slane %v494_v4, 5  ;;  %v9685_v29 = vld [vmem:[%s12348_s2 + $0x230] sm:$0xff]  }
  0xf9   : > { %2976 = vmatmul.mubr.bf16.gmra.mxu1 %v9667_v57  ;;  %v10860_v12 = vld [vmem:[%s10380_s11 + $0x38] sm:$0xf]  ;;  %v10863_v13 = vld [vmem:[%s10380_s11 + $0x3c] sm:$0x1]  ;;  %v9682_v14 = vld [vmem:[#allocation2 + $0x64] ss:$36 sps:$4 sm:$0xff]  }
  0xfa   : > { %3145 = vmatprep.mubr.bf16.mxu1 %v9676_v55  ;;  %1316 = vst [vmem:[#allocation2 + $0xcc] sm:$0xf] %v10860_v12  ;;  %v1336_v15 = vshrl.u32 %v10860_v12, 16  ;;  %v1339_v0 = vshll.u32 %v10860_v12, 16  ;;  %v1345_v16 = vshll.u32 %v10863_v13, 16  ;;  %v1187_v18 = vrot.slane %v1185_v10, 5 }
  0xfb   : > { %v9674_v17 = vld [vmem:[#allocation2 + $0x10] ss:$36 sps:$4 sm:$0xff]   ;;  %v1270_v19 = vsel %vm10406_vm5, %v8156_v2, %v1269_v11  ;;  %v5376_v20 = vld [vmem:[#allocation3 + $0x38] sm:$0xf]  ;;  %v5377_v23 = vld [vmem:[#allocation3 + $0x3c] sm:$0x1]  ;;  %v1196_v33 = vor.u32 %v1195_v9, %v1192_v6 }
  0xfc   : > { %v9661_v63 = vld [vmem:[#allocation2 + $0x31c] ss:$36 sps:$4 sm:$0xff]   ;;  %1292 = vst [vmem:[#allocation2 + $0xc8] sm:$0xf] %v1270_v19  ;;  %1451 = vst [vmem:[#allocation2 + $0xb0] sm:$0xf] %v1270_v19  ;;  %v1188_v27 = vsel %vm10394_vm4, %v1183_v5, %v1187_v18 }
  0xfd   : > { %2846 = vmatprep.mubr.bf16.mxu0 %v9661_v63  ;;  %v1338_v21 = vrot.slane %v1336_v15, 4  ;;  %v1341_v22 = vrot.slane %v1339_v0, 5  ;;  %v5485_v24 = vshrl.u32 %v5376_v20, 16  ;;  %v9679_v26 = vld [vmem:[#allocation2 + $0x5c] ss:$36 sps:$4 sm:$0xff]   ;;  %v5488_v28 = vshll.u32 %v5376_v20, 16 }
  0xfe   : > { %2847 = vmatmul.mubr.bf16.gmra.mxu0 %v9664_v1  ;;  %1240 = vst [vmem:[#allocation2 + $0xc4] sm:$0xf] %v1188_v27  ;;  %1399 = vst [vmem:[#allocation2 + $0xac] sm:$0xf] %v1188_v27  ;;  %v1347_v31 = vrot.slane %v1345_v16, 5  ;;  %v5494_v35 = vshll.u32 %v5377_v23, 16 }
  0xff   : > { %3016 = vmatprep.mubr.bf16.mxu0 %v9671_v58  ;;  %v1342_v30 = vor.u32 %v1341_v22, %v1338_v21  ;;  %v5487_v32 = vrot.slane %v5485_v24, 4  ;;  %v5490_v34 = vrot.slane %v5488_v28, 5  ;;  %v8157_v37 = vrot.slane %v10593_v8, 9  ;;  %v9684_v38 = vld [vmem:[#allocation2 + $0x60] ss:$36 sps:$4 sm:$0xff]   ;;  %v9694_v44 = vld [vmem:[%s12348_s2 + $0x228] sm:$0xff]  }
 0x100   : > { %v1204_v40 = vshrl.u32 %v10703_v7, 16  ;;  %v1207_v41 = vshll.u32 %v10703_v7, 16  ;;  %v9681_v42 = vld [vmem:[#allocation2 + $0x58] ss:$36 sps:$4 sm:$0xff]   ;;  %v1197_v45 = vrot.slane %v1196_v33, 4  ;;  %v5496_v46 = vrot.slane %v5494_v35, 5 }
 0x101   : > { %3146 = vmatmul.mubr.bf16.vlgmr.msra.gmra.mxu1 %v9678_v3  ;;  %v1343_v36 = vrot.slane %v1342_v30, 4  ;;  %v5491_v39 = vor.u32 %v5490_v34, %v5487_v32  ;;  %v510_v47 = vld [vmem:[%s10380_s11 + $0x74] sm:$0x1]  ;;  %v10886_v51 = vld [vmem:[%s10380_s11 + $0x78] sm:$0xf]  ;;  %v9704_v56 = vld [vmem:[%s12348_s2 + $0x220] sm:$0xff]  }
 0x102   : > { %3153 = vmatprep.mubr.bf16.mxu1 %v9682_v14  ;;  %v1199_v49 = vshll.u32 %v510_v47, 16  ;;  %v1273_v50 = vrot.slane %v510_v47, 5  ;;  %1322 = vst [vmem:[#allocation2 + $0x1a4] sm:$0xf] %v10886_v51  ;;  %v1350_v53 = vshrl.u32 %v10886_v51, 16  ;;  %v1206_v54 = vrot.slane %v1204_v40, 4 }
 0x103   : > { %v1348_v43 = vsel %vm10394_vm4, %v1343_v36, %v1347_v31  ;;  %v5492_v8 = vrot.slane %v5491_v39, 4  ;;  %v1209_v55 = vrot.slane %v1207_v41, 5  ;;  %v10896_v59 = vld [vmem:[%s10380_s11 + $0x7c] sm:$0x1]  ;;  %v1353_v61 = vshll.u32 %v10886_v51, 16  ;;  %s8011_s25 = scalar_lea.sflag [#allocation6], %s10273_s20 }
 0x104   : > { %1400 = vst [vmem:[#allocation2 + $0xd0] sm:$0xf] %v1348_v43  ;;  %v1201_v57 = vrot.slane %v1199_v49, 5  ;;  %v1274_v58 = vsel %vm10406_vm5, %v8157_v37, %v1273_v50  ;;  %v1352_v63 = vrot.slane %v1350_v53, 4  ;;  %v1359_v1 = vshll.u32 %v10896_v59, 16  ;;  %v9713_v0 = vld [vmem:[%s12348_s2 + $0x218] sm:$0xff]  }
 0x105   : > { %v5497_v62 = vsel %vm10394_vm4, %v5492_v8, %v5496_v46  ;;  %1298 = vst [vmem:[#allocation2 + $0x1a0] sm:$0xf] %v1274_v58  ;;  %1457 = vst [vmem:[#allocation2 + $0x188] sm:$0xf] %v1274_v58  ;;  %v5388_v2 = vld [vmem:[#allocation3 + $0x78] sm:$0xf]  ;;  %v1210_v21 = vor.u32 %v1209_v55, %v1206_v54 }
 0x106   : > { %3017 = vmatmul.mubr.bf16.vlgmr.msra.gmra.mxu0 %v9674_v17  ;;  %v1494_v3 = vld [vmem:[#allocation2 + $0xa8] sm:$0xff]  ;;  %v5323_v4 = vld [vmem:[#allocation3 + $0x38] sm:$0xf]  ;;  %v1202_v5 = vsel %vm10394_vm4, %v1197_v45, %v1201_v57  ;;  %v1355_v6 = vrot.slane %v1353_v61, 5  ;;  %v5569_v9 = vshrl.u32 %v5388_v2, 16  ;;  %v5572_v10 = vshll.u32 %v5388_v2, 16 }
 0x107   : > { %9397 = vmatpush3.bf16.msra.mxu0 %v9675_v52  ;;  %3024 = vmatprep.mubr.bf16.mxu0 %v9679_v26  ;;  %v9686_v52 = vld [vmem:[#allocation2 + $0xa4] ss:$36 sps:$4 sm:$0xff]   ;;  %v9695_v11 = vld [vmem:[#allocation2 + $0xf4] ss:$36 sps:$4 sm:$0xff]   ;;  %1246 = vst [vmem:[#allocation2 + $0x19c] sm:$0xf] %v1202_v5 }
 0x108   : > { %9398 = vmatprep.subr.bf16.mxu0 %v9685_v29  ;;  %1405 = vst [vmem:[#allocation2 + $0x184] sm:$0xf] %v1202_v5  ;;  %v1361_v14 = vrot.slane %v1359_v1, 5  ;;  %v5389_v15 = vld [vmem:[#allocation3 + $0x7c] sm:$0x1]  ;;  %v1356_v18 = vor.u32 %v1355_v6, %v1352_v63  ;;  %v5571_v19 = vrot.slane %v5569_v9, 4 }
 0x109   : > { %3154 = vmatmul.mubr.bf16.gmra.mxu1 %v9684_v38  ;;  %v5574_v20 = vrot.slane %v5572_v10, 5  ;;  %v9688_v23 = vld [vmem:[#allocation2 + $0xa0] ss:$36 sps:$4 sm:$0xff]   ;;  %v5578_v27 = vshll.u32 %v5389_v15, 16  ;;  %v9691_v28 = vld [vmem:[#allocation2 + $0xec] ss:$36 sps:$4 sm:$0xff]  }
 0x10a   : > { %v1357_v24 = vrot.slane %v1356_v18, 4  ;;  %v1211_v30 = vrot.slane %v1210_v21, 4  ;;  %v8158_v31 = vrot.slane %v10703_v7, 9  ;;  %v1218_v32 = vshrl.u32 %v10825_v25, 16  ;;  %v9697_v33 = vld [vmem:[#allocation2 + $0xf0] ss:$36 sps:$4 sm:$0xff]  }
 0x10b   : > { %9399 = vmatpush3.bf16.msra.mxu0 %v9685_v29  ;;  %v1499_v16 = vld [vmem:[#allocation2 + $0xcc] sm:$0xff]  ;;  %v5575_v26 = vor.u32 %v5574_v20, %v5571_v19  ;;  %v5580_v35 = vrot.slane %v5578_v27, 5  ;;  %v1221_v36 = vshll.u32 %v10825_v25, 16  ;;  %v8160_v37 = vrot.slane %v10860_v12, 9  ;;  %v9701_v38 = vld [vmem:[#allocation2 + $0x13c] ss:$36 sps:$4 sm:$0xff]  }
 0x10c   : > { %9400 = vmatprep.subr.bf16.mxu0 %v9694_v44  ;;  %v9689_v17 = vld [vmem:[#allocation2 + $0xac] ss:$36 sps:$4 sm:$0xff]   ;;  %5347 = vst [vmem:[#allocation2 + $0xcc] sm:$0xf] %v5323_v4  ;;  %v8189_v22 = vcombine.low %v1494_v3, %v1499_v16  ;;  %v1362_v29 = vsel %vm10394_vm4, %v1357_v24, %v1361_v14  ;;  %v526_v39 = vld [vmem:[%s10380_s11 + $0xb4] sm:$0x1] }
 0x10d   : > { %5779 = vst [vmem:[#allocation2 + $0xd0] sm:$0xf] %v5497_v62  ;;  %3161 = vmatprep.mubr.bf16.mxu1 %v9689_v17  ;;  %1406 = vst [vmem:[#allocation2 + $0x1a8] sm:$0xf] %v1362_v29  ;;  %v5576_v34 = vrot.slane %v5575_v26, 4  ;;  %v9723_v7 = vld [vmem:[%s12348_s2 + $0x210] sm:$0xff]  }
 0x10e   : > { %3025 = vmatmul.mubr.bf16.gmra.mxu0 %v9681_v42  ;;  %v1429_v40 = vrot.slane %v10863_v13, 5  ;;  %v9693_v41 = vld [vmem:[#allocation2 + $0xe8] ss:$36 sps:$4 sm:$0xff]   ;;  %v1213_v42 = vshll.u32 %v526_v39, 16  ;;  %v1277_v43 = vrot.slane %v526_v39, 5  ;;  %v1220_v2 = vrot.slane %v1218_v32, 4 }
 0x10f   : > { %3032 = vmatprep.mubr.bf16.mxu0 %v9686_v52  ;;  %9401 = vmatpush3.bf16.msra.mxu0 %v9694_v44  ;;  %v10919_v44 = vld [vmem:[%s10380_s11 + $0xb8] sm:$0xf]  ;;  %v10922_v46 = vld [vmem:[%s10380_s11 + $0xbc] sm:$0x1]  ;;  %v5581_v13 = vsel %vm10394_vm4, %v5576_v34, %v5580_v35  ;;  %v9732_v62 = vld [vmem:[%s12348_s2 + $0x208] sm:$0xff]   ;;  %v1223_v3 = vrot.slane %v1221_v36, 5 }
 0x110   : > { %9402 = vmatprep.subr.bf16.mxu0 %v9704_v56  ;;  %v9698_v45 = vld [vmem:[#allocation2 + $0x134] ss:$36 sps:$4 sm:$0xff]   ;;  %1328 = vst [vmem:[#allocation2 + $0x27c] sm:$0xf] %v10919_v44  ;;  %v1364_v12 = vshrl.u32 %v10919_v44, 16  ;;  %v1367_v47 = vshll.u32 %v10919_v44, 16  ;;  %v1430_v49 = vsel %vm10406_vm5, %v8160_v37, %v1429_v40  ;;  %v1278_v52 = vsel %vm10406_vm5, %v8158_v31, %v1277_v43 }
 0x111   : > { %3162 = vmatmul.mubr.bf16.gmra.mxu1 %v8189_v22  ;;  %v5329_v8 = vld [vmem:[#allocation3 + $0x78] sm:$0xf]  ;;  %v1215_v50 = vrot.slane %v1213_v42, 5  ;;  %v1373_v53 = vshll.u32 %v10922_v46, 16  ;;  %v5401_v55 = vld [vmem:[#allocation3 + $0xbc] sm:$0x1]  ;;  %v1224_v16 = vor.u32 %v1223_v3, %v1220_v2 }
 0x112   : > { %3169 = vmatprep.mubr.bf16.mxu1 %v9695_v11  ;;  %v5400_v54 = vld [vmem:[#allocation3 + $0xb8] sm:$0xf]  ;;  %1452 = vst [vmem:[#allocation2 + $0xd4] sm:$0xf] %v1430_v49  ;;  %1304 = vst [vmem:[#allocation2 + $0x278] sm:$0xf] %v1278_v52 }
 0x113   : > { %9403 = vmatpush3.bf16.msra.mxu0 %v9704_v56  ;;  %1463 = vst [vmem:[#allocation2 + $0x260] sm:$0xf] %v1278_v52  ;;  %v1366_v56 = vrot.slane %v1364_v12, 4  ;;  %v1369_v57 = vrot.slane %v1367_v47, 5  ;;  %v5653_v58 = vshrl.u32 %v5400_v54, 16  ;;  %v5656_v61 = vshll.u32 %v5400_v54, 16 }
 0x114   : > { %9404 = vmatprep.subr.bf16.mxu0 %v9713_v0  ;;  %v9708_v63 = vld [vmem:[#allocation2 + $0x184] ss:$36 sps:$4 sm:$0xff]   ;;  %v1216_v1 = vsel %vm10394_vm4, %v1211_v30, %v1215_v50  ;;  %5353 = vst [vmem:[#allocation2 + $0x1a4] sm:$0xf] %v5329_v8  ;;  %v1375_v5 = vrot.slane %v1373_v53, 5  ;;  %v5662_v10 = vshll.u32 %v5401_v55, 16 }
 0x115   : > { %5785 = vst [vmem:[#allocation2 + $0x1a8] sm:$0xf] %v5581_v13  ;;  %1252 = vst [vmem:[#allocation2 + $0x274] sm:$0xf] %v1216_v1  ;;  %v1370_v4 = vor.u32 %v1369_v57, %v1366_v56  ;;  %v5655_v6 = vrot.slane %v5653_v58, 4  ;;  %v5658_v9 = vrot.slane %v5656_v61, 5 }
 0x116   : > { %3033 = vmatmul.mubr.bf16.gmra.mxu0 %v9688_v23  ;;  %1411 = vst [vmem:[#allocation2 + $0x25c] sm:$0xf] %v1216_v1  ;;  %v9703_v11 = vld [vmem:[#allocation2 + $0x138] ss:$36 sps:$4 sm:$0xff]   ;;  %v8161_v17 = vrot.slane %v10886_v51, 9  ;;  %v8159_v20 = vrot.slane %v10825_v25, 9 }
 0x117   : > { %3040 = vmatprep.mubr.bf16.mxu0 %v9691_v28  ;;  %9405 = vmatpush3.bf16.msra.mxu0 %v9713_v0  ;;  %v1371_v14 = vrot.slane %v1370_v4, 4  ;;  %v5659_v15 = vor.u32 %v5658_v9, %v5655_v6  ;;  %v9700_v0 = vld [vmem:[#allocation2 + $0x130] ss:$36 sps:$4 sm:$0xff]   ;;  %v9705_v18 = vld [vmem:[#allocation2 + $0x17c] ss:$36 sps:$4 sm:$0xff]   ;;  %v1433_v21 = vrot.slane %v10896_v59, 5 }
 0x118   : > { %9406 = vmatprep.subr.bf16.mxu0 %v9723_v7  ;;  %v5664_v23 = vrot.slane %v5662_v10, 5  ;;  %v9742_v24 = vld [vmem:[%s12348_s2 + $0x200] sm:$0xff]   ;;  %v542_v26 = vld [vmem:[%s10380_s11 + $0xf4] sm:$0x1]  ;;  %v8162_v27 = vrot.slane %v10919_v44, 9  ;;  %v1437_v25 = vrot.slane %v10922_v46, 5 }
 0x119   : > { %3170 = vmatmul.mubr.bf16.gmra.mxu1 %v9697_v33  ;;  %v1376_v19 = vsel %vm10394_vm4, %v1371_v14, %v1375_v5  ;;  %v5660_v22 = vrot.slane %v5659_v15, 4  ;;  %v1434_v51 = vsel %vm10406_vm5, %v8161_v17, %v1433_v21  ;;  %v1524_v28 = vld [vmem:[#allocation2 + $0x180] sm:$0xff]  ;;  %v1225_v29 = vrot.slane %v1224_v16, 4  ;;  %v543_v32 = vld [vmem:[%s10380_s11 + $0xf8] sm:$0xf]  ;;  %s10042_s8 = scalar_lea.vmem %s12302_s15, 3072 }
 0x11a   : > { %3177 = vmatprep.mubr.bf16.mxu1 %v9701_v38  ;;  %1412 = vst [vmem:[#allocation2 + $0x280] sm:$0xf] %v1376_v19  ;;  %v1227_v30 = vshll.u32 %v542_v26, 16  ;;  %1458 = vst [vmem:[#allocation2 + $0x1ac] sm:$0xf] %v1434_v51  ;;  %v1281_v31 = vrot.slane %v542_v26, 5  ;;  %v1438_v34 = vsel %vm10406_vm5, %v8162_v27, %v1437_v25  ;;  %p10043_p11 = scmp.ne.s32.totalorder %s12302_s15, %s10042_s8 }
 0x11b   : > { %9407 = vmatpush3.bf16.msra.mxu0 %v9723_v7  ;;  %v544_v33 = vld [vmem:[%s10380_s11 + $0xfc] sm:$0x1]  ;;  %v9714_v35 = vld [vmem:[#allocation2 + $0x1cc] ss:$36 sps:$4 sm:$0xff]   ;;  %1334 = vst [vmem:[#allocation2 + $0x354] sm:$0xf] %v543_v32 }
 0x11c   : > { %9408 = vmatprep.subr.bf16.mxu0 %v9732_v62  ;;  %v1529_v59 = vld [vmem:[#allocation2 + $0x1a4] sm:$0xff]  ;;  %v1229_v36 = vrot.slane %v1227_v30, 5  ;;  %v1378_v37 = vshrl.u32 %v543_v32, 16  ;;  %v1381_v38 = vshll.u32 %v543_v32, 16  ;;  %v1387_v7 = vshll.u32 %v544_v33, 16  ;;  %p12462_p7 = scmp.ne.s32.totalorder %s12368_s18, 0 }
 0x11d   : > { %1464 = vst [vmem:[#allocation2 + $0x284] sm:$0xf] %v1438_v34  ;;  %v8216_v39 = vcombine.low %v1524_v28, %v1529_v59  ;;  %v5335_v40 = vld [vmem:[#allocation3 + $0xb8] sm:$0xf]  ;;  %v1282_v42 = vsel %vm10406_vm5, %v8159_v20, %v1281_v31  ;;  %v5413_v47 = vld [vmem:[#allocation3 + $0xfc] sm:$0x1] }
 0x11e   : > { %3041 = vmatmul.mubr.bf16.gmra.mxu0 %v9693_v41  ;;  %v5665_v41 = vsel %vm10394_vm4, %v5660_v22, %v5664_v23  ;;  %v5412_v43 = vld [vmem:[#allocation3 + $0xf8] sm:$0xf]  ;;  %1310 = vst [vmem:[#allocation2 + $0x350] sm:$0xf] %v1282_v42  ;;  %1469 = vst [vmem:[#allocation2 + $0x338] sm:$0xf] %v1282_v42  ;;  %p10044_p12 = pnand %p10043_p11, %p12462_p7 }
 0x11f   : > { %3048 = vmatprep.mubr.bf16.mxu0 %v9698_v45  ;;  %9409 = vmatpush3.bf16.msra.mxu0 %v9732_v62  ;;  %v9707_v44 = vld [vmem:[#allocation2 + $0x178] ss:$36 sps:$4 sm:$0xff]   ;;  %v1230_v45 = vsel %vm10394_vm4, %v1225_v29, %v1229_v36  ;;  %v1380_v8 = vrot.slane %v1378_v37, 4  ;;  %v1383_v46 = vrot.slane %v1381_v38, 5  ;;  %v5737_v49 = vshrl.u32 %v5412_v43, 16 }
 0x120   : > { %9410 = vmatprep.subr.bf16.mxu0 %v9742_v24  ;;  %1258 = vst [vmem:[#allocation2 + $0x34c] sm:$0xf] %v1230_v45  ;;  %1417 = vst [vmem:[#allocation2 + $0x334] sm:$0xf] %v1230_v45  ;;  %v5740_v13 = vshll.u32 %v5412_v43, 16  ;;  %v1389_v52 = vrot.slane %v1387_v7, 5  ;;  %p10045_p10 = pneg %p10044_p12 }
 0x121   : > { %3178 = vmatmul.mubr.bf16.gmra.mxu1 %v9703_v11  ;;  %v10962_v12 = vld [vmem:[#allocation2 + $0x25c] ss:$36 sps:$4 sm:$0xff]   ;;  %5359 = vst [vmem:[#allocation2 + $0x27c] sm:$0xf] %v5335_v40  ;;  %v1384_v50 = vor.u32 %v1383_v46, %v1380_v8  ;;  %v9710_v53 = vld [vmem:[#allocation2 + $0x1c4] ss:$36 sps:$4 sm:$0xff]  }
 0x122   : > { %3185 = vmatprep.mubr.bf16.mxu1 %v9708_v63  ;;  %5791 = vst [vmem:[#allocation2 + $0x280] sm:$0xf] %v5665_v41  ;;  %v5739_v54 = vrot.slane %v5737_v49, 4  ;;  %v5742_v55 = vrot.slane %v5740_v13, 5  ;;  %v8163_v56 = vrot.slane %v543_v32, 9  ;;  %v5746_v58 = vshll.u32 %v5413_v47, 16 }
 0x123   : > { %9411 = vmatpush3.bf16.msra.mxu0 %v9742_v24  ;;  %v1385_v57 = vrot.slane %v1384_v50, 4  ;;  %v1441_v61 = vrot.slane %v544_v33, 5  ;;  %v5808_v63 = vld [vmem:[#allocation3 + $0x38] sm:$0xe]  ;;  %v5809_v2 = vld [vmem:[#allocation3 + $0x3c] sm:$0x1] }
 0x124   : > { %v5743_v62 = vor.u32 %v5742_v55, %v5739_v54  ;;  %v8422_v3 = vrot.slane %v5808_v63, 9  ;;  %v9716_v5 = vld [vmem:[#allocation2 + $0x1c8] ss:$36 sps:$4 sm:$0xff]   ;;  %v5916_v6 = vrot.slane %v5809_v2, 5  ;;  %v9712_v9 = vld [vmem:[#allocation2 + $0x1c0] ss:$36 sps:$4 sm:$0xff]  }
 0x125   : > { %v1390_v1 = vsel %vm10394_vm4, %v1385_v57, %v1389_v52  ;;  %v1442_v4 = vsel %vm10406_vm5, %v8163_v56, %v1441_v61  ;;  %v9720_v10 = vld [vmem:[#allocation2 + $0x214] ss:$36 sps:$4 sm:$0xff]   ;;  %v5748_v14 = vrot.slane %v5746_v58, 5  ;;  %v9717_v16 = vld [vmem:[#allocation2 + $0x20c] ss:$36 sps:$4 sm:$0xff]  }
 0x126   : > { %3049 = vmatmul.mubr.bf16.gmra.mxu0 %v9700_v0  ;;  %1418 = vst [vmem:[#allocation2 + $0x358] sm:$0xf] %v1390_v1  ;;  %1470 = vst [vmem:[#allocation2 + $0x35c] sm:$0xf] %v1442_v4  ;;  %v5744_v11 = vrot.slane %v5743_v62, 4  ;;  %v5917_v0 = vsel %vm10406_vm5, %v8422_v3, %v5916_v6  ;;  %v1554_v31 = vld [vmem:[#allocation2 + $0x258] sm:$0xff] }
 0x127   : > { %3056 = vmatprep.mubr.bf16.mxu0 %v9705_v18  ;;  %v10968_v15 = vld [vmem:[#allocation2 + $0xb0] ss:$36 sps:$4 sm:$0xff]   ;;  %v5341_v17 = vld [vmem:[#allocation3 + $0xf8] sm:$0xf]  ;;  %v5821_v19 = vld [vmem:[#allocation3 + $0x7c] sm:$0x1] }
 0x128   : > { %6019 = vst [vmem:[#allocation2 + $0xd4] sm:$0xf] %v5917_v0  ;;  %v5820_v18 = vld [vmem:[#allocation3 + $0x78] sm:$0xe]  ;;  %v5749_v20 = vsel %vm10394_vm4, %v5744_v11, %v5748_v14  ;;  %v5940_v22 = vrot.slane %v5821_v19, 5  ;;  %v1584_v13 = vld [vmem:[#allocation2 + $0x330] sm:$0xff] }
 0x129   : > { %3186 = vmatmul.mubr.bf16.gmra.mxu1 %v8216_v39  ;;  %v8428_v21 = vrot.slane %v5820_v18, 9  ;;  %v10974_v24 = vld [vmem:[#allocation2 + $0x188] ss:$36 sps:$4 sm:$0xff]   ;;  %v9722_v51 = vld [vmem:[#allocation2 + $0x210] ss:$36 sps:$4 sm:$0xff]   ;;  %v1559_v32 = vld [vmem:[#allocation2 + $0x27c] sm:$0xff] }
 0x12a   : > { %3193 = vmatprep.mubr.bf16.mxu1 %v9714_v35  ;;  %5365 = vst [vmem:[#allocation2 + $0x354] sm:$0xf] %v5341_v17  ;;  %v9719_v27 = vld [vmem:[#allocation2 + $0x208] ss:$36 sps:$4 sm:$0xff]   ;;  %v5832_v25 = vld [vmem:[#allocation3 + $0xb8] sm:$0xe]  ;;  %v8243_v40 = vcombine.low %v1554_v31, %v1559_v32 }
 0x12b   : > { %v5941_v26 = vsel %vm10406_vm5, %v8428_v21, %v5940_v22  ;;  %v5833_v28 = vld [vmem:[#allocation3 + $0xbc] sm:$0x1]  ;;  %v9724_v59 = vld [vmem:[#allocation2 + $0x254] ss:$36 sps:$4 sm:$0xff]   ;;  %v8434_v29 = vrot.slane %v5832_v25, 9 }
 0x12c   : > { %6025 = vst [vmem:[#allocation2 + $0x1ac] sm:$0xf] %v5941_v26  ;;  %v5964_v30 = vrot.slane %v5833_v28, 5  ;;  %v10978_v33 = vld [vmem:[#allocation2 + $0x260] ss:$36 sps:$4 sm:$0xff]  }
 0x12d   : > { %v9746_v23 = vld [vmem:[#allocation2 + $0x334] ss:$36 sps:$4 sm:$0xff]   ;;  %v5845_v36 = vld [vmem:[#allocation3 + $0xfc] sm:$0x1]  ;;  %v9733_v39 = vld [vmem:[#allocation2 + $0x2a4] ss:$36 sps:$4 sm:$0xff]  }
 0x12e   : > { %3057 = vmatmul.mubr.bf16.gmra.mxu0 %v9707_v44  ;;  %5797 = vst [vmem:[#allocation2 + $0x358] sm:$0xf] %v5749_v20  ;;  %v5965_v34 = vsel %vm10406_vm5, %v8434_v29, %v5964_v30  ;;  %v5844_v35 = vld [vmem:[#allocation3 + $0xf8] sm:$0xe]  ;;  %v5988_v7 = vrot.slane %v5845_v36, 5 }
 0x12f   : > { %3064 = vmatprep.mubr.bf16.mxu0 %v9710_v53  ;;  %6031 = vst [vmem:[#allocation2 + $0x284] sm:$0xf] %v5965_v34  ;;  %v10983_v37 = vld [vmem:[#allocation2 + $0x338] ss:$36 sps:$4 sm:$0xff]   ;;  %v8440_v38 = vrot.slane %v5844_v35, 9 }
 0x130   : > { %v9726_v42 = vld [vmem:[#allocation2 + $0x250] ss:$36 sps:$4 sm:$0xff]   ;;  %v9729_v43 = vld [vmem:[#allocation2 + $0x29c] ss:$36 sps:$4 sm:$0xff]   ;;  %v9736_v46 = vld [vmem:[#allocation2 + $0x2e4] ss:$36 sps:$4 sm:$0xff]  }
 0x131   : > { %3194 = vmatmul.mubr.bf16.gmra.mxu1 %v9716_v5  ;;  %v5989_v41 = vsel %vm10406_vm5, %v8440_v38, %v5988_v7  ;;  %v9735_v44 = vld [vmem:[#allocation2 + $0x2a0] ss:$36 sps:$4 sm:$0xff]   ;;  %v9739_v45 = vld [vmem:[#allocation2 + $0x2ec] ss:$36 sps:$4 sm:$0xff]   ;;  %v9731_v8 = vld [vmem:[#allocation2 + $0x298] ss:$36 sps:$4 sm:$0xff]  }
 0x132   : > { %3201 = vmatprep.mubr.bf16.mxu1 %v9720_v10  ;;  %6037 = vst [vmem:[#allocation2 + $0x35c] sm:$0xf] %v5989_v41  ;;  %v9738_v47 = vld [vmem:[#allocation2 + $0x2e0] ss:$36 sps:$4 sm:$0xff]   ;;  %v9743_v49 = vld [vmem:[#allocation2 + $0x32c] ss:$36 sps:$4 sm:$0xff]  }
 0x133   : > { %v9745_v53 = vld [vmem:[#allocation2 + $0x328] ss:$36 sps:$4 sm:$0xff]   ;;  %v8668_v54 = vpop.f32.mrf.mxu0  ;;  %v10990_v55 = vld [vmem:[%s12349_s3] ss:$0 sm:$0xff]  ;;  %vm333_vm7 = vsmask.f32 256 }
 0x134   : > { %v9748_v56 = vld [vmem:[#allocation2 + $0x20] ss:$36 sps:$4 sm:$0xff]   ;;  %v9749_v10 = vld [vmem:[#allocation2 + $0x68] ss:$36 sps:$4 sm:$0xff]   ;;  %vm11050_vm8 = vmand %vm332_vm6, %vm333_vm7  ;;  %vm407_vm9 = vsmask.f32 7938 }
 0x135   : > { %v1589_v50 = vld [vmem:[#allocation2 + $0x354] sm:$0xff]  ;;  %v8756_v57 = vpop.f32.mrf.mxu1  ;;  %v8669_v58 = vpop.f32.mrf.mxu0  ;;  %v9752_v29 = vld [vmem:[#allocation2 + $0x140] ss:$36 sps:$4 sm:$0xff]   ;;  %vm11057_vm10 = vmand %vm332_vm6, %vm407_vm9 }
 0x136   : > { %3065 = vmatmul.mubr.bf16.gmra.mxu0 %v9712_v9  ;;  %v8270_v52 = vcombine.low %v1584_v13, %v1589_v50  ;;  %v8670_v61 = vadd.f32 %v8669_v58, %v8668_v54  ;;  %v9761_v13 = vld [vmem:[#allocation7 + $0x38] sm:$0xff]   ;;  %vm11367_vm12 = vmand %vm3731_vm11, %vm407_vm9 }
 0x137   : > { %3072 = vmatprep.mubr.bf16.mxu0 %v9717_v16  ;;  %v8757_v62 = vpop.f32.mrf.mxu1  ;;  %v8671_v63 = vpop.f32.mrf.mxu0  ;;  %v469_v48 = vld [vmem:[#allocation3 + $0xdc] sm:$0x1] }
 0x138   : > { %v8758_v1 = vadd.f32 %v8757_v62, %v8756_v57  ;;  %v2761_v2 = vadd.f32 %v8670_v61, %v10990_v55 }
 0x139   : > { %3202 = vmatmul.mubr.bf16.gmra.mxu1 %v9722_v51  ;;  %v8759_v3 = vpop.f32.mrf.mxu1  ;;  %v8672_v4 = vpop.f32.mrf.mxu0 }
 0x13a   : > { %3209 = vmatprep.mubr.bf16.mxu1 %v10962_v12  ;;  %v9741_v12 = vld [vmem:[#allocation2 + $0x2e8] ss:$36 sps:$4 sm:$0xff]   ;;  %v10993_v5 = vadd.f32 %v8758_v1, %v2761_v2  ;;  %v8673_v6 = vadd.f32 %v8672_v4, %v8671_v63  ;;  %v9755_v2 = vld [vmem:[#allocation2 + $0x218] ss:$36 sps:$4 sm:$0xff]  }
 0x13b   : > { %v8760_v9 = vpop.f32.mrf.mxu1 }
 0x13c   : > { %v8761_v11 = vadd.f32 %v8760_v9, %v8759_v3  ;;  %v2764_v14 = vadd.f32 %v8673_v6, %v10990_v55 }
 0x13e   : > { %3073 = vmatmul.mubr.bf16.gmra.mxu0 %v9719_v27  ;;  %v10996_v17 = vadd.f32 %v8761_v11, %v2764_v14  ;;  %v9751_v27 = vld [vmem:[#allocation2 + $0xf8] ss:$36 sps:$4 sm:$0xff]  }
 0x13f   : > { %3080 = vmatprep.mubr.bf16.mxu0 %v9724_v59 }
 0x140   : > { %v8762_v0 = vpop.f32.mrf.mxu1 }
 0x141   : > { %3210 = vmatmul.mubr.bf16.gmra.mxu1 %v8243_v40 }
 0x142   : > { %3217 = vmatprep.mubr.bf16.mxu1 %v9733_v39  ;;  %v8763_v18 = vpop.f32.mrf.mxu1 }
 0x143   : > { %v8764_v20 = vadd.f32 %v8763_v18, %v8762_v0 }
 0x144   : > { %v8765_v22 = vpop.f32.mrf.mxu1 }
 0x145   : > { %v8674_v16 = vpop.f32.mrf.mxu0 }
 0x146   : > { %3081 = vmatmul.mubr.bf16.gmra.mxu0 %v9726_v42  ;;  %v8766_v51 = vpop.f32.mrf.mxu1 }
 0x147   : > { %3088 = vmatprep.mubr.bf16.mxu0 %v9729_v43  ;;  %v8675_v19 = vpop.f32.mrf.mxu0  ;;  %v8767_v30 = vadd.f32 %v8766_v51, %v8765_v22 }
 0x148   : > { %v8676_v21 = vadd.f32 %v8675_v19, %v8674_v16  ;;  %v9762_v19 = vld [vmem:[#allocation7 + $0x70] sm:$0xff]  }
 0x149   : > { %3218 = vmatmul.mubr.bf16.gmra.mxu1 %v9735_v44  ;;  %v8768_v31 = vpop.f32.mrf.mxu1 }
 0x14a   : > { %3225 = vmatprep.mubr.bf16.mxu1 %v9739_v45  ;;  %v2769_v26 = vadd.f32 %v8676_v21, %v10990_v55 }
 0x14b   : > { %v8769_v35 = vpop.f32.mrf.mxu1 }
 0x14c   : > { %v11000_v28 = vadd.f32 %v8764_v20, %v2769_v26  ;;  %v8770_v36 = vadd.f32 %v8769_v35, %v8768_v31  ;;  %v9763_v20 = vld [vmem:[#allocation7 + $0x30] sm:$0xff]   ;;  %v9757_v26 = vld [vmem:[#allocation2 + $0x2a8] ss:$36 sps:$4 sm:$0xff]  }
 0x14e   : > { %3089 = vmatmul.mubr.bf16.gmra.mxu0 %v9731_v8 }
 0x14f   : > { %3096 = vmatprep.mubr.bf16.mxu0 %v9736_v46 }
 0x151   : > { %3226 = vmatmul.mubr.bf16.gmra.mxu1 %v9741_v12  ;;  %v9754_v12 = vld [vmem:[#allocation2 + $0x1d0] ss:$36 sps:$4 sm:$0xff]  }
 0x152   : > { %3233 = vmatprep.mubr.bf16.mxu1 %v9746_v23  ;;  %v8677_v23 = vpop.f32.mrf.mxu0 }
 0x154   : > { %v8678_v25 = vpop.f32.mrf.mxu0 }
 0x155   : > { %v8679_v59 = vadd.f32 %v8678_v25, %v8677_v23 }
 0x156   : > { %3097 = vmatmul.mubr.bf16.gmra.mxu0 %v9738_v47  ;;  %v8680_v34 = vpop.f32.mrf.mxu0 }
 0x157   : > { %3104 = vmatprep.mubr.bf16.mxu0 %v9743_v49  ;;  %v2772_v32 = vadd.f32 %v8679_v59, %v10990_v55  ;;  %v9760_v49 = vld [vmem:[#allocation7 + $0x78] sm:$0xff]   ;;  %v9758_v59 = vld [vmem:[#allocation2 + $0x2f0] ss:$36 sps:$4 sm:$0xff]  }
 0x158   : > { %v8681_v7 = vpop.f32.mrf.mxu0  ;;  %9024 = vmatprep.subr.bf16.mxu1 %v9760_v49 }
 0x159   : > { %3234 = vmatmul.mubr.bf16.gmra.mxu1 %v8270_v52  ;;  %v11003_v38 = vadd.f32 %v8767_v30, %v2772_v32  ;;  %v8682_v39 = vadd.f32 %v8681_v7, %v8680_v34 }
 0x15a   : > { %v8683_v40 = vpop.f32.mrf.mxu0  ;;  %9025 = vmatpush3.bf16.msra.mxu1 %v9761_v13 }
 0x15b   : > { %v2777_v42 = vadd.f32 %v8682_v39, %v10990_v55  ;;  %9026 = vmatprep.subr.bf16.mxu1 %v9762_v19  ;;  %v9766_v19 = vld [vmem:[#allocation7 + $0x60] sm:$0xff]  }
 0x15c   : > { %v8684_v43 = vpop.f32.mrf.mxu0 }
 0x15d   : > { %v11006_v44 = vadd.f32 %v8770_v36, %v2777_v42  ;;  %v8685_v45 = vadd.f32 %v8684_v43, %v8683_v40 }
 0x15e   : > { %3105 = vmatmul.mubr.bf16.gmra.mxu0 %v9745_v53  ;;  %v8686_v47 = vpop.f32.mrf.mxu0  ;;  %9027 = vmatpush3.bf16.msra.mxu1 %v9763_v20  ;;  %v9767_v20 = vld [vmem:[#allocation7 + $0x20] sm:$0xff]  }
 0x15f   : > { %9412 = vmatprep.mubr.bf16.mxu0 %v9748_v56  ;;  %v2780_v50 = vadd.f32 %v8685_v45, %v10990_v55 }
 0x160   : > { %v8687_v53 = vpop.f32.mrf.mxu0 }
 0x161   : > { %v8688_v57 = vadd.f32 %v8687_v53, %v8686_v47 }
 0x162   : > { %v8689_v61 = vpop.f32.mrf.mxu0 }
 0x163   : > { %v2785_v62 = vadd.f32 %v8688_v57, %v10990_v55 }
 0x164   : > { %v8690_v1 = vpop.f32.mrf.mxu0 }
 0x165   : > { %v8691_v4 = vadd.f32 %v8690_v1, %v8689_v61 }
 0x166   : > { %9413 = vmatmul.mubr.bf16.vlgmr.msra.gmra.mxu0 %v9749_v10 }
 0x167   : > { %9416 = vmatprep.mubr.bf16.mxu0 %v10968_v15  ;;  %v8771_v15 = vpop.f32.mrf.mxu1  ;;  %v2788_v10 = vadd.f32 %v8691_v4, %v10990_v55 }
 0x169   : > { %v8772_v41 = vpop.f32.mrf.mxu1 }
 0x16a   : > { %v8773_v8 = vadd.f32 %v8772_v41, %v8771_v15 }
 0x16b   : > { %v8774_v46 = vpop.f32.mrf.mxu1 }
 0x16c   : > { %v11010_v56 = vadd.f32 %v8773_v8, %v2780_v50  ;;  %v8692_v11 = vpop.f32.mrf.mxu0  ;;  %v9764_v8 = vld [vmem:[#allocation7 + $0x68] sm:$0xff]  }
 0x16d   : > { %v8775_v52 = vpop.f32.mrf.mxu1  ;;  %9028 = vmatprep.subr.bf16.mxu1 %v9764_v8  ;;  %v9768_v8 = vld [vmem:[#allocation7 + $0x58] sm:$0xff]  }
 0x16e   : > { %9417 = vmatmul.mubr.bf16.gmra.mxu0 %v9751_v27  ;;  %v8776_v54 = vadd.f32 %v8775_v52, %v8774_v46  ;;  %v8693_v18 = vpop.f32.mrf.mxu0  ;;  %v9765_v46 = vld [vmem:[#allocation7 + $0x28] sm:$0xff]  }
 0x16f   : > { %9420 = vmatprep.mubr.bf16.mxu0 %v9752_v29  ;;  %v8777_v58 = vpop.f32.mrf.mxu1  ;;  %v8694_v21 = vadd.f32 %v8693_v18, %v8692_v11  ;;  %9029 = vmatpush3.bf16.msra.mxu1 %v9765_v46  ;;  %v9769_v46 = vld [vmem:[#allocation7 + $0x18] sm:$0xff]  }
 0x170   : > { %v11013_v3 = vadd.f32 %v8776_v54, %v2785_v62  ;;  %v8695_v23 = vpop.f32.mrf.mxu0  ;;  %9030 = vmatprep.subr.bf16.mxu1 %v9766_v19  ;;  %v409_v19 = vld [vmem:[#allocation3 + $0xc] sm:$0x1] }
 0x171   : > { %v8778_v63 = vpop.f32.mrf.mxu1  ;;  %v2793_v51 = vadd.f32 %v8694_v21, %v10990_v55 }
 0x172   : > { %v8779_v6 = vadd.f32 %v8778_v63, %v8777_v58  ;;  %v8696_v25 = vpop.f32.mrf.mxu0 }
 0x173   : > { %v8780_v9 = vpop.f32.mrf.mxu1  ;;  %v8697_v30 = vadd.f32 %v8696_v25, %v8695_v23  ;;  %9031 = vmatpush3.bf16.msra.mxu1 %v9767_v20 }
 0x174   : > { %v11016_v0 = vadd.f32 %v8779_v6, %v2788_v10  ;;  %9032 = vmatprep.subr.bf16.mxu1 %v9768_v8  ;;  %v353_v8 = vld [vmem:[#allocation3 + $0x48] sm:$0x1] }
 0x175   : > { %v2796_v35 = vadd.f32 %v8697_v30, %v10990_v55 }
 0x176   : > { %9421 = vmatmul.mubr.bf16.gmra.mxu0 %v10974_v24  ;;  %v8781_v24 = vpop.f32.mrf.mxu1 }
 0x177   : > { %9424 = vmatprep.mubr.bf16.mxu0 %v9754_v12  ;;  %v8782_v14 = vadd.f32 %v8781_v24, %v8780_v9  ;;  %9033 = vmatpush3.bf16.msra.mxu1 %v9769_v46  ;;  %v427_v46 = vld [vmem:[#allocation3 + $0x4c] sm:$0x1] }
 0x178   : > { %v8783_v16 = vpop.f32.mrf.mxu1 }
 0x179   : > { %v11020_v29 = vadd.f32 %v8782_v14, %v2793_v51 }
 0x17a   : > { %v8784_v22 = vpop.f32.mrf.mxu1 }
 0x17b   : > { %v8785_v31 = vadd.f32 %v8784_v22, %v8783_v16 }
 0x17c   : > { %v8786_v27 = vpop.f32.mrf.mxu1 }
 0x17d   : > { %v11023_v15 = vadd.f32 %v8785_v31, %v2796_v35 }
 0x17e   : > { %9425 = vmatmul.mubr.bf16.gmra.mxu0 %v9755_v2  ;;  %v8787_v32 = vpop.f32.mrf.mxu1 }
 0x17f   : > { %9428 = vmatprep.mubr.bf16.mxu0 %v10978_v33  ;;  %v8698_v33 = vpop.f32.mrf.mxu0  ;;  %v8788_v34 = vadd.f32 %v8787_v32, %v8786_v27 }
 0x180   : > { %v8789_v36 = vpop.f32.mrf.mxu1 }
 0x181   : > { %v8699_v7 = vpop.f32.mrf.mxu0 }
 0x182   : > { %v8700_v39 = vadd.f32 %v8699_v7, %v8698_v33  ;;  %v8790_v40 = vpop.f32.mrf.mxu1 }
 0x183   : > { %v8701_v41 = vpop.f32.mrf.mxu0  ;;  %v8791_v49 = vadd.f32 %v8790_v40, %v8789_v36 }
 0x184   : > { %v2801_v42 = vadd.f32 %v8700_v39, %v10990_v55  ;;  %v8792_v43 = vpop.f32.mrf.mxu1 }
 0x185   : > { %v8702_v45 = vpop.f32.mrf.mxu0 }
 0x186   : > { %9429 = vmatmul.mubr.bf16.gmra.mxu0 %v9757_v26  ;;  %v11026_v12 = vadd.f32 %v8788_v34, %v2801_v42  ;;  %v8703_v47 = vadd.f32 %v8702_v45, %v8701_v41  ;;  %v8793_v13 = vpop.f32.mrf.mxu1 }
 0x187   : > { %9432 = vmatprep.mubr.bf16.mxu0 %v9758_v59  ;;  %v8704_v50 = vpop.f32.mrf.mxu0  ;;  %v8794_v52 = vadd.f32 %v8793_v13, %v8792_v43 }
 0x188   : > { %v2804_v53 = vadd.f32 %v8703_v47, %v10990_v55  ;;  %v8795_v54 = vpop.f32.mrf.mxu1 }
 0x189   : > { %v8705_v57 = vpop.f32.mrf.mxu0 }
 0x18a   : > { %v11030_v58 = vadd.f32 %v8791_v49, %v2804_v53  ;;  %v8706_v61 = vadd.f32 %v8705_v57, %v8704_v50  ;;  %v8796_v62 = vpop.f32.mrf.mxu1  ;;  %v341_v57 = vld [vmem:[#allocation3 + $0x18] sm:$0x1] }
 0x18b   : > { %v8707_v63 = vpop.f32.mrf.mxu0  ;;  %v8797_v10 = vadd.f32 %v8796_v62, %v8795_v54 }
 0x18c   : > { %v2809_v1 = vadd.f32 %v8706_v61, %v10990_v55  ;;  %v8798_v2 = vpop.f32.mrf.mxu1 }
 0x18d   : > { %v8708_v4 = vpop.f32.mrf.mxu0 }
 0x18e   : > { %9433 = vmatmul.mubr.bf16.gmra.mxu0 %v10983_v37  ;;  %v11033_v6 = vadd.f32 %v8794_v52, %v2809_v1  ;;  %v8709_v9 = vadd.f32 %v8708_v4, %v8707_v63  ;;  %v8799_v24 = vpop.f32.mrf.mxu1  ;;  %v12380_v1 = vmov 0 }
 0x18f   : > { %v8800_v11 = vadd.f32 %v8799_v24, %v8798_v2  ;;  %v12381_v1 = vsel %vm11050_vm8, 4294967295, %v12380_v1  ;;  %v415_v2 = vld [vmem:[#allocation3 + $0x1c] sm:$0x1] }
 0x190   : > { %v8710_v37 = vpop.f32.mrf.mxu0  ;;  %v2812_v14 = vadd.f32 %v8709_v9, %v10990_v55  ;;  %v8801_v16 = vpop.f32.mrf.mxu1  ;;  %12382 = vst [vmem:[#allocation15_spill] sm:$0xff] %v12381_v1 }
 0x192   : > { %v8711_v18 = vpop.f32.mrf.mxu0  ;;  %v11036_v21 = vadd.f32 %v8797_v10, %v2812_v14  ;;  %v8802_v23 = vpop.f32.mrf.mxu1  ;;  %v342_v10 = vsel %vm11050_vm8, 0, %v341_v57  ;;  %v416_v14 = vsel %vm11057_vm10, 0, %v415_v2  ;;  %v421_v2 = vld [vmem:[#allocation3 + $0x2c] sm:$0x1] }
 0x193   : > { %v8712_v22 = vadd.f32 %v8711_v18, %v8710_v37  ;;  %v8803_v31 = vadd.f32 %v8802_v23, %v8801_v16  ;;  %343 = vst [vmem:[#allocation3 + $0x18] sm:$0x1] %v342_v10  ;;  %417 = vst [vmem:[#allocation3 + $0x1c] sm:$0x1] %v416_v14  ;;  %v335_v18 = vld [vmem:[#allocation3 + $0x8] sm:$0x1] }
 0x194   : > { %v8713_v26 = vpop.f32.mrf.mxu0 }
 0x195   : > { %v2817_v51 = vadd.f32 %v8712_v22, %v10990_v55  ;;  %v8804_v27 = vpop.f32.mrf.mxu1 }
 0x196   : > { %v8714_v25 = vpop.f32.mrf.mxu0 }
 0x197   : > { %v11039_v59 = vadd.f32 %v8800_v11, %v2817_v51  ;;  %v8715_v30 = vadd.f32 %v8714_v25, %v8713_v26  ;;  %v8805_v32 = vpop.f32.mrf.mxu1  ;;  %v336_v26 = vsel %vm11050_vm8, 0, %v335_v18  ;;  %v410_v51 = vsel %vm11057_vm10, 0, %v409_v19  ;;  %v356_v19 = vld [vmem:[#allocation3 + $0x50] sm:$0x1] }
 0x198   : > { %v8716_v33 = vpop.f32.mrf.mxu0  ;;  %v8806_v34 = vadd.f32 %v8805_v32, %v8804_v27  ;;  %v9770_v27 = vld [vmem:[#allocation7 + $0xf8] sm:$0xff]   ;;  %337 = vst [vmem:[#allocation3 + $0x8] sm:$0x1] %v336_v26  ;;  %411 = vst [vmem:[#allocation3 + $0xc] sm:$0x1] %v410_v51 }
 0x199   : > { %v2820_v35 = vadd.f32 %v8715_v30, %v10990_v55  ;;  %v8807_v36 = vpop.f32.mrf.mxu1  ;;  %v344_v30 = vld [vmem:[#allocation3 + $0x20] sm:$0x1]  ;;  %9112 = vmatprep.subr.bf16.mxu0 %v9770_v27 }
 0x19a   : > { %v8717_v7 = vpop.f32.mrf.mxu0 }
 0x19b   : > { %v11042_v39 = vadd.f32 %v8803_v31, %v2820_v35  ;;  %v8718_v40 = vadd.f32 %v8717_v7, %v8716_v33  ;;  %v8808_v42 = vpop.f32.mrf.mxu1  ;;  %v418_v31 = vld [vmem:[#allocation3 + $0x24] sm:$0x1]  ;;  %v345_v33 = vsel %vm11050_vm8, 0, %v344_v30  ;;  %v9772_v35 = vld [vmem:[#allocation7 + $0xb8] sm:$0xff]   ;;  %v338_v7 = vld [vmem:[#allocation3 + $0x10] sm:$0x1] }
 0x19c   : > { %v8719_v41 = vpop.f32.mrf.mxu0  ;;  %v8809_v13 = vadd.f32 %v8808_v42, %v8807_v36  ;;  %346 = vst [vmem:[#allocation3 + $0x20] sm:$0x1] %v345_v33  ;;  %9113 = vmatpush3.bf16.msra.mxu0 %v9772_v35  ;;  %v424_v35 = vld [vmem:[#allocation3 + $0x34] sm:$0x1] }
 0x19d   : > { %v2825_v43 = vadd.f32 %v8718_v40, %v10990_v55  ;;  %v339_v40 = vsel %vm11050_vm8, 0, %v338_v7  ;;  %v9778_v7 = vld [vmem:[#allocation7 + $0xe0] sm:$0xff]  }
 0x19e   : > { %v8720_v45 = vpop.f32.mrf.mxu0  ;;  %340 = vst [vmem:[#allocation3 + $0x10] sm:$0x1] %v339_v40 }
 0x19f   : > { %v11045_v47 = vadd.f32 %v8806_v34, %v2825_v43  ;;  %v8721_v49 = vadd.f32 %v8720_v45, %v8719_v41  ;;  %v419_v34 = vsel %vm11057_vm10, 0, %v418_v31  ;;  %v412_v41 = vld [vmem:[#allocation3 + $0x14] sm:$0x1] }
 0x1a0   : > { %420 = vst [vmem:[#allocation3 + $0x24] sm:$0x1] %v419_v34  ;;  %v413_v45 = vsel %vm11057_vm10, 0, %v412_v41  ;;  %v425_v41 = vsel %vm11057_vm10, 0, %v424_v35 }
 0x1a1   : > { %v2828_v52 = vadd.f32 %v8721_v49, %v10990_v55  ;;  %v9774_v49 = vld [vmem:[#allocation7 + $0xf0] sm:$0xff]   ;;  %414 = vst [vmem:[#allocation3 + $0x14] sm:$0x1] %v413_v45  ;;  %426 = vst [vmem:[#allocation3 + $0x34] sm:$0x1] %v425_v41 }
 0x1a2   : > { %v8722_v50 = vpop.f32.mrf.mxu0  ;;  %9114 = vmatprep.subr.bf16.mxu0 %v9774_v49 }
 0x1a3   : > { %v11048_v61 = vadd.f32 %v8809_v13, %v2828_v52  ;;  %v354_v13 = vsel %vm11050_vm8, 0, %v353_v8  ;;  %v365_v8 = vld [vmem:[#allocation3 + $0x68] sm:$0x1] }
 0x1a4   : > { %v8810_v53 = vpop.f32.mrf.mxu1  ;;  %v8723_v54 = vpop.f32.mrf.mxu0  ;;  %355 = vst [vmem:[#allocation3 + $0x48] sm:$0x1] %v354_v13  ;;  %v366_v13 = vsel %vm11050_vm8, 0, %v365_v8 }
 0x1a5   : > { %v8724_v62 = vadd.f32 %v8723_v54, %v8722_v50  ;;  %v428_v50 = vsel %vm11057_vm10, 0, %v427_v46  ;;  %v9775_v54 = vld [vmem:[#allocation7 + $0xb0] sm:$0xff]   ;;  %v439_v46 = vld [vmem:[#allocation3 + $0x6c] sm:$0x1]  ;;  %367 = vst [vmem:[#allocation3 + $0x68] sm:$0x1] %v366_v13 }
 0x1a6   : > { %v8811_v63 = vpop.f32.mrf.mxu1  ;;  %v8725_v4 = vpop.f32.mrf.mxu0  ;;  %429 = vst [vmem:[#allocation3 + $0x4c] sm:$0x1] %v428_v50  ;;  %9115 = vmatpush3.bf16.msra.mxu0 %v9775_v54  ;;  %v440_v50 = vsel %vm11057_vm10, 0, %v439_v46  ;;  %v362_v46 = vld [vmem:[#allocation3 + $0x60] sm:$0x1] }
 0x1a7   : > { %v8812_v9 = vadd.f32 %v8811_v63, %v8810_v53  ;;  %v2833_v37 = vadd.f32 %v8724_v62, %v10990_v55  ;;  %v347_v63 = vld [vmem:[#allocation3 + $0x28] sm:$0x1]  ;;  %441 = vst [vmem:[#allocation3 + $0x6c] sm:$0x1] %v440_v50  ;;  %v436_v50 = vld [vmem:[#allocation3 + $0x64] sm:$0x1] }
 0x1a8   : > { %v8813_v11 = vpop.f32.mrf.mxu1  ;;  %v8726_v16 = vpop.f32.mrf.mxu0 }
 0x1a9   : > { %v11064_v20 = vadd.f32 %v8812_v9, %v2833_v37  ;;  %v8727_v22 = vadd.f32 %v8726_v16, %v8725_v4  ;;  %v9776_v4 = vld [vmem:[#allocation7 + $0xe8] sm:$0xff]   ;;  %v348_v37 = vsel %vm11050_vm8, 0, %v347_v63 }
 0x1aa   : > { %v8814_v23 = vpop.f32.mrf.mxu1  ;;  %349 = vst [vmem:[#allocation3 + $0x28] sm:$0x1] %v348_v37  ;;  %9116 = vmatprep.subr.bf16.mxu0 %v9776_v4 }
 0x1ab   : > { %v8815_v25 = vadd.f32 %v8814_v23, %v8813_v11  ;;  %v2836_v32 = vadd.f32 %v8727_v22, %v10990_v55  ;;  %v422_v11 = vsel %vm11057_vm10, 0, %v421_v2  ;;  %v430_v22 = vld [vmem:[#allocation3 + $0x54] sm:$0x1]  ;;  %v9777_v23 = vld [vmem:[#allocation7 + $0xa8] sm:$0xff]  }
 0x1ac   : > { %423 = vst [vmem:[#allocation3 + $0x2c] sm:$0x1] %v422_v11  ;;  %v431_v31 = vsel %vm11057_vm10, 0, %v430_v22  ;;  %9117 = vmatpush3.bf16.msra.mxu0 %v9777_v23  ;;  %v368_v11 = vld [vmem:[#allocation3 + $0x70] sm:$0x1] }
 0x1ad   : > { %v11075_v36 = vadd.f32 %v8815_v25, %v2836_v32  ;;  %v357_v25 = vsel %vm11050_vm8, 0, %v356_v19  ;;  %v350_v32 = vld [vmem:[#allocation3 + $0x30] sm:$0x1]  ;;  %432 = vst [vmem:[#allocation3 + $0x54] sm:$0x1] %v431_v31  ;;  %9118 = vmatprep.subr.bf16.mxu0 %v9778_v7 }
 0x1ae   : > { %358 = vst [vmem:[#allocation3 + $0x50] sm:$0x1] %v357_v25  ;;  %v351_v34 = vsel %vm11050_vm8, 0, %v350_v32  ;;  %v9771_v25 = vld [vmem:[#allocation7 + $0x50] sm:$0xff]   ;;  %v9782_v32 = vld [vmem:[#allocation7 + $0xd8] sm:$0xff]  }
 0x1af   : > { %12385 = vst [vmem:[#allocation16_spill] sm:$0xff] %v11075_v36  ;;  %352 = vst [vmem:[#allocation3 + $0x30] sm:$0x1] %v351_v34  ;;  %9034 = vmatprep.subr.bf16.mxu1 %v9771_v25  ;;  %v380_v25 = vld [vmem:[#allocation3 + $0xa0] sm:$0x1] }
 0x1b1   : > { %v8728_v42 = vpop.f32.mrf.mxu0  ;;  %v8816_v43 = vpop.f32.mrf.mxu1 }
 0x1b3   : > { %v8729_v52 = vpop.f32.mrf.mxu0  ;;  %v8817_v53 = vpop.f32.mrf.mxu1 }
 0x1b4   : > { %v8730_v57 = vadd.f32 %v8729_v52, %v8728_v42  ;;  %v8818_v62 = vadd.f32 %v8817_v53, %v8816_v43 }
 0x1b5   : > { %v8731_v9 = vpop.f32.mrf.mxu0  ;;  %v8819_v10 = vpop.f32.mrf.mxu1 }
 0x1b6   : > { %v2841_v14 = vadd.f32 %v8730_v57, %v10990_v55  ;;  %v359_v57 = vld [vmem:[#allocation3 + $0x58] sm:$0x1] }
 0x1b7   : > { %v8732_v16 = vpop.f32.mrf.mxu0  ;;  %v8820_v18 = vpop.f32.mrf.mxu1  ;;  %v360_v2 = vsel %vm11050_vm8, 0, %v359_v57  ;;  %v377_v57 = vld [vmem:[#allocation3 + $0x98] sm:$0x1] }
 0x1b8   : > { %v11090_v26 = vadd.f32 %v8818_v62, %v2841_v14  ;;  %v8733_v51 = vadd.f32 %v8732_v16, %v8731_v9  ;;  %v8821_v27 = vadd.f32 %v8820_v18, %v8819_v10  ;;  %v433_v62 = vld [vmem:[#allocation3 + $0x5c] sm:$0x1]  ;;  %v9780_v9 = vld [vmem:[#allocation7 + $0xa0] sm:$0xff]   ;;  %361 = vst [vmem:[#allocation3 + $0x58] sm:$0x1] %v360_v2  ;;  %v369_v18 = vsel %vm11050_vm8, 0, %v368_v11 }
 0x1b9   : > { %v8822_v30 = vpop.f32.mrf.mxu1  ;;  %v434_v4 = vsel %vm11057_vm10, 0, %v433_v62  ;;  %v442_v14 = vld [vmem:[#allocation3 + $0x74] sm:$0x1]  ;;  %9119 = vmatpush3.bf16.msra.mxu0 %v9780_v9  ;;  %370 = vst [vmem:[#allocation3 + $0x70] sm:$0x1] %v369_v18 }
 0x1ba   : > { %v2844_v33 = vadd.f32 %v8733_v51, %v10990_v55  ;;  %435 = vst [vmem:[#allocation3 + $0x5c] sm:$0x1] %v434_v4  ;;  %v443_v19 = vsel %vm11057_vm10, 0, %v442_v14  ;;  %9120 = vmatprep.subr.bf16.mxu0 %v9782_v32  ;;  %v451_v62 = vld [vmem:[#allocation3 + $0x9c] sm:$0x1]  ;;  %v9786_v14 = vld [vmem:[#allocation7 + $0xc8] sm:$0xff]  }
 0x1bb   : > { %v8823_v40 = vpop.f32.mrf.mxu1  ;;  %444 = vst [vmem:[#allocation3 + $0x74] sm:$0x1] %v443_v19  ;;  %v452_v4 = vsel %vm11057_vm10, 0, %v451_v62  ;;  %v445_v11 = vld [vmem:[#allocation3 + $0x8c] sm:$0x1] }
 0x1bc   : > { %v11101_v43 = vadd.f32 %v8821_v27, %v2844_v33  ;;  %v8824_v45 = vadd.f32 %v8823_v40, %v8822_v30  ;;  %v9773_v30 = vld [vmem:[#allocation7 + $0x10] sm:$0xff]   ;;  %v9783_v33 = vld [vmem:[#allocation7 + $0x98] sm:$0xff]   ;;  %453 = vst [vmem:[#allocation3 + $0x9c] sm:$0x1] %v452_v4  ;;  %v463_v4 = vld [vmem:[#allocation3 + $0xcc] sm:$0x1] }
 0x1bd   : > { %v8825_v49 = vpop.f32.mrf.mxu1  ;;  %9035 = vmatpush3.bf16.msra.mxu1 %v9773_v30  ;;  %9121 = vmatpush3.bf16.msra.mxu0 %v9783_v33  ;;  %v454_v30 = vld [vmem:[#allocation3 + $0xa4] sm:$0x1] }
 0x1be   : > { %v8734_v42 = vpop.f32.mrf.mxu0  ;;  %v455_v33 = vsel %vm11057_vm10, 0, %v454_v30  ;;  %v9787_v30 = vld [vmem:[#allocation7 + $0x40] sm:$0xff]  }
 0x1bf   : > { %v8826_v54 = vpop.f32.mrf.mxu1  ;;  %456 = vst [vmem:[#allocation3 + $0xa4] sm:$0x1] %v455_v33  ;;  %v9789_v33 = vld [vmem:[#allocation7] sm:$0xff]  }
 0x1c0   : > { %v8735_v52 = vpop.f32.mrf.mxu0  ;;  %v8827_v51 = vadd.f32 %v8826_v54, %v8825_v49  ;;  %v437_v54 = vsel %vm11057_vm10, 0, %v436_v50 }
 0x1c1   : > { %v8736_v53 = vadd.f32 %v8735_v52, %v8734_v42  ;;  %v11112_v37 = vpop.f32.mrf.mxu1  ;;  %v9785_v52 = vld [vmem:[#allocation7 + $0x90] sm:$0xff]   ;;  %438 = vst [vmem:[#allocation3 + $0x64] sm:$0x1] %v437_v54  ;;  %v9790_v54 = vld [vmem:[#allocation7 + $0xc0] sm:$0xff]  }
 0x1c2   : > { %v8737_v63 = vpop.f32.mrf.mxu0 }
 0x1c3   : > { %v2849_v10 = vadd.f32 %v8736_v53, %v10990_v55  ;;  %v11120_v27 = vpop.f32.mrf.mxu1 }
 0x1c4   : > { %v8738_v16 = vpop.f32.mrf.mxu0 }
 0x1c5   : > { %v11118_v22 = vadd.f32 %v8824_v45, %v2849_v10  ;;  %v8739_v23 = vadd.f32 %v8738_v16, %v8737_v63  ;;  %v11123_v35 = vpop.f32.mrf.mxu1  ;;  %v9784_v45 = vld [vmem:[#allocation7 + $0xd0] sm:$0xff]   ;;  %v371_v10 = vld [vmem:[#allocation3 + $0x88] sm:$0x1] }
 0x1c6   : > { %v8844_v31 = vpop.f32.mrf.mxu0  ;;  %9122 = vmatprep.subr.bf16.mxu0 %v9784_v45  ;;  %v372_v19 = vsel %vm11050_vm8, 0, %v371_v10 }
 0x1c7   : > { %v2852_v34 = vadd.f32 %v8739_v23, %v10990_v55  ;;  %v11127_v42 = vpop.f32.mrf.mxu1  ;;  %v363_v55 = vsel %vm11050_vm8, 0, %v362_v46  ;;  %9123 = vmatpush3.bf16.msra.mxu0 %v9785_v52  ;;  %v446_v23 = vsel %vm11057_vm10, 0, %v445_v11  ;;  %373 = vst [vmem:[#allocation3 + $0x88] sm:$0x1] %v372_v19  ;;  %v9781_v46 = vld [vmem:[#allocation7 + $0x8] sm:$0xff]   ;;  %v464_v19 = vsel %vm11057_vm10, 0, %v463_v4 }
 0x1c8   : > { %v8845_v7 = vpop.f32.mrf.mxu0  ;;  %364 = vst [vmem:[#allocation3 + $0x60] sm:$0x1] %v363_v55  ;;  %447 = vst [vmem:[#allocation3 + $0x8c] sm:$0x1] %v446_v23  ;;  %9124 = vmatprep.subr.bf16.mxu0 %v9786_v14  ;;  %v374_v55 = vld [vmem:[#allocation3 + $0x90] sm:$0x1] }
 0x1c9   : > { %v11125_v40 = vadd.f32 %v8827_v51, %v2852_v34  ;;  %v8846_v41 = vadd.f32 %v8845_v7, %v8844_v31  ;;  %v11132_v13 = vpop.f32.mrf.mxu1  ;;  %v9779_v7 = vld [vmem:[#allocation7 + $0x48] sm:$0xff]   ;;  %v375_v52 = vsel %vm11050_vm8, 0, %v374_v55  ;;  %465 = vst [vmem:[#allocation3 + $0xcc] sm:$0x1] %v464_v19  ;;  %v392_v55 = vld [vmem:[#allocation3 + $0xd0] sm:$0x1] }
 0x1ca   : > { %v8847_v8 = vpop.f32.mrf.mxu0  ;;  %9036 = vmatprep.subr.bf16.mxu1 %v9779_v7  ;;  %376 = vst [vmem:[#allocation3 + $0x90] sm:$0x1] %v375_v52 }
 0x1cb   : > { %v11130_v49 = vadd.f32 %v8846_v41, %v10993_v5  ;;  %v11138_v2 = vpop.f32.mrf.mxu1  ;;  %v378_v5 = vsel %vm11050_vm8, 0, %v377_v57  ;;  %v9788_v41 = vld [vmem:[#allocation7 + $0x88] sm:$0xff]   ;;  %9037 = vmatpush3.bf16.msra.mxu1 %v9781_v46 }
 0x1cc   : > { %v8848_v53 = vpop.f32.mrf.mxu0  ;;  %379 = vst [vmem:[#allocation3 + $0x98] sm:$0x1] %v378_v5  ;;  %9125 = vmatpush3.bf16.msra.mxu0 %v9788_v41  ;;  %v389_v5 = vld [vmem:[#allocation3 + $0xc8] sm:$0x1]  ;;  %9038 = vmatprep.subr.bf16.mxu1 %v9787_v30 }
 0x1cd   : > { %v8849_v63 = vadd.f32 %v8848_v53, %v8847_v8  ;;  %v11147_v18 = vpop.f32.mrf.mxu1  ;;  %v448_v53 = vld [vmem:[#allocation3 + $0x94] sm:$0x1]  ;;  %9126 = vmatprep.subr.bf16.mxu0 %v9790_v54  ;;  %v390_v14 = vsel %vm11050_vm8, 0, %v389_v5 }
 0x1ce   : > { %v8850_v9 = vpop.f32.mrf.mxu0  ;;  %391 = vst [vmem:[#allocation3 + $0xc8] sm:$0x1] %v390_v14  ;;  %v460_v5 = vld [vmem:[#allocation3 + $0xb4] sm:$0x1] }
 0x1cf   : > { %v11145_v16 = vadd.f32 %v8849_v63, %v10996_v17  ;;  %v11153_v32 = vpop.f32.mrf.mxu1  ;;  %v381_v17 = vsel %vm11050_vm8, 0, %v380_v25  ;;  %9039 = vmatpush3.bf16.msra.mxu1 %v9789_v33  ;;  %v461_v19 = vsel %vm11057_vm10, 0, %v460_v5 }
 0x1d0   : > { %v8851_v51 = vpop.f32.mrf.mxu0  ;;  %382 = vst [vmem:[#allocation3 + $0xa0] sm:$0x1] %v381_v17  ;;  %v457_v17 = vld [vmem:[#allocation3 + $0xac] sm:$0x1]  ;;  %462 = vst [vmem:[#allocation3 + $0xb4] sm:$0x1] %v461_v19 }
 0x1d1   : > { %v8852_v31 = vadd.f32 %v8851_v51, %v8850_v9  ;;  %v11162_v8 = vpop.f32.mrf.mxu1  ;;  %v9791_v9 = vld [vmem:[#allocation7 + $0x80] sm:$0xff]   ;;  %v458_v46 = vsel %vm11057_vm10, 0, %v457_v17 }
 0x1d2   : > { %v8853_v34 = vpop.f32.mrf.mxu0  ;;  %9127 = vmatpush3.bf16.msra.mxu0 %v9791_v9  ;;  %459 = vst [vmem:[#allocation3 + $0xac] sm:$0x1] %v458_v46 }
 0x1d3   : > { %v11160_v45 = vadd.f32 %v8852_v31, %v11000_v28  ;;  %v11166_v62 = vpop.f32.mrf.mxu1  ;;  %v449_v28 = vsel %vm11057_vm10, 0, %v448_v53  ;;  %v383_v31 = vld [vmem:[#allocation3 + $0xa8] sm:$0x1]  ;;  %v393_v53 = vsel %vm11050_vm8, 0, %v392_v55 }
 0x1d4   : > { %v8854_v50 = vpop.f32.mrf.mxu0  ;;  %450 = vst [vmem:[#allocation3 + $0x94] sm:$0x1] %v449_v28  ;;  %394 = vst [vmem:[#allocation3 + $0xd0] sm:$0x1] %v393_v53 }
 0x1d5   : > { %v8855_v57 = vadd.f32 %v8854_v50, %v8853_v34  ;;  %v11173_v11 = vpop.f32.mrf.mxu1  ;;  %v384_v34 = vsel %vm11050_vm8, 0, %v383_v31  ;;  %v466_v50 = vld [vmem:[#allocation3 + $0xd4] sm:$0x1] }
 0x1d6   : > { %v8856_v63 = vpop.f32.mrf.mxu0  ;;  %385 = vst [vmem:[#allocation3 + $0xa8] sm:$0x1] %v384_v34  ;;  %v467_v54 = vsel %vm11057_vm10, 0, %v466_v50 }
 0x1d7   : > { %v11171_v10 = vadd.f32 %v8855_v57, %v11003_v38  ;;  %v11179_v25 = vpop.f32.mrf.mxu1  ;;  %468 = vst [vmem:[#allocation3 + $0xd4] sm:$0x1] %v467_v54 }
 0x1d8   : > { %v8857_v23 = vpop.f32.mrf.mxu0 }
 0x1d9   : > { %v8858_v51 = vadd.f32 %v8857_v23, %v8856_v63  ;;  %v11186_v41 = vpop.f32.mrf.mxu1  ;;  %v386_v63 = vld [vmem:[#allocation3 + $0xb0] sm:$0x1] }
 0x1da   : > { %v8859_v38 = vpop.f32.mrf.mxu0  ;;  %v387_v14 = vsel %vm11050_vm8, 0, %v386_v63 }
 0x1db   : > { %v11184_v7 = vadd.f32 %v8858_v51, %v11006_v44  ;;  %v11194_v57 = vpop.f32.mrf.mxu1  ;;  %388 = vst [vmem:[#allocation3 + $0xb0] sm:$0x1] %v387_v14 }
 0x1dc   : > { %v8860_v52 = vpop.f32.mrf.mxu0 }
 0x1dd   : > { %v8861_v44 = vadd.f32 %v8860_v52, %v8859_v38  ;;  %v11199_v9 = vpop.f32.mrf.mxu1 }
 0x1de   : > { %v8862_v28 = vpop.f32.mrf.mxu0 }
 0x1df   : > { %v11197_v4 = vadd.f32 %v8861_v44, %v11010_v56  ;;  %v11205_v30 = vpop.f32.mrf.mxu1 }
 0x1e0   : > { %v8863_v23 = vpop.f32.mrf.mxu0 }
 0x1e1   : > { %v8864_v51 = vadd.f32 %v8863_v23, %v8862_v28  ;;  %v11210_v56 = vpop.f32.mrf.mxu1 }
 0x1e2   : > { %v8865_v31 = vpop.f32.mrf.mxu0 }
 0x1e3   : > { %v11208_v17 = vadd.f32 %v8864_v51, %v11013_v3  ;;  %v11212_v34 = vpop.f32.mrf.mxu1 }
 0x1e4   : > { %v8866_v38 = vpop.f32.mrf.mxu0 }
 0x1e5   : > { %v8867_v33 = vadd.f32 %v8866_v38, %v8865_v31  ;;  %v11217_v50 = vpop.f32.mrf.mxu1  ;;  %v401_v31 = vld [vmem:[#allocation3 + $0xe8] sm:$0x1]  ;;  %v475_v38 = vld [vmem:[#allocation3 + $0xec] sm:$0x1] }
 0x1e6   : > { %v8868_v46 = vpop.f32.mrf.mxu0 }
 0x1e7   : > { %v11215_v55 = vadd.f32 %v8867_v33, %v11016_v0  ;;  %v11222_v3 = vpop.f32.mrf.mxu1 }
 0x1e8   : > { %v8869_v52 = vpop.f32.mrf.mxu0 }
 0x1e9   : > { %v8870_v53 = vadd.f32 %v8869_v52, %v8868_v46  ;;  %v11227_v19 = vpop.f32.mrf.mxu1  ;;  %v402_v46 = vsel %vm11050_vm8, 0, %v401_v31  ;;  %v476_v52 = vsel %vm11057_vm10, 0, %v475_v38 }
 0x1ea   : > { %v8871_v54 = vpop.f32.mrf.mxu0  ;;  %403 = vst [vmem:[#allocation3 + $0xe8] sm:$0x1] %v402_v46  ;;  %477 = vst [vmem:[#allocation3 + $0xec] sm:$0x1] %v476_v52 }
 0x1eb   : > { %v11220_v44 = vadd.f32 %v8870_v53, %v11020_v29  ;;  %v11232_v29 = vpop.f32.mrf.mxu1 }
 0x1ec   : > { %v8872_v28 = vpop.f32.mrf.mxu0 }
 0x1ed   : > { %v8873_v63 = vadd.f32 %v8872_v28, %v8871_v54 }
 0x1ee   : > { %v8874_v5 = vpop.f32.mrf.mxu0 }
 0x1ef   : > { %v11225_v14 = vadd.f32 %v8873_v63, %v11023_v15  ;;  %v11241_v63 = vpop.f32.mrf.mxu1 }
 0x1f0   : > { %v8875_v0 = vpop.f32.mrf.mxu0 }
 0x1f1   : > { %v8876_v23 = vadd.f32 %v8875_v0, %v8874_v5  ;;  %v11243_v36 = vpop.f32.mrf.mxu1 }
 0x1f2   : > { %v8877_v51 = vpop.f32.mrf.mxu0 }
 0x1f3   : > { %v11230_v33 = vadd.f32 %v8876_v23, %v11026_v12  ;;  %v395_v23 = vld [vmem:[#allocation3 + $0xd8] sm:$0x1] }
 0x1f4   : > { %v8878_v15 = vpop.f32.mrf.mxu0  ;;  %v396_v38 = vsel %vm11050_vm8, 0, %v395_v23 }
 0x1f5   : > { %v8879_v53 = vadd.f32 %v8878_v15, %v8877_v51  ;;  %v470_v51 = vsel %vm11057_vm10, 0, %v469_v48  ;;  %397 = vst [vmem:[#allocation3 + $0xd8] sm:$0x1] %v396_v38  ;;  %v11252_v15 = vpop.f32.mrf.mxu1 }
 0x1f6   : > { %v8880_v54 = vpop.f32.mrf.mxu0  ;;  %471 = vst [vmem:[#allocation3 + $0xdc] sm:$0x1] %v470_v51  ;;  %v9801_v51 = vld [vmem:[#allocation7 + $0x178] sm:$0xff]  }
 0x1f7   : > { %v11239_v28 = vadd.f32 %v8879_v53, %v11030_v58  ;;  %v11261_v38 = vpop.f32.mrf.mxu1  ;;  %9200 = vmatprep.subr.bf16.mxu1 %v9801_v51 }
 0x1f8   : > { %v8881_v12 = vpop.f32.mrf.mxu0 }
 0x1f9   : > { %v8882_v5 = vadd.f32 %v8881_v12, %v8880_v54 }
 0x1fa   : > { %v8883_v0 = vpop.f32.mrf.mxu0 }
 0x1fb   : > { %v11246_v31 = vadd.f32 %v8882_v5, %v11033_v6  ;;  %v404_v6 = vld [vmem:[#allocation3 + $0xf0] sm:$0x1]  ;;  %v478_v5 = vld [vmem:[#allocation3 + $0xf4] sm:$0x1] }
 0x1fc   : > { %v8884_v58 = vpop.f32.mrf.mxu0  ;;  %v405_v23 = vsel %vm11050_vm8, 0, %v404_v6  ;;  %v479_v48 = vsel %vm11057_vm10, 0, %v478_v5  ;;  %v11270_v5 = vpop.f32.mrf.mxu1 }
 0x1fd   : > { %12386 = vst [vmem:[#allocation17_spill] sm:$0xff] %v11246_v31  ;;  %v8885_v46 = vadd.f32 %v8884_v58, %v8883_v0  ;;  %406 = vst [vmem:[#allocation3 + $0xf0] sm:$0x1] %v405_v23  ;;  %v398_v58 = vld [vmem:[#allocation3 + $0xe0] sm:$0x1] }
 0x1fe   : > { %v8886_v52 = vpop.f32.mrf.mxu0  ;;  %480 = vst [vmem:[#allocation3 + $0xf4] sm:$0x1] %v479_v48 }
 0x1ff   : > { %v11255_v53 = vadd.f32 %v8885_v46, %v11036_v21 }
 0x200   : > { %v8887_v54 = vpop.f32.mrf.mxu0 }
 0x201   : > { %12387 = vst [vmem:[#allocation18_spill] sm:$0xff] %v11255_v53  ;;  %v8888_v12 = vadd.f32 %v8887_v54, %v8886_v52  ;;  %v399_v52 = vsel %vm11050_vm8, 0, %v398_v58  ;;  %v472_v54 = vld [vmem:[#allocation3 + $0xe4] sm:$0x1] }
 0x202   : > { %v8889_v60 = vpop.f32.mrf.mxu0  ;;  %400 = vst [vmem:[#allocation3 + $0xe0] sm:$0x1] %v399_v52  ;;  %v473_v6 = vsel %vm11057_vm10, 0, %v472_v54 }
 0x203   : > { %v11264_v0 = vadd.f32 %v8888_v12, %v11039_v59  ;;  %474 = vst [vmem:[#allocation3 + $0xe4] sm:$0x1] %v473_v6 }
 0x204   : > { %v8890_v21 = vpop.f32.mrf.mxu0 }
 0x205   : > { %12388 = vst [vmem:[#allocation19_spill] sm:$0xff] %v11264_v0  ;;  %v8891_v46 = vadd.f32 %v8890_v21, %v8889_v60  ;;  %v8972_v60 = vpop.f32.mrf.mxu1 }
 0x206   : > { %v8892_v53 = vpop.f32.mrf.mxu0 }
 0x207   : > { %v11273_v59 = vadd.f32 %v8891_v46, %v11042_v39  ;;  %v8974_v52 = vpop.f32.mrf.mxu1 }
 0x208   : > { %v8893_v12 = vpop.f32.mrf.mxu0 }
 0x209   : > { %v8894_v23 = vadd.f32 %v8893_v12, %v8892_v53  ;;  %v8975_v39 = vpop.f32.mrf.mxu1 }
 0x20a   : > { %v8895_v48 = vpop.f32.mrf.mxu0 }
 0x20b   : > { %v11276_v21 = vadd.f32 %v8894_v23, %v11045_v47  ;;  %v8977_v47 = vpop.f32.mrf.mxu1 }
 0x20c   : > { %v8896_v58 = vpop.f32.mrf.mxu0 }
 0x20d   : > { %12389 = vst [vmem:[#allocation20_spill] sm:$0xff] %v11276_v21  ;;  %v8897_v1 = vadd.f32 %v8896_v58, %v8895_v48  ;;  %v8978_v58 = vpop.f32.mrf.mxu1 }
 0x20e   : > { %v8898_v51 = vpop.f32.mrf.mxu0 }
 0x20f   : > { %v11279_v24 = vadd.f32 %v8897_v1, %v11048_v61 }
 0x210   : > { %v8899_v54 = vpop.f32.mrf.mxu0 }
 0x211   : > { %12390 = vst [vmem:[#allocation21_spill] sm:$0xff] %v11279_v24  ;;  %v8900_v0 = vadd.f32 %v8899_v54, %v8898_v51  ;;  %v8980_v54 = vpop.f32.mrf.mxu1 }
 0x212   : > { %v11281_v31 = vpop.f32.mrf.mxu0 }
 0x213   : > { %v11284_v46 = vadd.f32 %v8900_v0, %v11064_v20  ;;  %v8934_v0 = vadd.f32 %v11120_v27, %v11112_v37  ;;  %v8949_v37 = vadd.f32 %v11179_v25, %v11173_v11  ;;  %v8961_v11 = vadd.f32 %v11222_v3, %v11217_v50 }
 0x214   : > { %v11286_v53 = vpop.f32.mrf.mxu0  ;;  %v8979_v3 = vadd.f32 %v8978_v58, %v8977_v47 }
 0x215   : > { %12391 = vst [vmem:[#allocation22_spill] sm:$0xff] %v11284_v46  ;;  %v8940_v46 = vadd.f32 %v11138_v2, %v11132_v13  ;;  %v8952_v13 = vadd.f32 %v11194_v57, %v11186_v41  ;;  %v8964_v57 = vadd.f32 %v11232_v29, %v11227_v19 }
 0x216   : > { %v8904_v6 = vpop.f32.mrf.mxu0 }
 0x217   : > { %v3172_v50 = vadd.f32 %v8952_v13, %v11208_v17  ;;  %v11346_v17 = vadd.f32 %v8964_v57, %v11230_v33  ;;  %v11363_v33 = vadd.f32 %v8979_v3, %v11273_v59 }
 0x218   : > { %v8905_v12 = vpop.f32.mrf.mxu0 }
 0x219   : > { %v8906_v23 = vadd.f32 %v8905_v12, %v8904_v6  ;;  %v8937_v12 = vadd.f32 %v11127_v42, %v11123_v35  ;;  %v3156_v35 = vadd.f32 %v8940_v46, %v11160_v45  ;;  %v3148_v42 = vadd.f32 %v8934_v0, %v11130_v49  ;;  %v12394_v0 = vld [vmem:[#allocation19_spill] sm:$0xff] }
 0x21a   : > { %v8907_v48 = vpop.f32.mrf.mxu0 }
 0x21b   : > { %v11289_v21 = vadd.f32 %v8906_v23, %v11090_v26  ;;  %v8943_v26 = vadd.f32 %v11153_v32, %v11147_v18  ;;  %v8955_v18 = vadd.f32 %v11205_v30, %v11199_v9  ;;  %v8967_v9 = vadd.f32 %v11243_v36, %v11241_v63 }
 0x21c   : > { %v8908_v61 = vpop.f32.mrf.mxu0  ;;  %v11332_v30 = vadd.f32 %v8949_v37, %v11197_v4  ;;  %v3745_v37 = vld [vmem:[#allocation3 + $0x18] sm:$0xf] }
 0x21d   : > { %v8909_v1 = vadd.f32 %v8908_v61, %v8907_v48  ;;  %v8946_v48 = vadd.f32 %v11166_v62, %v11162_v8  ;;  %v3159_v8 = vadd.f32 %v8943_v26, %v11171_v10  ;;  %v3151_v62 = vadd.f32 %v8937_v12, %v11145_v16 }
 0x21e   : > { %v8910_v51 = vpop.f32.mrf.mxu0  ;;  %v8970_v10 = vadd.f32 %v11261_v38, %v11252_v15  ;;  %v11337_v19 = vadd.f32 %v8955_v18, %v11215_v55  ;;  %v11343_v38 = vadd.f32 %v8961_v11, %v11225_v14  ;;  %v12392_v55 = vld [vmem:[#allocation17_spill] sm:$0xff]  ;;  %v12397_v18 = vld [vmem:[#allocation20_spill] sm:$0xff] }
 0x21f   : > { %v11292_v24 = vadd.f32 %v8909_v1, %v11101_v43  ;;  %v8981_v43 = vpop.f32.mrf.mxu1  ;;  %v3164_v49 = vadd.f32 %v8946_v48, %v11184_v7  ;;  %v8976_v7 = vadd.f32 %v8975_v39, %v8974_v52  ;;  %v11349_v52 = vadd.f32 %v8967_v9, %v11239_v28  ;;  %v12393_v1 = vld [vmem:[#allocation18_spill] sm:$0xff]  ;;  %v9845_v48 = vld [vmem:[#allocation7 + $0x1f8] sm:$0xff]  }
 0x220   : > { %v8911_v20 = vpop.f32.mrf.mxu0  ;;  %v11352_v39 = vadd.f32 %v8970_v10, %v12392_v55  ;;  %9288 = vmatprep.subr.bf16.mxu0 %v9845_v48  ;;  %v3751_v55 = vld [vmem:[#allocation3 + $0x20] sm:$0xf] }
 0x221   : > { %v8912_v6 = vadd.f32 %v8911_v20, %v8910_v51  ;;  %v8983_v25 = vpop.f32.mrf.mxu1 }
 0x222   : > { %v8913_v23 = vpop.f32.mrf.mxu0 }
 0x223   : > { %v11305_v61 = vadd.f32 %v8912_v6, %v11118_v22  ;;  %v8958_v22 = vadd.f32 %v11212_v34, %v11210_v56  ;;  %v8973_v56 = vadd.f32 %v8972_v60, %v11270_v5  ;;  %v8984_v29 = vpop.f32.mrf.mxu1  ;;  %v8982_v5 = vadd.f32 %v8981_v43, %v8980_v54  ;;  %v9880_v43 = vld [vmem:[#allocation7 + $0x1d8] sm:$0xff]  }
 0x224   : > { %v8914_v27 = vpop.f32.mrf.mxu0  ;;  %v11357_v20 = vadd.f32 %v8984_v29, %v8983_v25  ;;  %v11360_v6 = vadd.f32 %v8976_v7, %v12394_v0  ;;  %v3733_v25 = vld [vmem:[#allocation3 + $0x8] sm:$0xf] }
 0x225   : > { %v8915_v2 = vadd.f32 %v8914_v27, %v8913_v23  ;;  %v11340_v36 = vadd.f32 %v8958_v22, %v11220_v44  ;;  %v11355_v51 = vadd.f32 %v8973_v56, %v12393_v1  ;;  %v3748_v27 = vld [vmem:[#allocation3 + $0x1c] sm:$0x1]  ;;  %v11372_v59 = vadd.f32 %v8982_v5, %v12397_v18  ;;  %v11374_v22 = vpop.f32.mrf.mxu1 }
 0x226   : > { %v9414_v32 = vpop.f32.mrf.mxu0 }
 0x227   : > { %v11322_v45 = vadd.f32 %v8915_v2, %v11125_v40  ;;  %v3285_v41 = vadd.f32 %v9414_v32, %v3156_v35  ;;  %v11380_v5 = vpop.f32.mrf.mxu1 }
 0x228   : > { %v3276_v16 = vpop.f32.mrf.mxu0 }
 0x229   : > { %v3373_v40 = vmax.f32 %v3285_v41, 0.0  ;;  %v3277_v34 = vadd.f32 %v3276_v16, %v3148_v42  ;;  %v3736_v41 = vld [vmem:[#allocation3 + $0xc] sm:$0x1]  ;;  %v11396_v18 = vpop.f32.mrf.mxu1 }
 0x22a   : > { %v9415_v46 = vpop.f32.mrf.mxu0 }
 0x22b   : > { %v8630_v63 = vpack.c.bf16 %v3373_v40, %v3373_v40  ;;  %v3371_v15 = vmax.f32 %v3277_v34, 0.0  ;;  %v3288_v4 = vadd.f32 %v9415_v46, %v3159_v8 }
 0x22c   : > { %v3279_v60 = vpop.f32.mrf.mxu0 }
 0x22d   : > { %v3508_v44 = vshrl.u32 %v8630_v63, 16  ;;  %v8628_v47 = vpack.c.bf16 %v3371_v15, %v3371_v15  ;;  %v3374_v58 = vmax.f32 %v3288_v4, 0.0  ;;  %v3280_v14 = vadd.f32 %v3279_v60, %v3151_v62 }
 0x22e   : > { %v9418_v54 = vpop.f32.mrf.mxu0  ;;  %v3511_v12 = vshll.u32 %v8630_v63, 16 }
 0x22f   : > { %v3510_v28 = vrot.slane %v3508_v44, 7  ;;  %v3492_v26 = vshrl.u32 %v8628_v47, 16  ;;  %v8631_v23 = vpack.c.bf16 %v3374_v58, %v3374_v58  ;;  %v3495_v13 = vshll.u32 %v8628_v47, 16  ;;  %v3754_v44 = vld [vmem:[#allocation3 + $0x24] sm:$0x1] }
 0x230   : > { %v3372_v2 = vmax.f32 %v3280_v14, 0.0  ;;  %v3301_v35 = vadd.f32 %v9418_v54, %v3172_v50  ;;  %v3292_v42 = vpop.f32.mrf.mxu0 }
 0x231   : > { %v3513_v32 = vor.u32 %v3511_v12, %v3510_v28  ;;  %v3514_v8 = vrot.slane %v3510_v28, 4  ;;  %v3494_v62 = vrot.slane %v3492_v26, 7  ;;  %v3516_v11 = vshrl.u32 %v8631_v23, 16  ;;  %v3739_v26 = vld [vmem:[#allocation3 + $0x10] sm:$0xf] }
 0x232   : > { %v3519_v57 = vshll.u32 %v8631_v23, 16  ;;  %v8629_v9 = vpack.c.bf16 %v3372_v2, %v3372_v2  ;;  %v3377_v10 = vmax.f32 %v3301_v35, 0.0  ;;  %v3293_v16 = vadd.f32 %v3292_v42, %v3164_v49  ;;  %v9419_v56 = vpop.f32.mrf.mxu0  ;;  %v3742_v23 = vld [vmem:[#allocation3 + $0x14] sm:$0x1] }
 0x233   : > { %v3746_v40 = vsel %vm11367_vm12, %v3513_v32, %v3745_v37  ;;  %v3749_v50 = vsel %vm11050_vm8, %v3514_v8, %v3748_v27  ;;  %v3497_v7 = vor.u32 %v3495_v13, %v3494_v62  ;;  %v3498_v3 = vrot.slane %v3494_v62, 4 }
 0x234   : > { %3747 = vst [vmem:[#allocation3 + $0x18] sm:$0xf] %v3746_v40  ;;  %3750 = vst [vmem:[#allocation3 + $0x1c] sm:$0x1] %v3749_v50  ;;  %v3518_v46 = vrot.slane %v3516_v11, 7  ;;  %v3500_v29 = vshrl.u32 %v8629_v9, 16  ;;  %v8634_v15 = vpack.c.bf16 %v3377_v10, %v3377_v10  ;;  %v3295_v4 = vpop.f32.mrf.mxu0  ;;  %v3304_v58 = vadd.f32 %v9419_v56, %v11337_v19 }
 0x235   : > { %v3503_v63 = vshll.u32 %v8629_v9, 16  ;;  %v3734_v49 = vsel %vm11367_vm12, %v3497_v7, %v3733_v25  ;;  %v3737_v60 = vsel %vm11050_vm8, %v3498_v3, %v3736_v41  ;;  %v3375_v47 = vmax.f32 %v3293_v16, 0.0  ;;  %v3769_v11 = vld [vmem:[#allocation3 + $0x48] sm:$0xf]  ;;  %v3772_v10 = vld [vmem:[#allocation3 + $0x4c] sm:$0x1] }
 0x236   : > { %3735 = vst [vmem:[#allocation3 + $0x8] sm:$0xf] %v3734_v49  ;;  %3738 = vst [vmem:[#allocation3 + $0xc] sm:$0x1] %v3737_v60  ;;  %v3521_v1 = vor.u32 %v3519_v57, %v3518_v46  ;;  %v3522_v14 = vrot.slane %v3518_v46, 4  ;;  %v3502_v54 = vrot.slane %v3500_v29, 7  ;;  %v9422_v28 = vpop.f32.mrf.mxu0  ;;  %v11389_v12 = vadd.f32 %v11286_v53, %v11281_v31 }
 0x237   : > { %v3540_v0 = vshrl.u32 %v8634_v15, 16  ;;  %v8632_v48 = vpack.c.bf16 %v3375_v47, %v3375_v47  ;;  %v3378_v37 = vmax.f32 %v3304_v58, 0.0  ;;  %v3296_v27 = vadd.f32 %v3295_v4, %v11332_v30  ;;  %v3760_v4 = vld [vmem:[#allocation3 + $0x2c] sm:$0x1] }
 0x238   : > { %v3752_v19 = vsel %vm11367_vm12, %v3521_v1, %v3751_v55  ;;  %v3755_v13 = vsel %vm11050_vm8, %v3522_v14, %v3754_v44  ;;  %v3505_v2 = vor.u32 %v3503_v63, %v3502_v54  ;;  %v3506_v35 = vrot.slane %v3502_v54, 4  ;;  %v3308_v42 = vpop.f32.mrf.mxu0  ;;  %v11407_v63 = vpop.f32.mrf.mxu1  ;;  %v3775_v1 = vld [vmem:[#allocation3 + $0x50] sm:$0xf] }
 0x239   : > { %3753 = vst [vmem:[#allocation3 + $0x20] sm:$0xf] %v3752_v19  ;;  %3756 = vst [vmem:[#allocation3 + $0x24] sm:$0x1] %v3755_v13  ;;  %v3542_v31 = vrot.slane %v3540_v0, 7  ;;  %v3543_v53 = vshll.u32 %v8634_v15, 16  ;;  %v8635_v8 = vpack.c.bf16 %v3378_v37, %v3378_v37  ;;  %v3317_v41 = vadd.f32 %v9422_v28, %v11346_v17 }
 0x23a   : > { %v3524_v32 = vshrl.u32 %v8632_v48, 16  ;;  %v3740_v30 = vsel %vm11367_vm12, %v3505_v2, %v3739_v26  ;;  %v3743_v62 = vsel %vm11050_vm8, %v3506_v35, %v3742_v23  ;;  %v3376_v25 = vmax.f32 %v3296_v27, 0.0  ;;  %v9423_v57 = vpop.f32.mrf.mxu0  ;;  %v3757_v15 = vld [vmem:[#allocation3 + $0x28] sm:$0xf]  ;;  %v3778_v27 = vld [vmem:[#allocation3 + $0x54] sm:$0x1] }
 0x23b   : > { %3741 = vst [vmem:[#allocation3 + $0x10] sm:$0xf] %v3740_v30  ;;  %3744 = vst [vmem:[#allocation3 + $0x14] sm:$0x1] %v3743_v62  ;;  %v3545_v9 = vor.u32 %v3543_v53, %v3542_v31  ;;  %v3527_v16 = vshll.u32 %v8632_v48, 16  ;;  %v3309_v56 = vadd.f32 %v3308_v42, %v11340_v36  ;;  %v11405_v40 = vadd.f32 %v9423_v57, %v11349_v52  ;;  %v11422_v42 = vpop.f32.mrf.mxu1 }
 0x23c   : > { %v3546_v50 = vrot.slane %v3542_v31, 4  ;;  %v3526_v7 = vrot.slane %v3524_v32, 7  ;;  %v3548_v3 = vshrl.u32 %v8635_v8, 16  ;;  %v3551_v46 = vshll.u32 %v8635_v8, 16  ;;  %v3311_v29 = vpop.f32.mrf.mxu0  ;;  %v3763_v19 = vld [vmem:[#allocation3 + $0x30] sm:$0xf] }
 0x23d   : > { %v3770_v17 = vsel %vm11367_vm12, %v3545_v9, %v3769_v11  ;;  %v8633_v49 = vpack.c.bf16 %v3376_v25, %v3376_v25  ;;  %v3381_v60 = vmax.f32 %v3317_v41, 0.0  ;;  %v3379_v55 = vmax.f32 %v3309_v56, 0.0  ;;  %v4597_v26 = vld [vmem:[#allocation3 + $0x8] sm:$0xf]  ;;  %v3766_v13 = vld [vmem:[#allocation3 + $0x34] sm:$0x1] }
 0x23e   : > { %3771 = vst [vmem:[#allocation3 + $0x48] sm:$0xf] %v3770_v17  ;;  %v3773_v36 = vsel %vm11050_vm8, %v3546_v50, %v3772_v10  ;;  %v3529_v52 = vor.u32 %v3527_v16, %v3526_v7  ;;  %v3530_v44 = vrot.slane %v3526_v7, 4  ;;  %v3550_v47 = vrot.slane %v3548_v3, 7  ;;  %v9426_v58 = vpop.f32.mrf.mxu0  ;;  %4621 = vst [vmem:[#allocation2 + $0xc] sm:$0xf] %v4597_v26 }
 0x23f   : > { %3774 = vst [vmem:[#allocation3 + $0x4c] sm:$0x1] %v3773_v36  ;;  %v3532_v14 = vshrl.u32 %v8633_v49, 16  ;;  %v3535_v54 = vshll.u32 %v8633_v49, 16  ;;  %v8638_v0 = vpack.c.bf16 %v3381_v60, %v3381_v60  ;;  %v11413_v28 = vpack.c.bf16 %v3379_v55, %v3379_v55  ;;  %v4599_v17 = vld [vmem:[#allocation3 + $0x18] sm:$0xf] }
 0x240   : > { %v3758_v23 = vsel %vm11367_vm12, %v3529_v52, %v3757_v15  ;;  %v3761_v48 = vsel %vm11050_vm8, %v3530_v44, %v3760_v4  ;;  %v3553_v37 = vor.u32 %v3551_v46, %v3550_v47  ;;  %v11420_v2 = vadd.f32 %v3311_v29, %v11343_v38  ;;  %v3324_v35 = vpop.f32.mrf.mxu0  ;;  %v5802_v31 = vld [vmem:[#allocation3 + $0x20] sm:$0xe]  ;;  %v5803_v53 = vld [vmem:[#allocation3 + $0x24] sm:$0x1]  ;;  %v11436_v15 = vpop.f32.mrf.mxu1  ;;  %v3793_v60 = vld [vmem:[#allocation3 + $0x68] sm:$0xf] }
 0x241   : > { %3759 = vst [vmem:[#allocation3 + $0x28] sm:$0xf] %v3758_v23  ;;  %3762 = vst [vmem:[#allocation3 + $0x2c] sm:$0x1] %v3761_v48  ;;  %v3554_v32 = vrot.slane %v3550_v47, 4  ;;  %v3534_v8 = vrot.slane %v3532_v14, 7  ;;  %v3333_v30 = vadd.f32 %v9426_v58, %v11360_v6  ;;  %v11426_v62 = vadd.f32 %v3324_v35, %v11352_v39 }
 0x242   : > { %v8419_v11 = vrot.slane %v5802_v31, 9  ;;  %v5904_v25 = vrot.slane %v5803_v53, 5  ;;  %v3776_v38 = vsel %vm11367_vm12, %v3553_v37, %v3775_v1  ;;  %v3572_v41 = vshrl.u32 %v8638_v0, 16  ;;  %v9427_v57 = vpop.f32.mrf.mxu0  ;;  %v4598_v9 = vld [vmem:[#allocation3 + $0x10] sm:$0xf] }
 0x243   : > { %3777 = vst [vmem:[#allocation3 + $0x50] sm:$0xf] %v3776_v38  ;;  %v3779_v10 = vsel %vm11050_vm8, %v3554_v32, %v3778_v27  ;;  %v3537_v16 = vor.u32 %v3535_v54, %v3534_v8  ;;  %v3538_v56 = vrot.slane %v3534_v8, 4  ;;  %v3575_v50 = vshll.u32 %v8638_v0, 16  ;;  %4622 = vst [vmem:[#allocation2 + $0x30] sm:$0xf] %v4598_v9 }
 0x244   : > { %v5905_v39 = vsel %vm10406_vm5, %v8419_v11, %v5904_v25  ;;  %3780 = vst [vmem:[#allocation3 + $0x54] sm:$0x1] %v3779_v10  ;;  %v3574_v7 = vrot.slane %v3572_v41, 7  ;;  %v3556_v3 = vshrl.u32 %v11413_v28, 16  ;;  %v3559_v46 = vshll.u32 %v11413_v28, 16  ;;  %v3327_v29 = vpop.f32.mrf.mxu0  ;;  %v12400_v28 = vld [vmem:[#allocation16_spill] sm:$0xff] }
 0x245   : > { %6016 = vst [vmem:[#allocation2 + $0x68] sm:$0xf] %v5905_v39  ;;  %v3764_v4 = vsel %vm11367_vm12, %v3537_v16, %v3763_v19  ;;  %v3767_v49 = vsel %vm11050_vm8, %v3538_v56, %v3766_v13  ;;  %v3796_v55 = vld [vmem:[#allocation3 + $0x6c] sm:$0x1]  ;;  %v3382_v36 = vmax.f32 %v11405_v40, 0.0  ;;  %v3380_v52 = vmax.f32 %v11420_v2, 0.0 }
 0x246   : > { %4623 = vst [vmem:[#allocation2 + $0x54] sm:$0xf] %v4599_v17  ;;  %3765 = vst [vmem:[#allocation3 + $0x30] sm:$0xf] %v3764_v4  ;;  %v3577_v44 = vor.u32 %v3575_v50, %v3574_v7  ;;  %v3578_v47 = vrot.slane %v3574_v7, 4  ;;  %v3558_v58 = vrot.slane %v3556_v3, 7  ;;  %v9430_v14 = vpop.f32.mrf.mxu0  ;;  %v8988_v0 = vadd.f32 %v11380_v5, %v11374_v22 }
 0x247   : > { %3768 = vst [vmem:[#allocation3 + $0x34] sm:$0x1] %v3767_v49  ;;  %v3385_v1 = vmax.f32 %v3333_v30, 0.0  ;;  %v4600_v54 = vld [vmem:[#allocation3 + $0x20] sm:$0xf]  ;;  %v3094_v26 = vadd.f32 %v11389_v12, %v12400_v28  ;;  %v8991_v40 = vadd.f32 %v11407_v63, %v11396_v18  ;;  %v8639_v48 = vpack.c.bf16 %v3382_v36, %v3382_v36  ;;  %v11455_v12 = vpop.f32.mrf.mxu1  ;;  %v12402_v10 = vld [vmem:[#allocation22_spill] sm:$0xff] }
 0x248   : > { %v3781_v23 = vld [vmem:[#allocation3 + $0x58] sm:$0xf]  ;;  %4624 = vst [vmem:[#allocation2 + $0x78] sm:$0xf] %v4600_v54  ;;  %v3878_v37 = vld [vmem:[#allocation3 + $0x8] sm:$0xf]  ;;  %v3794_v27 = vsel %vm11367_vm12, %v3577_v44, %v3793_v60  ;;  %v3797_v19 = vsel %vm11050_vm8, %v3578_v47, %v3796_v55  ;;  %v3561_v13 = vor.u32 %v3559_v46, %v3558_v58  ;;  %v3340_v5 = vpop.f32.mrf.mxu0  ;;  %v8637_v53 = vpack.c.bf16 %v3380_v52, %v3380_v52 }
 0x249   : > { %v3784_v2 = vld [vmem:[#allocation3 + $0x5c] sm:$0x1]  ;;  %v3383_v22 = vmax.f32 %v11426_v62, 0.0  ;;  %3902 = vst [vmem:[#allocation2 + $0x24] sm:$0xf] %v3878_v37  ;;  %v3562_v63 = vrot.slane %v3558_v58, 4  ;;  %v8642_v32 = vpack.c.bf16 %v3385_v1, %v3385_v1  ;;  %v3336_v41 = vadd.f32 %v9427_v57, %v11363_v33  ;;  %v11468_v17 = vpop.f32.mrf.mxu1 }
 0x24a   : > { %v5804_v35 = vld [vmem:[#allocation3 + $0x28] sm:$0xe]  ;;  %v5805_v18 = vld [vmem:[#allocation3 + $0x2c] sm:$0x1]  ;;  %3795 = vst [vmem:[#allocation3 + $0x68] sm:$0xf] %v3794_v27  ;;  %v3782_v11 = vsel %vm11367_vm12, %v3561_v13, %v3781_v23  ;;  %v3328_v9 = vadd.f32 %v3327_v29, %v11355_v51  ;;  %v3220_v16 = vadd.f32 %v8988_v0, %v12402_v10  ;;  %v9431_v56 = vpop.f32.mrf.mxu0  ;;  %v3223_v51 = vadd.f32 %v8991_v40, %v3094_v26 }
 0x24b   : > { %3798 = vst [vmem:[#allocation3 + $0x6c] sm:$0x1] %v3797_v19  ;;  %v3580_v31 = vshrl.u32 %v8639_v48, 16  ;;  %v8420_v8 = vrot.slane %v5804_v35, 9  ;;  %v5908_v30 = vrot.slane %v5805_v18, 5  ;;  %v12401_v25 = vld [vmem:[#allocation21_spill] sm:$0xff]  ;;  %v3785_v38 = vsel %vm11050_vm8, %v3562_v63, %v3784_v2  ;;  %v8998_v27 = vpop.f32.mrf.mxu1 }
 0x24c   : > { %v3215_v62 = vadd.f32 %v11357_v20, %v12401_v25  ;;  %3783 = vst [vmem:[#allocation3 + $0x58] sm:$0xf] %v3782_v11  ;;  %3786 = vst [vmem:[#allocation3 + $0x5c] sm:$0x1] %v3785_v38  ;;  %v3583_v7 = vshll.u32 %v8639_v48, 16  ;;  %v8640_v46 = vpack.c.bf16 %v3383_v22, %v3383_v22  ;;  %v3564_v49 = vshrl.u32 %v8637_v53, 16  ;;  %v3343_v28 = vpop.f32.mrf.mxu0 }
 0x24d   : > { %v5909_v50 = vsel %vm10406_vm5, %v8420_v8, %v5908_v30  ;;  %v3582_v39 = vrot.slane %v3580_v31, 7  ;;  %v3799_v3 = vld [vmem:[#allocation3 + $0x70] sm:$0xf]  ;;  %v3802_v4 = vld [vmem:[#allocation3 + $0x74] sm:$0x1]  ;;  %v3604_v33 = vshrl.u32 %v8642_v32, 16  ;;  %v3349_v57 = vadd.f32 %v9430_v14, %v3220_v16 }
 0x24e   : > { %v3879_v20 = vld [vmem:[#allocation3 + $0x10] sm:$0xf]  ;;  %6017 = vst [vmem:[#allocation2 + $0x8c] sm:$0xf] %v5909_v50  ;;  %v3880_v29 = vld [vmem:[#allocation3 + $0x18] sm:$0xf]  ;;  %v3341_v37 = vadd.f32 %v3340_v5, %v11372_v59  ;;  %v3352_v63 = vadd.f32 %v9431_v56, %v3223_v51  ;;  %v3344_v31 = vadd.f32 %v3343_v28, %v3215_v62 }
 0x24f   : > { %3903 = vst [vmem:[#allocation2 + $0x48] sm:$0xf] %v3879_v20  ;;  %v3585_v60 = vor.u32 %v3583_v7, %v3582_v39  ;;  %v3586_v55 = vrot.slane %v3582_v39, 4  ;;  %v3567_v36 = vshll.u32 %v8637_v53, 16  ;;  %v3787_v52 = vld [vmem:[#allocation3 + $0x60] sm:$0xf] }
 0x250   : > { %v3607_v44 = vshll.u32 %v8642_v32, 16  ;;  %3904 = vst [vmem:[#allocation2 + $0x6c] sm:$0xf] %v3880_v29  ;;  %v3566_v47 = vrot.slane %v3564_v49, 7  ;;  %v3790_v58 = vld [vmem:[#allocation3 + $0x64] sm:$0x1] }
 0x251   : > { %v3606_v1 = vrot.slane %v3604_v33, 7  ;;  %v3386_v54 = vmax.f32 %v3336_v41, 0.0  ;;  %v3384_v0 = vmax.f32 %v3328_v9, 0.0  ;;  %v3800_v23 = vsel %vm11367_vm12, %v3585_v60, %v3799_v3  ;;  %v3817_v26 = vld [vmem:[#allocation3 + $0x98] sm:$0xf]  ;;  %v8999_v41 = vpop.f32.mrf.mxu1 }
 0x252   : > { %v3803_v14 = vsel %vm11050_vm8, %v3586_v55, %v3802_v4  ;;  %v3820_v40 = vld [vmem:[#allocation3 + $0x9c] sm:$0x1]  ;;  %v3588_v48 = vshrl.u32 %v8640_v46, 16  ;;  %3801 = vst [vmem:[#allocation3 + $0x70] sm:$0xf] %v3800_v23  ;;  %v3569_v19 = vor.u32 %v3567_v36, %v3566_v47  ;;  %v3570_v13 = vrot.slane %v3566_v47, 4 }
 0x253   : > { %3804 = vst [vmem:[#allocation3 + $0x74] sm:$0x1] %v3803_v14  ;;  %v3609_v2 = vor.u32 %v3607_v44, %v3606_v1  ;;  %v3610_v22 = vrot.slane %v3606_v1, 4  ;;  %v8643_v35 = vpack.c.bf16 %v3386_v54, %v3386_v54  ;;  %v8641_v18 = vpack.c.bf16 %v3384_v0, %v3384_v0  ;;  %v3805_v8 = vld [vmem:[#allocation3 + $0x88] sm:$0xf] }
 0x254   : > { %v3788_v53 = vsel %vm11367_vm12, %v3569_v19, %v3787_v52  ;;  %v3791_v32 = vsel %vm11050_vm8, %v3570_v13, %v3790_v58  ;;  %v3590_v30 = vrot.slane %v3588_v48, 7  ;;  %v3591_v11 = vshll.u32 %v8640_v46, 16  ;;  %v3808_v25 = vld [vmem:[#allocation3 + $0x8c] sm:$0x1]  ;;  %v3823_v9 = vld [vmem:[#allocation3 + $0xa0] sm:$0xf] }
 0x255   : > { %v3818_v59 = vsel %vm11367_vm12, %v3609_v2, %v3817_v26  ;;  %v3821_v5 = vsel %vm11050_vm8, %v3610_v22, %v3820_v40  ;;  %3789 = vst [vmem:[#allocation3 + $0x60] sm:$0xf] %v3788_v53  ;;  %3792 = vst [vmem:[#allocation3 + $0x64] sm:$0x1] %v3791_v32  ;;  %v3612_v62 = vshrl.u32 %v8643_v35, 16  ;;  %v3615_v38 = vshll.u32 %v8643_v35, 16  ;;  %v9434_v2 = vpop.f32.mrf.mxu0  ;;  %v9001_v35 = vpop.f32.mrf.mxu1 }
 0x256   : > { %3819 = vst [vmem:[#allocation3 + $0x98] sm:$0xf] %v3818_v59  ;;  %3822 = vst [vmem:[#allocation3 + $0x9c] sm:$0x1] %v3821_v5  ;;  %v3596_v10 = vshrl.u32 %v8641_v18, 16  ;;  %v3599_v16 = vshll.u32 %v8641_v18, 16  ;;  %v3593_v39 = vor.u32 %v3591_v11, %v3590_v30  ;;  %v9000_v55 = vadd.f32 %v8999_v41, %v8998_v27 }
 0x257   : > { %v3389_v56 = vmax.f32 %v3349_v57, 0.0  ;;  %v3387_v50 = vmax.f32 %v3341_v37, 0.0  ;;  %v3594_v7 = vrot.slane %v3590_v30, 4  ;;  %v3614_v3 = vrot.slane %v3612_v62, 7  ;;  %v4601_v4 = vld [vmem:[#allocation3 + $0x28] sm:$0xf] }
 0x258   : > { %v3390_v20 = vmax.f32 %v3352_v63, 0.0  ;;  %v3598_v49 = vrot.slane %v3596_v10, 7  ;;  %v3388_v29 = vmax.f32 %v3344_v31, 0.0  ;;  %v4602_v60 = vld [vmem:[#allocation3 + $0x30] sm:$0xf]  ;;  %v3806_v36 = vsel %vm11367_vm12, %v3593_v39, %v3805_v8 }
 0x259   : > { %v8646_v33 = vpack.c.bf16 %v3389_v56, %v3389_v56  ;;  %v8644_v51 = vpack.c.bf16 %v3387_v50, %v3387_v50  ;;  %4625 = vst [vmem:[#allocation2 + $0x9c] sm:$0xf] %v4601_v4  ;;  %v3881_v46 = vld [vmem:[#allocation3 + $0x20] sm:$0xf]  ;;  %v3809_v57 = vsel %vm11050_vm8, %v3594_v7, %v3808_v25  ;;  %v3617_v52 = vor.u32 %v3615_v38, %v3614_v3  ;;  %v3826_v44 = vld [vmem:[#allocation3 + $0xa4] sm:$0x1]  ;;  %v3356_v7 = vpop.f32.mrf.mxu0 }
 0x25a   : > { %v3811_v47 = vld [vmem:[#allocation3 + $0x90] sm:$0xf]  ;;  %v3814_v58 = vld [vmem:[#allocation3 + $0x94] sm:$0x1]  ;;  %4626 = vst [vmem:[#allocation2 + $0xc0] sm:$0xf] %v4602_v60  ;;  %v3601_v54 = vor.u32 %v3599_v16, %v3598_v49  ;;  %v8647_v28 = vpack.c.bf16 %v3390_v20, %v3390_v20  ;;  %v8994_v23 = vadd.f32 %v11436_v15, %v11422_v42  ;;  %v8645_v13 = vpack.c.bf16 %v3388_v29, %v3388_v29 }
 0x25b   : > { %3905 = vst [vmem:[#allocation2 + $0x90] sm:$0xf] %v3881_v46  ;;  %3807 = vst [vmem:[#allocation3 + $0x88] sm:$0xf] %v3806_v36  ;;  %v3618_v1 = vrot.slane %v3614_v3, 4  ;;  %v3602_v0 = vrot.slane %v3598_v49, 4  ;;  %v3824_v14 = vsel %vm11367_vm12, %v3617_v52, %v3823_v9  ;;  %v3236_v22 = vadd.f32 %v9000_v55, %v11305_v61  ;;  %v9002_v3 = vpop.f32.mrf.mxu1 }
 0x25c   : > { %3810 = vst [vmem:[#allocation3 + $0x8c] sm:$0x1] %v3809_v57  ;;  %v3636_v26 = vshrl.u32 %v8646_v33, 16  ;;  %v3620_v40 = vshrl.u32 %v8644_v51, 16  ;;  %v3882_v48 = vld [vmem:[#allocation3 + $0x28] sm:$0xf]  ;;  %v3812_v27 = vsel %vm11367_vm12, %v3601_v54, %v3811_v47  ;;  %v3228_v11 = vadd.f32 %v8994_v23, %v11289_v21 }
 0x25d   : > { %3825 = vst [vmem:[#allocation3 + $0xa0] sm:$0xf] %v3824_v14  ;;  %v3827_v37 = vsel %vm11050_vm8, %v3618_v1, %v3826_v44  ;;  %v3815_v19 = vsel %vm11050_vm8, %v3602_v0, %v3814_v58  ;;  %3906 = vst [vmem:[#allocation2 + $0xb4] sm:$0xf] %v3882_v48  ;;  %v3639_v42 = vshll.u32 %v8646_v33, 16  ;;  %v3623_v53 = vshll.u32 %v8644_v51, 16 }
 0x25e   : > { %3828 = vst [vmem:[#allocation3 + $0xa4] sm:$0x1] %v3827_v37  ;;  %3813 = vst [vmem:[#allocation3 + $0x90] sm:$0xf] %v3812_v27  ;;  %v3841_v15 = vld [vmem:[#allocation3 + $0xc8] sm:$0xf]  ;;  %v3365_v30 = vadd.f32 %v9434_v2, %v3236_v22  ;;  %v8997_v44 = vadd.f32 %v11468_v17, %v11455_v12  ;;  %v3357_v54 = vadd.f32 %v3356_v7, %v3228_v11  ;;  %v9435_v2 = vpop.f32.mrf.mxu0 }
 0x25f   : > { %3816 = vst [vmem:[#allocation3 + $0x94] sm:$0x1] %v3815_v19  ;;  %v3638_v18 = vrot.slane %v3636_v26, 7  ;;  %v3844_v63 = vld [vmem:[#allocation3 + $0xcc] sm:$0x1]  ;;  %v3622_v31 = vrot.slane %v3620_v40, 7  ;;  %v9003_v0 = vadd.f32 %v9002_v3, %v9001_v35 }
 0x260   : > { %v3644_v32 = vshrl.u32 %v8647_v28, 16  ;;  %v3829_v59 = vld [vmem:[#allocation3 + $0xa8] sm:$0xf]  ;;  %v3832_v5 = vld [vmem:[#allocation3 + $0xac] sm:$0x1]  ;;  %v3628_v8 = vshrl.u32 %v8645_v13, 16 }
 0x261   : > { %v3641_v25 = vor.u32 %v3639_v42, %v3638_v18  ;;  %v3642_v62 = vrot.slane %v3638_v18, 4  ;;  %v3625_v38 = vor.u32 %v3623_v53, %v3622_v31  ;;  %v3626_v41 = vrot.slane %v3622_v31, 4  ;;  %v3847_v9 = vld [vmem:[#allocation3 + $0xd0] sm:$0xf]  ;;  %v4359_v39 = vld [vmem:[#allocation3 + $0x8] sm:$0xe] }
 0x262   : > { %v3835_v10 = vld [vmem:[#allocation3 + $0xb0] sm:$0xf]  ;;  %v3646_v16 = vrot.slane %v3644_v32, 7  ;;  %v3647_v61 = vshll.u32 %v8647_v28, 16  ;;  %v3630_v56 = vrot.slane %v3628_v8, 7  ;;  %v3631_v50 = vshll.u32 %v8645_v13, 16 }
 0x263   : > { %v3842_v20 = vsel %vm11367_vm12, %v3641_v25, %v3841_v15  ;;  %v3845_v4 = vsel %vm11050_vm8, %v3642_v62, %v3844_v63  ;;  %v3830_v21 = vsel %vm11367_vm12, %v3625_v38, %v3829_v59  ;;  %v3833_v49 = vsel %vm11050_vm8, %v3626_v41, %v3832_v5  ;;  %v3850_v33 = vld [vmem:[#allocation3 + $0xd4] sm:$0x1]  ;;  %v4603_v51 = vld [vmem:[#allocation3 + $0x48] sm:$0xf]  ;;  %v4604_v29 = vld [vmem:[#allocation3 + $0x50] sm:$0xf]  ;;  %v3359_v5 = vpop.f32.mrf.mxu0 }
 0x264   : > { %v3884_v60 = vld [vmem:[#allocation3 + $0x48] sm:$0xf]  ;;  %3843 = vst [vmem:[#allocation3 + $0xc8] sm:$0xf] %v3842_v20  ;;  %3846 = vst [vmem:[#allocation3 + $0xcc] sm:$0x1] %v3845_v4  ;;  %v3649_v46 = vor.u32 %v3647_v61, %v3646_v16  ;;  %v3633_v55 = vor.u32 %v3631_v50, %v3630_v56  ;;  %v3231_v59 = vadd.f32 %v8997_v44, %v11292_v24 }
 0x265   : > { %3831 = vst [vmem:[#allocation3 + $0xa8] sm:$0xf] %v3830_v21  ;;  %3834 = vst [vmem:[#allocation3 + $0xac] sm:$0x1] %v3833_v49  ;;  %v4360_v36 = vld [vmem:[#allocation3 + $0xc] sm:$0x1]  ;;  %v3239_v25 = vadd.f32 %v9003_v0, %v11322_v45 }
 0x266   : > { %v4361_v57 = vld [vmem:[#allocation3 + $0x10] sm:$0xe]  ;;  %v4363_v52 = vld [vmem:[#allocation3 + $0x18] sm:$0xe]  ;;  %4627 = vst [vmem:[#allocation2 + $0xe4] sm:$0xf] %v4603_v51  ;;  %v3848_v23 = vsel %vm11367_vm12, %v3649_v46, %v3847_v9  ;;  %v3836_v14 = vsel %vm11367_vm12, %v3633_v55, %v3835_v10  ;;  %v3360_v61 = vadd.f32 %v3359_v5, %v3231_v59 }
 0x267   : > { %4628 = vst [vmem:[#allocation2 + $0x108] sm:$0xf] %v4604_v29  ;;  %3908 = vst [vmem:[#allocation2 + $0xfc] sm:$0xf] %v3884_v60  ;;  %v8370_v47 = vrot.slane %v4359_v39, 9  ;;  %v3650_v28 = vrot.slane %v3646_v16, 4  ;;  %v3368_v16 = vadd.f32 %v9435_v2, %v3239_v25 }
 0x268   : > { %v4362_v58 = vld [vmem:[#allocation3 + $0x14] sm:$0x1]  ;;  %v4364_v1 = vld [vmem:[#allocation3 + $0x1c] sm:$0x1]  ;;  %3849 = vst [vmem:[#allocation3 + $0xd0] sm:$0xf] %v3848_v23 }
 0x269   : > { %v3838_v26 = vld [vmem:[#allocation3 + $0xb4] sm:$0x1]  ;;  %v3634_v40 = vrot.slane %v3630_v56, 4  ;;  %3837 = vst [vmem:[#allocation3 + $0xb0] sm:$0xf] %v3836_v14  ;;  %v4459_v48 = vrot.slane %v4360_v36, 5  ;;  %v3851_v12 = vsel %vm11050_vm8, %v3650_v28, %v3850_v33 }
 0x26a   : > { %v3393_v37 = vmax.f32 %v3365_v30, 0.0  ;;  %v8371_v27 = vrot.slane %v4361_v57, 9  ;;  %v4463_v17 = vrot.slane %v4362_v58, 5  ;;  %v8372_v19 = vrot.slane %v4363_v52, 9  ;;  %3852 = vst [vmem:[#allocation3 + $0xd4] sm:$0x1] %v3851_v12 }
 0x26b   : > { %v4467_v13 = vrot.slane %v4364_v1, 5  ;;  %v3839_v42 = vsel %vm11050_vm8, %v3634_v40, %v3838_v26  ;;  %v4460_v15 = vsel %vm10406_vm5, %v8370_v47, %v4459_v48  ;;  %v3391_v35 = vmax.f32 %v3357_v54, 0.0  ;;  %v3927_v18 = vld [vmem:[#allocation3 + $0x8] sm:$0xf]  ;;  %v4605_v53 = vld [vmem:[#allocation3 + $0x58] sm:$0xf] }
 0x26c   : > { %v8650_v22 = vpack.c.bf16 %v3393_v37, %v3393_v37  ;;  %3840 = vst [vmem:[#allocation3 + $0xb4] sm:$0x1] %v3839_v42  ;;  %4574 = vst [vmem:[#allocation2 + $0x2c] sm:$0xf] %v4460_v15  ;;  %v4464_v63 = vsel %vm10406_vm5, %v8371_v27, %v4463_v17  ;;  %v3988_v11 = vshrl.u32 %v3927_v18, 16  ;;  %v3991_v10 = vshll.u32 %v3927_v18, 16 }
 0x26d   : > { %v4468_v31 = vsel %vm10406_vm5, %v8372_v19, %v4467_v13  ;;  %4575 = vst [vmem:[#allocation2 + $0x50] sm:$0xf] %v4464_v63  ;;  %v8648_v32 = vpack.c.bf16 %v3391_v35, %v3391_v35  ;;  %4629 = vst [vmem:[#allocation2 + $0x12c] sm:$0xf] %v4605_v53  ;;  %v3865_v62 = vld [vmem:[#allocation3 + $0xe8] sm:$0xf] }
 0x26e   : > { %4576 = vst [vmem:[#allocation2 + $0x74] sm:$0xf] %v4468_v31  ;;  %v3668_v8 = vshrl.u32 %v8650_v22, 16  ;;  %v3868_v38 = vld [vmem:[#allocation3 + $0xec] sm:$0x1]  ;;  %v9846_v56 = vld [vmem:[#allocation7 + $0x1b8] sm:$0xff]  }
 0x26f   : > { %v3652_v30 = vshrl.u32 %v8648_v32, 16  ;;  %v3853_v41 = vld [vmem:[#allocation3 + $0xd8] sm:$0xf]  ;;  %v3856_v9 = vld [vmem:[#allocation3 + $0xdc] sm:$0x1]  ;;  %v3671_v39 = vshll.u32 %v8650_v22, 16 }
 0x270   : > { %v3670_v50 = vrot.slane %v3668_v8, 7  ;;  %v3655_v3 = vshll.u32 %v8648_v32, 16  ;;  %v3928_v20 = vld [vmem:[#allocation3 + $0xc] sm:$0x1]  ;;  %v9855_v24 = vld [vmem:[#allocation7 + $0x1f0] sm:$0xff]   ;;  %v3990_v49 = vrot.slane %v3988_v11, 4 }
 0x271   : > { %v3654_v7 = vrot.slane %v3652_v30, 7  ;;  %v9794_v21 = vld [vmem:[#allocation2 + $0xc] ss:$36 sps:$4 sm:$0xff]   ;;  %v9797_v46 = vld [vmem:[#allocation2 + $0x54] ss:$36 sps:$4 sm:$0xff]   ;;  %v3993_v55 = vrot.slane %v3991_v10, 5 }
 0x272   : > { %v3673_v33 = vor.u32 %v3671_v39, %v3670_v50  ;;  %v3674_v51 = vrot.slane %v3670_v50, 4  ;;  %v3929_v60 = vld [vmem:[#allocation3 + $0x10] sm:$0xf]  ;;  %7454 = vmatprep.mubr.bf16.mxu0 %v9794_v21  ;;  %v3997_v36 = vshll.u32 %v3928_v20, 16  ;;  %v3394_v57 = vmax.f32 %v3368_v16, 0.0  ;;  %v9868_v12 = vld [vmem:[#allocation7 + $0x1e8] sm:$0xff]  }
 0x273   : > { %v9792_v4 = vld [vmem:[#allocation2 + $0x8] ss:$36 sps:$4 sm:$0xff]   ;;  %v3657_v45 = vor.u32 %v3655_v3, %v3654_v7  ;;  %v3658_v29 = vrot.slane %v3654_v7, 4  ;;  %v3392_v52 = vmax.f32 %v3360_v61, 0.0  ;;  %v4606_v54 = vld [vmem:[#allocation3 + $0x60] sm:$0xf]  ;;  %v3994_v23 = vor.u32 %v3993_v55, %v3990_v49 }
 0x274   : > { %7455 = vmatmul.mubr.bf16.vlgmr.msra.gmra.mxu0 %v9792_v4  ;;  %v3866_v44 = vsel %vm11367_vm12, %v3673_v33, %v3865_v62  ;;  %v3869_v47 = vsel %vm11050_vm8, %v3674_v51, %v3868_v38  ;;  %v3885_v0 = vld [vmem:[#allocation3 + $0x50] sm:$0xf]  ;;  %v11533_v28 = vld [vmem:[#allocation3 + $0x18] sm:$0xf]  ;;  %v8651_v14 = vpack.c.bf16 %v3394_v57, %v3394_v57  ;;  %4630 = vst [vmem:[#allocation2 + $0x150] sm:$0xf] %v4606_v54 }
 0x275   : > { %v3854_v58 = vsel %vm11367_vm12, %v3657_v45, %v3853_v41  ;;  %v3857_v1 = vsel %vm11050_vm8, %v3658_v29, %v3856_v9  ;;  %3867 = vst [vmem:[#allocation3 + $0xe8] sm:$0xf] %v3866_v44  ;;  %3870 = vst [vmem:[#allocation3 + $0xec] sm:$0x1] %v3869_v47  ;;  %7462 = vmatprep.mubr.bf16.mxu0 %v9797_v46  ;;  %v8649_v26 = vpack.c.bf16 %v3392_v52, %v3392_v52  ;;  %v3886_v40 = vld [vmem:[#allocation3 + $0x58] sm:$0xf] }
 0x276   : > { %3855 = vst [vmem:[#allocation3 + $0xd8] sm:$0xf] %v3854_v58  ;;  %3858 = vst [vmem:[#allocation3 + $0xdc] sm:$0x1] %v3857_v1  ;;  %9289 = vmatpush3.bf16.msra.mxu0 %v9846_v56  ;;  %v9859_v48 = vld [vmem:[#allocation7 + $0x1b0] sm:$0xff]   ;;  %v4002_v37 = vshrl.u32 %v3929_v60, 16 }
 0x277   : > { %3909 = vst [vmem:[#allocation2 + $0x120] sm:$0xf] %v3885_v0  ;;  %v4005_v27 = vshll.u32 %v3929_v60, 16  ;;  %3910 = vst [vmem:[#allocation2 + $0x144] sm:$0xf] %v3886_v40  ;;  %9290 = vmatprep.subr.bf16.mxu0 %v9855_v24  ;;  %v3995_v17 = vrot.slane %v3994_v23, 4 }
 0x278   : > { %v3999_v19 = vrot.slane %v3997_v36, 5  ;;  %v3676_v13 = vshrl.u32 %v8651_v14, 16  ;;  %v3660_v2 = vshrl.u32 %v8649_v26, 16  ;;  %v3930_v42 = vld [vmem:[#allocation3 + $0x14] sm:$0x1]  ;;  %v3679_v15 = vshll.u32 %v8651_v14, 16 }
 0x279   : > { %v3871_v22 = vld [vmem:[#allocation3 + $0xf0] sm:$0xf]  ;;  %v3874_v35 = vld [vmem:[#allocation3 + $0xf4] sm:$0x1]  ;;  %v3859_v18 = vld [vmem:[#allocation3 + $0xe0] sm:$0xf] }
 0x27a   : > { %v3862_v63 = vld [vmem:[#allocation3 + $0xe4] sm:$0x1]  ;;  %v4004_v31 = vrot.slane %v4002_v37, 4  ;;  %v4007_v53 = vrot.slane %v4005_v27, 5  ;;  %v4016_v32 = vshrl.u32 %v11533_v28, 16  ;;  %v4000_v5 = vsel %vm10394_vm4, %v3995_v17, %v3999_v19  ;;  %9291 = vmatpush3.bf16.msra.mxu0 %v9859_v48  ;;  %v9872_v38 = vld [vmem:[#allocation7 + $0x1a8] sm:$0xff]  }
 0x27b   : > { %v3678_v8 = vrot.slane %v3676_v13, 7  ;;  %v3662_v30 = vrot.slane %v3660_v2, 7  ;;  %v3663_v11 = vshll.u32 %v8649_v26, 16  ;;  %v11538_v25 = vld [vmem:[#allocation3 + $0x1c] sm:$0x1]  ;;  %v4011_v10 = vshll.u32 %v3930_v42, 16  ;;  %9292 = vmatprep.subr.bf16.mxu0 %v9868_v12 }
 0x27c   : > { %v4365_v62 = vld [vmem:[#allocation3 + $0x20] sm:$0xe]  ;;  %v9795_v41 = vld [vmem:[#allocation2 + $0x50] ss:$36 sps:$4 sm:$0xff]   ;;  %4334 = vst [vmem:[#allocation2 + $0x28] sm:$0xf] %v4000_v5  ;;  %v4008_v9 = vor.u32 %v4007_v53, %v4004_v31 }
 0x27d   : > { %v4019_v16 = vshll.u32 %v11533_v28, 16  ;;  %v9873_v61 = vld [vmem:[#allocation7 + $0x1e0] sm:$0xff]   ;;  %v3681_v56 = vor.u32 %v3679_v15, %v3678_v8  ;;  %v3682_v50 = vrot.slane %v3678_v8, 4  ;;  %v3665_v39 = vor.u32 %v3663_v11, %v3662_v30  ;;  %v4607_v3 = vld [vmem:[#allocation3 + $0x68] sm:$0xf]  ;;  %7463 = vmatmul.mubr.bf16.gmra.mxu0 %v9795_v41  ;;  %v9802_v14 = vld [vmem:[#allocation7 + $0x138] sm:$0xff]  }
 0x27e   : > { %v3666_v7 = vrot.slane %v3662_v30, 4  ;;  %v4608_v20 = vld [vmem:[#allocation3 + $0x70] sm:$0xf]  ;;  %v4018_v24 = vrot.slane %v4016_v32, 4  ;;  %v4366_v4 = vld [vmem:[#allocation3 + $0x24] sm:$0x1]  ;;  %9293 = vmatpush3.bf16.msra.mxu0 %v9872_v38 }
 0x27f   : > { %v4367_v21 = vld [vmem:[#allocation3 + $0x28] sm:$0xe]  ;;  %v8373_v49 = vrot.slane %v4365_v62, 9  ;;  %4631 = vst [vmem:[#allocation2 + $0x174] sm:$0xf] %v4607_v3  ;;  %v3872_v51 = vsel %vm11367_vm12, %v3681_v56, %v3871_v22  ;;  %v3875_v45 = vsel %vm11050_vm8, %v3682_v50, %v3874_v35  ;;  %v3860_v29 = vsel %vm11367_vm12, %v3665_v39, %v3859_v18  ;;  %v9875_v55 = vld [vmem:[#allocation7 + $0x1a0] sm:$0xff]   ;;  %9294 = vmatprep.subr.bf16.mxu0 %v9873_v61 }
 0x280   : > { %4632 = vst [vmem:[#allocation2 + $0x198] sm:$0xf] %v4608_v20  ;;  %v3933_v33 = vld [vmem:[#allocation3 + $0x20] sm:$0xf]  ;;  %v3863_v60 = vsel %vm11050_vm8, %v3666_v7, %v3862_v63  ;;  %v4368_v46 = vld [vmem:[#allocation3 + $0x2c] sm:$0x1] }
 0x281   : > { %v11549_v36 = vld [vmem:[#allocation3 + $0x28] sm:$0xf]  ;;  %3873 = vst [vmem:[#allocation3 + $0xf0] sm:$0xf] %v3872_v51  ;;  %3876 = vst [vmem:[#allocation3 + $0xf4] sm:$0x1] %v3875_v45 }
 0x282   : > { %3861 = vst [vmem:[#allocation3 + $0xe0] sm:$0xf] %v3860_v29  ;;  %3864 = vst [vmem:[#allocation3 + $0xe4] sm:$0x1] %v3863_v60  ;;  %v4009_v57 = vrot.slane %v4008_v9, 4  ;;  %v4013_v52 = vrot.slane %v4011_v10, 5  ;;  %9295 = vmatpush3.bf16.msra.mxu0 %v9875_v55 }
 0x283   : > { %v4021_v44 = vrot.slane %v4019_v16, 5  ;;  %v4025_v47 = vshll.u32 %v11538_v25, 16  ;;  %v3934_v58 = vld [vmem:[#allocation3 + $0x24] sm:$0x1]  ;;  %v4471_v1 = vrot.slane %v4366_v4, 5  ;;  %v8374_v34 = vrot.slane %v4367_v21, 9  ;;  %9296 = vmatprep.subr.bf16.mxu0 %v9880_v43 }
 0x284   : > { %v3936_v54 = vld [vmem:[#allocation3 + $0x2c] sm:$0x1]  ;;  %v4371_v0 = vld [vmem:[#allocation3 + $0x48] sm:$0xe]  ;;  %v3887_v23 = vld [vmem:[#allocation3 + $0x60] sm:$0xf]  ;;  %v4014_v26 = vsel %vm10394_vm4, %v4009_v57, %v4013_v52 }
 0x285   : > { %v4372_v28 = vld [vmem:[#allocation3 + $0x4c] sm:$0x1]  ;;  %v4022_v40 = vor.u32 %v4021_v44, %v4018_v24  ;;  %v4475_v48 = vrot.slane %v4368_v46, 5  ;;  %v4030_v37 = vshrl.u32 %v3933_v33, 16  ;;  %v3888_v27 = vld [vmem:[#allocation3 + $0x68] sm:$0xf]  ;;  %v4472_v13 = vsel %vm10406_vm5, %v8373_v49, %v4471_v1 }
 0x286   : > { %3911 = vst [vmem:[#allocation2 + $0x168] sm:$0xf] %v3887_v23  ;;  %v9884_v12 = vld [vmem:[#allocation7 + $0x198] sm:$0xff]   ;;  %v9798_v17 = vld [vmem:[#allocation2] ss:$36 sps:$4 sm:$0xff]   ;;  %v4033_v2 = vshll.u32 %v3933_v33, 16 }
 0x287   : > { %v9800_v19 = vld [vmem:[#allocation2 + $0x4] ss:$36 sps:$4 sm:$0xff]   ;;  %4335 = vst [vmem:[#allocation2 + $0x4c] sm:$0xf] %v4014_v26  ;;  %3912 = vst [vmem:[#allocation2 + $0x18c] sm:$0xf] %v3888_v27  ;;  %v4476_v22 = vsel %vm10406_vm5, %v8374_v34, %v4475_v48  ;;  %9297 = vmatpush3.bf16.msra.mxu0 %v9884_v12 }
 0x288   : > { %v4023_v42 = vrot.slane %v4022_v40, 4  ;;  %v4027_v15 = vrot.slane %v4025_v47, 5  ;;  %4577 = vst [vmem:[#allocation2 + $0x98] sm:$0xf] %v4472_v13  ;;  %v4032_v35 = vrot.slane %v4030_v37, 4  ;;  %v9814_v18 = vld [vmem:[#allocation7 + $0x170] sm:$0xff]   ;;  %7325 = vmatprep.mubr.bf16.mxu1 %v9800_v19 }
 0x289   : > { %v9885_v63 = vld [vmem:[#allocation7 + $0x1d0] sm:$0xff]   ;;  %4578 = vst [vmem:[#allocation2 + $0xbc] sm:$0xf] %v4476_v22  ;;  %v4035_v31 = vrot.slane %v4033_v2, 5  ;;  %v4039_v53 = vshll.u32 %v3934_v58, 16  ;;  %v4044_v32 = vshrl.u32 %v11549_v36, 16  ;;  %7326 = vmatmul.mubr.bf16.vlgmr.msra.gmra.mxu1 %v9798_v17 }
 0x28a   : > { %v4047_v5 = vshll.u32 %v11549_v36, 16  ;;  %v4028_v8 = vsel %vm10394_vm4, %v4023_v42, %v4027_v15  ;;  %v4053_v30 = vshll.u32 %v3936_v54, 16  ;;  %v8376_v11 = vrot.slane %v4371_v0, 9  ;;  %v9815_v62 = vld [vmem:[#allocation7 + $0x130] sm:$0xff]   ;;  %v9823_v38 = vld [vmem:[#allocation7 + $0x168] sm:$0xff]   ;;  %9201 = vmatpush3.bf16.msra.mxu1 %v9802_v14  ;;  %9298 = vmatprep.subr.bf16.mxu0 %v9885_v63  ;;  %v9837_v52 = vld [vmem:[#allocation7 + $0x160] sm:$0xff]  }
 0x28b   : > { %v4483_v25 = vrot.slane %v4372_v28, 5  ;;  %v3939_v41 = vld [vmem:[#allocation3 + $0x48] sm:$0xf]  ;;  %4336 = vst [vmem:[#allocation2 + $0x70] sm:$0xf] %v4028_v8  ;;  %v4036_v9 = vor.u32 %v4035_v31, %v4032_v35  ;;  %v9886_v16 = vld [vmem:[#allocation7 + $0x190] sm:$0xff]   ;;  %9202 = vmatprep.subr.bf16.mxu1 %v9814_v18 }
 0x28c   : > { %v11562_v10 = vld [vmem:[#allocation3 + $0x4c] sm:$0x1]  ;;  %v4046_v61 = vrot.slane %v4044_v32, 4  ;;  %v4373_v50 = vld [vmem:[#allocation3 + $0x50] sm:$0xe]  ;;  %v4041_v20 = vrot.slane %v4039_v53, 5  ;;  %9299 = vmatpush3.bf16.msra.mxu0 %v9886_v16 }
 0x28d   : > { %v4484_v56 = vsel %vm10406_vm5, %v8376_v11, %v4483_v25  ;;  %v4374_v39 = vld [vmem:[#allocation3 + $0x54] sm:$0x1]  ;;  %v9890_v7 = vld [vmem:[#allocation7 + $0x1c8] sm:$0xff]   ;;  %v4037_v3 = vrot.slane %v4036_v9, 4  ;;  %v4049_v24 = vrot.slane %v4047_v5, 5  ;;  %v4055_v33 = vrot.slane %v4053_v30, 5 }
 0x28e   : > { %4580 = vst [vmem:[#allocation2 + $0x104] sm:$0xf] %v4484_v56  ;;  %v4375_v4 = vld [vmem:[#allocation3 + $0x58] sm:$0xe]  ;;  %v9827_v21 = vld [vmem:[#allocation7 + $0x128] sm:$0xff]   ;;  %v4072_v51 = vshrl.u32 %v3939_v41, 16  ;;  %9203 = vmatpush3.bf16.msra.mxu1 %v9815_v62  ;;  %9300 = vmatprep.subr.bf16.mxu0 %v9890_v7 }
 0x28f   : > { %v11566_v49 = vld [vmem:[#allocation3 + $0x50] sm:$0xf]  ;;  %v4075_v45 = vshll.u32 %v3939_v41, 16  ;;  %v4376_v29 = vld [vmem:[#allocation3 + $0x5c] sm:$0x1]  ;;  %v4042_v60 = vsel %vm10394_vm4, %v4037_v3, %v4041_v20  ;;  %v4050_v46 = vor.u32 %v4049_v24, %v4046_v61  ;;  %v8377_v55 = vrot.slane %v4373_v50, 9  ;;  %9204 = vmatprep.subr.bf16.mxu1 %v9823_v38 }
 0x290   : > { %v4487_v36 = vrot.slane %v4374_v39, 5  ;;  %v4609_v57 = vld [vmem:[#allocation3 + $0x88] sm:$0xf]  ;;  %v9807_v44 = vld [vmem:[#allocation2 + $0x9c] ss:$36 sps:$4 sm:$0xff]   ;;  %v4074_v47 = vrot.slane %v4072_v51, 4 }
 0x291   : > { %4337 = vst [vmem:[#allocation2 + $0x94] sm:$0xf] %v4042_v60  ;;  %v4081_v58 = vshll.u32 %v11562_v10, 16  ;;  %4633 = vst [vmem:[#allocation2 + $0x1bc] sm:$0xf] %v4609_v57  ;;  %v9892_v43 = vld [vmem:[#allocation7 + $0x188] sm:$0xff]   ;;  %7470 = vmatprep.mubr.bf16.mxu0 %v9807_v44 }
 0x292   : > { %v3943_v1 = vld [vmem:[#allocation3 + $0x58] sm:$0xf]  ;;  %v4051_v54 = vrot.slane %v4050_v46, 4  ;;  %v4077_v0 = vrot.slane %v4075_v45, 5  ;;  %v4488_v28 = vsel %vm10406_vm5, %v8377_v55, %v4487_v36  ;;  %v11573_v23 = vld [vmem:[#allocation3 + $0x54] sm:$0x1]  ;;  %9205 = vmatpush3.bf16.msra.mxu1 %v9827_v21  ;;  %9301 = vmatpush3.bf16.msra.mxu0 %v9892_v43 }
 0x293   : > { %v9805_v34 = vld [vmem:[#allocation2 + $0x98] ss:$36 sps:$4 sm:$0xff]   ;;  %v4610_v14 = vld [vmem:[#allocation3 + $0x90] sm:$0xf]  ;;  %v9838_v26 = vld [vmem:[#allocation7 + $0x120] sm:$0xff]   ;;  %v8378_v48 = vrot.slane %v4375_v4, 9  ;;  %9206 = vmatprep.subr.bf16.mxu1 %v9837_v52 }
 0x294   : > { %v9803_v40 = vld [vmem:[#allocation2 + $0x4c] ss:$36 sps:$4 sm:$0xff]   ;;  %4581 = vst [vmem:[#allocation2 + $0x128] sm:$0xf] %v4488_v28  ;;  %v11575_v37 = vld [vmem:[#allocation3 + $0x5c] sm:$0x1]  ;;  %v4056_v19 = vsel %vm10394_vm4, %v4051_v54, %v4055_v33  ;;  %7471 = vmatmul.mubr.bf16.gmra.mxu0 %v9805_v34  ;;  %v4078_v13 = vor.u32 %v4077_v0, %v4074_v47 }
 0x295   : > { %v4377_v27 = vld [vmem:[#allocation3 + $0x60] sm:$0xe]  ;;  %4634 = vst [vmem:[#allocation2 + $0x1e0] sm:$0xf] %v4610_v14  ;;  %v9847_v12 = vld [vmem:[#allocation7 + $0x158] sm:$0xff]   ;;  %v4491_v2 = vrot.slane %v4376_v29, 5  ;;  %7333 = vmatprep.mubr.bf16.mxu1 %v9803_v40 }
 0x296   : > { %v9808_v17 = vld [vmem:[#allocation2 + $0x48] ss:$36 sps:$4 sm:$0xff]   ;;  %v4086_v42 = vshrl.u32 %v11566_v49, 16  ;;  %v11580_v22 = vld [vmem:[#allocation3 + $0x60] sm:$0xf]  ;;  %v4089_v18 = vshll.u32 %v11566_v49, 16  ;;  %9207 = vmatpush3.bf16.msra.mxu1 %v9838_v26 }
 0x297   : > { %v3890_v15 = vld [vmem:[#allocation3 + $0x88] sm:$0xf]  ;;  %4338 = vst [vmem:[#allocation2 + $0xb8] sm:$0xf] %v4056_v19  ;;  %v4378_v63 = vld [vmem:[#allocation3 + $0x64] sm:$0x1]  ;;  %7334 = vmatmul.mubr.bf16.gmra.mxu1 %v9808_v17  ;;  %v4492_v32 = vsel %vm10406_vm5, %v8378_v48, %v4491_v2  ;;  %9208 = vmatprep.subr.bf16.mxu1 %v9847_v12 }
 0x298   : > { %v9813_v35 = vld [vmem:[#allocation2 + $0xe4] ss:$36 sps:$4 sm:$0xff]   ;;  %3914 = vst [vmem:[#allocation2 + $0x1d4] sm:$0xf] %v3890_v15  ;;  %v4079_v31 = vrot.slane %v4078_v13, 4  ;;  %v4083_v53 = vrot.slane %v4081_v58, 5 }
 0x299   : > { %v4088_v5 = vrot.slane %v4086_v42, 4  ;;  %v4379_v8 = vld [vmem:[#allocation3 + $0x68] sm:$0xe]  ;;  %v9851_v30 = vld [vmem:[#allocation7 + $0x118] sm:$0xff]   ;;  %v9897_v11 = vld [vmem:[#allocation7 + $0x1c0] sm:$0xff]   ;;  %7478 = vmatprep.mubr.bf16.mxu0 %v9813_v35  ;;  %v4091_v25 = vrot.slane %v4089_v18, 5 }
 0x29a   : > { %4582 = vst [vmem:[#allocation2 + $0x14c] sm:$0xf] %v4492_v32  ;;  %v4095_v62 = vshll.u32 %v11573_v23, 16  ;;  %v4100_v38 = vshrl.u32 %v3943_v1, 16  ;;  %v4103_v41 = vshll.u32 %v3943_v1, 16  ;;  %v9863_v10 = vld [vmem:[#allocation7 + $0x150] sm:$0xff]   ;;  %v4084_v16 = vsel %vm10394_vm4, %v4079_v31, %v4083_v53  ;;  %9302 = vmatprep.subr.bf16.mxu0 %v9897_v11  ;;  %9209 = vmatpush3.bf16.msra.mxu1 %v9851_v30 }
 0x29b   : > { %v4380_v9 = vld [vmem:[#allocation3 + $0x6c] sm:$0x1]  ;;  %v4109_v61 = vshll.u32 %v11575_v37, 16  ;;  %v8379_v56 = vrot.slane %v4377_v27, 9  ;;  %v4495_v50 = vrot.slane %v4378_v63, 5  ;;  %v9898_v39 = vld [vmem:[#allocation7 + $0x180] sm:$0xff]   ;;  %v4092_v3 = vor.u32 %v4091_v25, %v4088_v5  ;;  %9210 = vmatprep.subr.bf16.mxu1 %v9863_v10 }
 0x29c   : > { %v11589_v7 = vld [vmem:[#allocation3 + $0x68] sm:$0xf]  ;;  %4340 = vst [vmem:[#allocation2 + $0x100] sm:$0xf] %v4084_v16  ;;  %v4102_v20 = vrot.slane %v4100_v38, 4  ;;  %v4105_v24 = vrot.slane %v4103_v41, 5  ;;  %9303 = vmatpush3.bf16.msra.mxu0 %v9898_v39 }
 0x29d   : > { %v3946_v4 = vld [vmem:[#allocation3 + $0x64] sm:$0x1]  ;;  %v4496_v49 = vsel %vm10406_vm5, %v8379_v56, %v4495_v50  ;;  %v8380_v33 = vrot.slane %v4379_v8, 9  ;;  %v4499_v51 = vrot.slane %v4380_v9, 5  ;;  %v3948_v45 = vld [vmem:[#allocation3 + $0x6c] sm:$0x1] }
 0x29e   : > { %v9811_v21 = vld [vmem:[#allocation2 + $0xe0] ss:$36 sps:$4 sm:$0xff]   ;;  %v4114_v29 = vshrl.u32 %v11580_v22, 16  ;;  %v9864_v60 = vld [vmem:[#allocation7 + $0x110] sm:$0xff]   ;;  %v4093_v46 = vrot.slane %v4092_v3, 4  ;;  %v4097_v55 = vrot.slane %v4095_v62, 5  ;;  %v4106_v36 = vor.u32 %v4105_v24, %v4102_v20 }
 0x29f   : > { %4583 = vst [vmem:[#allocation2 + $0x170] sm:$0xf] %v4496_v49  ;;  %v4117_v57 = vshll.u32 %v11580_v22, 16  ;;  %v4611_v52 = vld [vmem:[#allocation3 + $0x98] sm:$0xf]  ;;  %v9874_v44 = vld [vmem:[#allocation7 + $0x148] sm:$0xff]   ;;  %7479 = vmatmul.mubr.bf16.gmra.mxu0 %v9811_v21  ;;  %v4500_v43 = vsel %vm10406_vm5, %v8380_v33, %v4499_v51  ;;  %9211 = vmatpush3.bf16.msra.mxu1 %v9864_v60 }
 0x2a0   : > { %v9809_v47 = vld [vmem:[#allocation2 + $0x94] ss:$36 sps:$4 sm:$0xff]   ;;  %v4111_v58 = vrot.slane %v4109_v61, 5  ;;  %v4116_v1 = vrot.slane %v4114_v29, 4  ;;  %v4123_v34 = vshll.u32 %v3946_v4, 16  ;;  %v4098_v23 = vsel %vm10394_vm4, %v4093_v46, %v4097_v55  ;;  %v9879_v13 = vld [vmem:[#allocation7 + $0x108] sm:$0xff]   ;;  %9212 = vmatprep.subr.bf16.mxu1 %v9874_v44 }
 0x2a1   : > { %v11597_v54 = vld [vmem:[#allocation3 + $0x88] sm:$0xe]  ;;  %4635 = vst [vmem:[#allocation2 + $0x204] sm:$0xf] %v4611_v52  ;;  %v9816_v28 = vld [vmem:[#allocation2 + $0x90] ss:$36 sps:$4 sm:$0xff]   ;;  %7341 = vmatprep.mubr.bf16.mxu1 %v9809_v47 }
 0x2a2   : > { %v11599_v0 = vld [vmem:[#allocation3 + $0x88] sm:$0xf]  ;;  %v4107_v14 = vrot.slane %v4106_v36, 4  ;;  %4584 = vst [vmem:[#allocation2 + $0x194] sm:$0xf] %v4500_v43  ;;  %v4119_v26 = vrot.slane %v4117_v57, 5  ;;  %7342 = vmatmul.mubr.bf16.gmra.mxu1 %v9816_v28 }
 0x2a3   : > { %v4384_v40 = vld [vmem:[#allocation3 + $0x8c] sm:$0x1]  ;;  %v4612_v37 = vld [vmem:[#allocation3 + $0xa0] sm:$0xf]  ;;  %4341 = vst [vmem:[#allocation2 + $0x124] sm:$0xf] %v4098_v23  ;;  %9213 = vmatpush3.bf16.msra.mxu1 %v9879_v13 }
 0x2a4   : > { %v3952_v48 = vld [vmem:[#allocation3 + $0x8c] sm:$0x1]  ;;  %v4128_v12 = vshrl.u32 %v11589_v7, 16  ;;  %v4385_v17 = vld [vmem:[#allocation3 + $0x90] sm:$0xe]  ;;  %v4112_v2 = vsel %vm10394_vm4, %v4107_v14, %v4111_v58  ;;  %v4120_v42 = vor.u32 %v4119_v26, %v4116_v1  ;;  %v4131_v15 = vshll.u32 %v11589_v7, 16 }
 0x2a5   : > { %v9821_v27 = vld [vmem:[#allocation2 + $0x12c] ss:$36 sps:$4 sm:$0xff]   ;;  %v4386_v19 = vld [vmem:[#allocation3 + $0x94] sm:$0x1]  ;;  %4636 = vst [vmem:[#allocation2 + $0x228] sm:$0xf] %v4612_v37 }
 0x2a6   : > { %v4137_v22 = vshll.u32 %v3948_v45, 16  ;;  %v3891_v35 = vld [vmem:[#allocation3 + $0x90] sm:$0xf]  ;;  %v3892_v18 = vld [vmem:[#allocation3 + $0x98] sm:$0xf]  ;;  %7486 = vmatprep.mubr.bf16.mxu0 %v9821_v27  ;;  %v4125_v31 = vrot.slane %v4123_v34, 5 }
 0x2a7   : > { %v9817_v63 = vld [vmem:[#allocation2 + $0xdc] ss:$36 sps:$4 sm:$0xff]   ;;  %4342 = vst [vmem:[#allocation2 + $0x148] sm:$0xf] %v4112_v2  ;;  %v4130_v53 = vrot.slane %v4128_v12, 4  ;;  %v4121_v30 = vrot.slane %v4120_v42, 4 }
 0x2a8   : > { %3915 = vst [vmem:[#allocation2 + $0x1f8] sm:$0xf] %v3891_v35  ;;  %3916 = vst [vmem:[#allocation2 + $0x21c] sm:$0xf] %v3892_v18  ;;  %v9891_v32 = vld [vmem:[#allocation7 + $0x140] sm:$0xff]   ;;  %v4133_v11 = vrot.slane %v4131_v15, 5  ;;  %7349 = vmatprep.mubr.bf16.mxu1 %v9817_v63 }
 0x2a9   : > { %v3953_v5 = vld [vmem:[#allocation3 + $0x90] sm:$0xf]  ;;  %v9819_v8 = vld [vmem:[#allocation2 + $0x128] ss:$36 sps:$4 sm:$0xff]   ;;  %v4139_v25 = vrot.slane %v4137_v22, 5  ;;  %v8382_v62 = vrot.slane %v11597_v54, 9  ;;  %v4126_v56 = vsel %vm10394_vm4, %v4121_v30, %v4125_v31  ;;  %9214 = vmatprep.subr.bf16.mxu1 %v9891_v32 }
 0x2aa   : > { %v4387_v38 = vld [vmem:[#allocation3 + $0x98] sm:$0xe]  ;;  %v4507_v41 = vrot.slane %v4384_v40, 5  ;;  %v4156_v9 = vshrl.u32 %v11599_v0, 16  ;;  %v4159_v10 = vshll.u32 %v11599_v0, 16  ;;  %v4165_v16 = vshll.u32 %v3952_v48, 16  ;;  %7487 = vmatmul.mubr.bf16.gmra.mxu0 %v9819_v8 }
 0x2ab   : > { %v3955_v61 = vld [vmem:[#allocation3 + $0x98] sm:$0xf]  ;;  %v4134_v50 = vor.u32 %v4133_v11, %v4130_v53  ;;  %v4388_v39 = vld [vmem:[#allocation3 + $0x9c] sm:$0x1]  ;;  %v8383_v7 = vrot.slane %v4385_v17, 9  ;;  %v4511_v3 = vrot.slane %v4386_v19, 5 }
 0x2ac   : > { %v9896_v20 = vld [vmem:[#allocation7 + $0x100] sm:$0xff]   ;;  %v11612_v24 = vld [vmem:[#allocation7 + $0x238] sm:$0xff]   ;;  %4343 = vst [vmem:[#allocation2 + $0x16c] sm:$0xf] %v4126_v56  ;;  %v4508_v21 = vsel %vm10406_vm5, %v8382_v62, %v4507_v41  ;;  %v4158_v49 = vrot.slane %v4156_v9, 4  ;;  %v4161_v29 = vrot.slane %v4159_v10, 5 }
 0x2ad   : > { %v9830_v4 = vld [vmem:[#allocation2 + $0x174] ss:$36 sps:$4 sm:$0xff]   ;;  %v4135_v45 = vrot.slane %v4134_v50, 4  ;;  %4586 = vst [vmem:[#allocation2 + $0x1dc] sm:$0xf] %v4508_v21  ;;  %v4167_v60 = vrot.slane %v4165_v16, 5  ;;  %v4512_v46 = vsel %vm10406_vm5, %v8383_v7, %v4511_v3  ;;  %9215 = vmatpush3.bf16.msra.mxu1 %v9896_v20 }
 0x2ae   : > { %v3954_v33 = vld [vmem:[#allocation3 + $0x94] sm:$0x1]  ;;  %v9822_v51 = vld [vmem:[#allocation2 + $0xd8] ss:$36 sps:$4 sm:$0xff]   ;;  %7494 = vmatprep.mubr.bf16.mxu0 %v9830_v4  ;;  %v8384_v55 = vrot.slane %v4387_v38, 9  ;;  %v4515_v36 = vrot.slane %v4388_v39, 5  ;;  %v4162_v1 = vor.u32 %v4161_v29, %v4158_v49  ;;  %9436 = vmatprep.subr.bf16.mxu1 %v11612_v24 }
 0x2af   : > { %4587 = vst [vmem:[#allocation2 + $0x200] sm:$0xf] %v4512_v46  ;;  %v3956_v57 = vld [vmem:[#allocation3 + $0x9c] sm:$0x1]  ;;  %v4170_v52 = vshrl.u32 %v3953_v5, 16  ;;  %v4173_v44 = vshll.u32 %v3953_v5, 16  ;;  %7350 = vmatmul.mubr.bf16.gmra.mxu1 %v9822_v51  ;;  %v4140_v43 = vsel %vm10394_vm4, %v4135_v45, %v4139_v25 }
 0x2b0   : > { %v4389_v47 = vld [vmem:[#allocation3 + $0xa0] sm:$0xe]  ;;  %v9826_v58 = vld [vmem:[#allocation2 + $0x124] ss:$36 sps:$4 sm:$0xff]   ;;  %v4179_v34 = vshll.u32 %v3954_v33, 16  ;;  %v4516_v28 = vsel %vm10406_vm5, %v8384_v55, %v4515_v36  ;;  %v4184_v26 = vshrl.u32 %v3955_v61, 16 }
 0x2b1   : > { %v4390_v54 = vld [vmem:[#allocation3 + $0xa4] sm:$0x1]  ;;  %v9828_v0 = vld [vmem:[#allocation2 + $0x170] ss:$36 sps:$4 sm:$0xff]   ;;  %4344 = vst [vmem:[#allocation2 + $0x190] sm:$0xf] %v4140_v43  ;;  %7357 = vmatprep.mubr.bf16.mxu1 %v9826_v58 }
 0x2b2   : > { %v4172_v23 = vrot.slane %v4170_v52, 4  ;;  %v4175_v14 = vrot.slane %v4173_v44, 5  ;;  %v4391_v40 = vld [vmem:[#allocation3 + $0xa8] sm:$0xe]  ;;  %v3957_v48 = vld [vmem:[#allocation3 + $0xa0] sm:$0xf]  ;;  %7495 = vmatmul.mubr.bf16.gmra.mxu0 %v9828_v0 }
 0x2b3   : > { %v4163_v37 = vrot.slane %v4162_v1, 4  ;;  %4588 = vst [vmem:[#allocation2 + $0x224] sm:$0xf] %v4516_v28  ;;  %v4187_v27 = vshll.u32 %v3955_v61, 16  ;;  %v4392_v12 = vld [vmem:[#allocation3 + $0xac] sm:$0x1] }
 0x2b4   : > { %v4613_v17 = vld [vmem:[#allocation3 + $0xa8] sm:$0xf]  ;;  %v4176_v19 = vor.u32 %v4175_v14, %v4172_v23  ;;  %v4186_v13 = vrot.slane %v4184_v26, 4  ;;  %v8385_v2 = vrot.slane %v4389_v47, 9  ;;  %v4519_v42 = vrot.slane %v4390_v54, 5 }
 0x2b5   : > { %v4614_v15 = vld [vmem:[#allocation3 + $0xb0] sm:$0xf]  ;;  %4637 = vst [vmem:[#allocation2 + $0x24c] sm:$0xf] %v4613_v17  ;;  %v4168_v22 = vsel %vm10394_vm4, %v4163_v37, %v4167_v60  ;;  %v4189_v35 = vrot.slane %v4187_v27, 5  ;;  %v4193_v18 = vshll.u32 %v3956_v57, 16 }
 0x2b6   : > { %v8386_v63 = vrot.slane %v4391_v40, 9  ;;  %4638 = vst [vmem:[#allocation2 + $0x270] sm:$0xf] %v4614_v15  ;;  %v3893_v31 = vld [vmem:[#allocation3 + $0xa0] sm:$0xf]  ;;  %v4177_v32 = vrot.slane %v4176_v19, 4  ;;  %v4520_v8 = vsel %vm10406_vm5, %v8385_v2, %v4519_v42 }
 0x2b7   : > { %v9836_v53 = vld [vmem:[#allocation2 + $0x1bc] ss:$36 sps:$4 sm:$0xff]   ;;  %4346 = vst [vmem:[#allocation2 + $0x1d8] sm:$0xf] %v4168_v22  ;;  %v4181_v5 = vrot.slane %v4179_v34, 5  ;;  %v4190_v25 = vor.u32 %v4189_v35, %v4186_v13  ;;  %v4523_v62 = vrot.slane %v4392_v12, 5 }
 0x2b8   : > { %3917 = vst [vmem:[#allocation2 + $0x240] sm:$0xf] %v3893_v31  ;;  %v11627_v30 = vld [vmem:[#allocation3 + $0xc8] sm:$0xf]  ;;  %v9824_v11 = vld [vmem:[#allocation2 + $0x120] ss:$36 sps:$4 sm:$0xff]   ;;  %7502 = vmatprep.mubr.bf16.mxu0 %v9836_v53 }
 0x2b9   : > { %4589 = vst [vmem:[#allocation2 + $0x248] sm:$0xf] %v4520_v8  ;;  %v3894_v38 = vld [vmem:[#allocation3 + $0xa8] sm:$0xf]  ;;  %v4182_v9 = vsel %vm10394_vm4, %v4177_v32, %v4181_v5  ;;  %v3958_v10 = vld [vmem:[#allocation3 + $0xa4] sm:$0x1]  ;;  %7358 = vmatmul.mubr.bf16.gmra.mxu1 %v9824_v11  ;;  %v4524_v7 = vsel %vm10406_vm5, %v8386_v63, %v4523_v62 }
 0x2ba   : > { %v3959_v41 = vld [vmem:[#allocation3 + $0xa8] sm:$0xf]  ;;  %3918 = vst [vmem:[#allocation2 + $0x264] sm:$0xf] %v3894_v38  ;;  %v4198_v16 = vshrl.u32 %v3957_v48, 16  ;;  %v4201_v61 = vshll.u32 %v3957_v48, 16 }
 0x2bb   : > { %v9833_v56 = vld [vmem:[#allocation2 + $0x16c] ss:$36 sps:$4 sm:$0xff]   ;;  %v4191_v50 = vrot.slane %v4190_v25, 4  ;;  %v4195_v39 = vrot.slane %v4193_v18, 5  ;;  %4347 = vst [vmem:[#allocation2 + $0x1fc] sm:$0xf] %v4182_v9 }
 0x2bc   : > { %v9834_v3 = vld [vmem:[#allocation2 + $0x1b8] ss:$36 sps:$4 sm:$0xff]   ;;  %4590 = vst [vmem:[#allocation2 + $0x26c] sm:$0xf] %v4524_v7  ;;  %v3960_v20 = vld [vmem:[#allocation3 + $0xac] sm:$0x1]  ;;  %7365 = vmatprep.mubr.bf16.mxu1 %v9833_v56 }
 0x2bd   : > { %v4200_v4 = vrot.slane %v4198_v16, 4  ;;  %v4196_v21 = vsel %vm10394_vm4, %v4191_v50, %v4195_v39  ;;  %v4203_v49 = vrot.slane %v4201_v61, 5  ;;  %v4207_v33 = vshll.u32 %v3958_v10, 16  ;;  %v4395_v45 = vld [vmem:[#allocation3 + $0xc8] sm:$0xe]  ;;  %7503 = vmatmul.mubr.bf16.gmra.mxu0 %v9834_v3 }
 0x2be   : > { %v4212_v51 = vshrl.u32 %v3959_v41, 16  ;;  %4348 = vst [vmem:[#allocation2 + $0x220] sm:$0xf] %v4196_v21  ;;  %v4215_v29 = vshll.u32 %v3959_v41, 16  ;;  %v4396_v60 = vld [vmem:[#allocation3 + $0xcc] sm:$0x1] }
 0x2bf   : > { %v8388_v46 = vrot.slane %v4395_v45, 9  ;;  %v4240_v55 = vshrl.u32 %v11627_v30, 16  ;;  %v9831_v36 = vld [vmem:[#allocation2 + $0x168] ss:$36 sps:$4 sm:$0xff]   ;;  %v4204_v52 = vor.u32 %v4203_v49, %v4200_v4  ;;  %v4221_v47 = vshll.u32 %v3960_v20, 16 }
 0x2c0   : > { %v9844_v57 = vld [vmem:[#allocation2 + $0x204] ss:$36 sps:$4 sm:$0xff]   ;;  %v4214_v44 = vrot.slane %v4212_v51, 4  ;;  %v9841_v58 = vld [vmem:[#allocation2 + $0x1b4] ss:$36 sps:$4 sm:$0xff]   ;;  %v4217_v43 = vrot.slane %v4215_v29, 5 }
 0x2c1   : > { %v4531_v1 = vrot.slane %v4396_v60, 5  ;;  %v4615_v34 = vld [vmem:[#allocation3 + $0xc8] sm:$0xf]  ;;  %7510 = vmatprep.mubr.bf16.mxu0 %v9844_v57  ;;  %v4205_v54 = vrot.slane %v4204_v52, 4  ;;  %v4209_v0 = vrot.slane %v4207_v33, 5  ;;  %v4242_v48 = vrot.slane %v4240_v55, 4  ;;  %7366 = vmatmul.mubr.bf16.gmra.mxu1 %v9831_v36 }
 0x2c2   : > { %v4616_v28 = vld [vmem:[#allocation3 + $0xd0] sm:$0xf]  ;;  %4639 = vst [vmem:[#allocation2 + $0x294] sm:$0xf] %v4615_v34  ;;  %v3896_v23 = vld [vmem:[#allocation3 + $0xc8] sm:$0xf]  ;;  %v4218_v14 = vor.u32 %v4217_v43, %v4214_v44  ;;  %7373 = vmatprep.mubr.bf16.mxu1 %v9841_v58 }
 0x2c3   : > { %v4532_v26 = vsel %vm10406_vm5, %v8388_v46, %v4531_v1  ;;  %4640 = vst [vmem:[#allocation2 + $0x2b8] sm:$0xf] %v4616_v28  ;;  %3920 = vst [vmem:[#allocation2 + $0x2ac] sm:$0xf] %v3896_v23  ;;  %v3964_v40 = vld [vmem:[#allocation3 + $0xcc] sm:$0x1]  ;;  %v4210_v27 = vsel %vm10394_vm4, %v4205_v54, %v4209_v0 }
 0x2c4   : > { %v4243_v37 = vshll.u32 %v11627_v30, 16  ;;  %v4223_v12 = vrot.slane %v4221_v47, 5  ;;  %4592 = vst [vmem:[#allocation2 + $0x2b4] sm:$0xf] %v4532_v26  ;;  %v4249_v17 = vshll.u32 %v3964_v40, 16  ;;  %v4219_v2 = vrot.slane %v4218_v14, 4 }
 0x2c5   : > { %v4397_v19 = vld [vmem:[#allocation3 + $0xd0] sm:$0xe]  ;;  %4349 = vst [vmem:[#allocation2 + $0x244] sm:$0xf] %v4210_v27  ;;  %v4398_v15 = vld [vmem:[#allocation3 + $0xd4] sm:$0x1] }
 0x2c6   : > { %v3965_v13 = vld [vmem:[#allocation3 + $0xd0] sm:$0xf]  ;;  %v4245_v42 = vrot.slane %v4243_v37, 5  ;;  %v4399_v22 = vld [vmem:[#allocation3 + $0xd8] sm:$0xe]  ;;  %v4251_v31 = vrot.slane %v4249_v17, 5  ;;  %v4224_v53 = vsel %vm10394_vm4, %v4219_v2, %v4223_v12 }
 0x2c7   : > { %v3967_v35 = vld [vmem:[#allocation3 + $0xd8] sm:$0xf]  ;;  %v9842_v18 = vld [vmem:[#allocation2 + $0x200] ss:$36 sps:$4 sm:$0xff]   ;;  %v9854_v63 = vld [vmem:[#allocation2 + $0x24c] ss:$36 sps:$4 sm:$0xff]  }
 0x2c8   : > { %v4246_v32 = vor.u32 %v4245_v42, %v4242_v48  ;;  %v4400_v5 = vld [vmem:[#allocation3 + $0xdc] sm:$0x1]  ;;  %v8389_v8 = vrot.slane %v4397_v19, 9  ;;  %v4535_v30 = vrot.slane %v4398_v15, 5  ;;  %v4617_v11 = vld [vmem:[#allocation3 + $0xd8] sm:$0xf]  ;;  %7511 = vmatmul.mubr.bf16.gmra.mxu0 %v9842_v18 }
 0x2c9   : > { %4350 = vst [vmem:[#allocation2 + $0x268] sm:$0xf] %v4224_v53  ;;  %v8390_v25 = vrot.slane %v4399_v22, 9  ;;  %v4539_v62 = vrot.slane %v4400_v5, 5  ;;  %v4618_v38 = vld [vmem:[#allocation3 + $0xe0] sm:$0xf]  ;;  %7518 = vmatprep.mubr.bf16.mxu0 %v9854_v63 }
 0x2ca   : > { %4641 = vst [vmem:[#allocation2 + $0x2dc] sm:$0xf] %v4617_v11  ;;  %v3897_v41 = vld [vmem:[#allocation3 + $0xd0] sm:$0xf]  ;;  %v4247_v9 = vrot.slane %v4246_v32, 4  ;;  %v4536_v10 = vsel %vm10406_vm5, %v8389_v8, %v4535_v30  ;;  %v4254_v7 = vshrl.u32 %v3965_v13, 16 }
 0x2cb   : > { %4642 = vst [vmem:[#allocation2 + $0x300] sm:$0xf] %v4618_v38  ;;  %v3898_v16 = vld [vmem:[#allocation3 + $0xd8] sm:$0xf]  ;;  %3921 = vst [vmem:[#allocation2 + $0x2d0] sm:$0xf] %v3897_v41  ;;  %v4540_v50 = vsel %vm10406_vm5, %v8390_v25, %v4539_v62 }
 0x2cc   : > { %v3966_v61 = vld [vmem:[#allocation3 + $0xd4] sm:$0x1]  ;;  %4593 = vst [vmem:[#allocation2 + $0x2d8] sm:$0xf] %v4536_v10  ;;  %3922 = vst [vmem:[#allocation2 + $0x2f4] sm:$0xf] %v3898_v16  ;;  %v4252_v4 = vsel %vm10394_vm4, %v4247_v9, %v4251_v31 }
 0x2cd   : > { %v9839_v56 = vld [vmem:[#allocation2 + $0x1b0] ss:$36 sps:$4 sm:$0xff]   ;;  %v3968_v39 = vld [vmem:[#allocation3 + $0xdc] sm:$0x1]  ;;  %v4257_v3 = vshll.u32 %v3965_v13, 16  ;;  %v4263_v21 = vshll.u32 %v3966_v61, 16 }
 0x2ce   : > { %v9850_v20 = vld [vmem:[#allocation2 + $0x1fc] ss:$36 sps:$4 sm:$0xff]   ;;  %4594 = vst [vmem:[#allocation2 + $0x2fc] sm:$0xf] %v4540_v50  ;;  %v4268_v49 = vshrl.u32 %v3967_v35, 16  ;;  %7374 = vmatmul.mubr.bf16.gmra.mxu1 %v9839_v56  ;;  %v4256_v33 = vrot.slane %v4254_v7, 4 }
 0x2cf   : > { %4352 = vst [vmem:[#allocation2 + $0x2b0] sm:$0xf] %v4252_v4  ;;  %v4259_v51 = vrot.slane %v4257_v3, 5  ;;  %v4271_v45 = vshll.u32 %v3967_v35, 16  ;;  %7381 = vmatprep.mubr.bf16.mxu1 %v9850_v20  ;;  %v4277_v60 = vshll.u32 %v3968_v39, 16  ;;  %v4265_v34 = vrot.slane %v4263_v21, 5 }
 0x2d0   : > { %v4270_v29 = vrot.slane %v4268_v49, 4  ;;  %v4401_v46 = vld [vmem:[#allocation3 + $0xe0] sm:$0xe]  ;;  %v4402_v55 = vld [vmem:[#allocation3 + $0xe4] sm:$0x1] }
 0x2d1   : > { %v3969_v36 = vld [vmem:[#allocation3 + $0xe0] sm:$0xf]  ;;  %v4260_v57 = vor.u32 %v4259_v51, %v4256_v33  ;;  %v4273_v52 = vrot.slane %v4271_v45, 5  ;;  %v4403_v44 = vld [vmem:[#allocation3 + $0xe8] sm:$0xe]  ;;  %v8391_v58 = vrot.slane %v4401_v46, 9 }
 0x2d2   : > { %v4404_v47 = vld [vmem:[#allocation3 + $0xec] sm:$0x1]  ;;  %v9862_v1 = vld [vmem:[#allocation2 + $0x294] ss:$36 sps:$4 sm:$0xff]   ;;  %v3971_v54 = vld [vmem:[#allocation3 + $0xe8] sm:$0xf] }
 0x2d3   : > { %v9852_v43 = vld [vmem:[#allocation2 + $0x248] ss:$36 sps:$4 sm:$0xff]   ;;  %v4261_v0 = vrot.slane %v4260_v57, 4  ;;  %v4274_v28 = vor.u32 %v4273_v52, %v4270_v29  ;;  %v4543_v23 = vrot.slane %v4402_v55, 5  ;;  %v8392_v14 = vrot.slane %v4403_v44, 9 }
 0x2d4   : > { %v4619_v26 = vld [vmem:[#allocation3 + $0xe8] sm:$0xf]  ;;  %7519 = vmatmul.mubr.bf16.gmra.mxu0 %v9852_v43  ;;  %v4547_v40 = vrot.slane %v4404_v47, 5  ;;  %v4620_v48 = vld [vmem:[#allocation3 + $0xf0] sm:$0xf]  ;;  %v4279_v19 = vrot.slane %v4277_v60, 5 }
 0x2d5   : > { %4643 = vst [vmem:[#allocation2 + $0x324] sm:$0xf] %v4619_v26  ;;  %v3899_v37 = vld [vmem:[#allocation3 + $0xe0] sm:$0xf]  ;;  %v9848_v27 = vld [vmem:[#allocation2 + $0x1f8] ss:$36 sps:$4 sm:$0xff]   ;;  %7526 = vmatprep.mubr.bf16.mxu0 %v9862_v1  ;;  %v4266_v12 = vsel %vm10394_vm4, %v4261_v0, %v4265_v34  ;;  %v4544_v13 = vsel %vm10406_vm5, %v8391_v58, %v4543_v23 }
 0x2d6   : > { %v4275_v17 = vrot.slane %v4274_v28, 4  ;;  %4644 = vst [vmem:[#allocation2 + $0x348] sm:$0xf] %v4620_v48  ;;  %3923 = vst [vmem:[#allocation2 + $0x318] sm:$0xf] %v3899_v37  ;;  %v4548_v42 = vsel %vm10406_vm5, %v8392_v14, %v4547_v40  ;;  %v4282_v15 = vshrl.u32 %v3969_v36, 16  ;;  %7382 = vmatmul.mubr.bf16.gmra.mxu1 %v9848_v27 }
 0x2d7   : > { %v9858_v2 = vld [vmem:[#allocation2 + $0x244] ss:$36 sps:$4 sm:$0xff]   ;;  %4353 = vst [vmem:[#allocation2 + $0x2d4] sm:$0xf] %v4266_v12  ;;  %4595 = vst [vmem:[#allocation2 + $0x320] sm:$0xf] %v4544_v13 }
 0x2d8   : > { %v5368_v22 = vld [vmem:[#allocation3 + $0x18] sm:$0xf]  ;;  %v4280_v35 = vsel %vm10394_vm4, %v4275_v17, %v4279_v19  ;;  %4596 = vst [vmem:[#allocation2 + $0x344] sm:$0xf] %v4548_v42  ;;  %v3900_v18 = vld [vmem:[#allocation3 + $0xe8] sm:$0xf]  ;;  %7389 = vmatprep.mubr.bf16.mxu1 %v9858_v2 }
 0x2d9   : > { %v3970_v63 = vld [vmem:[#allocation3 + $0xe4] sm:$0x1]  ;;  %v3972_v31 = vld [vmem:[#allocation3 + $0xec] sm:$0x1]  ;;  %v9860_v53 = vld [vmem:[#allocation2 + $0x290] ss:$36 sps:$4 sm:$0xff]  }
 0x2da   : > { %4354 = vst [vmem:[#allocation2 + $0x2f8] sm:$0xf] %v4280_v35  ;;  %3924 = vst [vmem:[#allocation2 + $0x33c] sm:$0xf] %v3900_v18  ;;  %v4284_v32 = vrot.slane %v4282_v15, 4  ;;  %v4285_v5 = vshll.u32 %v3969_v36, 16 }
 0x2db   : > { %v4296_v8 = vshrl.u32 %v3971_v54, 16  ;;  %v5318_v30 = vld [vmem:[#allocation3 + $0x10] sm:$0xf]  ;;  %v4299_v11 = vshll.u32 %v3971_v54, 16  ;;  %v5319_v25 = vld [vmem:[#allocation3 + $0x18] sm:$0xf] }
 0x2dc   : > { %5342 = vst [vmem:[#allocation2 + $0x18] sm:$0xf] %v5318_v30  ;;  %v5366_v62 = vld [vmem:[#allocation3 + $0x10] sm:$0xf]  ;;  %v4287_v38 = vrot.slane %v4285_v5, 5  ;;  %v4291_v41 = vshll.u32 %v3970_v63, 16  ;;  %7527 = vmatmul.mubr.bf16.gmra.mxu0 %v9860_v53 }
 0x2dd   : > { %v4298_v9 = vrot.slane %v4296_v8, 4  ;;  %5343 = vst [vmem:[#allocation2 + $0x3c] sm:$0xf] %v5319_v25  ;;  %v5367_v10 = vld [vmem:[#allocation3 + $0x14] sm:$0x1]  ;;  %v5415_v16 = vshrl.u32 %v5366_v62, 16 }
 0x2de   : > { %v9871_v61 = vld [vmem:[#allocation2 + $0x2dc] ss:$36 sps:$4 sm:$0xff]   ;;  %v4301_v56 = vrot.slane %v4299_v11, 5  ;;  %v4305_v50 = vshll.u32 %v3972_v31, 16  ;;  %v5418_v39 = vshll.u32 %v5366_v62, 16  ;;  %v5424_v7 = vshll.u32 %v5367_v10, 16 }
 0x2df   : > { %v4645_v3 = vld [vmem:[#allocation3 + $0x8] sm:$0xf]  ;;  %v9856_v20 = vld [vmem:[#allocation2 + $0x240] ss:$36 sps:$4 sm:$0xff]   ;;  %v4288_v4 = vor.u32 %v4287_v38, %v4284_v32  ;;  %v5417_v21 = vrot.slane %v5415_v16, 4  ;;  %v5429_v49 = vshrl.u32 %v5368_v22, 16  ;;  %7534 = vmatprep.mubr.bf16.mxu0 %v9871_v61 }
 0x2e0   : > { %v5432_v33 = vshll.u32 %v5368_v22, 16  ;;  %v4302_v51 = vor.u32 %v4301_v56, %v4298_v9  ;;  %v5369_v45 = vld [vmem:[#allocation3 + $0x1c] sm:$0x1]  ;;  %v5420_v29 = vrot.slane %v5418_v39, 5  ;;  %v9867_v60 = vld [vmem:[#allocation2 + $0x28c] ss:$36 sps:$4 sm:$0xff]   ;;  %7390 = vmatmul.mubr.bf16.gmra.mxu1 %v9856_v20 }
 0x2e1   : > { %v4289_v46 = vrot.slane %v4288_v4, 4  ;;  %v4293_v55 = vrot.slane %v4291_v41, 5  ;;  %v4307_v57 = vrot.slane %v4305_v50, 5  ;;  %v5426_v44 = vrot.slane %v5424_v7, 5  ;;  %v4646_v47 = vld [vmem:[#allocation3 + $0xc] sm:$0x1]  ;;  %7397 = vmatprep.mubr.bf16.mxu1 %v9867_v60 }
 0x2e2   : > { %v4303_v36 = vrot.slane %v4302_v51, 4  ;;  %v5421_v52 = vor.u32 %v5420_v29, %v5417_v21  ;;  %v9869_v58 = vld [vmem:[#allocation2 + $0x2d8] ss:$36 sps:$4 sm:$0xff]   ;;  %v5431_v1 = vrot.slane %v5429_v49, 4  ;;  %v5434_v34 = vrot.slane %v5432_v33, 5 }
 0x2e3   : > { %v4294_v43 = vsel %vm10394_vm4, %v4289_v46, %v4293_v55  ;;  %v5438_v54 = vshll.u32 %v5369_v45, 16  ;;  %v4647_v0 = vld [vmem:[#allocation3 + $0x10] sm:$0xf]  ;;  %v9883_v28 = vld [vmem:[#allocation2 + $0x324] ss:$36 sps:$4 sm:$0xff]   ;;  %v4694_v40 = vshrl.u32 %v4645_v3, 16 }
 0x2e4   : > { %v4308_v23 = vsel %vm10394_vm4, %v4303_v36, %v4307_v57  ;;  %4355 = vst [vmem:[#allocation2 + $0x31c] sm:$0xf] %v4294_v43  ;;  %v5422_v14 = vrot.slane %v5421_v52, 4  ;;  %v4648_v26 = vld [vmem:[#allocation3 + $0x14] sm:$0x1]  ;;  %v4697_v48 = vshll.u32 %v4645_v3, 16  ;;  %v5435_v27 = vor.u32 %v5434_v34, %v5431_v1  ;;  %7535 = vmatmul.mubr.bf16.gmra.mxu0 %v9869_v58 }
 0x2e5   : > { %v5370_v37 = vld [vmem:[#allocation3 + $0x20] sm:$0xf]  ;;  %4356 = vst [vmem:[#allocation2 + $0x340] sm:$0xf] %v4308_v23  ;;  %v4703_v12 = vshll.u32 %v4646_v47, 16  ;;  %v4708_v17 = vshrl.u32 %v4647_v0, 16  ;;  %7542 = vmatprep.mubr.bf16.mxu0 %v9883_v28 }
 0x2e6   : > { %v4711_v19 = vshll.u32 %v4647_v0, 16  ;;  %v5077_v13 = vld [vmem:[#allocation3 + $0x8] sm:$0xe]  ;;  %v5427_v42 = vsel %vm10394_vm4, %v5422_v14, %v5426_v44  ;;  %v4696_v15 = vrot.slane %v4694_v40, 4  ;;  %v4699_v22 = vrot.slane %v4697_v48, 5 }
 0x2e7   : > { %v9865_v2 = vld [vmem:[#allocation2 + $0x288] ss:$36 sps:$4 sm:$0xff]   ;;  %v4717_v35 = vshll.u32 %v4648_v26, 16  ;;  %v9878_v63 = vld [vmem:[#allocation2 + $0x2d4] ss:$36 sps:$4 sm:$0xff]   ;;  %v5436_v31 = vrot.slane %v5435_v27, 4 }
 0x2e8   : > { %v5078_v18 = vld [vmem:[#allocation3 + $0xc] sm:$0x1]  ;;  %v5440_v53 = vrot.slane %v5438_v54, 5  ;;  %5774 = vst [vmem:[#allocation2 + $0x1c] sm:$0xf] %v5427_v42  ;;  %v4710_v32 = vrot.slane %v4708_v17, 4  ;;  %v4700_v11 = vor.u32 %v4699_v22, %v4696_v15  ;;  %7398 = vmatmul.mubr.bf16.gmra.mxu1 %v9865_v2 }
 0x2e9   : > { %v4713_v5 = vrot.slane %v4711_v19, 5  ;;  %v5079_v8 = vld [vmem:[#allocation3 + $0x10] sm:$0xe]  ;;  %v5372_v30 = vld [vmem:[#allocation3 + $0x28] sm:$0xf]  ;;  %v4705_v25 = vrot.slane %v4703_v12, 5  ;;  %7405 = vmatprep.mubr.bf16.mxu1 %v9878_v63 }
 0x2ea   : > { %v5080_v62 = vld [vmem:[#allocation3 + $0x14] sm:$0x1]  ;;  %v8393_v38 = vrot.slane %v5077_v13, 9  ;;  %v5175_v41 = vrot.slane %v5078_v18, 5  ;;  %v4649_v9 = vld [vmem:[#allocation3 + $0x18] sm:$0xf]  ;;  %v5441_v10 = vsel %vm10394_vm4, %v5436_v31, %v5440_v53 }
 0x2eb   : > { %v4714_v16 = vor.u32 %v4713_v5, %v4710_v32  ;;  %v8394_v61 = vrot.slane %v5079_v8, 9  ;;  %v5179_v56 = vrot.slane %v5080_v62, 5  ;;  %v5320_v50 = vld [vmem:[#allocation3 + $0x20] sm:$0xf]  ;;  %v5321_v39 = vld [vmem:[#allocation3 + $0x28] sm:$0xf] }
 0x2ec   : > { %5775 = vst [vmem:[#allocation2 + $0x40] sm:$0xf] %v5441_v10  ;;  %v4701_v7 = vrot.slane %v4700_v11, 4  ;;  %v4719_v3 = vrot.slane %v4717_v35, 5  ;;  %v5176_v20 = vsel %vm10406_vm5, %v8393_v38, %v5175_v41  ;;  %5344 = vst [vmem:[#allocation2 + $0x60] sm:$0xf] %v5320_v50 }
 0x2ed   : > { %5345 = vst [vmem:[#allocation2 + $0x84] sm:$0xf] %v5321_v39  ;;  %v5371_v4 = vld [vmem:[#allocation3 + $0x24] sm:$0x1]  ;;  %v5443_v21 = vshrl.u32 %v5370_v37, 16  ;;  %v4715_v49 = vrot.slane %v4714_v16, 4  ;;  %v5180_v33 = vsel %vm10406_vm5, %v8394_v61, %v5179_v56 }
 0x2ee   : > { %5293 = vst [vmem:[#allocation2 + $0x14] sm:$0xf] %v5176_v20  ;;  %v5373_v51 = vld [vmem:[#allocation3 + $0x2c] sm:$0x1]  ;;  %v5446_v45 = vshll.u32 %v5370_v37, 16  ;;  %v5452_v29 = vshll.u32 %v5371_v4, 16  ;;  %v4706_v46 = vsel %vm10394_vm4, %v4701_v7, %v4705_v25 }
 0x2ef   : > { %v4651_v60 = vld [vmem:[#allocation3 + $0x20] sm:$0xf]  ;;  %5294 = vst [vmem:[#allocation2 + $0x38] sm:$0xf] %v5180_v33  ;;  %v5445_v55 = vrot.slane %v5443_v21, 4  ;;  %v4720_v52 = vsel %vm10394_vm4, %v4715_v49, %v4719_v3  ;;  %v5457_v58 = vshrl.u32 %v5372_v30, 16 }
 0x2f0   : > { %v4650_v36 = vld [vmem:[#allocation3 + $0x1c] sm:$0x1]  ;;  %v9881_v57 = vld [vmem:[#allocation2 + $0x320] ss:$36 sps:$4 sm:$0xff]   ;;  %5053 = vst [vmem:[#allocation2 + $0x10] sm:$0xf] %v4706_v46 }
 0x2f1   : > { %v5448_v44 = vrot.slane %v5446_v45, 5  ;;  %v5454_v47 = vrot.slane %v5452_v29, 5  ;;  %v9876_v43 = vld [vmem:[#allocation2 + $0x2d0] ss:$36 sps:$4 sm:$0xff]   ;;  %5054 = vst [vmem:[#allocation2 + $0x34] sm:$0xf] %v4720_v52  ;;  %7543 = vmatmul.mubr.bf16.gmra.mxu0 %v9881_v57 }
 0x2f2   : > { %v5460_v1 = vshll.u32 %v5372_v30, 16  ;;  %v5466_v34 = vshll.u32 %v5373_v51, 16  ;;  %v4722_v54 = vshrl.u32 %v4649_v9, 16  ;;  %v4725_v0 = vshll.u32 %v4649_v9, 16  ;;  %v9889_v28 = vld [vmem:[#allocation2 + $0x31c] ss:$36 sps:$4 sm:$0xff]   ;;  %7406 = vmatmul.mubr.bf16.gmra.mxu1 %v9876_v43 }
 0x2f3   : > { %v5449_v23 = vor.u32 %v5448_v44, %v5445_v55  ;;  %v5459_v14 = vrot.slane %v5457_v58, 4  ;;  %v4652_v26 = vld [vmem:[#allocation3 + $0x24] sm:$0x1]  ;;  %v4731_v40 = vshll.u32 %v4650_v36, 16  ;;  %v4736_v48 = vshrl.u32 %v4651_v60, 16  ;;  %7413 = vmatprep.mubr.bf16.mxu1 %v9889_v28 }
 0x2f4   : > { %v5462_v37 = vrot.slane %v5460_v1, 5  ;;  %v5468_v27 = vrot.slane %v5466_v34, 5  ;;  %v4724_v12 = vrot.slane %v4722_v54, 4  ;;  %v4727_v17 = vrot.slane %v4725_v0, 5  ;;  %v5081_v19 = vld [vmem:[#allocation3 + $0x18] sm:$0xe] }
 0x2f5   : > { %v9895_v13 = vld [vmem:[#allocation2 + $0x1c] ss:$36 sps:$4 sm:$0xff]   ;;  %v5450_v2 = vrot.slane %v5449_v23, 4  ;;  %v4733_v35 = vrot.slane %v4731_v40, 5  ;;  %v4738_v18 = vrot.slane %v4736_v48, 4  ;;  %v4739_v32 = vshll.u32 %v4651_v60, 16 }
 0x2f6   : > { %v5082_v42 = vld [vmem:[#allocation3 + $0x1c] sm:$0x1]  ;;  %v5463_v15 = vor.u32 %v5462_v37, %v5459_v14  ;;  %v4728_v22 = vor.u32 %v4727_v17, %v4724_v12  ;;  %v5083_v63 = vld [vmem:[#allocation3 + $0x20] sm:$0xe]  ;;  %v4653_v31 = vld [vmem:[#allocation3 + $0x28] sm:$0xf]  ;;  %7712 = vmatprep.mubr.bf16.mxu0 %v9895_v13 }
 0x2f7   : > { %v5455_v53 = vsel %vm10394_vm4, %v5450_v2, %v5454_v47  ;;  %v4745_v5 = vshll.u32 %v4652_v26, 16  ;;  %v8395_v8 = vrot.slane %v5081_v19, 9  ;;  %v5322_v30 = vld [vmem:[#allocation3 + $0x30] sm:$0xf]  ;;  %v5084_v62 = vld [vmem:[#allocation3 + $0x24] sm:$0x1] }
 0x2f8   : > { %v5464_v11 = vrot.slane %v5463_v15, 4  ;;  %5776 = vst [vmem:[#allocation2 + $0x64] sm:$0xf] %v5455_v53  ;;  %v4729_v25 = vrot.slane %v4728_v22, 4  ;;  %v5183_v38 = vrot.slane %v5082_v42, 5  ;;  %v4741_v9 = vrot.slane %v4739_v32, 5 }
 0x2f9   : > { %5346 = vst [vmem:[#allocation2 + $0xa8] sm:$0xf] %v5322_v30  ;;  %v9893_v41 = vld [vmem:[#allocation2 + $0x18] ss:$36 sps:$4 sm:$0xff]   ;;  %v8396_v10 = vrot.slane %v5083_v63, 9  ;;  %v4747_v50 = vrot.slane %v4745_v5, 5 }
 0x2fa   : > { %v9887_v16 = vld [vmem:[#allocation2 + $0x318] ss:$36 sps:$4 sm:$0xff]   ;;  %v5469_v61 = vsel %vm10394_vm4, %v5464_v11, %v5468_v27  ;;  %v4734_v56 = vsel %vm10394_vm4, %v4729_v25, %v4733_v35  ;;  %v5184_v39 = vsel %vm10406_vm5, %v8395_v8, %v5183_v38  ;;  %v5374_v7 = vld [vmem:[#allocation3 + $0x30] sm:$0xf]  ;;  %v5375_v3 = vld [vmem:[#allocation3 + $0x34] sm:$0x1]  ;;  %7713 = vmatmul.mubr.bf16.vlgmr.msra.gmra.mxu0 %v9893_v41  ;;  %v4742_v4 = vor.u32 %v4741_v9, %v4738_v18 }
 0x2fb   : > { %v9901_v20 = vld [vmem:[#allocation2 + $0x14] ss:$36 sps:$4 sm:$0xff]   ;;  %5777 = vst [vmem:[#allocation2 + $0x88] sm:$0xf] %v5469_v61  ;;  %5055 = vst [vmem:[#allocation2 + $0x58] sm:$0xf] %v4734_v56  ;;  %7414 = vmatmul.mubr.bf16.gmra.mxu1 %v9887_v16 }
 0x2fc   : > { %v5187_v21 = vrot.slane %v5084_v62, 5  ;;  %5295 = vst [vmem:[#allocation2 + $0x5c] sm:$0xf] %v5184_v39  ;;  %v5471_v49 = vshrl.u32 %v5374_v7, 16  ;;  %v5474_v33 = vshll.u32 %v5374_v7, 16  ;;  %v5480_v45 = vshll.u32 %v5375_v3, 16  ;;  %7583 = vmatprep.mubr.bf16.mxu1 %v9901_v20 }
 0x2fd   : > { %v4654_v51 = vld [vmem:[#allocation3 + $0x2c] sm:$0x1]  ;;  %v4655_v29 = vld [vmem:[#allocation3 + $0x30] sm:$0xf]  ;;  %v4656_v60 = vld [vmem:[#allocation3 + $0x34] sm:$0x1] }
 0x2fe   : > { %v4750_v46 = vshrl.u32 %v4653_v31, 16  ;;  %v4743_v55 = vrot.slane %v4742_v4, 4  ;;  %v5188_v36 = vsel %vm10406_vm5, %v8396_v10, %v5187_v21  ;;  %v5473_v57 = vrot.slane %v5471_v49, 4  ;;  %v5085_v44 = vld [vmem:[#allocation3 + $0x28] sm:$0xe] }
 0x2ff   : > { %v5476_v52 = vrot.slane %v5474_v33, 5  ;;  %5296 = vst [vmem:[#allocation2 + $0x80] sm:$0xf] %v5188_v36  ;;  %v5482_v47 = vrot.slane %v5480_v45, 5  ;;  %v4753_v43 = vshll.u32 %v4653_v31, 16  ;;  %v4759_v1 = vshll.u32 %v4654_v51, 16 }
 0x300   : > { %v4752_v58 = vrot.slane %v4750_v46, 4  ;;  %v5086_v34 = vld [vmem:[#allocation3 + $0x2c] sm:$0x1]  ;;  %v5378_v54 = vld [vmem:[#allocation3 + $0x50] sm:$0xf]  ;;  %v4748_v0 = vsel %vm10394_vm4, %v4743_v55, %v4747_v50  ;;  %v4764_v23 = vshrl.u32 %v4655_v29, 16 }
 0x301   : > { %v5477_v28 = vor.u32 %v5476_v52, %v5473_v57  ;;  %v4767_v14 = vshll.u32 %v4655_v29, 16  ;;  %v5087_v26 = vld [vmem:[#allocation3 + $0x30] sm:$0xe]  ;;  %v5380_v40 = vld [vmem:[#allocation3 + $0x58] sm:$0xf]  ;;  %v4755_v48 = vrot.slane %v4753_v43, 5 }
 0x302   : > { %5056 = vst [vmem:[#allocation2 + $0x7c] sm:$0xf] %v4748_v0  ;;  %v4761_v37 = vrot.slane %v4759_v1, 5  ;;  %v4773_v27 = vshll.u32 %v4656_v60, 16  ;;  %v5088_v12 = vld [vmem:[#allocation3 + $0x34] sm:$0x1] }
 0x303   : > { %v8397_v17 = vrot.slane %v5085_v44, 9  ;;  %v5478_v19 = vrot.slane %v5477_v28, 4  ;;  %v4766_v13 = vrot.slane %v4764_v23, 4  ;;  %v4769_v2 = vrot.slane %v4767_v14, 5  ;;  %v5324_v15 = vld [vmem:[#allocation3 + $0x50] sm:$0xf] }
 0x304   : > { %v5191_v42 = vrot.slane %v5086_v34, 5  ;;  %v9902_v22 = vld [vmem:[#allocation2 + $0x60] ss:$36 sps:$4 sm:$0xff]   ;;  %v4756_v18 = vor.u32 %v4755_v48, %v4752_v58  ;;  %v4775_v63 = vrot.slane %v4773_v27, 5  ;;  %5348 = vst [vmem:[#allocation2 + $0xf0] sm:$0xf] %v5324_v15 }
 0x305   : > { %v9904_v35 = vld [vmem:[#allocation2 + $0x64] ss:$36 sps:$4 sm:$0xff]   ;;  %v9918_v31 = vld [vmem:[#allocation7 + $0x230] sm:$0xff]   ;;  %v5483_v53 = vsel %vm10394_vm4, %v5478_v19, %v5482_v47  ;;  %v4770_v32 = vor.u32 %v4769_v2, %v4766_v13  ;;  %v8398_v8 = vrot.slane %v5087_v26, 9  ;;  %v5325_v30 = vld [vmem:[#allocation3 + $0x58] sm:$0xf] }
 0x306   : > { %v5192_v5 = vsel %vm10406_vm5, %v8397_v17, %v5191_v42  ;;  %v5379_v11 = vld [vmem:[#allocation3 + $0x54] sm:$0x1]  ;;  %v4657_v25 = vld [vmem:[#allocation3 + $0x48] sm:$0xf]  ;;  %7720 = vmatprep.mubr.bf16.mxu0 %v9904_v35  ;;  %5778 = vst [vmem:[#allocation2 + $0xac] sm:$0xf] %v5483_v53 }
 0x307   : > { %v9899_v62 = vld [vmem:[#allocation2 + $0x10] ss:$36 sps:$4 sm:$0xff]   ;;  %v4757_v38 = vrot.slane %v4756_v18, 4  ;;  %v5195_v41 = vrot.slane %v5088_v12, 5  ;;  %5297 = vst [vmem:[#allocation2 + $0xa4] sm:$0xf] %v5192_v5  ;;  %7721 = vmatmul.mubr.bf16.gmra.mxu0 %v9902_v22 }
 0x308   : > { %5349 = vst [vmem:[#allocation2 + $0x114] sm:$0xf] %v5325_v30  ;;  %v5499_v9 = vshrl.u32 %v5378_v54, 16  ;;  %v5502_v10 = vshll.u32 %v5378_v54, 16  ;;  %v4771_v16 = vrot.slane %v4770_v32, 4  ;;  %v5508_v56 = vshll.u32 %v5379_v11, 16  ;;  %7584 = vmatmul.mubr.bf16.vlgmr.msra.gmra.mxu1 %v9899_v62 }
 0x309   : > { %v5381_v61 = vld [vmem:[#allocation3 + $0x5c] sm:$0x1]  ;;  %v5513_v50 = vshrl.u32 %v5380_v40, 16  ;;  %v5516_v39 = vshll.u32 %v5380_v40, 16  ;;  %v4659_v7 = vld [vmem:[#allocation3 + $0x50] sm:$0xf]  ;;  %v4762_v3 = vsel %vm10394_vm4, %v4757_v38, %v4761_v37  ;;  %v5196_v20 = vsel %vm10406_vm5, %v8398_v8, %v5195_v41  ;;  %9437 = vmatpush3.bf16.msra.mxu1 %v11612_v24 }
 0x30a   : > { %v5501_v4 = vrot.slane %v5499_v9, 4  ;;  %v5504_v21 = vrot.slane %v5502_v10, 5  ;;  %v4658_v49 = vld [vmem:[#allocation3 + $0x4c] sm:$0x1]  ;;  %v9908_v33 = vld [vmem:[#allocation2 + $0x5c] ss:$36 sps:$4 sm:$0xff]   ;;  %v4776_v51 = vsel %vm10394_vm4, %v4771_v16, %v4775_v63  ;;  %9438 = vmatprep.subr.bf16.mxu1 %v9918_v31 }
 0x30b   : > { %5057 = vst [vmem:[#allocation2 + $0xa0] sm:$0xf] %v4762_v3  ;;  %5298 = vst [vmem:[#allocation2 + $0xc8] sm:$0xf] %v5196_v20  ;;  %v5510_v45 = vrot.slane %v5508_v56, 5  ;;  %v5515_v60 = vrot.slane %v5513_v50, 4  ;;  %7591 = vmatprep.mubr.bf16.mxu1 %v9908_v33 }
 0x30c   : > { %5058 = vst [vmem:[#allocation2 + $0xc4] sm:$0xf] %v4776_v51  ;;  %v5505_v29 = vor.u32 %v5504_v21, %v5501_v4  ;;  %v5518_v46 = vrot.slane %v5516_v39, 5  ;;  %v5522_v55 = vshll.u32 %v5381_v61, 16  ;;  %v4660_v36 = vld [vmem:[#allocation3 + $0x54] sm:$0x1] }
 0x30d   : > { %v5089_v57 = vld [vmem:[#allocation3 + $0x48] sm:$0xe]  ;;  %v4778_v44 = vshrl.u32 %v4657_v25, 16  ;;  %v4781_v47 = vshll.u32 %v4657_v25, 16  ;;  %v4787_v58 = vshll.u32 %v4658_v49, 16  ;;  %v4792_v24 = vshrl.u32 %v4659_v7, 16  ;;  %9439 = vmatpush3.bf16.msra.mxu1 %v9918_v31 }
 0x30e   : > { %v9925_v52 = vld [vmem:[#allocation7 + $0x228] sm:$0xff]   ;;  %v9906_v1 = vld [vmem:[#allocation2 + $0x58] ss:$36 sps:$4 sm:$0xff]   ;;  %v5506_v34 = vrot.slane %v5505_v29, 4  ;;  %v5519_v54 = vor.u32 %v5518_v46, %v5515_v60  ;;  %v5524_v0 = vrot.slane %v5522_v55, 5  ;;  %v4795_v28 = vshll.u32 %v4659_v7, 16 }
 0x30f   : > { %v5090_v43 = vld [vmem:[#allocation3 + $0x4c] sm:$0x1]  ;;  %v5091_v23 = vld [vmem:[#allocation3 + $0x50] sm:$0xe]  ;;  %v9938_v14 = vld [vmem:[#allocation7 + $0x220] sm:$0xff]   ;;  %v4780_v48 = vrot.slane %v4778_v44, 4  ;;  %9440 = vmatprep.subr.bf16.mxu1 %v9925_v52 }
 0x310   : > { %v5382_v26 = vld [vmem:[#allocation3 + $0x60] sm:$0xf]  ;;  %v9911_v40 = vld [vmem:[#allocation2 + $0xac] ss:$36 sps:$4 sm:$0xff]   ;;  %v5092_v37 = vld [vmem:[#allocation3 + $0x54] sm:$0x1]  ;;  %v5511_v17 = vsel %vm10394_vm4, %v5506_v34, %v5510_v45  ;;  %7592 = vmatmul.mubr.bf16.gmra.mxu1 %v9906_v1 }
 0x311   : > { %v5384_v27 = vld [vmem:[#allocation3 + $0x68] sm:$0xf]  ;;  %v5520_v19 = vrot.slane %v5519_v54, 4  ;;  %v4783_v13 = vrot.slane %v4781_v47, 5  ;;  %v5326_v2 = vld [vmem:[#allocation3 + $0x60] sm:$0xf]  ;;  %7728 = vmatprep.mubr.bf16.mxu0 %v9911_v40  ;;  %9441 = vmatpush3.bf16.msra.mxu1 %v9925_v52 }
 0x312   : > { %v9909_v12 = vld [vmem:[#allocation2 + $0xa8] ss:$36 sps:$4 sm:$0xff]   ;;  %5780 = vst [vmem:[#allocation2 + $0xf4] sm:$0xf] %v5511_v17  ;;  %v4794_v42 = vrot.slane %v4792_v24, 4  ;;  %v4797_v15 = vrot.slane %v4795_v28, 5  ;;  %9442 = vmatprep.subr.bf16.mxu1 %v9938_v14 }
 0x313   : > { %v4801_v22 = vshll.u32 %v4660_v36, 16  ;;  %v8399_v35 = vrot.slane %v5089_v57, 9  ;;  %v5327_v18 = vld [vmem:[#allocation3 + $0x68] sm:$0xf]  ;;  %5350 = vst [vmem:[#allocation2 + $0x138] sm:$0xf] %v5326_v2  ;;  %7729 = vmatmul.mubr.bf16.gmra.mxu0 %v9909_v12  ;;  %v5525_v63 = vsel %vm10394_vm4, %v5520_v19, %v5524_v0  ;;  %v4784_v31 = vor.u32 %v4783_v13, %v4780_v48 }
 0x314   : > { %v5199_v53 = vrot.slane %v5090_v43, 5  ;;  %v8400_v32 = vrot.slane %v5091_v23, 9  ;;  %5351 = vst [vmem:[#allocation2 + $0x15c] sm:$0xf] %v5327_v18  ;;  %v5383_v5 = vld [vmem:[#allocation3 + $0x64] sm:$0x1]  ;;  %v4798_v11 = vor.u32 %v4797_v15, %v4794_v42 }
 0x315   : > { %v9914_v8 = vld [vmem:[#allocation2 + $0xa4] ss:$36 sps:$4 sm:$0xff]   ;;  %5781 = vst [vmem:[#allocation2 + $0x118] sm:$0xf] %v5525_v63  ;;  %v4789_v30 = vrot.slane %v4787_v58, 5  ;;  %v4803_v25 = vrot.slane %v4801_v22, 5  ;;  %9443 = vmatpush3.bf16.msra.mxu1 %v9938_v14 }
 0x316   : > { %v4661_v62 = vld [vmem:[#allocation3 + $0x58] sm:$0xf]  ;;  %v4785_v38 = vrot.slane %v4784_v31, 4  ;;  %v5200_v41 = vsel %vm10406_vm5, %v8399_v35, %v5199_v53  ;;  %v5203_v9 = vrot.slane %v5092_v37, 5  ;;  %v5527_v10 = vshrl.u32 %v5382_v26, 16  ;;  %7599 = vmatprep.mubr.bf16.mxu1 %v9914_v8  ;;  %v9958_v47 = vld [vmem:[#allocation7 + $0x210] sm:$0xff]  }
 0x317   : > { %v9945_v16 = vld [vmem:[#allocation7 + $0x218] sm:$0xff]   ;;  %v4799_v61 = vrot.slane %v4798_v11, 4  ;;  %5299 = vst [vmem:[#allocation2 + $0xec] sm:$0xf] %v5200_v41  ;;  %v5385_v56 = vld [vmem:[#allocation3 + $0x6c] sm:$0x1] }
 0x318   : > { %v5530_v50 = vshll.u32 %v5382_v26, 16  ;;  %v5536_v39 = vshll.u32 %v5383_v5, 16  ;;  %v5541_v7 = vshrl.u32 %v5384_v27, 16  ;;  %v4663_v3 = vld [vmem:[#allocation3 + $0x60] sm:$0xf]  ;;  %v4790_v4 = vsel %vm10394_vm4, %v4785_v38, %v4789_v30  ;;  %9444 = vmatprep.subr.bf16.mxu1 %v9945_v16  ;;  %v11708_v26 = vld [vmem:[#allocation7 + $0x208] sm:$0xff]  }
 0x319   : > { %v9912_v20 = vld [vmem:[#allocation2 + $0xa0] ss:$36 sps:$4 sm:$0xff]   ;;  %v5204_v21 = vsel %vm10406_vm5, %v8400_v32, %v5203_v9  ;;  %v5529_v49 = vrot.slane %v5527_v10, 4  ;;  %v5544_v33 = vshll.u32 %v5384_v27, 16  ;;  %v4804_v51 = vsel %vm10394_vm4, %v4799_v61, %v4803_v25  ;;  %5059 = vst [vmem:[#allocation2 + $0xe8] sm:$0xf] %v4790_v4  ;;  %9445 = vmatpush3.bf16.msra.mxu1 %v9945_v16 }
 0x31a   : > { %5300 = vst [vmem:[#allocation2 + $0x110] sm:$0xf] %v5204_v21  ;;  %v5532_v45 = vrot.slane %v5530_v50, 5  ;;  %v5543_v29 = vrot.slane %v5541_v7, 4  ;;  %v4662_v60 = vld [vmem:[#allocation3 + $0x5c] sm:$0x1]  ;;  %7600 = vmatmul.mubr.bf16.gmra.mxu1 %v9912_v20  ;;  %9446 = vmatprep.subr.bf16.mxu1 %v9958_v47 }
 0x31b   : > { %v4664_v46 = vld [vmem:[#allocation3 + $0x64] sm:$0x1]  ;;  %5060 = vst [vmem:[#allocation2 + $0x10c] sm:$0xf] %v4804_v51  ;;  %v5546_v55 = vrot.slane %v5544_v33, 5  ;;  %v5550_v36 = vshll.u32 %v5385_v56, 16 }
 0x31c   : > { %v4806_v57 = vshrl.u32 %v4661_v62, 16  ;;  %v4809_v52 = vshll.u32 %v4661_v62, 16  ;;  %v5093_v44 = vld [vmem:[#allocation3 + $0x58] sm:$0xe]  ;;  %v5533_v58 = vor.u32 %v5532_v45, %v5529_v49  ;;  %v5538_v24 = vrot.slane %v5536_v39, 5  ;;  %v9975_v11 = vld [vmem:[#allocation7 + $0x200] sm:$0xff]  }
 0x31d   : > { %v4820_v43 = vshrl.u32 %v4663_v3, 16  ;;  %v4823_v1 = vshll.u32 %v4663_v3, 16  ;;  %v5094_v34 = vld [vmem:[#allocation3 + $0x5c] sm:$0x1]  ;;  %v9917_v54 = vld [vmem:[#allocation2 + $0xf4] ss:$36 sps:$4 sm:$0xff]   ;;  %v5547_v0 = vor.u32 %v5546_v55, %v5543_v29  ;;  %9447 = vmatpush3.bf16.msra.mxu1 %v9958_v47 }
 0x31e   : > { %v4815_v28 = vshll.u32 %v4662_v60, 16  ;;  %v5095_v23 = vld [vmem:[#allocation3 + $0x60] sm:$0xe]  ;;  %v9915_v14 = vld [vmem:[#allocation2 + $0xf0] ss:$36 sps:$4 sm:$0xff]   ;;  %v5534_v40 = vrot.slane %v5533_v58, 4  ;;  %7736 = vmatprep.mubr.bf16.mxu0 %v9917_v54  ;;  %9448 = vmatprep.subr.bf16.mxu1 %v11708_v26 }
 0x31f   : > { %v5552_v48 = vrot.slane %v5550_v36, 5  ;;  %v4808_v37 = vrot.slane %v4806_v57, 4  ;;  %v4811_v27 = vrot.slane %v4809_v52, 5  ;;  %v4665_v12 = vld [vmem:[#allocation3 + $0x68] sm:$0xf]  ;;  %v5548_v17 = vrot.slane %v5547_v0, 4  ;;  %7737 = vmatmul.mubr.bf16.gmra.mxu0 %v9915_v14 }
 0x320   : > { %v4822_v19 = vrot.slane %v4820_v43, 4  ;;  %v4825_v13 = vrot.slane %v4823_v1, 5  ;;  %v4829_v2 = vshll.u32 %v4664_v46, 16  ;;  %v5328_v42 = vld [vmem:[#allocation3 + $0x70] sm:$0xf]  ;;  %v5539_v22 = vsel %vm10394_vm4, %v5534_v40, %v5538_v24 }
 0x321   : > { %v5386_v15 = vld [vmem:[#allocation3 + $0x70] sm:$0xf]  ;;  %v4812_v35 = vor.u32 %v4811_v27, %v4808_v37  ;;  %v5096_v18 = vld [vmem:[#allocation3 + $0x64] sm:$0x1]  ;;  %v8401_v63 = vrot.slane %v5093_v44, 9  ;;  %v5207_v31 = vrot.slane %v5094_v34, 5  ;;  %v5553_v53 = vsel %vm10394_vm4, %v5548_v17, %v5552_v48  ;;  %9449 = vmatpush3.bf16.msra.mxu1 %v11708_v26 }
 0x322   : > { %5352 = vst [vmem:[#allocation2 + $0x180] sm:$0xf] %v5328_v42  ;;  %5782 = vst [vmem:[#allocation2 + $0x13c] sm:$0xf] %v5539_v22  ;;  %v4826_v32 = vor.u32 %v4825_v13, %v4822_v19  ;;  %v8402_v5 = vrot.slane %v5095_v23, 9  ;;  %v4817_v41 = vrot.slane %v4815_v28, 5  ;;  %9450 = vmatprep.subr.bf16.mxu1 %v9975_v11 }
 0x323   : > { %v5387_v8 = vld [vmem:[#allocation3 + $0x74] sm:$0x1]  ;;  %v4666_v30 = vld [vmem:[#allocation3 + $0x6c] sm:$0x1]  ;;  %v4667_v25 = vld [vmem:[#allocation3 + $0x70] sm:$0xf]  ;;  %v5208_v10 = vsel %vm10406_vm5, %v8401_v63, %v5207_v31 }
 0x324   : > { %v9921_v62 = vld [vmem:[#allocation2 + $0xec] ss:$36 sps:$4 sm:$0xff]   ;;  %5783 = vst [vmem:[#allocation2 + $0x160] sm:$0xf] %v5553_v53  ;;  %v4813_v38 = vrot.slane %v4812_v35, 4  ;;  %v4831_v9 = vrot.slane %v4829_v2, 5 }
 0x325   : > { %v9919_v16 = vld [vmem:[#allocation2 + $0xe8] ss:$36 sps:$4 sm:$0xff]   ;;  %v4827_v61 = vrot.slane %v4826_v32, 4  ;;  %v5211_v56 = vrot.slane %v5096_v18, 5  ;;  %5301 = vst [vmem:[#allocation2 + $0x134] sm:$0xf] %v5208_v10  ;;  %7607 = vmatprep.mubr.bf16.mxu1 %v9921_v62  ;;  %9451 = vmatpush3.bf16.msra.mxu1 %v9975_v11 }
 0x326   : > { %v5555_v50 = vshrl.u32 %v5386_v15, 16  ;;  %v5558_v39 = vshll.u32 %v5386_v15, 16  ;;  %v4818_v7 = vsel %vm10394_vm4, %v4813_v38, %v4817_v41  ;;  %v5564_v3 = vshll.u32 %v5387_v8, 16  ;;  %v4668_v20 = vld [vmem:[#allocation3 + $0x74] sm:$0x1]  ;;  %7608 = vmatmul.mubr.bf16.gmra.mxu1 %v9919_v16 }
 0x327   : > { %v4834_v4 = vshrl.u32 %v4665_v12, 16  ;;  %v4837_v21 = vshll.u32 %v4665_v12, 16  ;;  %v4832_v49 = vsel %vm10394_vm4, %v4827_v61, %v4831_v9  ;;  %5061 = vst [vmem:[#allocation2 + $0x130] sm:$0xf] %v4818_v7  ;;  %v5212_v33 = vsel %vm10406_vm5, %v8402_v5, %v5211_v56  ;;  %v5097_v29 = vld [vmem:[#allocation3 + $0x68] sm:$0xe] }
 0x328   : > { %v5557_v51 = vrot.slane %v5555_v50, 4  ;;  %v5560_v45 = vrot.slane %v5558_v39, 5  ;;  %v5098_v60 = vld [vmem:[#allocation3 + $0x6c] sm:$0x1]  ;;  %5062 = vst [vmem:[#allocation2 + $0x154] sm:$0xf] %v4832_v49 }
 0x329   : > { %5302 = vst [vmem:[#allocation2 + $0x158] sm:$0xf] %v5212_v33  ;;  %v5566_v46 = vrot.slane %v5564_v3, 5  ;;  %v4836_v55 = vrot.slane %v4834_v4, 4  ;;  %v4839_v36 = vrot.slane %v4837_v21, 5  ;;  %v4843_v57 = vshll.u32 %v4666_v30, 16 }
 0x32a   : > { %v5099_v52 = vld [vmem:[#allocation3 + $0x70] sm:$0xe]  ;;  %v5561_v58 = vor.u32 %v5560_v45, %v5557_v51  ;;  %v4848_v24 = vshrl.u32 %v4667_v25, 16  ;;  %v4851_v43 = vshll.u32 %v4667_v25, 16  ;;  %v4857_v1 = vshll.u32 %v4668_v20, 16 }
 0x32b   : > { %v5330_v44 = vld [vmem:[#allocation3 + $0x90] sm:$0xf]  ;;  %v5331_v34 = vld [vmem:[#allocation3 + $0x98] sm:$0xf]  ;;  %v4840_v54 = vor.u32 %v4839_v36, %v4836_v55  ;;  %v4845_v0 = vrot.slane %v4843_v57, 5  ;;  %v8403_v23 = vrot.slane %v5097_v29, 9 }
 0x32c   : > { %v5390_v47 = vld [vmem:[#allocation3 + $0x90] sm:$0xf]  ;;  %5354 = vst [vmem:[#allocation2 + $0x1c8] sm:$0xf] %v5330_v44  ;;  %v5100_v28 = vld [vmem:[#allocation3 + $0x74] sm:$0x1] }
 0x32d   : > { %v5215_v14 = vrot.slane %v5098_v60, 5  ;;  %5355 = vst [vmem:[#allocation2 + $0x1ec] sm:$0xf] %v5331_v34  ;;  %v9924_v40 = vld [vmem:[#allocation2 + $0x13c] ss:$36 sps:$4 sm:$0xff]   ;;  %v5562_v48 = vrot.slane %v5561_v58, 4 }
 0x32e   : > { %v5391_v37 = vld [vmem:[#allocation3 + $0x94] sm:$0x1]  ;;  %v9922_v27 = vld [vmem:[#allocation2 + $0x138] ss:$36 sps:$4 sm:$0xff]   ;;  %v4841_v12 = vrot.slane %v4840_v54, 4  ;;  %v4850_v26 = vrot.slane %v4848_v24, 4  ;;  %7744 = vmatprep.mubr.bf16.mxu0 %v9924_v40 }
 0x32f   : > { %v4853_v17 = vrot.slane %v4851_v43, 5  ;;  %v4859_v19 = vrot.slane %v4857_v1, 5  ;;  %v5392_v13 = vld [vmem:[#allocation3 + $0x98] sm:$0xf]  ;;  %v4669_v2 = vld [vmem:[#allocation3 + $0x88] sm:$0xf]  ;;  %v5567_v42 = vsel %vm10394_vm4, %v5562_v48, %v5566_v46  ;;  %v5216_v15 = vsel %vm10406_vm5, %v8403_v23, %v5215_v14  ;;  %7745 = vmatmul.mubr.bf16.gmra.mxu0 %v9922_v27 }
 0x330   : > { %v8404_v22 = vrot.slane %v5099_v52, 9  ;;  %v5219_v35 = vrot.slane %v5100_v28, 5  ;;  %5784 = vst [vmem:[#allocation2 + $0x184] sm:$0xf] %v5567_v42  ;;  %v4846_v18 = vsel %vm10394_vm4, %v4841_v12, %v4845_v0  ;;  %5303 = vst [vmem:[#allocation2 + $0x17c] sm:$0xf] %v5216_v15 }
 0x331   : > { %v4854_v63 = vor.u32 %v4853_v17, %v4850_v26  ;;  %v5393_v31 = vld [vmem:[#allocation3 + $0x9c] sm:$0x1]  ;;  %v5583_v53 = vshrl.u32 %v5390_v47, 16  ;;  %v5586_v32 = vshll.u32 %v5390_v47, 16  ;;  %v9928_v5 = vld [vmem:[#allocation2 + $0x134] ss:$36 sps:$4 sm:$0xff]  }
 0x332   : > { %5063 = vst [vmem:[#allocation2 + $0x178] sm:$0xf] %v4846_v18  ;;  %v5220_v8 = vsel %vm10406_vm5, %v8404_v22, %v5219_v35  ;;  %v5592_v30 = vshll.u32 %v5391_v37, 16  ;;  %v4670_v11 = vld [vmem:[#allocation3 + $0x8c] sm:$0x1]  ;;  %v5597_v9 = vshrl.u32 %v5392_v13, 16  ;;  %7615 = vmatprep.mubr.bf16.mxu1 %v9928_v5 }
 0x333   : > { %v9926_v25 = vld [vmem:[#allocation2 + $0x130] ss:$36 sps:$4 sm:$0xff]   ;;  %v4855_v62 = vrot.slane %v4854_v63, 4  ;;  %5304 = vst [vmem:[#allocation2 + $0x1a0] sm:$0xf] %v5220_v8  ;;  %v5585_v38 = vrot.slane %v5583_v53, 4 }
 0x334   : > { %v5588_v41 = vrot.slane %v5586_v32, 5  ;;  %v4671_v10 = vld [vmem:[#allocation3 + $0x90] sm:$0xf]  ;;  %v5600_v16 = vshll.u32 %v5392_v13, 16  ;;  %v5606_v61 = vshll.u32 %v5393_v31, 16  ;;  %v4862_v56 = vshrl.u32 %v4669_v2, 16  ;;  %7616 = vmatmul.mubr.bf16.gmra.mxu1 %v9926_v25 }
 0x335   : > { %v4860_v50 = vsel %vm10394_vm4, %v4855_v62, %v4859_v19  ;;  %v5599_v7 = vrot.slane %v5597_v9, 4  ;;  %v4672_v3 = vld [vmem:[#allocation3 + $0x94] sm:$0x1]  ;;  %v4865_v20 = vshll.u32 %v4669_v2, 16  ;;  %v5101_v4 = vld [vmem:[#allocation3 + $0x88] sm:$0xe] }
 0x336   : > { %v5589_v39 = vor.u32 %v5588_v41, %v5585_v38  ;;  %v5102_v21 = vld [vmem:[#allocation3 + $0x8c] sm:$0x1]  ;;  %v5332_v49 = vld [vmem:[#allocation3 + $0xa0] sm:$0xf]  ;;  %5064 = vst [vmem:[#allocation2 + $0x19c] sm:$0xf] %v4860_v50 }
 0x337   : > { %v5594_v33 = vrot.slane %v5592_v30, 5  ;;  %v5602_v51 = vrot.slane %v5600_v16, 5  ;;  %v4864_v45 = vrot.slane %v4862_v56, 4  ;;  %v4871_v29 = vshll.u32 %v4670_v11, 16  ;;  %v5103_v60 = vld [vmem:[#allocation3 + $0x90] sm:$0xe] }
 0x338   : > { %v5333_v46 = vld [vmem:[#allocation3 + $0xa8] sm:$0xf]  ;;  %5356 = vst [vmem:[#allocation2 + $0x210] sm:$0xf] %v5332_v49  ;;  %v11734_v55 = vld [vmem:[#allocation3 + $0x50] sm:$0xe] }
 0x339   : > { %v5394_v36 = vld [vmem:[#allocation3 + $0xa0] sm:$0xf]  ;;  %v5590_v57 = vrot.slane %v5589_v39, 4  ;;  %v4867_v52 = vrot.slane %v4865_v20, 5  ;;  %v4876_v44 = vshrl.u32 %v4671_v10, 16  ;;  %v4879_v47 = vshll.u32 %v4671_v10, 16 }
 0x33a   : > { %v5104_v58 = vld [vmem:[#allocation3 + $0x94] sm:$0x1]  ;;  %5357 = vst [vmem:[#allocation2 + $0x234] sm:$0xf] %v5333_v46  ;;  %v9931_v24 = vld [vmem:[#allocation2 + $0x184] ss:$36 sps:$4 sm:$0xff]   ;;  %v5603_v43 = vor.u32 %v5602_v51, %v5599_v7 }
 0x33b   : > { %v5608_v1 = vrot.slane %v5606_v61, 5  ;;  %v4873_v34 = vrot.slane %v4871_v29, 5  ;;  %v9929_v54 = vld [vmem:[#allocation2 + $0x180] ss:$36 sps:$4 sm:$0xff]   ;;  %v5595_v0 = vsel %vm10394_vm4, %v5590_v57, %v5594_v33  ;;  %v4868_v28 = vor.u32 %v4867_v52, %v4864_v45  ;;  %v4673_v40 = vld [vmem:[#allocation3 + $0x98] sm:$0xf]  ;;  %7752 = vmatprep.mubr.bf16.mxu0 %v9931_v24 }
 0x33c   : > { %v4878_v23 = vrot.slane %v4876_v44, 4  ;;  %v4881_v14 = vrot.slane %v4879_v47, 5  ;;  %v5396_v48 = vld [vmem:[#allocation3 + $0xa8] sm:$0xf]  ;;  %v5604_v37 = vrot.slane %v5603_v43, 4  ;;  %v4885_v27 = vshll.u32 %v4672_v3, 16  ;;  %7753 = vmatmul.mubr.bf16.gmra.mxu0 %v9929_v54 }
 0x33d   : > { %5786 = vst [vmem:[#allocation2 + $0x1cc] sm:$0xf] %v5595_v0  ;;  %v8405_v12 = vrot.slane %v5101_v4, 9  ;;  %v5223_v26 = vrot.slane %v5102_v21, 5  ;;  %v11738_v17 = vld [vmem:[#allocation3 + $0x58] sm:$0xe] }
 0x33e   : > { %v4869_v19 = vrot.slane %v4868_v28, 4  ;;  %v4882_v13 = vor.u32 %v4881_v14, %v4878_v23  ;;  %v8406_v2 = vrot.slane %v5103_v60, 9  ;;  %v5227_v42 = vrot.slane %v5104_v58, 5  ;;  %v5395_v15 = vld [vmem:[#allocation3 + $0xa4] sm:$0x1] }
 0x33f   : > { %v8423_v22 = vrot.slane %v11734_v55, 9  ;;  %v5609_v35 = vsel %vm10394_vm4, %v5604_v37, %v5608_v1  ;;  %v5224_v18 = vsel %vm10406_vm5, %v8405_v12, %v5223_v26  ;;  %v5397_v63 = vld [vmem:[#allocation3 + $0xac] sm:$0x1]  ;;  %v5611_v31 = vshrl.u32 %v5394_v36, 16  ;;  %v4674_v53 = vld [vmem:[#allocation3 + $0x9c] sm:$0x1] }
 0x340   : > { %v4675_v32 = vld [vmem:[#allocation3 + $0xa0] sm:$0xf]  ;;  %5787 = vst [vmem:[#allocation2 + $0x1f0] sm:$0xf] %v5609_v35  ;;  %v4874_v8 = vsel %vm10394_vm4, %v4869_v19, %v4873_v34  ;;  %v4883_v30 = vrot.slane %v4882_v13, 4  ;;  %v4887_v11 = vrot.slane %v4885_v27, 5  ;;  %v5228_v25 = vsel %vm10406_vm5, %v8406_v2, %v5227_v42 }
 0x341   : > { %v9934_v5 = vld [vmem:[#allocation2 + $0x17c] ss:$36 sps:$4 sm:$0xff]   ;;  %5305 = vst [vmem:[#allocation2 + $0x1c4] sm:$0xf] %v5224_v18  ;;  %5065 = vst [vmem:[#allocation2 + $0x1c0] sm:$0xf] %v4874_v8 }
 0x342   : > { %v9932_v62 = vld [vmem:[#allocation2 + $0x178] ss:$36 sps:$4 sm:$0xff]   ;;  %5306 = vst [vmem:[#allocation2 + $0x1e8] sm:$0xf] %v5228_v25  ;;  %v5613_v38 = vrot.slane %v5611_v31, 4  ;;  %v5614_v41 = vshll.u32 %v5394_v36, 16  ;;  %7623 = vmatprep.mubr.bf16.mxu1 %v9934_v5  ;;  %v4888_v61 = vsel %vm10394_vm4, %v4883_v30, %v4887_v11 }
 0x343   : > { %v5620_v9 = vshll.u32 %v5395_v15, 16  ;;  %v5625_v10 = vshrl.u32 %v5396_v48, 16  ;;  %v4676_v16 = vld [vmem:[#allocation3 + $0xa4] sm:$0x1]  ;;  %v5628_v56 = vshll.u32 %v5396_v48, 16  ;;  %v5634_v50 = vshll.u32 %v5397_v63, 16  ;;  %7624 = vmatmul.mubr.bf16.gmra.mxu1 %v9932_v62 }
 0x344   : > { %v4890_v39 = vshrl.u32 %v4673_v40, 16  ;;  %v5105_v7 = vld [vmem:[#allocation3 + $0x98] sm:$0xe]  ;;  %v8424_v3 = vrot.slane %v11738_v17, 9  ;;  %5066 = vst [vmem:[#allocation2 + $0x1e4] sm:$0xf] %v4888_v61 }
 0x345   : > { %v5616_v20 = vrot.slane %v5614_v41, 5  ;;  %v5627_v4 = vrot.slane %v5625_v10, 4  ;;  %v4893_v21 = vshll.u32 %v4673_v40, 16  ;;  %v5334_v49 = vld [vmem:[#allocation3 + $0xb0] sm:$0xf]  ;;  %v5630_v33 = vrot.slane %v5628_v56, 5 }
 0x346   : > { %v4892_v51 = vrot.slane %v4890_v39, 4  ;;  %v4899_v45 = vshll.u32 %v4674_v53, 16  ;;  %v5106_v29 = vld [vmem:[#allocation3 + $0x9c] sm:$0x1]  ;;  %5358 = vst [vmem:[#allocation2 + $0x258] sm:$0xf] %v5334_v49 }
 0x347   : > { %v5617_v60 = vor.u32 %v5616_v20, %v5613_v38  ;;  %v4895_v46 = vrot.slane %v4893_v21, 5  ;;  %v4904_v36 = vshrl.u32 %v4675_v32, 16  ;;  %v4907_v57 = vshll.u32 %v4675_v32, 16  ;;  %v5107_v52 = vld [vmem:[#allocation3 + $0xa0] sm:$0xe] }
 0x348   : > { %v5398_v44 = vld [vmem:[#allocation3 + $0xb0] sm:$0xf]  ;;  %v5622_v47 = vrot.slane %v5620_v9, 5  ;;  %v5631_v58 = vor.u32 %v5630_v33, %v5627_v4  ;;  %v5636_v24 = vrot.slane %v5634_v50, 5  ;;  %v4913_v43 = vshll.u32 %v4676_v16, 16 }
 0x349   : > { %v5108_v1 = vld [vmem:[#allocation3 + $0xa4] sm:$0x1]  ;;  %v4677_v34 = vld [vmem:[#allocation3 + $0xa8] sm:$0xf]  ;;  %v9937_v54 = vld [vmem:[#allocation2 + $0x1cc] ss:$36 sps:$4 sm:$0xff]   ;;  %v4896_v28 = vor.u32 %v4895_v46, %v4892_v51 }
 0x34a   : > { %v5618_v0 = vrot.slane %v5617_v60, 4  ;;  %v4901_v23 = vrot.slane %v4899_v45, 5  ;;  %v8407_v14 = vrot.slane %v5105_v7, 9  ;;  %v5399_v40 = vld [vmem:[#allocation3 + $0xb4] sm:$0x1]  ;;  %v5632_v27 = vrot.slane %v5631_v58, 4  ;;  %7760 = vmatprep.mubr.bf16.mxu0 %v9937_v54 }
 0x34b   : > { %v11752_v48 = vld [vmem:[#allocation3 + $0x70] sm:$0xe]  ;;  %v9935_v37 = vld [vmem:[#allocation2 + $0x1c8] ss:$36 sps:$4 sm:$0xff]   ;;  %v4906_v12 = vrot.slane %v4904_v36, 4  ;;  %v4909_v26 = vrot.slane %v4907_v57, 5 }
 0x34c   : > { %v4679_v19 = vld [vmem:[#allocation3 + $0xb0] sm:$0xf]  ;;  %v5623_v13 = vsel %vm10394_vm4, %v5618_v0, %v5622_v47  ;;  %v4897_v2 = vrot.slane %v4896_v28, 4  ;;  %v5231_v42 = vrot.slane %v5106_v29, 5  ;;  %v8408_v15 = vrot.slane %v5107_v52, 9  ;;  %7761 = vmatmul.mubr.bf16.gmra.mxu0 %v9935_v37 }
 0x34d   : > { %v4678_v35 = vld [vmem:[#allocation3 + $0xac] sm:$0x1]  ;;  %v9941_v18 = vld [vmem:[#allocation2 + $0x1c4] ss:$36 sps:$4 sm:$0xff]   ;;  %v5637_v63 = vsel %vm10394_vm4, %v5632_v27, %v5636_v24  ;;  %5788 = vst [vmem:[#allocation2 + $0x214] sm:$0xf] %v5623_v13  ;;  %v4910_v31 = vor.u32 %v4909_v26, %v4906_v12 }
 0x34e   : > { %v4915_v53 = vrot.slane %v4913_v43, 5  ;;  %v5235_v32 = vrot.slane %v5108_v1, 5  ;;  %v9939_v5 = vld [vmem:[#allocation2 + $0x1c0] ss:$36 sps:$4 sm:$0xff]   ;;  %5789 = vst [vmem:[#allocation2 + $0x238] sm:$0xf] %v5637_v63  ;;  %v4902_v8 = vsel %vm10394_vm4, %v4897_v2, %v4901_v23  ;;  %v5232_v30 = vsel %vm10406_vm5, %v8407_v14, %v5231_v42  ;;  %7631 = vmatprep.mubr.bf16.mxu1 %v9941_v18 }
 0x34f   : > { %v5639_v11 = vshrl.u32 %v5398_v44, 16  ;;  %v5642_v25 = vshll.u32 %v5398_v44, 16  ;;  %v4680_v62 = vld [vmem:[#allocation3 + $0xb4] sm:$0x1]  ;;  %v5109_v38 = vld [vmem:[#allocation3 + $0xa8] sm:$0xe]  ;;  %7632 = vmatmul.mubr.bf16.gmra.mxu1 %v9939_v5 }
 0x350   : > { %v4911_v41 = vrot.slane %v4910_v31, 4  ;;  %5067 = vst [vmem:[#allocation2 + $0x208] sm:$0xf] %v4902_v8  ;;  %v5236_v9 = vsel %vm10406_vm5, %v8408_v15, %v5235_v32  ;;  %5307 = vst [vmem:[#allocation2 + $0x20c] sm:$0xf] %v5232_v30  ;;  %v5648_v10 = vshll.u32 %v5399_v40, 16 }
 0x351   : > { %v4918_v16 = vshrl.u32 %v4677_v34, 16  ;;  %v5110_v61 = vld [vmem:[#allocation3 + $0xac] sm:$0x1]  ;;  %v8427_v56 = vrot.slane %v11752_v48, 9  ;;  %v11765_v50 = vld [vmem:[#allocation3 + $0xa0] sm:$0xe] }
 0x352   : > { %v11767_v39 = vld [vmem:[#allocation3 + $0xa8] sm:$0xe]  ;;  %5308 = vst [vmem:[#allocation2 + $0x230] sm:$0xf] %v5236_v9  ;;  %v5641_v7 = vrot.slane %v5639_v11, 4  ;;  %v5644_v20 = vrot.slane %v5642_v25, 5  ;;  %v4916_v49 = vsel %vm10394_vm4, %v4911_v41, %v4915_v53 }
 0x353   : > { %v4921_v4 = vshll.u32 %v4677_v34, 16  ;;  %v5111_v21 = vld [vmem:[#allocation3 + $0xb0] sm:$0xe]  ;;  %v4920_v33 = vrot.slane %v4918_v16, 4  ;;  %v4927_v51 = vshll.u32 %v4678_v35, 16  ;;  %v4932_v45 = vshrl.u32 %v4679_v19, 16 }
 0x354   : > { %v5336_v29 = vld [vmem:[#allocation3 + $0xd0] sm:$0xf]  ;;  %5068 = vst [vmem:[#allocation2 + $0x22c] sm:$0xf] %v4916_v49  ;;  %v5645_v46 = vor.u32 %v5644_v20, %v5641_v7  ;;  %v5650_v36 = vrot.slane %v5648_v10, 5  ;;  %v4935_v52 = vshll.u32 %v4679_v19, 16 }
 0x355   : > { %v5402_v60 = vld [vmem:[#allocation3 + $0xd0] sm:$0xf]  ;;  %v4923_v57 = vrot.slane %v4921_v4, 5  ;;  %v5337_v44 = vld [vmem:[#allocation3 + $0xd8] sm:$0xf]  ;;  %v4934_v47 = vrot.slane %v4932_v45, 4 }
 0x356   : > { %5360 = vst [vmem:[#allocation2 + $0x2a0] sm:$0xf] %v5336_v29  ;;  %v4941_v58 = vshll.u32 %v4680_v62, 16  ;;  %v5112_v24 = vld [vmem:[#allocation3 + $0xb4] sm:$0x1]  ;;  %v8409_v43 = vrot.slane %v5109_v38, 9 }
 0x357   : > { %v5239_v1 = vrot.slane %v5110_v61, 5  ;;  %5361 = vst [vmem:[#allocation2 + $0x2c4] sm:$0xf] %v5337_v44  ;;  %v5404_v34 = vld [vmem:[#allocation3 + $0xd8] sm:$0xf]  ;;  %v5646_v54 = vrot.slane %v5645_v46, 4  ;;  %v4924_v0 = vor.u32 %v4923_v57, %v4920_v33 }
 0x358   : > { %v4937_v28 = vrot.slane %v4935_v52, 5  ;;  %v8410_v23 = vrot.slane %v5111_v21, 9  ;;  %v8431_v14 = vrot.slane %v11765_v50, 9  ;;  %v8432_v40 = vrot.slane %v11767_v39, 9  ;;  %v9944_v37 = vld [vmem:[#allocation2 + $0x214] ss:$36 sps:$4 sm:$0xff]  }
 0x359   : > { %v4929_v27 = vrot.slane %v4927_v51, 5  ;;  %v5240_v12 = vsel %vm10406_vm5, %v8409_v43, %v5239_v1  ;;  %v4681_v26 = vld [vmem:[#allocation3 + $0xc8] sm:$0xf]  ;;  %v9942_v19 = vld [vmem:[#allocation2 + $0x210] ss:$36 sps:$4 sm:$0xff]   ;;  %v5651_v13 = vsel %vm10394_vm4, %v5646_v54, %v5650_v36  ;;  %v4925_v2 = vrot.slane %v4924_v0, 4  ;;  %7768 = vmatprep.mubr.bf16.mxu0 %v9944_v37 }
 0x35a   : > { %v4938_v42 = vor.u32 %v4937_v28, %v4934_v47  ;;  %v5243_v15 = vrot.slane %v5112_v24, 5  ;;  %5309 = vst [vmem:[#allocation2 + $0x254] sm:$0xf] %v5240_v12  ;;  %5790 = vst [vmem:[#allocation2 + $0x25c] sm:$0xf] %v5651_v13  ;;  %v4943_v35 = vrot.slane %v4941_v58, 5  ;;  %7769 = vmatmul.mubr.bf16.gmra.mxu0 %v9942_v19 }
 0x35b   : > { %v5403_v18 = vld [vmem:[#allocation3 + $0xd4] sm:$0x1]  ;;  %v5667_v63 = vshrl.u32 %v5402_v60, 16  ;;  %v5670_v31 = vshll.u32 %v5402_v60, 16  ;;  %v5681_v53 = vshrl.u32 %v5404_v34, 16  ;;  %v4930_v5 = vsel %vm10394_vm4, %v4925_v2, %v4929_v27 }
 0x35c   : > { %v4683_v32 = vld [vmem:[#allocation3 + $0xd0] sm:$0xf]  ;;  %v4939_v8 = vrot.slane %v4938_v42, 4  ;;  %v5244_v30 = vsel %vm10406_vm5, %v8410_v23, %v5243_v15  ;;  %v5405_v11 = vld [vmem:[#allocation3 + $0xdc] sm:$0x1]  ;;  %v5684_v25 = vshll.u32 %v5404_v34, 16 }
 0x35d   : > { %v9948_v62 = vld [vmem:[#allocation2 + $0x20c] ss:$36 sps:$4 sm:$0xff]   ;;  %5069 = vst [vmem:[#allocation2 + $0x250] sm:$0xf] %v4930_v5  ;;  %5310 = vst [vmem:[#allocation2 + $0x278] sm:$0xf] %v5244_v30 }
 0x35e   : > { %v5669_v38 = vrot.slane %v5667_v63, 4  ;;  %v4682_v41 = vld [vmem:[#allocation3 + $0xcc] sm:$0x1]  ;;  %v4944_v10 = vsel %vm10394_vm4, %v4939_v8, %v4943_v35  ;;  %v5672_v16 = vrot.slane %v5670_v31, 5  ;;  %v5676_v61 = vshll.u32 %v5403_v18, 16  ;;  %7639 = vmatprep.mubr.bf16.mxu1 %v9948_v62 }
 0x35f   : > { %v9946_v9 = vld [vmem:[#allocation2 + $0x208] ss:$36 sps:$4 sm:$0xff]   ;;  %v5683_v7 = vrot.slane %v5681_v53, 4  ;;  %5070 = vst [vmem:[#allocation2 + $0x274] sm:$0xf] %v4944_v10  ;;  %v5686_v20 = vrot.slane %v5684_v25, 5 }
 0x360   : > { %v5690_v4 = vshll.u32 %v5405_v11, 16  ;;  %v4684_v21 = vld [vmem:[#allocation3 + $0xd4] sm:$0x1]  ;;  %v4946_v49 = vshrl.u32 %v4681_v26, 16  ;;  %v4949_v33 = vshll.u32 %v4681_v26, 16  ;;  %7640 = vmatmul.mubr.bf16.gmra.mxu1 %v9946_v9  ;;  %v5673_v45 = vor.u32 %v5672_v16, %v5669_v38 }
 0x361   : > { %v5113_v51 = vld [vmem:[#allocation3 + $0xc8] sm:$0xe]  ;;  %v4955_v29 = vshll.u32 %v4682_v41, 16  ;;  %v4960_v60 = vshrl.u32 %v4683_v32, 16  ;;  %v4963_v46 = vshll.u32 %v4683_v32, 16  ;;  %v5687_v47 = vor.u32 %v5686_v20, %v5683_v7 }
 0x362   : > { %v5114_v36 = vld [vmem:[#allocation3 + $0xcc] sm:$0x1]  ;;  %v5338_v57 = vld [vmem:[#allocation3 + $0xe0] sm:$0xf]  ;;  %v11783_v52 = vld [vmem:[#allocation3 + $0xd0] sm:$0xe] }
 0x363   : > { %v11785_v44 = vld [vmem:[#allocation3 + $0xd8] sm:$0xe]  ;;  %v4948_v58 = vrot.slane %v4946_v49, 4  ;;  %v4951_v24 = vrot.slane %v4949_v33, 5  ;;  %v5115_v43 = vld [vmem:[#allocation3 + $0xd0] sm:$0xe] }
 0x364   : > { %v5339_v1 = vld [vmem:[#allocation3 + $0xe8] sm:$0xf]  ;;  %5362 = vst [vmem:[#allocation2 + $0x2e8] sm:$0xf] %v5338_v57  ;;  %v5406_v34 = vld [vmem:[#allocation3 + $0xe0] sm:$0xf] }
 0x365   : > { %v9951_v54 = vld [vmem:[#allocation2 + $0x25c] ss:$36 sps:$4 sm:$0xff]   ;;  %v5674_v0 = vrot.slane %v5673_v45, 4  ;;  %v5678_v28 = vrot.slane %v5676_v61, 5  ;;  %v5692_v23 = vrot.slane %v5690_v4, 5  ;;  %v5688_v12 = vrot.slane %v5687_v47, 4 }
 0x366   : > { %5363 = vst [vmem:[#allocation2 + $0x30c] sm:$0xf] %v5339_v1  ;;  %v5408_v37 = vld [vmem:[#allocation3 + $0xe8] sm:$0xf]  ;;  %v9949_v27 = vld [vmem:[#allocation2 + $0x258] ss:$36 sps:$4 sm:$0xff]   ;;  %v4952_v26 = vor.u32 %v4951_v24, %v4948_v58  ;;  %7776 = vmatprep.mubr.bf16.mxu0 %v9951_v54 }
 0x367   : > { %v4957_v19 = vrot.slane %v4955_v29, 5  ;;  %v4962_v13 = vrot.slane %v4960_v60, 4  ;;  %v5679_v2 = vsel %vm10394_vm4, %v5674_v0, %v5678_v28  ;;  %v4965_v42 = vrot.slane %v4963_v46, 5  ;;  %v5116_v35 = vld [vmem:[#allocation3 + $0xd4] sm:$0x1]  ;;  %7777 = vmatmul.mubr.bf16.gmra.mxu0 %v9949_v27 }
 0x368   : > { %v4969_v15 = vshll.u32 %v4684_v21, 16  ;;  %v8411_v18 = vrot.slane %v5113_v51, 9  ;;  %v5693_v63 = vsel %vm10394_vm4, %v5688_v12, %v5692_v23  ;;  %5792 = vst [vmem:[#allocation2 + $0x2a4] sm:$0xf] %v5679_v2  ;;  %v4953_v31 = vrot.slane %v4952_v26, 4  ;;  %v9128_v51 = vpop.f32.mrf.mxu0 }
 0x369   : > { %v5247_v53 = vrot.slane %v5114_v36, 5  ;;  %v8412_v32 = vrot.slane %v5115_v43, 9  ;;  %v5407_v5 = vld [vmem:[#allocation3 + $0xe4] sm:$0x1]  ;;  %v8435_v8 = vrot.slane %v11783_v52, 9  ;;  %v8436_v11 = vrot.slane %v11785_v44, 9 }
 0x36a   : > { %v4685_v30 = vld [vmem:[#allocation3 + $0xd8] sm:$0xf]  ;;  %5793 = vst [vmem:[#allocation2 + $0x2c8] sm:$0xf] %v5693_v63  ;;  %v4966_v62 = vor.u32 %v4965_v42, %v4962_v13  ;;  %v4971_v38 = vrot.slane %v4969_v15, 5  ;;  %v4958_v9 = vsel %vm10394_vm4, %v4953_v31, %v4957_v19  ;;  %v5251_v16 = vrot.slane %v5116_v35, 5 }
 0x36b   : > { %v9954_v25 = vld [vmem:[#allocation2 + $0x254] ss:$36 sps:$4 sm:$0xff]   ;;  %v5248_v10 = vsel %vm10406_vm5, %v8411_v18, %v5247_v53  ;;  %v5409_v61 = vld [vmem:[#allocation3 + $0xec] sm:$0x1]  ;;  %v5695_v7 = vshrl.u32 %v5406_v34, 16  ;;  %v5698_v21 = vshll.u32 %v5406_v34, 16  ;;  %v9129_v34 = vpop.f32.mrf.mxu0 }
 0x36c   : > { %v9952_v41 = vld [vmem:[#allocation2 + $0x250] ss:$36 sps:$4 sm:$0xff]   ;;  %7647 = vmatprep.mubr.bf16.mxu1 %v9954_v25  ;;  %v4967_v4 = vrot.slane %v4966_v62, 4  ;;  %5071 = vst [vmem:[#allocation2 + $0x298] sm:$0xf] %v4958_v9  ;;  %v5704_v49 = vshll.u32 %v5407_v5, 16  ;;  %v5252_v29 = vsel %vm10406_vm5, %v8412_v32, %v5251_v16  ;;  %v11804_v53 = vadd.f32 %v9129_v34, %v9128_v51 }
 0x36d   : > { %v11797_v20 = vld [vmem:[#allocation3 + $0xf0] sm:$0xe]  ;;  %5311 = vst [vmem:[#allocation2 + $0x29c] sm:$0xf] %v5248_v10  ;;  %v5709_v33 = vshrl.u32 %v5408_v37, 16  ;;  %7648 = vmatmul.mubr.bf16.gmra.mxu1 %v9952_v41  ;;  %v5697_v60 = vrot.slane %v5695_v7, 4  ;;  %v9131_v15 = vpop.f32.mrf.mxu0 }
 0x36e   : > { %v4687_v45 = vld [vmem:[#allocation3 + $0xe0] sm:$0xf]  ;;  %v5712_v46 = vshll.u32 %v5408_v37, 16  ;;  %v4686_v36 = vld [vmem:[#allocation3 + $0xdc] sm:$0x1]  ;;  %v4972_v57 = vsel %vm10394_vm4, %v4967_v4, %v4971_v38  ;;  %v5700_v47 = vrot.slane %v5698_v21, 5 }
 0x36f   : > { %5312 = vst [vmem:[#allocation2 + $0x2c0] sm:$0xf] %v5252_v29  ;;  %v5711_v58 = vrot.slane %v5709_v33, 4  ;;  %v5718_v24 = vshll.u32 %v5409_v61, 16  ;;  %v4688_v43 = vld [vmem:[#allocation3 + $0xe4] sm:$0x1]  ;;  %v9132_v38 = vpop.f32.mrf.mxu0 }
 0x370   : > { %v5117_v1 = vld [vmem:[#allocation3 + $0xd8] sm:$0xe]  ;;  %v8439_v54 = vrot.slane %v11797_v20, 9  ;;  %5072 = vst [vmem:[#allocation2 + $0x2bc] sm:$0xf] %v4972_v57  ;;  %v5714_v0 = vrot.slane %v5712_v46, 5  ;;  %v5701_v26 = vor.u32 %v5700_v47, %v5697_v60 }
 0x371   : > { %v4974_v28 = vshrl.u32 %v4685_v30, 16  ;;  %v4977_v23 = vshll.u32 %v4685_v30, 16  ;;  %v5118_v27 = vld [vmem:[#allocation3 + $0xdc] sm:$0x1]  ;;  %v5119_v12 = vld [vmem:[#allocation3 + $0xe0] sm:$0xe]  ;;  %v9134_v51 = vpop.f32.mrf.mxu0 }
 0x372   : > { %v5340_v37 = vld [vmem:[#allocation3 + $0xf0] sm:$0xf]  ;;  %v5706_v19 = vrot.slane %v5704_v49, 5  ;;  %v4988_v13 = vshrl.u32 %v4687_v45, 16  ;;  %v4991_v2 = vshll.u32 %v4687_v45, 16  ;;  %v5715_v18 = vor.u32 %v5714_v0, %v5711_v58 }
 0x373   : > { %v5120_v42 = vld [vmem:[#allocation3 + $0xe4] sm:$0x1]  ;;  %5364 = vst [vmem:[#allocation2 + $0x330] sm:$0xf] %v5340_v37  ;;  %v4976_v63 = vrot.slane %v4974_v28, 4  ;;  %v4983_v31 = vshll.u32 %v4686_v36, 16  ;;  %v11814_v0 = vadd.f32 %v9132_v38, %v9131_v15  ;;  %v9135_v28 = vpop.f32.mrf.mxu0 }
 0x374   : > { %v9957_v35 = vld [vmem:[#allocation2 + $0x2a4] ss:$36 sps:$4 sm:$0xff]   ;;  %v5702_v5 = vrot.slane %v5701_v26, 4  ;;  %v5720_v25 = vrot.slane %v5718_v24, 5  ;;  %v4979_v30 = vrot.slane %v4977_v23, 5  ;;  %v4990_v62 = vrot.slane %v4988_v13, 4 }
 0x375   : > { %v9955_v32 = vld [vmem:[#allocation2 + $0x2a0] ss:$36 sps:$4 sm:$0xff]   ;;  %7784 = vmatprep.mubr.bf16.mxu0 %v9957_v35  ;;  %v5716_v41 = vrot.slane %v5715_v18, 4  ;;  %v4993_v9 = vrot.slane %v4991_v2, 5  ;;  %v4997_v10 = vshll.u32 %v4688_v43, 16  ;;  %v8413_v16 = vrot.slane %v5117_v1, 9  ;;  %v9137_v15 = vpop.f32.mrf.mxu0 }
 0x376   : > { %v4689_v61 = vld [vmem:[#allocation3 + $0xe8] sm:$0xf]  ;;  %v5410_v7 = vld [vmem:[#allocation3 + $0xf0] sm:$0xf]  ;;  %7785 = vmatmul.mubr.bf16.gmra.mxu0 %v9955_v32  ;;  %v5707_v4 = vsel %vm10394_vm4, %v5702_v5, %v5706_v19  ;;  %v4980_v21 = vor.u32 %v4979_v30, %v4976_v63  ;;  %v5255_v49 = vrot.slane %v5118_v27, 5  ;;  %v8414_v33 = vrot.slane %v5119_v12, 9 }
 0x377   : > { %v11808_v45 = vld [vmem:[#allocation3 + $0xf0] sm:$0xf]  ;;  %v5721_v29 = vsel %vm10394_vm4, %v5716_v41, %v5720_v25  ;;  %5794 = vst [vmem:[#allocation2 + $0x2ec] sm:$0xf] %v5707_v4  ;;  %v4985_v60 = vrot.slane %v4983_v31, 5  ;;  %v4994_v46 = vor.u32 %v4993_v9, %v4990_v62  ;;  %v5259_v36 = vrot.slane %v5120_v42, 5 }
 0x378   : > { %v5411_v57 = vld [vmem:[#allocation3 + $0xf4] sm:$0x1]  ;;  %v4690_v47 = vld [vmem:[#allocation3 + $0xec] sm:$0x1]  ;;  %v9961_v58 = vld [vmem:[#allocation2 + $0x29c] ss:$36 sps:$4 sm:$0xff]   ;;  %v5256_v1 = vsel %vm10406_vm5, %v8413_v16, %v5255_v49  ;;  %v9138_v16 = vpop.f32.mrf.mxu0 }
 0x379   : > { %5795 = vst [vmem:[#allocation2 + $0x310] sm:$0xf] %v5721_v29  ;;  %v4981_v24 = vrot.slane %v4980_v21, 4  ;;  %v4999_v43 = vrot.slane %v4997_v10, 5  ;;  %v4692_v34 = vld [vmem:[#allocation3 + $0xf4] sm:$0x1]  ;;  %v5260_v12 = vsel %vm10406_vm5, %v8414_v33, %v5259_v36  ;;  %7655 = vmatprep.mubr.bf16.mxu1 %v9961_v58 }
 0x37a   : > { %v9959_v23 = vld [vmem:[#allocation2 + $0x298] ss:$36 sps:$4 sm:$0xff]   ;;  %v4995_v27 = vrot.slane %v4994_v46, 4  ;;  %5313 = vst [vmem:[#allocation2 + $0x2e4] sm:$0xf] %v5256_v1  ;;  %v5723_v37 = vshrl.u32 %v5410_v7, 16  ;;  %v11824_v1 = vadd.f32 %v9135_v28, %v9134_v51 }
 0x37b   : > { %v5726_v26 = vshll.u32 %v5410_v7, 16  ;;  %v4986_v19 = vsel %vm10394_vm4, %v4981_v24, %v4985_v60  ;;  %5314 = vst [vmem:[#allocation2 + $0x308] sm:$0xf] %v5260_v12  ;;  %v5732_v13 = vshll.u32 %v5411_v57, 16  ;;  %v5002_v2 = vshrl.u32 %v4689_v61, 16  ;;  %7656 = vmatmul.mubr.bf16.gmra.mxu1 %v9959_v23 }
 0x37c   : > { %v5005_v42 = vshll.u32 %v4689_v61, 16  ;;  %v5121_v35 = vld [vmem:[#allocation3 + $0xe8] sm:$0xe]  ;;  %v5000_v18 = vsel %vm10394_vm4, %v4995_v27, %v4999_v43  ;;  %5073 = vst [vmem:[#allocation2 + $0x2e0] sm:$0xf] %v4986_v19  ;;  %v5725_v63 = vrot.slane %v5723_v37, 4  ;;  %v11826_v23 = vadd.f32 %v9138_v16, %v9137_v15 }
 0x37d   : > { %v5728_v31 = vrot.slane %v5726_v26, 5  ;;  %v5011_v32 = vshll.u32 %v4690_v47, 16  ;;  %v5122_v5 = vld [vmem:[#allocation3 + $0xec] sm:$0x1]  ;;  %5074 = vst [vmem:[#allocation2 + $0x304] sm:$0xf] %v5000_v18  ;;  %v9040_v47 = vpop.f32.mrf.mxu1 }
 0x37e   : > { %v5734_v25 = vrot.slane %v5732_v13, 5  ;;  %v5004_v30 = vrot.slane %v5002_v2, 4  ;;  %v5007_v62 = vrot.slane %v5005_v42, 5  ;;  %v5016_v38 = vshrl.u32 %v11808_v45, 16  ;;  %v5123_v41 = vld [vmem:[#allocation3 + $0xf0] sm:$0xe] }
 0x37f   : > { %v5124_v9 = vld [vmem:[#allocation3 + $0xf4] sm:$0x1]  ;;  %v5798_v10 = vld [vmem:[#allocation3 + $0x10] sm:$0xe]  ;;  %v5729_v61 = vor.u32 %v5728_v31, %v5725_v63  ;;  %v5013_v7 = vrot.slane %v5011_v32, 5  ;;  %v5019_v4 = vshll.u32 %v11808_v45, 16 }
 0x380   : > { %v5025_v21 = vshll.u32 %v4692_v34, 16  ;;  %v5799_v49 = vld [vmem:[#allocation3 + $0x14] sm:$0x1]  ;;  %v5800_v33 = vld [vmem:[#allocation3 + $0x18] sm:$0xe]  ;;  %v5008_v29 = vor.u32 %v5007_v62, %v5004_v30  ;;  %v5018_v60 = vrot.slane %v5016_v38, 4  ;;  %v9041_v34 = vpop.f32.mrf.mxu1 }
 0x381   : > { %v8415_v46 = vrot.slane %v5121_v35, 9  ;;  %v5263_v36 = vrot.slane %v5122_v5, 5  ;;  %v5801_v57 = vld [vmem:[#allocation3 + $0x1c] sm:$0x1]  ;;  %v9962_v58 = vld [vmem:[#allocation2 + $0x2e8] ss:$36 sps:$4 sm:$0xff]   ;;  %v9042_v62 = vadd.f32 %v9041_v34, %v9040_v47 }
 0x382   : > { %v9964_v24 = vld [vmem:[#allocation2 + $0x2ec] ss:$36 sps:$4 sm:$0xff]   ;;  %v5730_v43 = vrot.slane %v5729_v61, 4  ;;  %v5009_v27 = vrot.slane %v5008_v29, 4  ;;  %v5021_v12 = vrot.slane %v5019_v4, 5  ;;  %v5027_v37 = vrot.slane %v5025_v21, 5  ;;  %v9043_v31 = vpop.f32.mrf.mxu1 }
 0x383   : > { %v5264_v45 = vsel %vm10406_vm5, %v8415_v46, %v5263_v36  ;;  %v5811_v26 = vld [vmem:[#allocation3 + $0x54] sm:$0x1]  ;;  %v5813_v19 = vld [vmem:[#allocation3 + $0x5c] sm:$0x1]  ;;  %7792 = vmatprep.mubr.bf16.mxu0 %v9964_v24  ;;  %v8416_v2 = vrot.slane %v5123_v41, 9  ;;  %v5267_v42 = vrot.slane %v5124_v9, 5 }
 0x384   : > { %v5735_v13 = vsel %vm10394_vm4, %v5730_v43, %v5734_v25  ;;  %5315 = vst [vmem:[#allocation2 + $0x32c] sm:$0xf] %v5264_v45  ;;  %v8417_v51 = vrot.slane %v5798_v10, 9  ;;  %7793 = vmatmul.mubr.bf16.gmra.mxu0 %v9962_v58  ;;  %v5014_v28 = vsel %vm10394_vm4, %v5009_v27, %v5013_v7  ;;  %v5022_v35 = vor.u32 %v5021_v12, %v5018_v60  ;;  %v5806_v63 = vld [vmem:[#allocation3 + $0x30] sm:$0xe]  ;;  %v9044_v7 = vpop.f32.mrf.mxu1 }
 0x385   : > { %5796 = vst [vmem:[#allocation2 + $0x334] sm:$0xf] %v5735_v13  ;;  %v5896_v15 = vrot.slane %v5799_v49, 5  ;;  %v8418_v18 = vrot.slane %v5800_v33, 9  ;;  %v9966_v32 = vld [vmem:[#allocation2 + $0x2e0] ss:$36 sps:$4 sm:$0xff]   ;;  %v5268_v25 = vsel %vm10406_vm5, %v8416_v2, %v5267_v42  ;;  %v9045_v33 = vadd.f32 %v9044_v7, %v9043_v31  ;;  %v9140_v13 = vpop.f32.mrf.mxu0 }
 0x386   : > { %v9968_v5 = vld [vmem:[#allocation2 + $0x2e4] ss:$36 sps:$4 sm:$0xff]   ;;  %5075 = vst [vmem:[#allocation2 + $0x328] sm:$0xf] %v5014_v28  ;;  %v5900_v30 = vrot.slane %v5801_v57, 5  ;;  %v5023_v41 = vrot.slane %v5022_v35, 4  ;;  %v9046_v31 = vpop.f32.mrf.mxu1 }
 0x387   : > { %v11836_v38 = vld [vmem:[#allocation3 + $0x74] sm:$0x1]  ;;  %5316 = vst [vmem:[#allocation2 + $0x350] sm:$0xf] %v5268_v25  ;;  %v5897_v9 = vsel %vm10406_vm5, %v8417_v51, %v5896_v15  ;;  %v8421_v16 = vrot.slane %v5806_v63, 9  ;;  %7663 = vmatprep.mubr.bf16.mxu1 %v9968_v5  ;;  %v5920_v57 = vrot.slane %v5811_v26, 5 }
 0x388   : > { %v5807_v10 = vld [vmem:[#allocation3 + $0x34] sm:$0x1]  ;;  %v11843_v61 = vld [vmem:[%s12351_s5] ss:$0 sm:$0xff]  ;;  %v5901_v4 = vsel %vm10406_vm5, %v8418_v18, %v5900_v30  ;;  %6014 = vst [vmem:[#allocation2 + $0x20] sm:$0xf] %v5897_v9  ;;  %7664 = vmatmul.mubr.bf16.gmra.mxu1 %v9966_v32  ;;  %v5028_v36 = vsel %vm10394_vm4, %v5023_v41, %v5027_v37  ;;  %v9141_v32 = vpop.f32.mrf.mxu0  ;;  %v9047_v9 = vpop.f32.mrf.mxu1 }
 0x389   : > { %v5912_v21 = vrot.slane %v5807_v10, 5  ;;  %v7328_v49 = vadd.f32 %v9042_v62, %v11843_v61  ;;  %v5814_v29 = vld [vmem:[#allocation3 + $0x60] sm:$0xe]  ;;  %v5815_v60 = vld [vmem:[#allocation3 + $0x64] sm:$0x1]  ;;  %v5924_v47 = vrot.slane %v5813_v19, 5  ;;  %v7331_v12 = vadd.f32 %v9045_v33, %v11843_v61 }
 0x38a   : > { %v11848_v46 = vld [vmem:[#allocation3 + $0xa4] sm:$0x1]  ;;  %6015 = vst [vmem:[#allocation2 + $0x44] sm:$0xf] %v5901_v4  ;;  %v5816_v58 = vld [vmem:[#allocation3 + $0x68] sm:$0xe]  ;;  %v5921_v59 = vsel %vm10406_vm5, %v8423_v22, %v5920_v57  ;;  %v11876_v25 = vadd.f32 %v9141_v32, %v9140_v13  ;;  %v9143_v10 = vpop.f32.mrf.mxu0  ;;  %v9048_v4 = vadd.f32 %v9047_v9, %v9046_v31 }
 0x38b   : > { %v5817_v24 = vld [vmem:[#allocation3 + $0x6c] sm:$0x1]  ;;  %5076 = vst [vmem:[#allocation2 + $0x34c] sm:$0xf] %v5028_v36  ;;  %v5913_v27 = vsel %vm10406_vm5, %v8421_v16, %v5912_v21  ;;  %v8425_v45 = vrot.slane %v5814_v29, 9  ;;  %v5928_v34 = vrot.slane %v5815_v60, 5  ;;  %v5925_v37 = vsel %vm10406_vm5, %v8424_v3, %v5924_v47  ;;  %v9049_v29 = vpop.f32.mrf.mxu1 }
 0x38c   : > { %v5829_v43 = vld [vmem:[#allocation3 + $0xac] sm:$0x1]  ;;  %v5822_v2 = vld [vmem:[#allocation3 + $0x90] sm:$0xe]  ;;  %v5823_v42 = vld [vmem:[#allocation3 + $0x94] sm:$0x1]  ;;  %v11869_v17 = vadd.f32 %v11804_v53, %v7328_v49  ;;  %v11872_v3 = vadd.f32 %v11814_v0, %v7331_v12  ;;  %v9144_v60 = vpop.f32.mrf.mxu0  ;;  %v7336_v47 = vadd.f32 %v9048_v4, %v11843_v61 }
 0x38d   : > { %v11855_v51 = vld [vmem:[#allocation3 + $0xd4] sm:$0x1]  ;;  %6018 = vst [vmem:[#allocation2 + $0xb0] sm:$0xf] %v5913_v27  ;;  %v8426_v26 = vrot.slane %v5816_v58, 9  ;;  %v5932_v19 = vrot.slane %v5817_v24, 5  ;;  %v5929_v55 = vsel %vm10406_vm5, %v8425_v45, %v5928_v34  ;;  %v11893_v58 = vadd.f32 %v9144_v60, %v9143_v10 }
 0x38e   : > { %v5824_v28 = vld [vmem:[#allocation3 + $0x98] sm:$0xe]  ;;  %v5825_v35 = vld [vmem:[#allocation3 + $0x9c] sm:$0x1]  ;;  %v9969_v18 = vld [vmem:[#allocation2 + $0x330] ss:$36 sps:$4 sm:$0xff]   ;;  %v9146_v45 = vpop.f32.mrf.mxu0 }
 0x38f   : > { %v5837_v15 = vld [vmem:[#allocation3 + $0xdc] sm:$0x1]  ;;  %v9971_v63 = vld [vmem:[#allocation2 + $0x334] ss:$36 sps:$4 sm:$0xff]   ;;  %6020 = vst [vmem:[#allocation2 + $0xf8] sm:$0xf] %v5921_v59  ;;  %v5933_v5 = vsel %vm10406_vm5, %v8426_v26, %v5932_v19 }
 0x390   : > { %6021 = vst [vmem:[#allocation2 + $0x11c] sm:$0xf] %v5925_v37  ;;  %v5936_v22 = vrot.slane %v11836_v38, 5  ;;  %6022 = vst [vmem:[#allocation2 + $0x140] sm:$0xf] %v5929_v55  ;;  %v8429_v30 = vrot.slane %v5822_v2, 9  ;;  %7800 = vmatprep.mubr.bf16.mxu0 %v9971_v63  ;;  %v9147_v59 = vpop.f32.mrf.mxu0 }
 0x391   : > { %v5944_v62 = vrot.slane %v5823_v42, 5  ;;  %v5830_v41 = vld [vmem:[#allocation3 + $0xb0] sm:$0xe]  ;;  %6023 = vst [vmem:[#allocation2 + $0x164] sm:$0xf] %v5933_v5  ;;  %v8430_v0 = vrot.slane %v5824_v28, 9  ;;  %7801 = vmatmul.mubr.bf16.gmra.mxu0 %v9969_v18  ;;  %v9148_v19 = vadd.f32 %v9147_v59, %v9146_v45 }
 0x392   : > { %v5937_v53 = vsel %vm10406_vm5, %v8427_v56, %v5936_v22  ;;  %v5948_v38 = vrot.slane %v5825_v35, 5  ;;  %v5952_v16 = vrot.slane %v11848_v46, 5  ;;  %v5831_v7 = vld [vmem:[#allocation3 + $0xb4] sm:$0x1]  ;;  %v5956_v49 = vrot.slane %v5829_v43, 5  ;;  %v9149_v44 = vpop.f32.mrf.mxu0 }
 0x393   : > { %6024 = vst [vmem:[#allocation2 + $0x188] sm:$0xf] %v5937_v53  ;;  %v5945_v21 = vsel %vm10406_vm5, %v8429_v30, %v5944_v62  ;;  %v8433_v33 = vrot.slane %v5830_v41, 9  ;;  %v5960_v46 = vrot.slane %v5831_v7, 5  ;;  %v5968_v36 = vrot.slane %v11855_v51, 5 }
 0x394   : > { %v5949_v48 = vsel %vm10406_vm5, %v8430_v0, %v5948_v38  ;;  %6026 = vst [vmem:[#allocation2 + $0x1d0] sm:$0xf] %v5945_v21  ;;  %v5953_v56 = vsel %vm10406_vm5, %v8431_v14, %v5952_v16  ;;  %v9974_v57 = vld [vmem:[#allocation2 + $0x32c] ss:$36 sps:$4 sm:$0xff]   ;;  %v5957_v24 = vsel %vm10406_vm5, %v8432_v40, %v5956_v49  ;;  %v5972_v43 = vrot.slane %v5837_v15, 5  ;;  %v9050_v14 = vpop.f32.mrf.mxu1  ;;  %v9150_v32 = vpop.f32.mrf.mxu0 }
 0x395   : > { %6027 = vst [vmem:[#allocation2 + $0x1f4] sm:$0xf] %v5949_v48  ;;  %6028 = vst [vmem:[#allocation2 + $0x218] sm:$0xf] %v5953_v56  ;;  %v5838_v50 = vld [vmem:[#allocation3 + $0xe0] sm:$0xe]  ;;  %v5961_v34 = vsel %vm10406_vm5, %v8433_v33, %v5960_v46  ;;  %v5969_v13 = vsel %vm10406_vm5, %v8435_v8, %v5968_v36  ;;  %7671 = vmatprep.mubr.bf16.mxu1 %v9974_v57  ;;  %v9051_v40 = vadd.f32 %v9050_v14, %v9049_v29 }
 0x396   : > { %v5843_v27 = vld [vmem:[#allocation3 + $0xf4] sm:$0x1]  ;;  %v9972_v12 = vld [vmem:[#allocation2 + $0x328] ss:$36 sps:$4 sm:$0xff]   ;;  %6029 = vst [vmem:[#allocation2 + $0x23c] sm:$0xf] %v5957_v24  ;;  %v5973_v42 = vsel %vm10406_vm5, %v8436_v11, %v5972_v43  ;;  %v11910_v51 = vadd.f32 %v11824_v1, %v7336_v47  ;;  %v9052_v26 = vpop.f32.mrf.mxu1  ;;  %v9151_v30 = vadd.f32 %v9150_v32, %v9149_v44  ;;  %v9152_v10 = vpop.f32.mrf.mxu0 }
 0x397   : > { %v5839_v39 = vld [vmem:[#allocation3 + $0xe4] sm:$0x1]  ;;  %6030 = vst [vmem:[#allocation2 + $0x260] sm:$0xf] %v5961_v34  ;;  %6032 = vst [vmem:[#allocation2 + $0x2a8] sm:$0xf] %v5969_v13  ;;  %7672 = vmatmul.mubr.bf16.gmra.mxu1 %v9972_v12  ;;  %v7339_v8 = vadd.f32 %v9051_v40, %v11843_v61 }
 0x398   : > { %v9976_v2 = vld [vmem:[#allocation2 + $0x20] ss:$36 sps:$4 sm:$0xff]   ;;  %6033 = vst [vmem:[#allocation2 + $0x2cc] sm:$0xf] %v5973_v42  ;;  %v5840_v52 = vld [vmem:[#allocation3 + $0xe8] sm:$0xe]  ;;  %v9053_v11 = vpop.f32.mrf.mxu1  ;;  %v9153_v38 = vpop.f32.mrf.mxu0 }
 0x399   : > { %v5841_v37 = vld [vmem:[#allocation3 + $0xec] sm:$0x1]  ;;  %9452 = vmatprep.mubr.bf16.mxu1 %v9976_v2  ;;  %v8437_v28 = vrot.slane %v5838_v50, 9  ;;  %v5976_v35 = vrot.slane %v5839_v39, 5  ;;  %v8438_v15 = vrot.slane %v5840_v52, 9  ;;  %v5984_v63 = vrot.slane %v5843_v27, 5 }
 0x39a   : > { %v5980_v18 = vrot.slane %v5841_v37, 5  ;;  %v11916_v31 = vadd.f32 %v11826_v23, %v7339_v8  ;;  %v9054_v55 = vadd.f32 %v9053_v11, %v9052_v26  ;;  %v9055_v5 = vpop.f32.mrf.mxu1  ;;  %v9977_v41 = vld [vmem:[#allocation2 + $0x68] ss:$36 sps:$4 sm:$0xff]   ;;  %v9978_v23 = vld [vmem:[#allocation2 + $0xb0] ss:$36 sps:$4 sm:$0xff]   ;;  %v9154_v4 = vadd.f32 %v9153_v38, %v9152_v10  ;;  %v9155_v6 = vpop.f32.mrf.mxu0 }
 0x39b   : > { %v5977_v1 = vsel %vm10406_vm5, %v8437_v28, %v5976_v35  ;;  %v5985_v62 = vsel %vm10406_vm5, %v8439_v54, %v5984_v63  ;;  %v9979_v48 = vld [vmem:[#allocation2 + $0xf8] ss:$36 sps:$4 sm:$0xff]   ;;  %v9981_v2 = vld [vmem:[#allocation2 + $0x188] ss:$36 sps:$4 sm:$0xff]  }
 0x39c   : > { %v5981_v22 = vsel %vm10406_vm5, %v8438_v15, %v5980_v18  ;;  %6034 = vst [vmem:[#allocation2 + $0x2f0] sm:$0xf] %v5977_v1  ;;  %v7344_v9 = vadd.f32 %v9054_v55, %v11843_v61  ;;  %6036 = vst [vmem:[#allocation2 + $0x338] sm:$0xf] %v5985_v62  ;;  %v9056_v53 = vpop.f32.mrf.mxu1  ;;  %v9156_v49 = vpop.f32.mrf.mxu0  ;;  %v9982_v59 = vld [vmem:[#allocation2 + $0x1d0] ss:$36 sps:$4 sm:$0xff]  }
 0x39d   : > { %6035 = vst [vmem:[#allocation2 + $0x314] sm:$0xf] %v5981_v22  ;;  %v9057_v0 = vadd.f32 %v9056_v53, %v9055_v5  ;;  %v9157_v60 = vadd.f32 %v9156_v49, %v9155_v6  ;;  %v9983_v32 = vld [vmem:[#allocation2 + $0x218] ss:$36 sps:$4 sm:$0xff]  }
 0x39e   : > { %v11926_v16 = vadd.f32 %v11876_v25, %v7344_v9  ;;  %v9058_v7 = vpop.f32.mrf.mxu1  ;;  %v9158_v46 = vpop.f32.mrf.mxu0  ;;  %v9980_v25 = vld [vmem:[#allocation2 + $0x140] ss:$36 sps:$4 sm:$0xff]  }
 0x39f   : > { %9453 = vmatmul.mubr.bf16.vlgmr.msra.gmra.mxu1 %v9977_v41  ;;  %v7347_v20 = vadd.f32 %v9057_v0, %v11843_v61  ;;  %v9985_v49 = vld [vmem:[#allocation2 + $0x2a8] ss:$36 sps:$4 sm:$0xff]  }
 0x3a0   : > { %9456 = vmatprep.mubr.bf16.mxu1 %v9978_v23  ;;  %v9059_v54 = vpop.f32.mrf.mxu1  ;;  %v9159_v47 = vpop.f32.mrf.mxu0 }
 0x3a1   : > { %v9060_v21 = vadd.f32 %v9059_v54, %v9058_v7  ;;  %v11930_v33 = vadd.f32 %v11893_v58, %v7347_v20  ;;  %v9160_v50 = vadd.f32 %v9159_v47, %v9158_v46 }
 0x3a2   : > { %v9061_v29 = vpop.f32.mrf.mxu1  ;;  %v9161_v58 = vpop.f32.mrf.mxu0 }
 0x3a3   : > { %v7352_v56 = vadd.f32 %v9060_v21, %v11843_v61 }
 0x3a4   : > { %v9062_v36 = vpop.f32.mrf.mxu1  ;;  %v9162_v45 = vpop.f32.mrf.mxu0 }
 0x3a5   : > { %v9063_v57 = vadd.f32 %v9062_v36, %v9061_v29  ;;  %v11933_v24 = vadd.f32 %v9148_v19, %v7352_v56  ;;  %v9163_v39 = vadd.f32 %v9162_v45, %v9161_v58 }
 0x3a6   : > { %v9064_v43 = vpop.f32.mrf.mxu1  ;;  %v9164_v42 = vpop.f32.mrf.mxu0 }
 0x3a7   : > { %9457 = vmatmul.mubr.bf16.gmra.mxu1 %v9979_v48  ;;  %v7355_v27 = vadd.f32 %v9063_v57, %v11843_v61  ;;  %v9986_v48 = vld [vmem:[#allocation2 + $0x2f0] ss:$36 sps:$4 sm:$0xff]  }
 0x3a8   : > { %9460 = vmatprep.mubr.bf16.mxu1 %v9980_v25  ;;  %v9065_v12 = vpop.f32.mrf.mxu1  ;;  %v9165_v8 = vpop.f32.mrf.mxu0 }
 0x3a9   : > { %v9066_v14 = vadd.f32 %v9065_v12, %v9064_v43  ;;  %v11936_v34 = vadd.f32 %v9151_v30, %v7355_v27  ;;  %v9166_v28 = vadd.f32 %v9165_v8, %v9164_v42  ;;  %v9984_v30 = vld [vmem:[#allocation2 + $0x260] ss:$36 sps:$4 sm:$0xff]  }
 0x3aa   : > { %v9067_v13 = vpop.f32.mrf.mxu1  ;;  %v9167_v44 = vpop.f32.mrf.mxu0 }
 0x3ab   : > { %v7360_v40 = vadd.f32 %v9066_v14, %v11843_v61 }
 0x3ac   : > { %v9068_v52 = vpop.f32.mrf.mxu1  ;;  %v9168_v11 = vpop.f32.mrf.mxu0 }
 0x3ad   : > { %v9069_v37 = vadd.f32 %v9068_v52, %v9067_v13  ;;  %v11939_v26 = vadd.f32 %v9154_v4, %v7360_v40  ;;  %v9169_v55 = vadd.f32 %v9168_v11, %v9167_v44 }
 0x3ae   : > { %v9070_v19 = vpop.f32.mrf.mxu1  ;;  %v9170_v5 = vpop.f32.mrf.mxu0 }
 0x3af   : > { %9461 = vmatmul.mubr.bf16.gmra.mxu1 %v9981_v2  ;;  %v7363_v35 = vadd.f32 %v9069_v37, %v11843_v61 }
 0x3b0   : > { %9464 = vmatprep.mubr.bf16.mxu1 %v9982_v59  ;;  %v9071_v15 = vpop.f32.mrf.mxu1  ;;  %v9171_v9 = vpop.f32.mrf.mxu0 }
 0x3b1   : > { %v9072_v18 = vadd.f32 %v9071_v15, %v9070_v19  ;;  %v11942_v1 = vadd.f32 %v9157_v60, %v7363_v35  ;;  %v9172_v53 = vadd.f32 %v9171_v9, %v9170_v5 }
 0x3b2   : > { %v9073_v63 = vpop.f32.mrf.mxu1  ;;  %v9173_v38 = vpop.f32.mrf.mxu0 }
 0x3b3   : > { %v7368_v22 = vadd.f32 %v9072_v18, %v11843_v61 }
 0x3b4   : > { %v9074_v62 = vpop.f32.mrf.mxu1  ;;  %v9174_v20 = vpop.f32.mrf.mxu0 }
 0x3b5   : > { %v9075_v41 = vadd.f32 %v9074_v62, %v9073_v63  ;;  %v11945_v10 = vadd.f32 %v9160_v50, %v7368_v22  ;;  %v9175_v21 = vadd.f32 %v9174_v20, %v9173_v38 }
 0x3b6   : > { %v9076_v23 = vpop.f32.mrf.mxu1  ;;  %v9176_v60 = vpop.f32.mrf.mxu0 }
 0x3b7   : > { %9465 = vmatmul.mubr.bf16.gmra.mxu1 %v9983_v32  ;;  %v7371_v0 = vadd.f32 %v9075_v41, %v11843_v61 }
 0x3b8   : > { %9468 = vmatprep.mubr.bf16.mxu1 %v9984_v30  ;;  %v9077_v7 = vpop.f32.mrf.mxu1  ;;  %v9177_v25 = vpop.f32.mrf.mxu0 }
 0x3b9   : > { %v9078_v4 = vadd.f32 %v9077_v7, %v9076_v23  ;;  %v11948_v6 = vadd.f32 %v9163_v39, %v7371_v0  ;;  %v9178_v47 = vadd.f32 %v9177_v25, %v9176_v60  ;;  %v9987_v39 = vld [vmem:[#allocation2 + $0x338] ss:$36 sps:$4 sm:$0xff]  }
 0x3ba   : > { %v9079_v54 = vpop.f32.mrf.mxu1  ;;  %v9179_v50 = vpop.f32.mrf.mxu0 }
 0x3bb   : > { %v7376_v29 = vadd.f32 %v9078_v4, %v11843_v61 }
 0x3bc   : > { %v9080_v56 = vpop.f32.mrf.mxu1  ;;  %v9180_v12 = vpop.f32.mrf.mxu0 }
 0x3bd   : > { %v9081_v46 = vadd.f32 %v9080_v56, %v9079_v54  ;;  %v11951_v36 = vadd.f32 %v9166_v28, %v7376_v29  ;;  %v9181_v13 = vadd.f32 %v9180_v12, %v9179_v50 }
 0x3be   : > { %v9082_v57 = vpop.f32.mrf.mxu1  ;;  %v9182_v40 = vpop.f32.mrf.mxu0 }
 0x3bf   : > { %9469 = vmatmul.mubr.bf16.gmra.mxu1 %v9985_v49  ;;  %v7379_v43 = vadd.f32 %v9081_v46, %v11843_v61 }
 0x3c0   : > { %9472 = vmatprep.mubr.bf16.mxu1 %v9986_v48  ;;  %v9083_v27 = vpop.f32.mrf.mxu1  ;;  %v9183_v52 = vpop.f32.mrf.mxu0 }
 0x3c1   : > { %v9084_v58 = vadd.f32 %v9083_v27, %v9082_v57  ;;  %v11954_v14 = vadd.f32 %v9169_v55, %v7379_v43  ;;  %v9184_v19 = vadd.f32 %v9183_v52, %v9182_v40 }
 0x3c2   : > { %v9085_v45 = vpop.f32.mrf.mxu1  ;;  %v9185_v35 = vpop.f32.mrf.mxu0 }
 0x3c3   : > { %v7384_v2 = vadd.f32 %v9084_v58, %v11843_v61 }
 0x3c4   : > { %v9086_v42 = vpop.f32.mrf.mxu1  ;;  %v9186_v18 = vpop.f32.mrf.mxu0 }
 0x3c5   : > { %v9087_v59 = vadd.f32 %v9086_v42, %v9085_v45  ;;  %v11957_v37 = vadd.f32 %v9172_v53, %v7384_v2  ;;  %v9187_v55 = vadd.f32 %v9186_v18, %v9185_v35 }
 0x3c6   : > { %v9088_v8 = vpop.f32.mrf.mxu1  ;;  %v9188_v22 = vpop.f32.mrf.mxu0 }
 0x3c7   : > { %9473 = vmatmul.mubr.bf16.gmra.mxu1 %v9987_v39  ;;  %v7387_v28 = vadd.f32 %v9087_v59, %v11843_v61 }
 0x3c8   : > { %v9089_v44 = vpop.f32.mrf.mxu1  ;;  %v9189_v62 = vpop.f32.mrf.mxu0 }
 0x3c9   : > { %v9090_v15 = vadd.f32 %v9089_v44, %v9088_v8  ;;  %v11960_v11 = vadd.f32 %v9175_v21, %v7387_v28  ;;  %v9190_v23 = vadd.f32 %v9189_v62, %v9188_v22 }
 0x3ca   : > { %v9091_v63 = vpop.f32.mrf.mxu1  ;;  %v9191_v0 = vpop.f32.mrf.mxu0 }
 0x3cb   : > { %v7392_v32 = vadd.f32 %v9090_v15, %v11843_v61 }
 0x3cc   : > { %v9092_v5 = vpop.f32.mrf.mxu1  ;;  %v9192_v4 = vpop.f32.mrf.mxu0 }
 0x3cd   : > { %v9093_v30 = vadd.f32 %v9092_v5, %v9091_v63  ;;  %v11963_v41 = vadd.f32 %v9178_v47, %v7392_v32  ;;  %v9193_v21 = vadd.f32 %v9192_v4, %v9191_v0 }
 0x3ce   : > { %v9094_v9 = vpop.f32.mrf.mxu1  ;;  %v9194_v29 = vpop.f32.mrf.mxu0 }
 0x3cf   : > { %12404 = vst [vmem:[#allocation17_spill] sm:$0xff] %v11963_v41  ;;  %v7395_v53 = vadd.f32 %v9093_v30, %v11843_v61 }
 0x3d0   : > { %v9095_v38 = vpop.f32.mrf.mxu1  ;;  %v9195_v56 = vpop.f32.mrf.mxu0 }
 0x3d1   : > { %v9096_v7 = vadd.f32 %v9095_v38, %v9094_v9  ;;  %v11966_v20 = vadd.f32 %v9181_v13, %v7395_v53  ;;  %v9196_v57 = vadd.f32 %v9195_v56, %v9194_v29 }
 0x3d2   : > { %v9097_v54 = vpop.f32.mrf.mxu1  ;;  %v9197_v43 = vpop.f32.mrf.mxu0 }
 0x3d3   : > { %12405 = vst [vmem:[#allocation18_spill] sm:$0xff] %v11966_v20  ;;  %v7400_v49 = vadd.f32 %v9096_v7, %v11843_v61 }
 0x3d4   : > { %v9098_v60 = vpop.f32.mrf.mxu1  ;;  %v9198_v58 = vpop.f32.mrf.mxu0 }
 0x3d5   : > { %v9099_v48 = vadd.f32 %v9098_v60, %v9097_v54  ;;  %v11969_v46 = vadd.f32 %v9184_v19, %v7400_v49  ;;  %v9199_v13 = vadd.f32 %v9198_v58, %v9197_v43 }
 0x3d6   : > { %v9100_v25 = vpop.f32.mrf.mxu1  ;;  %v11975_v2 = vpop.f32.mrf.mxu0 }
 0x3d7   : > { %12406 = vst [vmem:[#allocation19_spill] sm:$0xff] %v11969_v46  ;;  %v7403_v47 = vadd.f32 %v9099_v48, %v11843_v61 }
 0x3d8   : > { %v9101_v50 = vpop.f32.mrf.mxu1  ;;  %v11977_v59 = vpop.f32.mrf.mxu0 }
 0x3d9   : > { %v9102_v27 = vadd.f32 %v9101_v50, %v9100_v25  ;;  %v11972_v12 = vadd.f32 %v9187_v55, %v7403_v47 }
 0x3da   : > { %v9103_v45 = vpop.f32.mrf.mxu1  ;;  %v11982_v28 = vpop.f32.mrf.mxu0 }
 0x3db   : > { %12407 = vst [vmem:[#allocation20_spill] sm:$0xff] %v11972_v12  ;;  %v7408_v39 = vadd.f32 %v9102_v27, %v11843_v61 }
 0x3dc   : > { %v9104_v40 = vpop.f32.mrf.mxu1  ;;  %v11984_v15 = vpop.f32.mrf.mxu0 }
 0x3dd   : > { %v9105_v42 = vadd.f32 %v9104_v40, %v9103_v45  ;;  %v11979_v52 = vadd.f32 %v9190_v23, %v7408_v39 }
 0x3de   : > { %v9106_v8 = vpop.f32.mrf.mxu1  ;;  %v11989_v5 = vpop.f32.mrf.mxu0 }
 0x3df   : > { %12408 = vst [vmem:[#allocation15_spill] sm:$0xff] %v11979_v52  ;;  %v7411_v19 = vadd.f32 %v9105_v42, %v11843_v61 }
 0x3e0   : > { %v9107_v35 = vpop.f32.mrf.mxu1  ;;  %v11994_v23 = vpop.f32.mrf.mxu0 }
 0x3e1   : > { %v9108_v44 = vadd.f32 %v9107_v35, %v9106_v8  ;;  %v11986_v18 = vadd.f32 %v9193_v21, %v7411_v19 }
 0x3e2   : > { %v9109_v63 = vpop.f32.mrf.mxu1  ;;  %v11996_v38 = vpop.f32.mrf.mxu0 }
 0x3e3   : > { %12409 = vst [vmem:[#allocation14_spill] sm:$0xff] %v11986_v18  ;;  %v7416_v55 = vadd.f32 %v9108_v44, %v11843_v61 }
 0x3e4   : > { %v9110_v32 = vpop.f32.mrf.mxu1  ;;  %v12003_v21 = vpop.f32.mrf.mxu0 }
 0x3e5   : > { %v9111_v22 = vadd.f32 %v9110_v32, %v9109_v63  ;;  %v11991_v30 = vadd.f32 %v9196_v57, %v7416_v55 }
 0x3e6   : > { %v9216_v62 = vpop.f32.mrf.mxu1  ;;  %v12005_v48 = vpop.f32.mrf.mxu0 }
 0x3e7   : > { %12410 = vst [vmem:[#allocation16_spill] sm:$0xff] %v11991_v30  ;;  %v7419_v9 = vadd.f32 %v9111_v22, %v11843_v61 }
 0x3e8   : > { %v9217_v53 = vpop.f32.mrf.mxu1  ;;  %v12010_v25 = vpop.f32.mrf.mxu0 }
 0x3e9   : > { %v9218_v0 = vadd.f32 %v9217_v53, %v9216_v62  ;;  %v11998_v7 = vadd.f32 %v9199_v13, %v7419_v9 }
 0x3ea   : > { %v9219_v4 = vpop.f32.mrf.mxu1  ;;  %v12012_v43 = vpop.f32.mrf.mxu0 }
 0x3eb   : > { %12411 = vst [vmem:[#allocation21_spill] sm:$0xff] %v11998_v7  ;;  %v12001_v54 = vadd.f32 %v9218_v0, %v11869_v17 }
 0x3ec   : > { %v9220_v49 = vpop.f32.mrf.mxu1  ;;  %v12017_v58 = vpop.f32.mrf.mxu0 }
 0x3ed   : > { %v9221_v29 = vadd.f32 %v9220_v49, %v9219_v4 }
 0x3ee   : > { %v9222_v60 = vpop.f32.mrf.mxu1  ;;  %v12022_v40 = vpop.f32.mrf.mxu0 }
 0x3ef   : > { %v12008_v61 = vadd.f32 %v9221_v29, %v11872_v3 }
 0x3f0   : > { %v9223_v56 = vpop.f32.mrf.mxu1  ;;  %v12027_v19 = vpop.f32.mrf.mxu0 }
 0x3f1   : > { %v9224_v57 = vadd.f32 %v9223_v56, %v9222_v60 }
 0x3f2   : > { %v9225_v47 = vpop.f32.mrf.mxu1  ;;  %v12032_v55 = vpop.f32.mrf.mxu0 }
 0x3f3   : > { %v12015_v17 = vadd.f32 %v9224_v57, %v11910_v51 }
 0x3f4   : > { %v9226_v50 = vpop.f32.mrf.mxu1  ;;  %v12034_v62 = vpop.f32.mrf.mxu0 }
 0x3f5   : > { %v9227_v27 = vadd.f32 %v9226_v50, %v9225_v47 }
 0x3f6   : > { %v9228_v45 = vpop.f32.mrf.mxu1  ;;  %v12039_v0 = vpop.f32.mrf.mxu0 }
 0x3f7   : > { %v12020_v13 = vadd.f32 %v9227_v27, %v11916_v31 }
 0x3f8   : > { %v9229_v3 = vpop.f32.mrf.mxu1 }
 0x3f9   : > { %v9230_v39 = vadd.f32 %v9229_v3, %v9228_v45 }
 0x3fa   : > { %v9231_v42 = vpop.f32.mrf.mxu1 }
 0x3fb   : > { %v12025_v8 = vadd.f32 %v9230_v39, %v11926_v16 }
 0x3fc   : > { %v9232_v51 = vpop.f32.mrf.mxu1 }
 0x3fd   : > { %v9233_v35 = vadd.f32 %v9232_v51, %v9231_v42 }
 0x3fe   : > { %v9234_v44 = vpop.f32.mrf.mxu1 }
 0x3ff   : > { %v12030_v63 = vadd.f32 %v9233_v35, %v11930_v33  ;;  %v12044_v33 = vpop.f32.mrf.mxu0 }
 0x400   : > { %v9235_v31 = vpop.f32.mrf.mxu1 }
 0x401   : > { %v9236_v32 = vadd.f32 %v9235_v31, %v9234_v44  ;;  %v12049_v47 = vpop.f32.mrf.mxu0 }
 0x402   : > { %v9237_v22 = vpop.f32.mrf.mxu1 }
 0x403   : > { %v12037_v9 = vadd.f32 %v9236_v32, %v11933_v24  ;;  %v12054_v45 = vpop.f32.mrf.mxu0 }
 0x404   : > { %v9238_v16 = vpop.f32.mrf.mxu1 }
 0x405   : > { %v9239_v53 = vadd.f32 %v9238_v16, %v9237_v22  ;;  %v12056_v39 = vpop.f32.mrf.mxu0 }
 0x406   : > { %v9240_v49 = vpop.f32.mrf.mxu1 }
 0x407   : > { %v12042_v4 = vadd.f32 %v9239_v53, %v11936_v34  ;;  %v12061_v44 = vpop.f32.mrf.mxu0 }
 0x408   : > { %v9241_v29 = vpop.f32.mrf.mxu1 }
 0x409   : > { %v9242_v60 = vadd.f32 %v9241_v29, %v9240_v49  ;;  %v12066_v22 = vpop.f32.mrf.mxu0 }
 0x40a   : > { %v9243_v56 = vpop.f32.mrf.mxu1 }
 0x40b   : > { %v12047_v57 = vadd.f32 %v9242_v60, %v11939_v26  ;;  %v12068_v29 = vpop.f32.mrf.mxu0 }
 0x40c   : > { %v9244_v24 = vpop.f32.mrf.mxu1 }
 0x40d   : > { %v9245_v50 = vadd.f32 %v9244_v24, %v9243_v56  ;;  %v12073_v24 = vpop.f32.mrf.mxu0 }
 0x40e   : > { %v9246_v34 = vpop.f32.mrf.mxu1 }
 0x40f   : > { %v12052_v27 = vadd.f32 %v9245_v50, %v11942_v1 }
 0x410   : > { %v9247_v3 = vpop.f32.mrf.mxu1 }
 0x411   : > { %v9248_v42 = vadd.f32 %v9247_v3, %v9246_v34  ;;  %v12080_v34 = vpop.f32.mrf.mxu0 }
 0x412   : > { %v9249_v51 = vpop.f32.mrf.mxu1 }
 0x413   : > { %v12059_v35 = vadd.f32 %v9248_v42, %v11945_v10 }
 0x414   : > { %v9250_v26 = vpop.f32.mrf.mxu1 }
 0x415   : > { %v9251_v31 = vadd.f32 %v9250_v26, %v9249_v51  ;;  %v12086_v51 = vpop.f32.mrf.mxu0 }
 0x416   : > { %v9252_v1 = vpop.f32.mrf.mxu1  ;;  %12413 = vst [vmem:[#allocation13_spill] sm:$0xff] %v12086_v51  ;;  %v7941_v51 = vld [vmem:[%s10279_s19 + $0x18] sm:$0xff] }
 0x417   : > { %v12064_v32 = vadd.f32 %v9251_v31, %v11948_v6 }
 0x418   : > { %v9253_v16 = vpop.f32.mrf.mxu1 }
 0x419   : > { %v9254_v53 = vadd.f32 %v9253_v16, %v9252_v1 }
 0x41a   : > { %v9255_v49 = vpop.f32.mrf.mxu1 }
 0x41b   : > { %v12071_v60 = vadd.f32 %v9254_v53, %v11951_v36  ;;  %v12090_v36 = vpop.f32.mrf.mxu0 }
 0x41c   : > { %v9256_v10 = vpop.f32.mrf.mxu1  ;;  %12414 = vst [vmem:[#allocation23_spill] sm:$0xff] %v12090_v36 }
 0x41d   : > { %v9257_v56 = vadd.f32 %v9256_v10, %v9255_v49 }
 0x41f   : > { %v12076_v50 = vadd.f32 %v9257_v56, %v11954_v14  ;;  %v12096_v14 = vpop.f32.mrf.mxu0 }
 0x420   : > { %v12078_v6 = vpop.f32.mrf.mxu1 }
 0x421   : > { %12412 = vst [vmem:[#allocation22_spill] sm:$0xff] %v12076_v50  ;;  %v12100_v53 = vpop.f32.mrf.mxu0 }
 0x422   : > { %v12082_v3 = vpop.f32.mrf.mxu1 }
 0x423   : > { %v12104_v10 = vpop.f32.mrf.mxu0 }
 0x424   : > { %v12084_v42 = vpop.f32.mrf.mxu1 }
 0x425   : > { %v12110_v7 = vpop.f32.mrf.mxu0 }
 0x426   : > { %v12088_v26 = vpop.f32.mrf.mxu1 }
 0x427   : > { %v12116_v20 = vpop.f32.mrf.mxu0 }
 0x428   : > { %12419 = vst [vmem:[#allocation28_spill] sm:$0xff] %v12116_v20 }
 0x429   : > { %v12120_v41 = vpop.f32.mrf.mxu0 }
 0x42a   : > { %12421 = vst [vmem:[#allocation30_spill] sm:$0xff] %v12120_v41 }
 0x42d   : > { %v12092_v31 = vpop.f32.mrf.mxu1 }
 0x42f   : > { %v12094_v1 = vpop.f32.mrf.mxu1 }
 0x431   : > { %v12098_v16 = vpop.f32.mrf.mxu1 }
 0x432   : > { %12415 = vst [vmem:[#allocation24_spill] sm:$0xff] %v12098_v16  ;;  %v12126_v16 = vpop.f32.mrf.mxu0 }
 0x433   : > { %v12102_v49 = vpop.f32.mrf.mxu1  ;;  %12424 = vst [vmem:[#allocation33_spill] sm:$0xff] %v12126_v16 }
 0x434   : > { %12416 = vst [vmem:[#allocation25_spill] sm:$0xff] %v12102_v49  ;;  %v12130_v36 = vpop.f32.mrf.mxu0 }
 0x435   : > { %12426 = vst [vmem:[#allocation35_spill] sm:$0xff] %v12130_v36 }
 0x43b   : > { %v12106_v56 = vpop.f32.mrf.mxu1 }
 0x43d   : > { %v12108_v18 = vpop.f32.mrf.mxu1 }
 0x43f   : > { %v12112_v52 = vpop.f32.mrf.mxu1 }
 0x440   : > { %12417 = vst [vmem:[#allocation26_spill] sm:$0xff] %v12112_v52 }
 0x441   : > { %v12114_v30 = vpop.f32.mrf.mxu1 }
 0x442   : > { %12418 = vst [vmem:[#allocation27_spill] sm:$0xff] %v12114_v30  ;;  %v12134_v30 = vpop.f32.mrf.mxu0 }
 0x443   : > { %12428 = vst [vmem:[#allocation37_spill] sm:$0xff] %v12134_v30 }
 0x444   : > { %v12142_v41 = vpop.f32.mrf.mxu0 }
 0x445   : > { %12431 = vst [vmem:[#allocation40_spill] sm:$0xff] %v12142_v41  ;;  %v9309_v41 = vadd.f32 %v11984_v15, %v11982_v28  ;;  %v7939_v28 = vld [vmem:[%s10279_s19 + $0x8] sm:$0xff]  ;;  %v9318_v15 = vadd.f32 %v12010_v25, %v12005_v48  ;;  %v7942_v25 = vld [vmem:[%s10279_s19 + $0x20] sm:$0xff] }
 0x448   : > { %v12118_v12 = vpop.f32.mrf.mxu1 }
 0x449   : > { %12420 = vst [vmem:[#allocation29_spill] sm:$0xff] %v12118_v12 }
 0x44a   : > { %v12122_v50 = vpop.f32.mrf.mxu1 }
 0x44b   : > { %12422 = vst [vmem:[#allocation31_spill] sm:$0xff] %v12122_v50  ;;  %v9312_v50 = vadd.f32 %v11994_v23, %v11989_v5  ;;  %v12153_v5 = vpop.f32.mrf.mxu0 }
 0x44c   : > { %v12124_v49 = vpop.f32.mrf.mxu1 }
 0x44d   : > { %12423 = vst [vmem:[#allocation32_spill] sm:$0xff] %v12124_v49  ;;  %v7723_v36 = vadd.f32 %v9312_v50, %v12015_v17 }
 0x44e   : > { %v12128_v46 = vpop.f32.mrf.mxu1 }
 0x44f   : > { %12425 = vst [vmem:[#allocation34_spill] sm:$0xff] %v12128_v46  ;;  %v9306_v46 = vadd.f32 %v11977_v59, %v11975_v2 }
 0x451   : > { %v7715_v30 = vadd.f32 %v9306_v46, %v12001_v54 }
 0x457   : > { %v12132_v52 = vpop.f32.mrf.mxu1 }
 0x458   : > { %12427 = vst [vmem:[#allocation36_spill] sm:$0xff] %v12132_v52  ;;  %v7940_v52 = vld [vmem:[%s10279_s19 + $0x10] sm:$0xff] }
 0x459   : > { %v12136_v20 = vpop.f32.mrf.mxu1 }
 0x45a   : > { %12429 = vst [vmem:[#allocation38_spill] sm:$0xff] %v12136_v20  ;;  %v9315_v20 = vadd.f32 %v12003_v21, %v11996_v38  ;;  %v9324_v38 = vadd.f32 %v12027_v19, %v12022_v40  ;;  %v7944_v19 = vld [vmem:[%s10279_s19 + $0x30] sm:$0xff] }
 0x45b   : > { %v12138_v12 = vpop.f32.mrf.mxu1 }
 0x45c   : > { %12430 = vst [vmem:[#allocation39_spill] sm:$0xff] %v12138_v12  ;;  %v7726_v17 = vadd.f32 %v9315_v20, %v12020_v13  ;;  %v7739_v13 = vadd.f32 %v9324_v38, %v12037_v9  ;;  %v9321_v9 = vadd.f32 %v12017_v58, %v12012_v43  ;;  %v9260_v43 = vadd.f32 %v12082_v3, %v12078_v6 }
 0x45d   : > { %v12144_v49 = vpop.f32.mrf.mxu1 }
 0x45e   : > { %12432 = vst [vmem:[#allocation41_spill] sm:$0xff] %v12144_v49  ;;  %v7938_v49 = vld [vmem:[%s10279_s19] sm:$0xff] }
 0x45f   : > { %v9454_v16 = vpop.f32.mrf.mxu1 }
 0x460   : > { %v7852_v12 = vadd.f32 %v9454_v16, %v7723_v36  ;;  %v7731_v16 = vadd.f32 %v9318_v15, %v12025_v8  ;;  %v9336_v8 = vadd.f32 %v12061_v44, %v12056_v39 }
 0x461   : > { %v7843_v23 = vpop.f32.mrf.mxu1 }
 0x462   : > { %v7964_v2 = vadd.f32 %v7940_v52, %v7852_v12  ;;  %v7844_v59 = vadd.f32 %v7843_v23, %v7715_v30  ;;  %v7718_v12 = vadd.f32 %v9309_v41, %v12008_v61  ;;  %v12168_v52 = vpop.f32.mrf.mxu0  ;;  %v9327_v41 = vadd.f32 %v12034_v62, %v12032_v55 }
 0x463   : > { %v9455_v50 = vpop.f32.mrf.mxu1  ;;  %v7755_v44 = vadd.f32 %v9336_v8, %v12059_v35 }
 0x464   : > { %7988 = vst [vmem:[%s12164_s13 + $0x10] sm:$0xff] %v7964_v2  ;;  %v7962_v46 = vadd.f32 %v7938_v49, %v7844_v59  ;;  %v7855_v54 = vadd.f32 %v9455_v50, %v7726_v17  ;;  %v12180_v49 = vpop.f32.mrf.mxu0  ;;  %v7742_v55 = vadd.f32 %v9327_v41, %v12042_v4  ;;  %v7945_v2 = vld [vmem:[%s10279_s19 + $0x38] sm:$0xff]  ;;  %v7734_v50 = vadd.f32 %v9321_v9, %v12030_v63 }
 0x465   : > { %v7846_v20 = vpop.f32.mrf.mxu1  ;;  %v9330_v4 = vadd.f32 %v12044_v33, %v12039_v0  ;;  %v9339_v63 = vadd.f32 %v12068_v29, %v12066_v22  ;;  %v9333_v0 = vadd.f32 %v12054_v45, %v12049_v47  ;;  %v7642_v33 = vadd.f32 %v9260_v43, %v11957_v37  ;;  %v7949_v45 = vld [vmem:[%s10279_s19 + $0x58] sm:$0xff] }
 0x466   : > { %7986 = vst [vmem:[%s12164_s13] sm:$0xff] %v7962_v46  ;;  %v7965_v30 = vadd.f32 %v7941_v51, %v7855_v54  ;;  %v7847_v21 = vadd.f32 %v7846_v20, %v7718_v12  ;;  %v12194_v58 = vpop.f32.mrf.mxu0  ;;  %v7943_v46 = vld [vmem:[%s10279_s19 + $0x28] sm:$0xff]  ;;  %v7948_v20 = vld [vmem:[%s10279_s19 + $0x50] sm:$0xff]  ;;  %v9263_v22 = vadd.f32 %v12088_v26, %v12084_v42  ;;  %v9342_v42 = vadd.f32 %v12080_v34, %v12073_v24 }
 0x467   : > { %v9458_v40 = vpop.f32.mrf.mxu1  ;;  %v9351_v24 = vadd.f32 %v12110_v7, %v12104_v10  ;;  %v9266_v34 = vadd.f32 %v12094_v1, %v12092_v31  ;;  %v12438_v10 = vld [vmem:[#allocation24_spill] sm:$0xff] }
 0x468   : > { %7989 = vst [vmem:[%s12164_s13 + $0x18] sm:$0xff] %v7965_v30  ;;  %v7963_v61 = vadd.f32 %v7939_v28, %v7847_v21  ;;  %v7868_v36 = vadd.f32 %v9458_v40, %v7739_v13  ;;  %v7747_v28 = vadd.f32 %v9330_v4, %v12047_v57  ;;  %v12209_v15 = vpop.f32.mrf.mxu0  ;;  %v7946_v30 = vld [vmem:[%s10279_s19 + $0x40] sm:$0xff]  ;;  %v7758_v13 = vadd.f32 %v9339_v63, %v12064_v32  ;;  %v12440_v4 = vld [vmem:[#allocation22_spill] sm:$0xff] }
 0x469   : > { %v7859_v48 = vpop.f32.mrf.mxu1  ;;  %v9348_v57 = vadd.f32 %v12100_v53, %v12096_v14  ;;  %v9272_v14 = vadd.f32 %v12108_v18, %v12106_v56  ;;  %v12433_v18 = vld [vmem:[#allocation13_spill] sm:$0xff]  ;;  %v12434_v56 = vld [vmem:[#allocation23_spill] sm:$0xff] }
 0x46a   : > { %7987 = vst [vmem:[%s12164_s13 + $0x8] sm:$0xff] %v7963_v61  ;;  %v7968_v51 = vadd.f32 %v7944_v19, %v7868_v36  ;;  %v7860_v23 = vadd.f32 %v7859_v48, %v7731_v16  ;;  %v7750_v19 = vadd.f32 %v9333_v0, %v12052_v27  ;;  %v12223_v26 = vpop.f32.mrf.mxu0  ;;  %v7947_v61 = vld [vmem:[%s10279_s19 + $0x48] sm:$0xff]  ;;  %v7645_v36 = vadd.f32 %v9263_v22, %v11960_v11  ;;  %v7952_v48 = vld [vmem:[%s10279_s19 + $0x70] sm:$0xff] }
 0x46b   : > { %v9459_v62 = vpop.f32.mrf.mxu1  ;;  %v7771_v32 = vadd.f32 %v9348_v57, %v7642_v33  ;;  %v12445_v0 = vld [vmem:[#allocation30_spill] sm:$0xff] }
 0x46c   : > { %7992 = vst [vmem:[%s12164_s13 + $0x30] sm:$0xff] %v7968_v51  ;;  %v7966_v59 = vadd.f32 %v7942_v25, %v7860_v23  ;;  %v7871_v17 = vadd.f32 %v9459_v62, %v7742_v55  ;;  %v7763_v25 = vadd.f32 %v9342_v42, %v12071_v60  ;;  %v9345_v51 = vadd.f32 %v12434_v56, %v12433_v18  ;;  %v12435_v23 = vld [vmem:[#allocation26_spill] sm:$0xff]  ;;  %v12436_v55 = vld [vmem:[#allocation27_spill] sm:$0xff]  ;;  %v7950_v60 = vld [vmem:[%s10279_s19 + $0x60] sm:$0xff] }
 0x46d   : > { %v7862_v38 = vpop.f32.mrf.mxu1  ;;  %v9275_v62 = vadd.f32 %v12436_v55, %v12435_v23  ;;  %v7774_v1 = vadd.f32 %v9351_v24, %v7645_v36  ;;  %v12448_v57 = vld [vmem:[#allocation38_spill] sm:$0xff]  ;;  %v12453_v24 = vld [vmem:[#allocation35_spill] sm:$0xff]  ;;  %v7954_v18 = vld [vmem:[%s10279_s19 + $0x80] sm:$0xff] }
 0x46e   : > { %7990 = vst [vmem:[%s12164_s13 + $0x20] sm:$0xff] %v7966_v59  ;;  %v7969_v54 = vadd.f32 %v7945_v2, %v7871_v17  ;;  %v7863_v39 = vadd.f32 %v7862_v38, %v7734_v50  ;;  %v9370_v2 = vpop.f32.mrf.mxu0  ;;  %v12437_v59 = vld [vmem:[#allocation19_spill] sm:$0xff]  ;;  %v12439_v50 = vld [vmem:[#allocation25_spill] sm:$0xff] }
 0x46f   : > { %v9462_v12 = vpop.f32.mrf.mxu1  ;;  %v7658_v17 = vadd.f32 %v9272_v14, %v12437_v59  ;;  %v9269_v43 = vadd.f32 %v12439_v50, %v12438_v10  ;;  %v12456_v23 = vld [vmem:[#allocation41_spill] sm:$0xff]  ;;  %v12458_v10 = vld [vmem:[#allocation32_spill] sm:$0xff]  ;;  %v12459_v50 = vld [vmem:[#allocation34_spill] sm:$0xff] }
 0x470   : > { %7993 = vst [vmem:[%s12164_s13 + $0x38] sm:$0xff] %v7969_v54  ;;  %v7967_v6 = vadd.f32 %v7943_v46, %v7863_v39  ;;  %v7884_v3 = vadd.f32 %v9462_v12, %v7755_v44  ;;  %v7953_v46 = vld [vmem:[%s10279_s19 + $0x78] sm:$0xff]  ;;  %v7766_v54 = vadd.f32 %v9345_v51, %v12440_v4  ;;  %v12441_v39 = vld [vmem:[#allocation17_spill] sm:$0xff]  ;;  %v9371_v22 = vpop.f32.mrf.mxu0  ;;  %v9366_v4 = vadd.f32 %v12194_v58, %v12180_v49 }
 0x471   : > { %v7875_v35 = vpop.f32.mrf.mxu1  ;;  %v7650_v44 = vadd.f32 %v9266_v34, %v12441_v39  ;;  %v12442_v12 = vld [vmem:[#allocation37_spill] sm:$0xff]  ;;  %v12454_v51 = vld [vmem:[#allocation16_spill] sm:$0xff] }
 0x472   : > { %7991 = vst [vmem:[%s12164_s13 + $0x28] sm:$0xff] %v7967_v6  ;;  %v7972_v29 = vadd.f32 %v7948_v20, %v7884_v3  ;;  %v7876_v21 = vadd.f32 %v7875_v35, %v7747_v28  ;;  %v12443_v20 = vld [vmem:[#allocation40_spill] sm:$0xff] }
 0x473   : > { %v9463_v47 = vpop.f32.mrf.mxu1  ;;  %v9360_v63 = vadd.f32 %v12443_v20, %v12442_v12  ;;  %v12444_v28 = vld [vmem:[#allocation28_spill] sm:$0xff]  ;;  %v12460_v12 = vld [vmem:[#allocation21_spill] sm:$0xff] }
 0x474   : > { %7996 = vst [vmem:[%s12164_s13 + $0x50] sm:$0xff] %v7972_v29  ;;  %v7970_v37 = vadd.f32 %v7946_v30, %v7876_v21  ;;  %v7887_v40 = vadd.f32 %v9463_v47, %v7758_v13  ;;  %v9354_v33 = vadd.f32 %v12445_v0, %v12444_v28  ;;  %v12446_v35 = vld [vmem:[#allocation20_spill] sm:$0xff]  ;;  %v7951_v21 = vld [vmem:[%s10279_s19 + $0x68] sm:$0xff]  ;;  %v7960_v28 = vld [vmem:[%s10279_s19 + $0xb0] sm:$0xff] }
 0x475   : > { %v7878_v41 = vpop.f32.mrf.mxu1  ;;  %v7661_v30 = vadd.f32 %v9275_v62, %v12446_v35  ;;  %v12447_v13 = vld [vmem:[#allocation36_spill] sm:$0xff] }
 0x476   : > { %7994 = vst [vmem:[%s12164_s13 + $0x40] sm:$0xff] %v7970_v37  ;;  %v7973_v53 = vadd.f32 %v7949_v45, %v7887_v40  ;;  %v7879_v16 = vadd.f32 %v7878_v41, %v7750_v19  ;;  %v9284_v47 = vadd.f32 %v12448_v57, %v12447_v13  ;;  %v7787_v40 = vadd.f32 %v9360_v63, %v7658_v17  ;;  %v12449_v19 = vld [vmem:[#allocation18_spill] sm:$0xff] }
 0x477   : > { %v9466_v27 = vpop.f32.mrf.mxu1  ;;  %v7653_v42 = vadd.f32 %v9269_v43, %v12449_v19  ;;  %v9363_v41 = vadd.f32 %v12168_v52, %v12153_v5  ;;  %v12455_v52 = vld [vmem:[#allocation39_spill] sm:$0xff]  ;;  %v9281_v43 = vadd.f32 %v12459_v50, %v12458_v10 }
 0x478   : > { %7997 = vst [vmem:[%s12164_s13 + $0x58] sm:$0xff] %v7973_v53  ;;  %v7971_v11 = vadd.f32 %v7947_v61, %v7879_v16  ;;  %v7900_v9 = vadd.f32 %v9466_v27, %v7771_v32  ;;  %v12450_v61 = vld [vmem:[#allocation29_spill] sm:$0xff]  ;;  %v12451_v32 = vld [vmem:[#allocation31_spill] sm:$0xff]  ;;  %v7674_v5 = vadd.f32 %v9284_v47, %v12454_v51  ;;  %v9287_v55 = vadd.f32 %v12456_v23, %v12455_v52 }
 0x479   : > { %v7891_v8 = vpop.f32.mrf.mxu1  ;;  %v9278_v36 = vadd.f32 %v12451_v32, %v12450_v61  ;;  %v7956_v53 = vld [vmem:[%s10279_s19 + $0x90] sm:$0xff]  ;;  %v7790_v56 = vadd.f32 %v9363_v41, %v7661_v30  ;;  %v7959_v61 = vld [vmem:[%s10279_s19 + $0xa8] sm:$0xff] }
 0x47a   : > { %7995 = vst [vmem:[%s12164_s13 + $0x48] sm:$0xff] %v7971_v11  ;;  %v7976_v7 = vadd.f32 %v7952_v48, %v7900_v9  ;;  %v7892_v31 = vadd.f32 %v7891_v8, %v7763_v25  ;;  %v7779_v48 = vadd.f32 %v9354_v33, %v7650_v44  ;;  %v12452_v25 = vld [vmem:[#allocation33_spill] sm:$0xff]  ;;  %v9373_v11 = vpop.f32.mrf.mxu0  ;;  %v7955_v44 = vld [vmem:[%s10279_s19 + $0x88] sm:$0xff]  ;;  %v7677_v20 = vadd.f32 %v9287_v55, %v12460_v12 }
 0x47b   : > { %v9467_v38 = vpop.f32.mrf.mxu1  ;;  %v9357_v34 = vadd.f32 %v12453_v24, %v12452_v25  ;;  %v12461_v33 = vld [vmem:[#allocation14_spill] sm:$0xff] }
 0x47c   : > { %8000 = vst [vmem:[%s12164_s13 + $0x70] sm:$0xff] %v7976_v7  ;;  %v7974_v6 = vadd.f32 %v7950_v60, %v7892_v31  ;;  %v7903_v3 = vadd.f32 %v9467_v38, %v7774_v1  ;;  %v12457_v60 = vld [vmem:[#allocation15_spill] sm:$0xff]  ;;  %v7957_v7 = vld [vmem:[%s10279_s19 + $0x98] sm:$0xff]  ;;  %v9372_v1 = vadd.f32 %v9371_v22, %v9370_v2  ;;  %v7669_v35 = vadd.f32 %v9281_v43, %v12461_v33 }
 0x47d   : > { %v7894_v29 = vpop.f32.mrf.mxu1  ;;  %v7666_v59 = vadd.f32 %v9278_v36, %v12457_v60  ;;  %v7782_v31 = vadd.f32 %v9357_v34, %v7653_v42 }
 0x47e   : > { %7998 = vst [vmem:[%s12164_s13 + $0x60] sm:$0xff] %v7974_v6  ;;  %v7977_v45 = vadd.f32 %v7953_v46, %v7903_v3  ;;  %v7895_v37 = vadd.f32 %v7894_v29, %v7766_v54  ;;  %v9374_v54 = vpop.f32.mrf.mxu0  ;;  %v7803_v6 = vadd.f32 %v9372_v1, %v7674_v5  ;;  %v7958_v29 = vld [vmem:[%s10279_s19 + $0xa0] sm:$0xff] }
 0x47f   : > { %v9470_v14 = vpop.f32.mrf.mxu1  ;;  %v7795_v0 = vadd.f32 %v9366_v4, %v7666_v59  ;;  %v9375_v49 = vadd.f32 %v9374_v54, %v9373_v11 }
 0x480   : > { %8001 = vst [vmem:[%s12164_s13 + $0x78] sm:$0xff] %v7977_v45  ;;  %v7975_v16 = vadd.f32 %v7951_v21, %v7895_v37  ;;  %v7916_v27 = vadd.f32 %v9470_v14, %v7787_v40  ;;  %v9369_v21 = vadd.f32 %v12223_v26, %v12209_v15  ;;  %v7961_v37 = vld [vmem:[%s10279_s19 + $0xb8] sm:$0xff]  ;;  %s10119_s19 = smov [#allocation9]  }
 0x481   : > { %v7907_v9 = vpop.f32.mrf.mxu1  ;;  %v7806_v47 = vadd.f32 %v9375_v49, %v7677_v20  ;;  %s10046_s27 = sshll.u32 %s10119_s19, 4  ;;  %s10047_s27 = int_to_ptr.vmem [resolvable:$false] %s10046_s27 }
 0x482   : > { %7999 = vst [vmem:[%s12164_s13 + $0x68] sm:$0xff] %v7975_v16  ;;  %v7980_v62 = vadd.f32 %v7956_v53, %v7916_v27  ;;  %v7908_v8 = vadd.f32 %v7907_v9, %v7779_v48  ;;  %v7798_v42 = vadd.f32 %v9369_v21, %v7669_v35  ;;  %s10048_s29 = scalar_lea.vmem %s10047_s27, 6144  ;;  %p10049_p2 = scmp.lt.s32.totalorder %s12302_s15, %s10047_s27 }
 0x483   : > { %v9471_v17 = vpop.f32.mrf.mxu1  ;;  %p10050_p13 = scmp.lt.s32.totalorder %s10048_s29, %s10042_s8 }
 0x484   : > { %8004 = vst [vmem:[%s12164_s13 + $0x90] sm:$0xff] %v7980_v62  ;;  %v7978_v38 = vadd.f32 %v7954_v18, %v7908_v8  ;;  %v7919_v46 = vadd.f32 %v9471_v17, %v7790_v56 }
 0x485   : > { %v7910_v39 = vpop.f32.mrf.mxu1  ;;  %p10051_p0 = por %p10050_p13, %p10049_p2 }
 0x486   : > { %8002 = vst [vmem:[%s12164_s13 + $0x80] sm:$0xff] %v7978_v38  ;;  %v7981_v63 = vadd.f32 %v7957_v7, %v7919_v46  ;;  %v7911_v2 = vadd.f32 %v7910_v39, %v7782_v31 }
 0x487   : > { %v9474_v3 = vpop.f32.mrf.mxu1  ;;  %p10052_p5 = pnand %p10051_p0, %p10045_p10 }
 0x488   : > { %8005 = vst [vmem:[%s12164_s13 + $0x98] sm:$0xff] %v7981_v63  ;;  %v7979_v58 = vadd.f32 %v7955_v44, %v7911_v2  ;;  %v7932_v30 = vadd.f32 %v9474_v3, %v7803_v6 }
 0x489   : > { %v7923_v22 = vpop.f32.mrf.mxu1 }
 0x48a   : > { %8003 = vst [vmem:[%s12164_s13 + $0x88] sm:$0xff] %v7979_v58  ;;  %v7984_v13 = vadd.f32 %v7960_v28, %v7932_v30  ;;  %v7924_v57 = vadd.f32 %v7923_v22, %v7795_v0 }
 0x48b   : > { %v9475_v45 = vpop.f32.mrf.mxu1 }
 0x48c   : > { %8008 = vst [vmem:[%s12164_s13 + $0xb0] sm:$0xff] %v7984_v13  ;;  %v7982_v40 = vadd.f32 %v7958_v29, %v7924_v57  ;;  %v7935_v19 = vadd.f32 %v9475_v45, %v7806_v47 }
 0x48d   : > { %v7926_v41 = vpop.f32.mrf.mxu1 }
 0x48e   : > { %8006 = vst [vmem:[%s12164_s13 + $0xa0] sm:$0xff] %v7982_v40  ;;  %v7985_v15 = vadd.f32 %v7961_v37, %v7935_v19  ;;  %v7927_v26 = vadd.f32 %v7926_v41, %v7798_v42 }
 0x490   : > { %8009 = vst [vmem:[%s12164_s13 + $0xb8] sm:$0xff] %v7985_v15  ;;  %v7983_v32 = vadd.f32 %v7959_v61, %v7927_v26 }
 0x492   : > { %8007 = vst [vmem:[%s12164_s13 + $0xa8] sm:$0xff] %v7983_v32 }
 0x493   : > { %10055 = shalt.err (!%p10052_p5)
}
 0x494   : > { %s10056_s11 = scalar_lea.hbm %s12299_s16, 3072  ;;  %s10060_s26 = scalar_lea.hbm %s12352_s6, 6144 }
 0x495   : > { %p10057_p9 = scmp.ne.s32.totalorder %s12299_s16, %s10056_s11  ;;  %p10061_p6 = scmp.lt.s32.totalorder %s12299_s16, %s12352_s6 }
 0x496   : > { %p10062_p8 = scmp.lt.s32.totalorder %s10060_s26, %s10056_s11 }
 0x497   : > { %p10058_p1 = pnand %p10057_p9, %p12462_p7 }
 0x498   : > { %p10063_p3 = por %p10062_p8, %p10061_p6 }
 0x499   : > { %p10059_p4 = pneg %p10058_p1 }
 0x49b   : > { %p10064_p11 = pnand %p10063_p3, %p10059_p4 }
 0x49d   : > { %10067 = shalt.err (!%p10064_p11)
}
 0x49e   : > { %s10120_s14 = smov 128   ;;  %s10121_s10 = smov 8  }
 0x49f   : > { %9486 = dma.vmem_to_hbm [thread:$0]  (%p12462_p7), %s12302_s15, 3072, %s12299_s16, %s8011_s25, %s10120_s14, %s10120_s14, %s10121_s10  }
 0x4a0 PF: > { %s8040_s8 = sand.u32 1, %s10098_s21   ;;  %p12463_p12 = scmp.ne.s32.totalorder %s12364_s28, 0 }
 0x4a1   : > { %p12464_p10 = scmp.ge.s32.totalorder %s10110_s24, 2  ;;  %s8041_s19 = scalar_lea.sflag [#allocation6], %s8040_s8 }
 0x4a3   : > { %p9497_p2 = pnand %p12464_p10, %p12463_p12 }
 0x4a5   : > { %p9498_p13 = pneg %p9497_p2 }
 0x4a7   : > { %10093 = dma.done.wait (%p9498_p13), %s8041_s19, 3072  }
 0x4a8   : > { %10095 = vsyncadd (%p9498_p13), %s8041_s19, 4294964224  ;;  %p20_p0 = scmp.ge.s32.totalorder %s10211_s9, 4   ;;  %s12465_s21 = smov %s10102_s22 }
 0x4a9   : > { %s12466_s22 = smov %s10106_s23  ;;  %s12467_s23 = smov %s10228_s17 }
 0x4aa   : > { %s12468_s24 = smov %s10211_s9  ;;  %22 = sbr.rel (!%p20_p0) target bundleno = 6 (0x6), region = 99 }
 0x4af   :  { %8046 = vsyncpa [#allocation5], 1 }
 0x4b0   :  { %8048 = vsyncpa [#allocation5 + $0x1], 1 }
 0x4b1   :  { %8049 = vsyncpa [#allocation8], 1 }
 0x4b2   :  { %8050 = vsyncpa [#allocation6], 1 }
 0x4b3   :  { %8052 = vsyncpa [#allocation6 + $0x1], 1 }

</bundles_post_ra>
